<compile_context>
chip_gen: v5e
topology: v5e:2x2
jax: 0.10.0
libtpu: 0.0.40
codegen_flags: <defaults>
</compile_context>

<pallas_src>
import numpy as np
import jax
import jax.numpy as jnp
from jax.experimental import pallas as pl
from jax.experimental.pallas import tpu as pltpu

EPS = 1e-5
N_CLASSES = 10
PAD_OUT = 128  # lane-dense padded width of the final layer
HIDDEN = 512
IN_FEATS = 28 * 28


def _bn_scale_shift(h, gamma, beta, inv_b):
    """Single-pass training-mode BatchNorm1d coefficients for f32 h of shape (B, F).

    Biased variance (PyTorch BN forward), var = E[h^2] - mean^2 clamped at 0 to guard the
    cancellation case, rsqrt on the EUP slot. Returns per-feature (scale, shift) so the
    caller applies BN as a single FMA over h.
    """
    s1 = jnp.sum(h, axis=0, keepdims=True)
    s2 = jnp.sum(h * h, axis=0, keepdims=True)
    mean = s1 * inv_b
    var = jnp.maximum(s2 * inv_b - mean * mean, 0.0)
    scale = gamma * jax.lax.rsqrt(var + EPS)
    shift = beta - mean * scale
    return scale, shift


def mlp_bn_kernel(x_ref,
                  w1_ref, g1_ref, be1_ref,
                  w2_hbm, g2_ref, be2_ref,
                  w3_hbm, g3_ref, be3_ref,
                  o_ref,
                  w2_vmem, w3_vmem, sem):
    """Fused: Linear(784->512, no bias)+BN+ReLU -> Linear(512->512)+BN+ReLU ->
    Linear(512->128 lane-padded; real logits in columns [:10])+BN.

    w2/w3 arrive as HBM refs; their DMA into VMEM scratch is started immediately and waited
    only right before the dot that consumes them, hiding it behind layer-1 compute."""
    cp2 = pltpu.make_async_copy(w2_hbm, w2_vmem, sem.at[0])
    cp3 = pltpu.make_async_copy(w3_hbm, w3_vmem, sem.at[1])
    cp2.start()
    cp3.start()

    inv_b = 1.0 / x_ref.shape[0]

    # Layer 1: Linear(784, 512, bias=False) -> BN -> ReLU (f32->bf16 cast of x done in-kernel)
    x = x_ref[...].astype(jnp.bfloat16)
    h = jnp.dot(x, w1_ref[...], preferred_element_type=jnp.float32)
    sc, sh = _bn_scale_shift(h, g1_ref[...], be1_ref[...], inv_b)
    h = jnp.maximum(h * sc + sh, 0.0).astype(jnp.bfloat16)  # fused BN + ReLU + bf16 downcast

    # Layer 2: Linear(512, 512) -> BN -> ReLU. Linear bias dropped: BN's batch-mean
    # subtraction cancels it exactly (rounding-order difference only vs. PyTorch).
    cp2.wait()
    h = jnp.dot(h, w2_vmem[...], preferred_element_type=jnp.float32)
    sc, sh = _bn_scale_shift(h, g2_ref[...], be2_ref[...], inv_b)
    h = jnp.maximum(h * sc + sh, 0.0).astype(jnp.bfloat16)

    # Layer 3: Linear(512, 10) -> BN, computed lane-dense at width 128. Padded columns have
    # all-zero weights -> mean=0, var=0, shift=0, output 0 (no NaN); sliced off in the wrapper.
    cp3.wait()
    h = jnp.dot(h, w3_vmem[...], preferred_element_type=jnp.float32)
    sc, sh = _bn_scale_shift(h, g3_ref[...], be3_ref[...], inv_b)
    o_ref[...] = (h * sc + sh).astype(o_ref.dtype)


@jax.jit
def batchnorm_nn_forward(x_img, kparams):
    """x_img: (B, 1, 28, 28) float32 (NCHW). Returns logits (B, 10) float32."""
    B = x_img.shape[0]
    x = x_img.reshape(B, -1)  # nn.Flatten -> (B, 784); stays f32, cast to bf16 in-kernel

    vmem = pl.BlockSpec(memory_space=pltpu.MemorySpace.VMEM)
    hbm = pl.BlockSpec(memory_space=pl.ANY)  # raw ref; DMA'd manually inside the kernel

    args = (
        x,
        kparams["w1"], kparams["g1"], kparams["be1"],
        kparams["w2"], kparams["g2"], kparams["be2"],
        kparams["w3"], kparams["g3"], kparams["be3"],
    )
    in_specs = [vmem,               # x
                vmem, vmem, vmem,   # w1, g1, be1
                hbm, vmem, vmem,    # w2 (manual DMA), g2, be2
                hbm, vmem, vmem]    # w3 (manual DMA), g3, be3

    # Gridless call: whole-array VMEM operands, no pipeline double-buffering. Working set
    # ~2 MiB, so a 16 MiB scoped-VMEM limit is safe on v5e / v6e / v7x.
    out_padded = pl.pallas_call(
        mlp_bn_kernel,
        out_shape=jax.ShapeDtypeStruct((B, PAD_OUT), jnp.float32),
        in_specs=in_specs,
        out_specs=vmem,
        scratch_shapes=[
            pltpu.VMEM((HIDDEN, HIDDEN), jnp.bfloat16),   # w2 landing buffer
            pltpu.VMEM((HIDDEN, PAD_OUT), jnp.bfloat16),  # w3 landing buffer
            pltpu.SemaphoreType.DMA((2,)),
        ],
        compiler_params=pltpu.CompilerParams(vmem_limit_bytes=16 << 20),
    )(*args)
    return out_padded[:, :N_CLASSES]


def reference_forward(x_img, params):
    """Plain-JAX reference: bf16 dots / f32 accumulation like the kernel, but with the
    original two-pass BN and the b2/b3 biases, to validate the kernel's single-pass,
    bias-cancelled rewrite."""
    def bn(h, g, b):
        m = jnp.mean(h, axis=0, keepdims=True)
        hc = h - m
        v = jnp.mean(hc * hc, axis=0, keepdims=True)
        return hc * (g * jax.lax.rsqrt(v + EPS)) + b

    x = x_img.reshape(x_img.shape[0], -1).astype(jnp.bfloat16)
    h = jnp.dot(x, params["w1"].astype(jnp.bfloat16), preferred_element_type=jnp.float32)
    h = jnp.maximum(bn(h, params["g1"], params["be1"]), 0.0)
    h = jnp.dot(h.astype(jnp.bfloat16), params["w2"].astype(jnp.bfloat16),
                preferred_element_type=jnp.float32) + params["b2"]
    h = jnp.maximum(bn(h, params["g2"], params["be2"]), 0.0)
    h = jnp.dot(h.astype(jnp.bfloat16), params["w3"].astype(jnp.bfloat16),
                preferred_element_type=jnp.float32) + params["b3"]
    return bn(h, params["g3"], params["be3"])


def init_params(key):
    """Deterministic init mirroring PyTorch shapes (weights stored as (in, out)), all f32."""
    k1, k2, k3, k4, k5 = jax.random.split(key, 5)

    def uinit(k, shape, fan_in):
        bound = 1.0 / np.sqrt(fan_in)
        return jax.random.uniform(k, shape, jnp.float32, -bound, bound)

    return dict(
        # Linear(784, 512, bias=False)
        w1=uinit(k1, (IN_FEATS, HIDDEN), IN_FEATS),
        g1=jnp.ones((1, HIDDEN), jnp.float32), be1=jnp.zeros((1, HIDDEN), jnp.float32),
        # Linear(512, 512)
        w2=uinit(k2, (HIDDEN, HIDDEN), HIDDEN), b2=uinit(k3, (1, HIDDEN), HIDDEN),
        g2=jnp.ones((1, HIDDEN), jnp.float32), be2=jnp.zeros((1, HIDDEN), jnp.float32),
        # Linear(512, 10)
        w3=uinit(k4, (HIDDEN, N_CLASSES), HIDDEN), b3=uinit(k5, (1, N_CLASSES), HIDDEN),
        g3=jnp.ones((1, N_CLASSES), jnp.float32), be3=jnp.zeros((1, N_CLASSES), jnp.float32),
    )


def pack_params(params):
    """Kernel layout: bf16 weights, f32 BN affine, final layer padded to 128 columns.
    Linear biases b2/b3 are omitted (exactly cancelled by training-mode BN)."""
    pad = PAD_OUT - N_CLASSES
    return dict(
        w1=params["w1"].astype(jnp.bfloat16),
        g1=params["g1"], be1=params["be1"],
        w2=params["w2"].astype(jnp.bfloat16),
        g2=params["g2"], be2=params["be2"],
        w3=jnp.pad(params["w3"], ((0, 0), (0, pad))).astype(jnp.bfloat16),
        g3=jnp.pad(params["g3"], ((0, 0), (0, pad)), constant_values=1.0),
        be3=jnp.pad(params["be3"], ((0, 0), (0, pad))),
    )


if __name__ == "__main__":
    key = jax.random.PRNGKey(0)
    kp, kx = jax.random.split(key)
    params = init_params(kp)
    kparams = pack_params(params)

    # Batch of 128 NCHW images: training-mode BN needs B >= 2, and 128 rows actually use the
    # MXU sublane dimension (bf16 min tile is (16, 128)).
    B = 128
    x_img = jax.random.normal(kx, (B, 1, 28, 28), jnp.float32)

    logits = jax.block_until_ready(batchnorm_nn_forward(x_img, kparams))
    ref = jax.block_until_ready(reference_forward(x_img, params))

    assert logits.shape == (B, N_CLASSES) and logits.dtype == jnp.float32
    # Tolerance covers bf16-dot rounding plus the (exact-in-real-arithmetic) bias-cancellation
    # and single-pass-variance rewrites.
    np.testing.assert_allclose(np.asarray(logits), np.asarray(ref), rtol=2e-3, atol=2e-3)

    print("KERNEL_OK")
</pallas_src>

<mosaic_0001>
module attributes {stable_mosaic.version = 11 : i64} {
  func.func @mlp_bn_kernel(%arg0: memref<128x784xf32, #tpu.memory_space<vmem>>, %arg1: memref<784x512xbf16, #tpu.memory_space<vmem>>, %arg2: memref<1x512xf32, #tpu.memory_space<vmem>>, %arg3: memref<1x512xf32, #tpu.memory_space<vmem>>, %arg4: memref<512x512xbf16, #tpu.memory_space<any>>, %arg5: memref<1x512xf32, #tpu.memory_space<vmem>>, %arg6: memref<1x512xf32, #tpu.memory_space<vmem>>, %arg7: memref<512x128xbf16, #tpu.memory_space<any>>, %arg8: memref<1x128xf32, #tpu.memory_space<vmem>>, %arg9: memref<1x128xf32, #tpu.memory_space<vmem>>, %arg10: memref<128x128xf32, #tpu.memory_space<vmem>>, %arg11: memref<512x512xbf16, #tpu.memory_space<vmem>>, %arg12: memref<512x128xbf16, #tpu.memory_space<vmem>>, %arg13: memref<2x!tpu.dma_semaphore, #tpu.memory_space<semaphore_mem>>) attributes {dimension_semantics = [], scalar_prefetch = 0 : i64, scratch_operands = 3 : i64, tpu.core_type = #tpu.core_type<tc>} {
    %c0_i32 = arith.constant 0 : i32
    %0 = tpu.memref_slice %arg13[%c0_i32] : memref<2x!tpu.dma_semaphore, #tpu.memory_space<semaphore_mem>> -> memref<1x!tpu.dma_semaphore, #tpu.memory_space<semaphore_mem>>
    %1 = tpu.memref_squeeze %0 : memref<1x!tpu.dma_semaphore, #tpu.memory_space<semaphore_mem>> -> memref<!tpu.dma_semaphore, #tpu.memory_space<semaphore_mem>>
    tpu.enqueue_dma source(%arg4 : memref<512x512xbf16, #tpu.memory_space<any>>) target(%arg11 : memref<512x512xbf16, #tpu.memory_space<vmem>>) target_semaphore(%1 : memref<!tpu.dma_semaphore, #tpu.memory_space<semaphore_mem>>)
    %c1_i32 = arith.constant 1 : i32
    %2 = tpu.memref_slice %arg13[%c1_i32] : memref<2x!tpu.dma_semaphore, #tpu.memory_space<semaphore_mem>> -> memref<1x!tpu.dma_semaphore, #tpu.memory_space<semaphore_mem>>
    %3 = tpu.memref_squeeze %2 : memref<1x!tpu.dma_semaphore, #tpu.memory_space<semaphore_mem>> -> memref<!tpu.dma_semaphore, #tpu.memory_space<semaphore_mem>>
    tpu.enqueue_dma source(%arg7 : memref<512x128xbf16, #tpu.memory_space<any>>) target(%arg12 : memref<512x128xbf16, #tpu.memory_space<vmem>>) target_semaphore(%3 : memref<!tpu.dma_semaphore, #tpu.memory_space<semaphore_mem>>)
    %c0 = arith.constant 0 : index
    %c0_0 = arith.constant 0 : index
    %4 = vector.load %arg0[%c0, %c0_0] : memref<128x784xf32, #tpu.memory_space<vmem>>, vector<128x784xf32>
    %5 = arith.truncf %4 : vector<128x784xf32> to vector<128x784xbf16>
    %c0_1 = arith.constant 0 : index
    %c0_2 = arith.constant 0 : index
    %6 = vector.load %arg1[%c0_1, %c0_2] : memref<784x512xbf16, #tpu.memory_space<vmem>>, vector<784x512xbf16>
    %cst = arith.constant dense<0.000000e+00> : vector<128x512xf32>
    %7 = tpu.matmul %5, %6, %cst {dimension_numbers = #tpu.dot_dimension_numbers<[1], [0], [0], [1], [0, 0, 1, 1], [], []>} : vector<128x784xbf16>, vector<784x512xbf16>, vector<128x512xf32> -> vector<128x512xf32>
    %c0_3 = arith.constant 0 : index
    %c0_4 = arith.constant 0 : index
    %8 = vector.load %arg2[%c0_3, %c0_4] : memref<1x512xf32, #tpu.memory_space<vmem>>, vector<1x512xf32>
    %c0_5 = arith.constant 0 : index
    %c0_6 = arith.constant 0 : index
    %9 = vector.load %arg3[%c0_5, %c0_6] : memref<1x512xf32, #tpu.memory_space<vmem>>, vector<1x512xf32>
    %cst_7 = arith.constant dense<0.000000e+00> : vector<512xf32>
    %10 = vector.multi_reduction <add>, %7, %cst_7 [0] : vector<128x512xf32> to vector<512xf32>
    %11 = vector.shape_cast %10 : vector<512xf32> to vector<1x512xf32>
    %12 = arith.mulf %7, %7 : vector<128x512xf32>
    %cst_8 = arith.constant dense<0.000000e+00> : vector<512xf32>
    %13 = vector.multi_reduction <add>, %12, %cst_8 [0] : vector<128x512xf32> to vector<512xf32>
    %14 = vector.shape_cast %13 : vector<512xf32> to vector<1x512xf32>
    %cst_9 = arith.constant 7.812500e-03 : f32
    %15 = vector.broadcast %cst_9 : f32 to vector<1x512xf32>
    %16 = arith.mulf %11, %15 : vector<1x512xf32>
    %cst_10 = arith.constant 7.812500e-03 : f32
    %17 = vector.broadcast %cst_10 : f32 to vector<1x512xf32>
    %18 = arith.mulf %14, %17 : vector<1x512xf32>
    %19 = arith.mulf %16, %16 : vector<1x512xf32>
    %20 = arith.subf %18, %19 : vector<1x512xf32>
    %cst_11 = arith.constant 0.000000e+00 : f32
    %21 = vector.broadcast %cst_11 : f32 to vector<1x512xf32>
    %22 = arith.maximumf %20, %21 : vector<1x512xf32>
    %cst_12 = arith.constant 9.99999974E-6 : f32
    %23 = vector.broadcast %cst_12 : f32 to vector<1x512xf32>
    %24 = arith.addf %22, %23 : vector<1x512xf32>
    %25 = math.rsqrt %24 : vector<1x512xf32>
    %26 = arith.mulf %8, %25 : vector<1x512xf32>
    %27 = arith.mulf %16, %26 : vector<1x512xf32>
    %28 = arith.subf %9, %27 : vector<1x512xf32>
    %29 = vector.broadcast %26 : vector<1x512xf32> to vector<128x512xf32>
    %30 = arith.mulf %7, %29 : vector<128x512xf32>
    %31 = vector.broadcast %28 : vector<1x512xf32> to vector<128x512xf32>
    %32 = arith.addf %30, %31 : vector<128x512xf32>
    %cst_13 = arith.constant 0.000000e+00 : f32
    %33 = vector.broadcast %cst_13 : f32 to vector<128x512xf32>
    %34 = arith.maximumf %32, %33 : vector<128x512xf32>
    %35 = arith.truncf %34 : vector<128x512xf32> to vector<128x512xbf16>
    %c0_i32_14 = arith.constant 0 : i32
    %36 = tpu.memref_slice %arg13[%c0_i32_14] : memref<2x!tpu.dma_semaphore, #tpu.memory_space<semaphore_mem>> -> memref<1x!tpu.dma_semaphore, #tpu.memory_space<semaphore_mem>>
    %37 = tpu.memref_squeeze %36 : memref<1x!tpu.dma_semaphore, #tpu.memory_space<semaphore_mem>> -> memref<!tpu.dma_semaphore, #tpu.memory_space<semaphore_mem>>
    tpu.wait_dma2 semaphore(%37 : memref<!tpu.dma_semaphore, #tpu.memory_space<semaphore_mem>>) src(%arg4 : memref<512x512xbf16, #tpu.memory_space<any>>) dst(%arg11 : memref<512x512xbf16, #tpu.memory_space<vmem>>)
    %c0_15 = arith.constant 0 : index
    %c0_16 = arith.constant 0 : index
    %38 = vector.load %arg11[%c0_15, %c0_16] : memref<512x512xbf16, #tpu.memory_space<vmem>>, vector<512x512xbf16>
    %cst_17 = arith.constant dense<0.000000e+00> : vector<128x512xf32>
    %39 = tpu.matmul %35, %38, %cst_17 {dimension_numbers = #tpu.dot_dimension_numbers<[1], [0], [0], [1], [0, 0, 1, 1], [], []>} : vector<128x512xbf16>, vector<512x512xbf16>, vector<128x512xf32> -> vector<128x512xf32>
    %c0_18 = arith.constant 0 : index
    %c0_19 = arith.constant 0 : index
    %40 = vector.load %arg5[%c0_18, %c0_19] : memref<1x512xf32, #tpu.memory_space<vmem>>, vector<1x512xf32>
    %c0_20 = arith.constant 0 : index
    %c0_21 = arith.constant 0 : index
    %41 = vector.load %arg6[%c0_20, %c0_21] : memref<1x512xf32, #tpu.memory_space<vmem>>, vector<1x512xf32>
    %cst_22 = arith.constant dense<0.000000e+00> : vector<512xf32>
    %42 = vector.multi_reduction <add>, %39, %cst_22 [0] : vector<128x512xf32> to vector<512xf32>
    %43 = vector.shape_cast %42 : vector<512xf32> to vector<1x512xf32>
    %44 = arith.mulf %39, %39 : vector<128x512xf32>
    %cst_23 = arith.constant dense<0.000000e+00> : vector<512xf32>
    %45 = vector.multi_reduction <add>, %44, %cst_23 [0] : vector<128x512xf32> to vector<512xf32>
    %46 = vector.shape_cast %45 : vector<512xf32> to vector<1x512xf32>
    %cst_24 = arith.constant 7.812500e-03 : f32
    %47 = vector.broadcast %cst_24 : f32 to vector<1x512xf32>
    %48 = arith.mulf %43, %47 : vector<1x512xf32>
    %cst_25 = arith.constant 7.812500e-03 : f32
    %49 = vector.broadcast %cst_25 : f32 to vector<1x512xf32>
    %50 = arith.mulf %46, %49 : vector<1x512xf32>
    %51 = arith.mulf %48, %48 : vector<1x512xf32>
    %52 = arith.subf %50, %51 : vector<1x512xf32>
    %cst_26 = arith.constant 0.000000e+00 : f32
    %53 = vector.broadcast %cst_26 : f32 to vector<1x512xf32>
    %54 = arith.maximumf %52, %53 : vector<1x512xf32>
    %cst_27 = arith.constant 9.99999974E-6 : f32
    %55 = vector.broadcast %cst_27 : f32 to vector<1x512xf32>
    %56 = arith.addf %54, %55 : vector<1x512xf32>
    %57 = math.rsqrt %56 : vector<1x512xf32>
    %58 = arith.mulf %40, %57 : vector<1x512xf32>
    %59 = arith.mulf %48, %58 : vector<1x512xf32>
    %60 = arith.subf %41, %59 : vector<1x512xf32>
    %61 = vector.broadcast %58 : vector<1x512xf32> to vector<128x512xf32>
    %62 = arith.mulf %39, %61 : vector<128x512xf32>
    %63 = vector.broadcast %60 : vector<1x512xf32> to vector<128x512xf32>
    %64 = arith.addf %62, %63 : vector<128x512xf32>
    %cst_28 = arith.constant 0.000000e+00 : f32
    %65 = vector.broadcast %cst_28 : f32 to vector<128x512xf32>
    %66 = arith.maximumf %64, %65 : vector<128x512xf32>
    %67 = arith.truncf %66 : vector<128x512xf32> to vector<128x512xbf16>
    %c1_i32_29 = arith.constant 1 : i32
    %68 = tpu.memref_slice %arg13[%c1_i32_29] : memref<2x!tpu.dma_semaphore, #tpu.memory_space<semaphore_mem>> -> memref<1x!tpu.dma_semaphore, #tpu.memory_space<semaphore_mem>>
    %69 = tpu.memref_squeeze %68 : memref<1x!tpu.dma_semaphore, #tpu.memory_space<semaphore_mem>> -> memref<!tpu.dma_semaphore, #tpu.memory_space<semaphore_mem>>
    tpu.wait_dma2 semaphore(%69 : memref<!tpu.dma_semaphore, #tpu.memory_space<semaphore_mem>>) src(%arg7 : memref<512x128xbf16, #tpu.memory_space<any>>) dst(%arg12 : memref<512x128xbf16, #tpu.memory_space<vmem>>)
    %c0_30 = arith.constant 0 : index
    %c0_31 = arith.constant 0 : index
    %70 = vector.load %arg12[%c0_30, %c0_31] : memref<512x128xbf16, #tpu.memory_space<vmem>>, vector<512x128xbf16>
    %cst_32 = arith.constant dense<0.000000e+00> : vector<128x128xf32>
    %71 = tpu.matmul %67, %70, %cst_32 {dimension_numbers = #tpu.dot_dimension_numbers<[1], [0], [0], [1], [0, 0, 1, 1], [], []>} : vector<128x512xbf16>, vector<512x128xbf16>, vector<128x128xf32> -> vector<128x128xf32>
    %c0_33 = arith.constant 0 : index
    %c0_34 = arith.constant 0 : index
    %72 = vector.load %arg8[%c0_33, %c0_34] : memref<1x128xf32, #tpu.memory_space<vmem>>, vector<1x128xf32>
    %c0_35 = arith.constant 0 : index
    %c0_36 = arith.constant 0 : index
    %73 = vector.load %arg9[%c0_35, %c0_36] : memref<1x128xf32, #tpu.memory_space<vmem>>, vector<1x128xf32>
    %cst_37 = arith.constant dense<0.000000e+00> : vector<128xf32>
    %74 = vector.multi_reduction <add>, %71, %cst_37 [0] : vector<128x128xf32> to vector<128xf32>
    %75 = vector.shape_cast %74 : vector<128xf32> to vector<1x128xf32>
    %76 = arith.mulf %71, %71 : vector<128x128xf32>
    %cst_38 = arith.constant dense<0.000000e+00> : vector<128xf32>
    %77 = vector.multi_reduction <add>, %76, %cst_38 [0] : vector<128x128xf32> to vector<128xf32>
    %78 = vector.shape_cast %77 : vector<128xf32> to vector<1x128xf32>
    %cst_39 = arith.constant 7.812500e-03 : f32
    %79 = vector.broadcast %cst_39 : f32 to vector<1x128xf32>
    %80 = arith.mulf %75, %79 : vector<1x128xf32>
    %cst_40 = arith.constant 7.812500e-03 : f32
    %81 = vector.broadcast %cst_40 : f32 to vector<1x128xf32>
    %82 = arith.mulf %78, %81 : vector<1x128xf32>
    %83 = arith.mulf %80, %80 : vector<1x128xf32>
    %84 = arith.subf %82, %83 : vector<1x128xf32>
    %cst_41 = arith.constant 0.000000e+00 : f32
    %85 = vector.broadcast %cst_41 : f32 to vector<1x128xf32>
    %86 = arith.maximumf %84, %85 : vector<1x128xf32>
    %cst_42 = arith.constant 9.99999974E-6 : f32
    %87 = vector.broadcast %cst_42 : f32 to vector<1x128xf32>
    %88 = arith.addf %86, %87 : vector<1x128xf32>
    %89 = math.rsqrt %88 : vector<1x128xf32>
    %90 = arith.mulf %72, %89 : vector<1x128xf32>
    %91 = arith.mulf %80, %90 : vector<1x128xf32>
    %92 = arith.subf %73, %91 : vector<1x128xf32>
    %93 = vector.broadcast %90 : vector<1x128xf32> to vector<128x128xf32>
    %94 = arith.mulf %71, %93 : vector<128x128xf32>
    %95 = vector.broadcast %92 : vector<1x128xf32> to vector<128x128xf32>
    %96 = arith.addf %94, %95 : vector<128x128xf32>
    %c0_43 = arith.constant 0 : index
    %c0_44 = arith.constant 0 : index
    %97 = vector.load %arg10[%c0_43, %c0_44] : memref<128x128xf32, #tpu.memory_space<vmem>>, vector<128x128xf32>
    tpu.vector_store %arg10[%c0_43, %c0_44], %96 {strides = array<i32>} : memref<128x128xf32, #tpu.memory_space<vmem>>, vector<128x128xf32>,
    return
  }
}

</mosaic_0001>

<bundles_post_ra>
// kernel: batchnorm_nn_forward.1
= control target key start
LH: loop header
LB: loop body
LE: loop exit
PB: predicated region body
PF: predicated region fallthrough
CT: control target
= control target key end

     0   :  { %vm1403_vm0 = vcmask 130048   ;;  %vm3105_vm6 = vcmask 1040384   ;;  %s7986_s23 = smov [#allocation2]   ;;  %vm3107_vm14 = vcmask 1042434   ;;  %vm3109_vm15 = vcmask 1041408   ;;  %s12607_s1 = inlined_call_operand.vmem [shape: bf16[784,512], index: 1, kind: input, shape index: {}]   ;;  %s12608_s0 = inlined_call_operand.vmem [shape: f32[128,784], index: 0, kind: input, shape index: {}]   ;;  %s12609_s4 = inlined_call_operand.hbm [shape: bf16[512,512], index: 4, kind: input, shape index: {}]   ;;  %s12610_s7 = inlined_call_operand.hbm [shape: bf16[512,128], index: 7, kind: input, shape index: {}]   ;;  %s12611_s5 = inlined_call_operand.vmem [shape: f32[1,512], index: 5, kind: input, shape index: {}]   ;;  %s12612_s6 = inlined_call_operand.vmem [shape: f32[1,512], index: 6, kind: input, shape index: {}]   ;;  %s12613_s8 = inlined_call_operand.vmem [shape: f32[1,128], index: 8, kind: input, shape index: {}]   ;;  %s12614_s9 = inlined_call_operand.vmem [shape: f32[1,128], index: 9, kind: input, shape index: {}]   ;;  %s12615_s10 = inlined_call_operand.vmem [shape: f32[128,128], index: 10, kind: output, shape index: {}]   ;;  %s12616_s2 = inlined_call_operand.vmem [shape: f32[1,512], index: 2, kind: input, shape index: {}]   ;;  %s12617_s3 = inlined_call_operand.vmem [shape: f32[1,512], index: 3, kind: input, shape index: {}]  }
   0x1   :  { %v6214_v0 = vld [vmem:[%s12607_s1 + $0xe0] sm:$0xf]  ;;  %v7588_v1 = vld [vmem:[%s12607_s1 + $0xec] sm:$0xf0]  ;;  %s39_s22 = sshll.u32 %s12609_s4, 4  ;;  %s41_s24 = sshll.u32 %s7986_s23, 4  ;;  %s40_s22 = int_to_ptr.hbm [resolvable:$true] %s39_s22  ;;  %s42_s24 = int_to_ptr.vmem [resolvable:$true] %s41_s24 }
   0x2   :  { %v6342_v2 = vld [vmem:[%s12607_s1 + $0x1e0] sm:$0xf]  ;;  %v6215_v3 = vor.u32 %v7588_v1, %v6214_v0  ;;  %v7620_v4 = vld [vmem:[%s12607_s1 + $0x1ec] sm:$0xf0]  ;;  %44 = dma.hbm_to_vmem [thread:$0]  %s40_s22, 16384, %s42_s24, [#allocation4] }
   0x3   :  { %v6470_v5 = vld [vmem:[%s12607_s1 + $0x2e0] sm:$0xf]  ;;  %v7652_v6 = vld [vmem:[%s12607_s1 + $0x2ec] sm:$0xf0]  ;;  %v6343_v7 = vor.u32 %v7620_v4, %v6342_v2  ;;  %s53_s27 = sshll.u32 %s12610_s7, 4  ;;  %s7987_s4 = smov [#allocation3]   ;;  %s54_s27 = int_to_ptr.hbm [resolvable:$true] %s53_s27 }
   0x4   :  { %v6471_v8 = vor.u32 %v7652_v6, %v6470_v5  ;;  %v6598_v9 = vld [vmem:[%s12607_s1 + $0x3e0] sm:$0xf]  ;;  %v7684_v10 = vld [vmem:[%s12607_s1 + $0x3ec] sm:$0xf0]  ;;  %1428 = vmatpush.bf16.msra.mxu0 %v6215_v3  ;;  %s55_s28 = sshll.u32 %s7987_s4, 4  ;;  %s56_s28 = int_to_ptr.vmem [resolvable:$true] %s55_s28 }
   0x5   :  { %v6198_v11 = vld [vmem:[%s12607_s1 + $0xc0] sm:$0xf]  ;;  %v6599_v12 = vor.u32 %v7684_v10, %v6598_v9  ;;  %v7584_v13 = vld [vmem:[%s12607_s1 + $0xcc] sm:$0xf0]  ;;  %1477 = vmatpush.bf16.msra.mxu1 %v6343_v7  ;;  %58 = dma.hbm_to_vmem [thread:$0]  %s54_s27, 4096, %s56_s28, [#allocation4 + $0x1] }
   0x6   :  { %v6326_v14 = vld [vmem:[%s12607_s1 + $0x1c0] sm:$0xf]  ;;  %v7616_v15 = vld [vmem:[%s12607_s1 + $0x1cc] sm:$0xf0]  ;;  %1526 = vmatpush.bf16.msra.mxu2 %v6471_v8  ;;  %v6199_v16 = vor.u32 %v7584_v13, %v6198_v11 }
   0x7   :  { %v6327_v17 = vor.u32 %v7616_v15, %v6326_v14  ;;  %v6454_v18 = vld [vmem:[%s12607_s1 + $0x2c0] sm:$0xf]  ;;  %v7648_v19 = vld [vmem:[%s12607_s1 + $0x2cc] sm:$0xf0]  ;;  %1575 = vmatpush.bf16.msra.mxu3 %v6599_v12 }
   0x8   :  { %v6582_v20 = vld [vmem:[%s12607_s1 + $0x3c0] sm:$0xf]  ;;  %v6455_v21 = vor.u32 %v7648_v19, %v6454_v18  ;;  %v7680_v22 = vld [vmem:[%s12607_s1 + $0x3cc] sm:$0xf0]  ;;  %1429 = vmatpush.bf16.msra.mxu0 %v6199_v16 }
   0x9   :  { %v6182_v23 = vld [vmem:[%s12607_s1 + $0xa0] sm:$0xf]  ;;  %v7580_v24 = vld [vmem:[%s12607_s1 + $0xac] sm:$0xf0]  ;;  %v6583_v25 = vor.u32 %v7680_v22, %v6582_v20  ;;  %1478 = vmatpush.bf16.msra.mxu1 %v6327_v17 }
   0xa   :  { %v6310_v26 = vld [vmem:[%s12607_s1 + $0x1a0] sm:$0xf]  ;;  %v7612_v27 = vld [vmem:[%s12607_s1 + $0x1ac] sm:$0xf0]  ;;  %v6183_v29 = vor.u32 %v7580_v24, %v6182_v23  ;;  %1527 = vmatpush.bf16.msra.mxu2 %v6455_v21 }
   0xb   :  { %v6438_v28 = vld [vmem:[%s12607_s1 + $0x2a0] sm:$0xf]  ;;  %v7644_v30 = vld [vmem:[%s12607_s1 + $0x2ac] sm:$0xf0]  ;;  %v6311_v33 = vor.u32 %v7612_v27, %v6310_v26  ;;  %1576 = vmatpush.bf16.msra.mxu3 %v6583_v25 }
   0xc   :  { %v6566_v31 = vld [vmem:[%s12607_s1 + $0x3a0] sm:$0xf]  ;;  %v7676_v32 = vld [vmem:[%s12607_s1 + $0x3ac] sm:$0xf0]  ;;  %v6439_v34 = vor.u32 %v7644_v30, %v6438_v28  ;;  %1430 = vmatpush.bf16.msra.mxu0 %v6183_v29  ;;  %v66_v29 = vld [vmem:[%s12608_s0 + $0x38] sm:$0xff] }
   0xd   :  { %v6166_v35 = vld [vmem:[%s12607_s1 + $0x80] sm:$0xf]  ;;  %v7576_v36 = vld [vmem:[%s12607_s1 + $0x8c] sm:$0xf0]  ;;  %v6567_v38 = vor.u32 %v7676_v32, %v6566_v31  ;;  %1479 = vmatpush.bf16.msra.mxu1 %v6311_v33  ;;  %v60_v30 = vld [vmem:[%s12608_s0 + $0x8] sm:$0xff] }
   0xe   :  { %v6294_v37 = vld [vmem:[%s12607_s1 + $0x180] sm:$0xf]  ;;  %v7608_v39 = vld [vmem:[%s12607_s1 + $0x18c] sm:$0xf0]  ;;  %v6167_v44 = vor.u32 %v7576_v36, %v6166_v35  ;;  %1528 = vmatpush.bf16.msra.mxu2 %v6439_v34  ;;  %v7586_v35 = vld [vmem:[%s12607_s1 + $0xe4] sm:$0xf] }
   0xf   :  { %v6422_v40 = vld [vmem:[%s12607_s1 + $0x280] sm:$0xf]  ;;  %v7640_v41 = vld [vmem:[%s12607_s1 + $0x28c] sm:$0xf0]  ;;  %v6295_v45 = vor.u32 %v7608_v39, %v6294_v37  ;;  %1577 = vmatpush.bf16.msra.mxu3 %v6567_v38  ;;  %v6216_v36 = vld [vmem:[%s12607_s1 + $0xf0] sm:$0xf0] }
  0x10   :  { %v6550_v42 = vld [vmem:[%s12607_s1 + $0x380] sm:$0xf]  ;;  %v7672_v43 = vld [vmem:[%s12607_s1 + $0x38c] sm:$0xf0]  ;;  %v6423_v46 = vor.u32 %v7640_v41, %v6422_v40  ;;  %1431 = vmatpush.bf16.msra.mxu0 %v6167_v44  ;;  %v68_v40 = vld [vmem:[%s12608_s0 + $0x48] sm:$0xff] }
  0x11   :  { %v6150_v47 = vld [vmem:[%s12607_s1 + $0x60] sm:$0xf]  ;;  %v7572_v48 = vld [vmem:[%s12607_s1 + $0x6c] sm:$0xf0]  ;;  %v6551_v50 = vor.u32 %v7672_v43, %v6550_v42  ;;  %1480 = vmatpush.bf16.msra.mxu1 %v6295_v45  ;;  %v62_v41 = vld [vmem:[%s12608_s0 + $0x18] sm:$0xff] }
  0x12   :  { %v6278_v49 = vld [vmem:[%s12607_s1 + $0x160] sm:$0xf]  ;;  %v7604_v51 = vld [vmem:[%s12607_s1 + $0x16c] sm:$0xf0]  ;;  %v6151_v56 = vor.u32 %v7572_v48, %v6150_v47  ;;  %1529 = vmatpush.bf16.msra.mxu2 %v6423_v46  ;;  %v6219_v48 = vor.u32 %v7586_v35, %v6216_v36  ;;  %v96_v36 = vld [vmem:[%s12608_s0 + $0x128] sm:$0xff] }
  0x13   :  { %v6406_v52 = vld [vmem:[%s12607_s1 + $0x260] sm:$0xf]  ;;  %v7636_v53 = vld [vmem:[%s12607_s1 + $0x26c] sm:$0xf0]  ;;  %v6279_v57 = vor.u32 %v7604_v51, %v6278_v49  ;;  %1578 = vmatpush.bf16.msra.mxu3 %v6551_v50 }
  0x14   :  { %v6534_v54 = vld [vmem:[%s12607_s1 + $0x360] sm:$0xf]  ;;  %v7668_v55 = vld [vmem:[%s12607_s1 + $0x36c] sm:$0xf0]  ;;  %v6407_v58 = vor.u32 %v7636_v53, %v6406_v52  ;;  %1432 = vmatpush.bf16.msra.mxu0 %v6151_v56  ;;  %v7582_v53 = vld [vmem:[%s12607_s1 + $0xc4] sm:$0xf] }
  0x15   :  { %v6134_v59 = vld [vmem:[%s12607_s1 + $0x40] sm:$0xf]  ;;  %v7568_v60 = vld [vmem:[%s12607_s1 + $0x4c] sm:$0xf0]  ;;  %v6535_v62 = vor.u32 %v7668_v55, %v6534_v54  ;;  %1481 = vmatpush.bf16.msra.mxu1 %v6279_v57  ;;  %v6200_v54 = vld [vmem:[%s12607_s1 + $0xd0] sm:$0xf0] }
  0x16   :  { %v6262_v61 = vld [vmem:[%s12607_s1 + $0x140] sm:$0xf]  ;;  %v7600_v63 = vld [vmem:[%s12607_s1 + $0x14c] sm:$0xf0]  ;;  %v6135_v4 = vor.u32 %v7568_v60, %v6134_v59  ;;  %1530 = vmatpush.bf16.msra.mxu2 %v6407_v58  ;;  %v6203_v60 = vor.u32 %v7582_v53, %v6200_v54 }
  0x17   :  { %v6390_v0 = vld [vmem:[%s12607_s1 + $0x240] sm:$0xf]  ;;  %v7632_v1 = vld [vmem:[%s12607_s1 + $0x24c] sm:$0xf0]  ;;  %v6263_v5 = vor.u32 %v7600_v63, %v6262_v61  ;;  %1579 = vmatpush.bf16.msra.mxu3 %v6535_v62 }
  0x18   :  { %v6518_v2 = vld [vmem:[%s12607_s1 + $0x340] sm:$0xf]  ;;  %v7664_v3 = vld [vmem:[%s12607_s1 + $0x34c] sm:$0xf0]  ;;  %v6391_v6 = vor.u32 %v7632_v1, %v6390_v0  ;;  %1433 = vmatpush.bf16.msra.mxu0 %v6135_v4  ;;  %v7578_v0 = vld [vmem:[%s12607_s1 + $0xa4] sm:$0xf] }
  0x19   :  { %v6118_v7 = vld [vmem:[%s12607_s1 + $0x20] sm:$0xf]  ;;  %v7564_v8 = vld [vmem:[%s12607_s1 + $0x2c] sm:$0xf0]  ;;  %v6519_v10 = vor.u32 %v7664_v3, %v6518_v2  ;;  %1482 = vmatpush.bf16.msra.mxu1 %v6263_v5  ;;  %v6184_v4 = vld [vmem:[%s12607_s1 + $0xb0] sm:$0xf0] }
  0x1a   :  { %v6246_v9 = vld [vmem:[%s12607_s1 + $0x120] sm:$0xf]  ;;  %v7596_v11 = vld [vmem:[%s12607_s1 + $0x12c] sm:$0xf0]  ;;  %v6119_v17 = vor.u32 %v7564_v8, %v6118_v7  ;;  %1531 = vmatpush.bf16.msra.mxu2 %v6391_v6  ;;  %v6187_v5 = vor.u32 %v7578_v0, %v6184_v4 }
  0x1b   :  { %v6374_v12 = vld [vmem:[%s12607_s1 + $0x220] sm:$0xf]  ;;  %v7628_v13 = vld [vmem:[%s12607_s1 + $0x22c] sm:$0xf0]  ;;  %v6247_v21 = vor.u32 %v7596_v11, %v6246_v9  ;;  %1580 = vmatpush.bf16.msra.mxu3 %v6519_v10  ;;  %v80_v11 = vld [vmem:[%s12608_s0 + $0xa8] sm:$0xff] }
  0x1c   :  { %v6502_v14 = vld [vmem:[%s12607_s1 + $0x320] sm:$0xf]  ;;  %v7660_v15 = vld [vmem:[%s12607_s1 + $0x32c] sm:$0xf0]  ;;  %v6375_v22 = vor.u32 %v7628_v13, %v6374_v12  ;;  %1434 = vmatpush.bf16.msra.mxu0 %v6119_v17  ;;  %v74_v12 = vld [vmem:[%s12608_s0 + $0x78] sm:$0xff] }
  0x1d   :  { %v6102_v16 = vld [vmem:[%s12607_s1] sm:$0xf]  ;;  %v7560_v18 = vld [vmem:[%s12607_s1 + $0xc] sm:$0xf0]  ;;  %v6503_v26 = vor.u32 %v7660_v15, %v6502_v14  ;;  %1483 = vmatpush.bf16.msra.mxu1 %v6247_v21  ;;  %v82_v15 = vld [vmem:[%s12608_s0 + $0xb8] sm:$0xff] }
  0x1e   :  { %v6230_v19 = vld [vmem:[%s12607_s1 + $0x100] sm:$0xf]  ;;  %v7592_v20 = vld [vmem:[%s12607_s1 + $0x10c] sm:$0xf0]  ;;  %v6103_v33 = vor.u32 %v7560_v18, %v6102_v16  ;;  %1532 = vmatpush.bf16.msra.mxu2 %v6375_v22  ;;  %v76_v16 = vld [vmem:[%s12608_s0 + $0x88] sm:$0xff] }
  0x1f   :  { %v6358_v23 = vld [vmem:[%s12607_s1 + $0x200] sm:$0xf]  ;;  %v7624_v24 = vld [vmem:[%s12607_s1 + $0x20c] sm:$0xf0]  ;;  %v6231_v37 = vor.u32 %v7592_v20, %v6230_v19  ;;  %1581 = vmatpush.bf16.msra.mxu3 %v6503_v26  ;;  %v6168_v26 = vld [vmem:[%s12607_s1 + $0x90] sm:$0xf0] }
  0x20   :  { %v6486_v25 = vld [vmem:[%s12607_s1 + $0x300] sm:$0xf]  ;;  %v7656_v27 = vld [vmem:[%s12607_s1 + $0x30c] sm:$0xf0]  ;;  %v6359_v38 = vor.u32 %v7624_v24, %v6358_v23  ;;  %1435 = vmatpush.bf16.msra.mxu0 %v6103_v33  ;;  %v7574_v24 = vld [vmem:[%s12607_s1 + $0x84] sm:$0xf] }
  0x21   :  { %v59_v28 = vld [vmem:[%s12608_s0] sm:$0xff]  ;;  %v7752_v32 = vld [vmem:[%s12607_s1 + $0x60c] sm:$0xf0]  ;;  %v6487_v42 = vor.u32 %v7656_v27, %v6486_v25  ;;  %1484 = vmatpush.bf16.msra.mxu1 %v6231_v37  ;;  %v88_v33 = vld [vmem:[%s12608_s0 + $0xe8] sm:$0xff] }
  0x22   :  { %v6870_v31 = vld [vmem:[%s12607_s1 + $0x600] sm:$0xf]  ;;  %v61_v39 = vld [vmem:[%s12608_s0 + $0x10] sm:$0xff]  ;;  %v8277_v47 = vpack.c.bf16 %v66_v29, %v59_v28  ;;  %1533 = vmatpush.bf16.msra.mxu2 %v6359_v38  ;;  %v6171_v29 = vor.u32 %v7574_v24, %v6168_v26  ;;  %v90_v37 = vld [vmem:[%s12608_s0 + $0xf8] sm:$0xff] }
  0x23   :  { %v67_v34 = vld [vmem:[%s12608_s0 + $0x40] sm:$0xff]  ;;  %v69_v43 = vld [vmem:[%s12608_s0 + $0x50] sm:$0xff]  ;;  %v6871_v44 = vor.u32 %v7752_v32, %v6870_v31  ;;  %v8287_v52 = vpack.c.bf16 %v68_v40, %v61_v39  ;;  %1582 = vmatpush.bf16.msra.mxu3 %v6487_v42  ;;  %v94_v32 = vld [vmem:[%s12608_s0 + $0x118] sm:$0xff] }
  0x24   :  { %v6726_v45 = vld [vmem:[%s12607_s1 + $0x4e0] sm:$0xf]  ;;  %v7716_v46 = vld [vmem:[%s12607_s1 + $0x4ec] sm:$0xf0]  ;;  %12800 = vst [vmem:[#allocation13_spill] sm:$0xff] %v8277_v47  ;;  %v8285_v51 = vpack.c.bf16 %v67_v34, %v60_v30  ;;  %v8295_v55 = vpack.c.bf16 %v69_v43, %v62_v41  ;;  %1436 = vmatmul.bf16.vlgmr.msra.gmra.mxu0 %v8277_v47 }
  0x25   :  { %v6854_v49 = vld [vmem:[%s12607_s1 + $0x5e0] sm:$0xf]  ;;  %v7748_v50 = vld [vmem:[%s12607_s1 + $0x5ec] sm:$0xf0]  ;;  %v6727_v56 = vor.u32 %v7716_v46, %v6726_v45  ;;  %1534 = vmatmul.bf16.vlgmr.msra.gmra.mxu2 %v8287_v52  ;;  %v7570_v45 = vld [vmem:[%s12607_s1 + $0x64] sm:$0xf] }
  0x26   :  { %1729 = vmatpush.bf16.msrb.mxu2 %v6871_v44  ;;  %v6855_v57 = vor.u32 %v7748_v50, %v6854_v49  ;;  %v6710_v58 = vld [vmem:[%s12607_s1 + $0x4c0] sm:$0xf]  ;;  %v7712_v59 = vld [vmem:[%s12607_s1 + $0x4cc] sm:$0xf0]  ;;  %1485 = vmatmul.bf16.vlgmr.msra.gmra.mxu1 %v8285_v51 }
  0x27   :  { %1771 = vmatpush.bf16.msrb.mxu3 %v6219_v48  ;;  %v6838_v61 = vld [vmem:[%s12607_s1 + $0x5c0] sm:$0xf]  ;;  %v7744_v62 = vld [vmem:[%s12607_s1 + $0x5cc] sm:$0xf0]  ;;  %1624 = vmatpush.bf16.msrb.mxu0 %v6727_v56  ;;  %v6711_v63 = vor.u32 %v7712_v59, %v6710_v58  ;;  %v6152_v48 = vld [vmem:[%s12607_s1 + $0x70] sm:$0xf0] }
  0x28   :  { %1583 = vmatmul.bf16.vlgmr.msra.gmra.mxu3 %v8295_v55  ;;  %1673 = vmatpush.bf16.msrb.mxu1 %v6855_v57  ;;  %v6839_v1 = vor.u32 %v7744_v62, %v6838_v61  ;;  %v6694_v2 = vld [vmem:[%s12607_s1 + $0x4a0] sm:$0xf]  ;;  %v7708_v3 = vld [vmem:[%s12607_s1 + $0x4ac] sm:$0xf0]  ;;  %v6155_v53 = vor.u32 %v7570_v45, %v6152_v48  ;;  %v108_v57 = vld [vmem:[%s12608_s0 + $0x188] sm:$0xff] }
  0x29   :  { %v6822_v6 = vld [vmem:[%s12607_s1 + $0x5a0] sm:$0xf]  ;;  %v7740_v7 = vld [vmem:[%s12607_s1 + $0x5ac] sm:$0xf0]  ;;  %v6695_v8 = vor.u32 %v7708_v3, %v6694_v2  ;;  %v102_v58 = vld [vmem:[%s12608_s0 + $0x158] sm:$0xff] }
  0x2a   :  { %v6823_v9 = vor.u32 %v7740_v7, %v6822_v6  ;;  %v73_v10 = vld [vmem:[%s12608_s0 + $0x70] sm:$0xff]  ;;  %v75_v14 = vld [vmem:[%s12608_s0 + $0x80] sm:$0xff]  ;;  %v110_v61 = vld [vmem:[%s12608_s0 + $0x198] sm:$0xff] }
  0x2b   :  { %1772 = vmatpush.bf16.msrb.mxu3 %v6203_v60  ;;  %1625 = vmatpush.bf16.msrb.mxu0 %v6711_v63  ;;  %v81_v13 = vld [vmem:[%s12608_s0 + $0xb0] sm:$0xff]  ;;  %v83_v17 = vld [vmem:[%s12608_s0 + $0xc0] sm:$0xff]  ;;  %v8355_v18 = vpack.c.bf16 %v80_v11, %v73_v10  ;;  %v8359_v20 = vpack.c.bf16 %v82_v15, %v75_v14  ;;  %v104_v62 = vld [vmem:[%s12608_s0 + $0x168] sm:$0xff] }
  0x2c   :  { %1674 = vmatpush.bf16.msrb.mxu1 %v6839_v1  ;;  %v8357_v19 = vpack.c.bf16 %v81_v13, %v74_v12  ;;  %v8361_v21 = vpack.c.bf16 %v83_v17, %v76_v16  ;;  %v6678_v22 = vld [vmem:[%s12607_s1 + $0x480] sm:$0xf]  ;;  %v7704_v23 = vld [vmem:[%s12607_s1 + $0x48c] sm:$0xf0]  ;;  %v7566_v6 = vld [vmem:[%s12607_s1 + $0x44] sm:$0xf] }
  0x2d   :  { %12801 = vst [vmem:[#allocation14_spill] sm:$0xff] %v8355_v18  ;;  %v6679_v25 = vor.u32 %v7704_v23, %v6678_v22  ;;  %v6806_v27 = vld [vmem:[%s12607_s1 + $0x580] sm:$0xf]  ;;  %v7736_v28 = vld [vmem:[%s12607_s1 + $0x58c] sm:$0xf0]  ;;  %v122_v14 = vld [vmem:[%s12608_s0 + $0x1f8] sm:$0xff] }
  0x2e   :  { %12802 = vst [vmem:[#allocation15_spill] sm:$0xff] %v8357_v19  ;;  %v6807_v30 = vor.u32 %v7736_v28, %v6806_v27  ;;  %v87_v31 = vld [vmem:[%s12608_s0 + $0xe0] sm:$0xff]  ;;  %v89_v35 = vld [vmem:[%s12608_s0 + $0xf0] sm:$0xff]  ;;  %v116_v15 = vld [vmem:[%s12608_s0 + $0x1c8] sm:$0xff] }
  0x2f   :  { %1773 = vmatpush.bf16.msrb.mxu3 %v6187_v5  ;;  %1626 = vmatpush.bf16.msrb.mxu0 %v6695_v8  ;;  %12803 = vst [vmem:[#allocation16_spill] sm:$0xff] %v8361_v21  ;;  %v95_v34 = vld [vmem:[%s12608_s0 + $0x120] sm:$0xff]  ;;  %v97_v38 = vld [vmem:[%s12608_s0 + $0x130] sm:$0xff]  ;;  %v8409_v39 = vpack.c.bf16 %v94_v32, %v87_v31  ;;  %v8413_v41 = vpack.c.bf16 %v96_v36, %v89_v35  ;;  %v124_v22 = vld [vmem:[%s12608_s0 + $0x208] sm:$0xff] }
  0x30   :  { %1675 = vmatpush.bf16.msrb.mxu1 %v6823_v9  ;;  %v8411_v40 = vpack.c.bf16 %v95_v34, %v88_v33  ;;  %v8415_v42 = vpack.c.bf16 %v97_v38, %v90_v37  ;;  %v6662_v43 = vld [vmem:[%s12607_s1 + $0x460] sm:$0xf]  ;;  %v7700_v44 = vld [vmem:[%s12607_s1 + $0x46c] sm:$0xf0]  ;;  %v6136_v8 = vld [vmem:[%s12607_s1 + $0x50] sm:$0xf0] }
  0x31   :  { %12804 = vst [vmem:[#allocation17_spill] sm:$0xff] %v8409_v39  ;;  %v6663_v46 = vor.u32 %v7700_v44, %v6662_v43  ;;  %v6790_v49 = vld [vmem:[%s12607_s1 + $0x560] sm:$0xf]  ;;  %v7732_v50 = vld [vmem:[%s12607_s1 + $0x56c] sm:$0xf0]  ;;  %v6139_v11 = vor.u32 %v7566_v6, %v6136_v8  ;;  %v118_v23 = vld [vmem:[%s12608_s0 + $0x1d8] sm:$0xff] }
  0x32   :  { %12805 = vst [vmem:[#allocation18_spill] sm:$0xff] %v8411_v40  ;;  %v6791_v54 = vor.u32 %v7732_v50, %v6790_v49  ;;  %v101_v56 = vld [vmem:[%s12608_s0 + $0x150] sm:$0xff]  ;;  %v103_v60 = vld [vmem:[%s12608_s0 + $0x160] sm:$0xff]  ;;  %v136_v43 = vld [vmem:[%s12608_s0 + $0x268] sm:$0xff] }
  0x33   :  { %1627 = vmatpush.bf16.msrb.mxu0 %v6679_v25  ;;  %1774 = vmatpush.bf16.msrb.mxu3 %v6171_v29  ;;  %12806 = vst [vmem:[#allocation19_spill] sm:$0xff] %v8415_v42  ;;  %v109_v59 = vld [vmem:[%s12608_s0 + $0x190] sm:$0xff]  ;;  %v111_v63 = vld [vmem:[%s12608_s0 + $0x1a0] sm:$0xff]  ;;  %v8463_v0 = vpack.c.bf16 %v108_v57, %v101_v56  ;;  %v8467_v2 = vpack.c.bf16 %v110_v61, %v103_v60  ;;  %v130_v44 = vld [vmem:[%s12608_s0 + $0x238] sm:$0xff] }
  0x34   :  { %1441 = vmatmul.bf16.gmra.mxu0 %v8355_v18  ;;  %1676 = vmatpush.bf16.msrb.mxu1 %v6807_v30  ;;  %v8465_v1 = vpack.c.bf16 %v109_v59, %v102_v58  ;;  %v8469_v3 = vpack.c.bf16 %v111_v63, %v104_v62  ;;  %v6646_v4 = vld [vmem:[%s12607_s1 + $0x440] sm:$0xf]  ;;  %v7696_v5 = vld [vmem:[%s12607_s1 + $0x44c] sm:$0xf0]  ;;  %v7562_v31 = vld [vmem:[%s12607_s1 + $0x24] sm:$0xf] }
  0x35   :  { %1539 = vmatmul.bf16.gmra.mxu2 %v8359_v20  ;;  %12807 = vst [vmem:[#allocation20_spill] sm:$0xff] %v8463_v0  ;;  %v6647_v7 = vor.u32 %v7696_v5, %v6646_v4  ;;  %v6774_v9 = vld [vmem:[%s12607_s1 + $0x540] sm:$0xf]  ;;  %v7728_v10 = vld [vmem:[%s12607_s1 + $0x54c] sm:$0xf0]  ;;  %v138_v48 = vld [vmem:[%s12608_s0 + $0x278] sm:$0xff] }
  0x36   :  { %1490 = vmatmul.bf16.gmra.mxu1 %v8357_v19  ;;  %12808 = vst [vmem:[#allocation21_spill] sm:$0xff] %v8465_v1  ;;  %v6775_v12 = vor.u32 %v7728_v10, %v6774_v9  ;;  %v115_v13 = vld [vmem:[%s12608_s0 + $0x1c0] sm:$0xff]  ;;  %v117_v17 = vld [vmem:[%s12608_s0 + $0x1d0] sm:$0xff]  ;;  %v132_v49 = vld [vmem:[%s12608_s0 + $0x248] sm:$0xff] }
  0x37   :  { %1628 = vmatpush.bf16.msrb.mxu0 %v6663_v46  ;;  %1775 = vmatpush.bf16.msrb.mxu3 %v6155_v53  ;;  %12809 = vst [vmem:[#allocation22_spill] sm:$0xff] %v8469_v3  ;;  %v123_v16 = vld [vmem:[%s12608_s0 + $0x200] sm:$0xff]  ;;  %v125_v24 = vld [vmem:[%s12608_s0 + $0x210] sm:$0xff]  ;;  %v8517_v25 = vpack.c.bf16 %v122_v14, %v115_v13  ;;  %v8521_v27 = vpack.c.bf16 %v124_v22, %v117_v17  ;;  %v150_v8 = vld [vmem:[%s12608_s0 + $0x2d8] sm:$0xff] }
  0x38   :  { %1588 = vmatmul.bf16.gmra.mxu3 %v8361_v21  ;;  %1677 = vmatpush.bf16.msrb.mxu1 %v6791_v54  ;;  %v8519_v26 = vpack.c.bf16 %v123_v16, %v116_v15  ;;  %v8523_v28 = vpack.c.bf16 %v125_v24, %v118_v23  ;;  %v6630_v29 = vld [vmem:[%s12607_s1 + $0x420] sm:$0xf]  ;;  %v7692_v30 = vld [vmem:[%s12607_s1 + $0x42c] sm:$0xf0]  ;;  %v6120_v33 = vld [vmem:[%s12607_s1 + $0x30] sm:$0xf0] }
  0x39   :  { %12810 = vst [vmem:[#allocation23_spill] sm:$0xff] %v8517_v25  ;;  %v6631_v32 = vor.u32 %v7692_v30, %v6630_v29  ;;  %v6758_v34 = vld [vmem:[%s12607_s1 + $0x520] sm:$0xf]  ;;  %v7724_v35 = vld [vmem:[%s12607_s1 + $0x52c] sm:$0xf0]  ;;  %v6123_v36 = vor.u32 %v7562_v31, %v6120_v33  ;;  %v144_v9 = vld [vmem:[%s12608_s0 + $0x2a8] sm:$0xff] }
  0x3a   :  { %12811 = vst [vmem:[#allocation24_spill] sm:$0xff] %v8519_v26  ;;  %v6759_v37 = vor.u32 %v7724_v35, %v6758_v34  ;;  %v129_v38 = vld [vmem:[%s12608_s0 + $0x230] sm:$0xff]  ;;  %v131_v46 = vld [vmem:[%s12608_s0 + $0x240] sm:$0xff]  ;;  %v146_v13 = vld [vmem:[%s12608_s0 + $0x2b8] sm:$0xff] }
  0x3b   :  { %1629 = vmatpush.bf16.msrb.mxu0 %v6647_v7  ;;  %1776 = vmatpush.bf16.msrb.mxu3 %v6139_v11  ;;  %12812 = vst [vmem:[#allocation25_spill] sm:$0xff] %v8523_v28  ;;  %v137_v45 = vld [vmem:[%s12608_s0 + $0x270] sm:$0xff]  ;;  %v139_v50 = vld [vmem:[%s12608_s0 + $0x280] sm:$0xff]  ;;  %v8571_v53 = vpack.c.bf16 %v136_v43, %v129_v38  ;;  %v8575_v56 = vpack.c.bf16 %v138_v48, %v131_v46 }
  0x3c   :  { %1678 = vmatpush.bf16.msrb.mxu1 %v6775_v12  ;;  %v8573_v54 = vpack.c.bf16 %v137_v45, %v130_v44  ;;  %v8577_v57 = vpack.c.bf16 %v139_v50, %v132_v49  ;;  %v6614_v58 = vld [vmem:[%s12607_s1 + $0x400] sm:$0xf]  ;;  %v7688_v59 = vld [vmem:[%s12607_s1 + $0x40c] sm:$0xf0]  ;;  %v7558_v60 = vld [vmem:[%s12607_s1 + $0x4] sm:$0xf] }
  0x3d   :  { %12813 = vst [vmem:[#allocation26_spill] sm:$0xff] %v8571_v53  ;;  %v6615_v61 = vor.u32 %v7688_v59, %v6614_v58  ;;  %v6104_v62 = vld [vmem:[%s12607_s1 + $0x10] sm:$0xf0]  ;;  %v6742_v63 = vld [vmem:[%s12607_s1 + $0x500] sm:$0xf]  ;;  %v152_v12 = vld [vmem:[%s12608_s0 + $0x2e8] sm:$0xff] }
  0x3e   :  { %12814 = vst [vmem:[#allocation27_spill] sm:$0xff] %v8573_v54  ;;  %v7720_v4 = vld [vmem:[%s12607_s1 + $0x50c] sm:$0xf0]  ;;  %v6107_v5 = vor.u32 %v7558_v60, %v6104_v62  ;;  %v143_v7 = vld [vmem:[%s12608_s0 + $0x2a0] sm:$0xff]  ;;  %v6600_v24 = vld [vmem:[%s12607_s1 + $0x3f0] sm:$0xf0] }
  0x3f   :  { %1630 = vmatpush.bf16.msrb.mxu0 %v6631_v32  ;;  %1777 = vmatpush.bf16.msrb.mxu3 %v6123_v36  ;;  %12815 = vst [vmem:[#allocation28_spill] sm:$0xff] %v8577_v57  ;;  %v6743_v6 = vor.u32 %v7720_v4, %v6742_v63  ;;  %v151_v10 = vld [vmem:[%s12608_s0 + $0x2e0] sm:$0xff]  ;;  %v145_v11 = vld [vmem:[%s12608_s0 + $0x2b0] sm:$0xff]  ;;  %v8625_v15 = vpack.c.bf16 %v150_v8, %v143_v7  ;;  %v164_v44 = vld [vmem:[%s12608_s0 + $0x348] sm:$0xff] }
  0x40   :  { %1679 = vmatpush.bf16.msrb.mxu1 %v6759_v37  ;;  %v153_v14 = vld [vmem:[%s12608_s0 + $0x2f0] sm:$0xff]  ;;  %v8627_v16 = vpack.c.bf16 %v151_v10, %v144_v9  ;;  %v8629_v17 = vpack.c.bf16 %v152_v12, %v145_v11  ;;  %v7682_v23 = vld [vmem:[%s12607_s1 + $0x3e4] sm:$0xf]  ;;  %v158_v45 = vld [vmem:[%s12608_s0 + $0x318] sm:$0xff] }
  0x41   :  { %12816 = vst [vmem:[#allocation29_spill] sm:$0xff] %v8625_v15  ;;  %v8631_v22 = vpack.c.bf16 %v153_v14, %v146_v13  ;;  %v7618_v29 = vld [vmem:[%s12607_s1 + $0x1e4] sm:$0xf]  ;;  %v6603_v30 = vor.u32 %v7682_v23, %v6600_v24  ;;  %v6344_v31 = vld [vmem:[%s12607_s1 + $0x1f0] sm:$0xf0]  ;;  %v166_v49 = vld [vmem:[%s12608_s0 + $0x358] sm:$0xff] }
  0x42   :  { %12817 = vst [vmem:[#allocation30_spill] sm:$0xff] %v8627_v16  ;;  %v7714_v32 = vld [vmem:[%s12607_s1 + $0x4e4] sm:$0xf]  ;;  %v6728_v33 = vld [vmem:[%s12607_s1 + $0x4f0] sm:$0xf0]  ;;  %v6347_v34 = vor.u32 %v7618_v29, %v6344_v31  ;;  %v160_v50 = vld [vmem:[%s12608_s0 + $0x328] sm:$0xff] }
  0x43   :  { %1631 = vmatpush.bf16.msrb.mxu0 %v6615_v61  ;;  %1778 = vmatpush.bf16.msrb.mxu3 %v6107_v5  ;;  %v6731_v35 = vor.u32 %v7714_v32, %v6728_v33  ;;  %v7650_v36 = vld [vmem:[%s12607_s1 + $0x2e4] sm:$0xf]  ;;  %v6472_v37 = vld [vmem:[%s12607_s1 + $0x2f0] sm:$0xf0]  ;;  %v70_v24 = vld [vmem:[%s12608_s0 + $0x58] sm:$0xff] }
  0x44   :  { %1446 = vmatmul.bf16.gmra.mxu0 %v8409_v39  ;;  %1680 = vmatpush.bf16.msrb.mxu1 %v6743_v6  ;;  %v6475_v38 = vor.u32 %v7650_v36, %v6472_v37  ;;  %v157_v43 = vld [vmem:[%s12608_s0 + $0x310] sm:$0xff]  ;;  %v159_v48 = vld [vmem:[%s12608_s0 + $0x320] sm:$0xff]  ;;  %v64_v29 = vld [vmem:[%s12608_s0 + $0x28] sm:$0xff] }
  0x45   :  { %1544 = vmatmul.bf16.gmra.mxu2 %v8413_v41  ;;  %v165_v46 = vld [vmem:[%s12608_s0 + $0x350] sm:$0xff]  ;;  %v167_v58 = vld [vmem:[%s12608_s0 + $0x360] sm:$0xff]  ;;  %v8685_v59 = vpack.c.bf16 %v164_v44, %v157_v43  ;;  %v8689_v61 = vpack.c.bf16 %v166_v49, %v159_v48  ;;  %v72_v32 = vld [vmem:[%s12608_s0 + $0x68] sm:$0xff] }
  0x46   :  { %1495 = vmatmul.bf16.gmra.mxu1 %v8411_v40  ;;  %1918 = vmatpush.bf16.msra.mxu2 %v6603_v30  ;;  %v8687_v60 = vpack.c.bf16 %v165_v46, %v158_v45  ;;  %v8691_v62 = vpack.c.bf16 %v167_v58, %v160_v50  ;;  %v7678_v63 = vld [vmem:[%s12607_s1 + $0x3c4] sm:$0xf]  ;;  %v6584_v4 = vld [vmem:[%s12607_s1 + $0x3d0] sm:$0xf0] }
  0x47   :  { %1820 = vmatpush.bf16.msra.mxu0 %v6347_v34  ;;  %1967 = vmatpush.bf16.msra.mxu3 %v6731_v35  ;;  %12818 = vst [vmem:[#allocation31_spill] sm:$0xff] %v8685_v59  ;;  %v7614_v5 = vld [vmem:[%s12607_s1 + $0x1c4] sm:$0xf]  ;;  %v6587_v6 = vor.u32 %v7678_v63, %v6584_v4  ;;  %v6328_v7 = vld [vmem:[%s12607_s1 + $0x1d0] sm:$0xf0] }
  0x48   :  { %1593 = vmatmul.bf16.gmra.mxu3 %v8415_v42  ;;  %1869 = vmatpush.bf16.msra.mxu1 %v6475_v38  ;;  %12819 = vst [vmem:[#allocation32_spill] sm:$0xff] %v8687_v60  ;;  %v7710_v8 = vld [vmem:[%s12607_s1 + $0x4c4] sm:$0xf]  ;;  %v6712_v9 = vld [vmem:[%s12607_s1 + $0x4d0] sm:$0xf0]  ;;  %v6331_v10 = vor.u32 %v7614_v5, %v6328_v7 }
  0x49   :  { %12820 = vst [vmem:[#allocation33_spill] sm:$0xff] %v8689_v61  ;;  %v6715_v11 = vor.u32 %v7710_v8, %v6712_v9  ;;  %v7646_v12 = vld [vmem:[%s12607_s1 + $0x2c4] sm:$0xf]  ;;  %v6456_v13 = vld [vmem:[%s12607_s1 + $0x2d0] sm:$0xf0] }
  0x4a   :  { %12821 = vst [vmem:[#allocation34_spill] sm:$0xff] %v8691_v62  ;;  %1919 = vmatpush.bf16.msra.mxu2 %v6587_v6  ;;  %v6459_v14 = vor.u32 %v7646_v12, %v6456_v13  ;;  %v63_v23 = vld [vmem:[%s12608_s0 + $0x20] sm:$0xff]  ;;  %v65_v31 = vld [vmem:[%s12608_s0 + $0x30] sm:$0xff] }
  0x4b   :  { %1821 = vmatpush.bf16.msra.mxu0 %v6331_v10  ;;  %1968 = vmatpush.bf16.msra.mxu3 %v6715_v11  ;;  %v71_v30 = vld [vmem:[%s12608_s0 + $0x60] sm:$0xff]  ;;  %v8739_v33 = vpack.c.bf16 %v70_v24, %v63_v23  ;;  %v8743_v36 = vpack.c.bf16 %v72_v32, %v65_v31  ;;  %v6568_v44 = vld [vmem:[%s12607_s1 + $0x3b0] sm:$0xf0]  ;;  %v84_v23 = vld [vmem:[%s12608_s0 + $0xc8] sm:$0xff] }
  0x4c   :  { %1870 = vmatpush.bf16.msra.mxu1 %v6459_v14  ;;  %v8741_v35 = vpack.c.bf16 %v71_v30, %v64_v29  ;;  %v7674_v43 = vld [vmem:[%s12607_s1 + $0x3a4] sm:$0xf]  ;;  %v6312_v48 = vld [vmem:[%s12607_s1 + $0x1b0] sm:$0xf0]  ;;  %v78_v24 = vld [vmem:[%s12608_s0 + $0x98] sm:$0xff] }
  0x4d   :  { %12822 = vst [vmem:[#allocation35_spill] sm:$0xff] %v8739_v33  ;;  %v7610_v45 = vld [vmem:[%s12607_s1 + $0x1a4] sm:$0xf]  ;;  %v6571_v46 = vor.u32 %v7674_v43, %v6568_v44  ;;  %v6696_v50 = vld [vmem:[%s12607_s1 + $0x4b0] sm:$0xf0]  ;;  %v86_v31 = vld [vmem:[%s12608_s0 + $0xd8] sm:$0xff] }
  0x4e   :  { %12823 = vst [vmem:[#allocation36_spill] sm:$0xff] %v8741_v35  ;;  %v7706_v49 = vld [vmem:[%s12607_s1 + $0x4a4] sm:$0xf]  ;;  %v6315_v63 = vor.u32 %v7610_v45, %v6312_v48  ;;  %v6440_v12 = vld [vmem:[%s12607_s1 + $0x2b0] sm:$0xf0] }
  0x4f   :  { %12824 = vst [vmem:[#allocation37_spill] sm:$0xff] %v8743_v36  ;;  %v6699_v4 = vor.u32 %v7706_v49, %v6696_v50  ;;  %1920 = vmatpush.bf16.msra.mxu2 %v6571_v46  ;;  %v7642_v11 = vld [vmem:[%s12607_s1 + $0x2a4] sm:$0xf]  ;;  %v77_v14 = vld [vmem:[%s12608_s0 + $0x90] sm:$0xff] }
  0x50   :  { %1822 = vmatpush.bf16.msra.mxu0 %v6315_v63  ;;  %v6443_v13 = vor.u32 %v7642_v11, %v6440_v12  ;;  %v85_v29 = vld [vmem:[%s12608_s0 + $0xd0] sm:$0xff]  ;;  %v79_v30 = vld [vmem:[%s12608_s0 + $0xa0] sm:$0xff] }
  0x51   :  { %1969 = vmatpush.bf16.msra.mxu3 %v6699_v4  ;;  %v8796_v44 = vpack.c.bf16 %v85_v29, %v78_v24  ;;  %v8798_v45 = vpack.c.bf16 %v86_v31, %v79_v30  ;;  %v7670_v50 = vld [vmem:[%s12607_s1 + $0x384] sm:$0xf]  ;;  %v6424_v31 = vld [vmem:[%s12607_s1 + $0x290] sm:$0xf0] }
  0x52   :  { %1871 = vmatpush.bf16.msra.mxu1 %v6443_v13  ;;  %v7606_v63 = vld [vmem:[%s12607_s1 + $0x184] sm:$0xf] }
  0x53   :  { %12826 = vst [vmem:[#allocation39_spill] sm:$0xff] %v8796_v44  ;;  %v7638_v30 = vld [vmem:[%s12607_s1 + $0x284] sm:$0xf] }
  0x54   :  { %1451 = vmatmul.bf16.gmra.mxu0 %v8463_v0  ;;  %12827 = vst [vmem:[#allocation40_spill] sm:$0xff] %v8798_v45 }
  0x55   :  { %1549 = vmatmul.bf16.gmra.mxu2 %v8467_v2 }
  0x56   :  { %1500 = vmatmul.bf16.gmra.mxu1 %v8465_v1 }
  0x58   :  { %1598 = vmatmul.bf16.gmra.mxu3 %v8469_v3 }
  0x64   :  { %1456 = vmatmul.bf16.gmra.mxu0 %v8517_v25 }
  0x65   :  { %1554 = vmatmul.bf16.gmra.mxu2 %v8521_v27 }
  0x66   :  { %1505 = vmatmul.bf16.gmra.mxu1 %v8519_v26 }
  0x68   :  { %1603 = vmatmul.bf16.gmra.mxu3 %v8523_v28 }
  0x74   :  { %1461 = vmatmul.bf16.gmra.mxu0 %v8571_v53 }
  0x75   :  { %1559 = vmatmul.bf16.gmra.mxu2 %v8575_v56 }
  0x76   :  { %1510 = vmatmul.bf16.gmra.mxu1 %v8573_v54 }
  0x78   :  { %1608 = vmatmul.bf16.gmra.mxu3 %v8577_v57 }
  0x84   :  { %1466 = vmatmul.bf16.gmra.mxu0 %v8625_v15 }
  0x85   :  { %1564 = vmatmul.bf16.gmra.mxu2 %v8629_v17 }
  0x86   :  { %1515 = vmatmul.bf16.gmra.mxu1 %v8627_v16 }
  0x88   :  { %1613 = vmatmul.bf16.gmra.mxu3 %v8631_v22 }
  0x94   :  { %1471 = vmatmul.bf16.gmra.mxu0 %v8685_v59 }
  0x95   :  { %1569 = vmatmul.bf16.gmra.mxu2 %v8689_v61 }
  0x96   :  { %1520 = vmatmul.bf16.gmra.mxu1 %v8687_v60 }
  0x98   :  { %1618 = vmatmul.bf16.gmra.mxu3 %v8691_v62 }
  0xa1   :  { %v1437_v34 = vpop.f32.mrf.mxu0 }
  0xa3   :  { %v1486_v37 = vpop.f32.mrf.mxu1 }
  0xa4   :  { %v1487_v38 = vadd.f32 %v1486_v37, %v1437_v34  ;;  %1632 = vmatmul.bf16.vlgmr.msrb.gmra.mxu0 %v8739_v33  ;;  %v8794_v34 = vpack.c.bf16 %v84_v23, %v77_v14 }
  0xa5   :  { %6884 = vmatmul.msk.bf16.vlgmr.msrb.gmra.mxu2 %vm1403_vm0, %v8743_v36 }
  0xa6   :  { %1681 = vmatmul.bf16.vlgmr.msrb.gmra.mxu1 %v8741_v35  ;;  %12825 = vst [vmem:[#allocation38_spill] sm:$0xff] %v8794_v34 }
  0xa8   :  { %1779 = vmatmul.bf16.vlgmr.msrb.gmra.mxu3 %v8277_v47  ;;  %v1535_v58 = vpop.f32.mrf.mxu2 }
  0xa9   :  { %v1536_v5 = vadd.f32 %v1535_v58, %v1487_v38  ;;  %v1439_v7 = vpop.f32.mrf.mxu0  ;;  %v6552_v58 = vld [vmem:[%s12607_s1 + $0x390] sm:$0xf0] }
  0xaa   :  { %v6555_v4 = vor.u32 %v7670_v50, %v6552_v58  ;;  %v100_v50 = vld [vmem:[%s12608_s0 + $0x148] sm:$0xff] }
  0xab   :  { %v1584_v6 = vpop.f32.mrf.mxu3  ;;  %v1488_v8 = vpop.f32.mrf.mxu1 }
  0xac   :  { %v8768_v9 = vadd.f32 %v1584_v6, %v1536_v5  ;;  %v1489_v10 = vadd.f32 %v1488_v8, %v1439_v7  ;;  %v6296_v5 = vld [vmem:[%s12607_s1 + $0x190] sm:$0xf0]  ;;  %v7702_v6 = vld [vmem:[%s12607_s1 + $0x484] sm:$0xf]  ;;  %1921 = vmatpush.bf16.msra.mxu2 %v6555_v4 }
  0xad   :  { %v6680_v7 = vld [vmem:[%s12607_s1 + $0x490] sm:$0xf0] }
  0xae   :  { %v6683_v11 = vor.u32 %v7702_v6, %v6680_v7 }
  0xb0   :  { %v1537_v32 = vpop.f32.mrf.mxu2  ;;  %1970 = vmatpush.bf16.msra.mxu3 %v6683_v11 }
  0xb1   :  { %v1538_v37 = vadd.f32 %v1537_v32, %v1489_v10  ;;  %v1442_v43 = vpop.f32.mrf.mxu0  ;;  %v6299_v10 = vor.u32 %v7606_v63, %v6296_v5  ;;  %v6427_v32 = vor.u32 %v7638_v30, %v6424_v31  ;;  %v6280_v30 = vld [vmem:[%s12607_s1 + $0x170] sm:$0xf0]  ;;  %v7698_v31 = vld [vmem:[%s12607_s1 + $0x464] sm:$0xf] }
  0xb3   :  { %v1586_v38 = vpop.f32.mrf.mxu3  ;;  %v1491_v46 = vpop.f32.mrf.mxu1  ;;  %1823 = vmatpush.bf16.msra.mxu0 %v6299_v10  ;;  %1872 = vmatpush.bf16.msra.mxu1 %v6427_v32  ;;  %v6664_v32 = vld [vmem:[%s12607_s1 + $0x470] sm:$0xf0] }
  0xb4   :  { %v8800_v48 = vadd.f32 %v1586_v38, %v1538_v37  ;;  %v1492_v49 = vadd.f32 %v1491_v46, %v1442_v43  ;;  %1637 = vmatmul.bf16.gmra.mxu0 %v8794_v34  ;;  %v91_v37 = vld [vmem:[%s12608_s0 + $0x100] sm:$0xff]  ;;  %v98_v38 = vld [vmem:[%s12608_s0 + $0x138] sm:$0xff]  ;;  %v92_v43 = vld [vmem:[%s12608_s0 + $0x108] sm:$0xff] }
  0xb5   :  { %6885 = vmatmul.msk.bf16.gmra.mxu2 %vm1403_vm0, %v8798_v45  ;;  %v99_v46 = vld [vmem:[%s12608_s0 + $0x140] sm:$0xff]  ;;  %v8851_v63 = vpack.c.bf16 %v98_v38, %v91_v37 }
  0xb6   :  { %1686 = vmatmul.bf16.gmra.mxu1 %v8796_v44  ;;  %v8853_v7 = vpack.c.bf16 %v99_v46, %v92_v43  ;;  %v6667_v43 = vor.u32 %v7698_v31, %v6664_v32  ;;  %v114_v31 = vld [vmem:[%s12608_s0 + $0x1b8] sm:$0xff] }
  0xb7   :  { %12828 = vst [vmem:[#allocation41_spill] sm:$0xff] %v8851_v63 }
  0xb8   :  { %1784 = vmatmul.bf16.gmra.mxu3 %v8355_v18  ;;  %v1540_v8 = vpop.f32.mrf.mxu2  ;;  %12829 = vst [vmem:[#allocation42_spill] sm:$0xff] %v8853_v7 }
  0xb9   :  { %v1541_v12 = vadd.f32 %v1540_v8, %v1492_v49  ;;  %v1444_v14 = vpop.f32.mrf.mxu0  ;;  %v93_v49 = vld [vmem:[%s12608_s0 + $0x110] sm:$0xff]  ;;  %1971 = vmatpush.bf16.msra.mxu3 %v6667_v43 }
  0xba   :  { %v8855_v8 = vpack.c.bf16 %v100_v50, %v93_v49 }
  0xbb   :  { %v1589_v13 = vpop.f32.mrf.mxu3  ;;  %v1493_v23 = vpop.f32.mrf.mxu1 }
  0xbc   :  { %v8825_v24 = vadd.f32 %v1589_v13, %v1541_v12  ;;  %v1494_v29 = vadd.f32 %v1493_v23, %v1444_v14  ;;  %12830 = vst [vmem:[#allocation43_spill] sm:$0xff] %v8855_v8  ;;  %v7666_v13 = vld [vmem:[%s12607_s1 + $0x364] sm:$0xf]  ;;  %v6536_v14 = vld [vmem:[%s12607_s1 + $0x370] sm:$0xf0] }
  0xbd   :  { %v7602_v23 = vld [vmem:[%s12607_s1 + $0x164] sm:$0xf] }
  0xbe   :  { %v6283_v38 = vor.u32 %v7602_v23, %v6280_v30  ;;  %v106_v23 = vld [vmem:[%s12608_s0 + $0x178] sm:$0xff]  ;;  %v107_v30 = vld [vmem:[%s12608_s0 + $0x180] sm:$0xff] }
  0xc0   :  { %v1542_v58 = vpop.f32.mrf.mxu2  ;;  %1824 = vmatpush.bf16.msra.mxu0 %v6283_v38 }
  0xc1   :  { %v1543_v4 = vadd.f32 %v1542_v58, %v1494_v29  ;;  %v1447_v6 = vpop.f32.mrf.mxu0  ;;  %v6539_v29 = vor.u32 %v7666_v13, %v6536_v14  ;;  %v112_v14 = vld [vmem:[%s12608_s0 + $0x1a8] sm:$0xff] }
  0xc3   :  { %v1591_v5 = vpop.f32.mrf.mxu3  ;;  %v1496_v10 = vpop.f32.mrf.mxu1  ;;  %1922 = vmatpush.bf16.msra.mxu2 %v6539_v29  ;;  %v113_v29 = vld [vmem:[%s12608_s0 + $0x1b0] sm:$0xff] }
  0xc4   :  { %v8857_v11 = vadd.f32 %v1591_v5, %v1543_v4  ;;  %v1497_v12 = vadd.f32 %v1496_v10, %v1447_v6  ;;  %1642 = vmatmul.bf16.gmra.mxu0 %v8851_v63  ;;  %v7634_v6 = vld [vmem:[%s12607_s1 + $0x264] sm:$0xf]  ;;  %v6408_v10 = vld [vmem:[%s12607_s1 + $0x270] sm:$0xf0] }
  0xc5   :  { %6886 = vmatmul.msk.bf16.gmra.mxu2 %vm1403_vm0, %v8855_v8  ;;  %v6411_v13 = vor.u32 %v7634_v6, %v6408_v10 }
  0xc6   :  { %1691 = vmatmul.bf16.gmra.mxu1 %v8853_v7 }
  0xc7   :  { %1873 = vmatpush.bf16.msra.mxu1 %v6411_v13  ;;  %v6520_v13 = vld [vmem:[%s12607_s1 + $0x350] sm:$0xf0] }
  0xc8   :  { %1789 = vmatmul.bf16.gmra.mxu3 %v8409_v39  ;;  %v1545_v37 = vpop.f32.mrf.mxu2 }
  0xc9   :  { %v1546_v46 = vadd.f32 %v1545_v37, %v1497_v12  ;;  %v1449_v50 = vpop.f32.mrf.mxu0  ;;  %v105_v12 = vld [vmem:[%s12608_s0 + $0x170] sm:$0xff] }
  0xca   :  { %v8908_v37 = vpack.c.bf16 %v112_v14, %v105_v12  ;;  %v7598_v12 = vld [vmem:[%s12607_s1 + $0x144] sm:$0xf] }
  0xcb   :  { %v1594_v49 = vpop.f32.mrf.mxu3  ;;  %v1498_v58 = vpop.f32.mrf.mxu1 }
  0xcc   :  { %v8882_v4 = vadd.f32 %v1594_v49, %v1546_v46  ;;  %v1499_v5 = vadd.f32 %v1498_v58, %v1449_v50  ;;  %12831 = vst [vmem:[#allocation44_spill] sm:$0xff] %v8908_v37  ;;  %v8910_v49 = vpack.c.bf16 %v113_v29, %v106_v23  ;;  %v8912_v50 = vpack.c.bf16 %v114_v31, %v107_v30  ;;  %v6264_v23 = vld [vmem:[%s12607_s1 + $0x150] sm:$0xf0]  ;;  %v7694_v29 = vld [vmem:[%s12607_s1 + $0x444] sm:$0xf] }
  0xcd   :  { %v6648_v30 = vld [vmem:[%s12607_s1 + $0x450] sm:$0xf0] }
  0xce   :  { %12832 = vst [vmem:[#allocation45_spill] sm:$0xff] %v8910_v49 }
  0xcf   :  { %12833 = vst [vmem:[#allocation46_spill] sm:$0xff] %v8912_v50 }
  0xd0   :  { %v1547_v32 = vpop.f32.mrf.mxu2 }
  0xd1   :  { %v1548_v38 = vadd.f32 %v1547_v32, %v1499_v5  ;;  %v1452_v46 = vpop.f32.mrf.mxu0  ;;  %v7662_v5 = vld [vmem:[%s12607_s1 + $0x344] sm:$0xf]  ;;  %v6267_v32 = vor.u32 %v7598_v12, %v6264_v23  ;;  %v120_v23 = vld [vmem:[%s12608_s0 + $0x1e8] sm:$0xff] }
  0xd2   :  { %v6523_v14 = vor.u32 %v7662_v5, %v6520_v13 }
  0xd3   :  { %v1596_v43 = vpop.f32.mrf.mxu3  ;;  %v1501_v58 = vpop.f32.mrf.mxu1  ;;  %1825 = vmatpush.bf16.msra.mxu0 %v6267_v32 }
  0xd4   :  { %v8914_v6 = vadd.f32 %v1596_v43, %v1548_v38  ;;  %v1502_v10 = vadd.f32 %v1501_v58, %v1452_v46  ;;  %1647 = vmatmul.bf16.gmra.mxu0 %v8908_v37  ;;  %v6651_v38 = vor.u32 %v7694_v29, %v6648_v30  ;;  %1923 = vmatpush.bf16.msra.mxu2 %v6523_v14  ;;  %v126_v14 = vld [vmem:[%s12608_s0 + $0x218] sm:$0xff]  ;;  %v127_v29 = vld [vmem:[%s12608_s0 + $0x220] sm:$0xff] }
  0xd5   :  { %6887 = vmatmul.msk.bf16.gmra.mxu2 %vm1403_vm0, %v8912_v50  ;;  %v7630_v50 = vld [vmem:[%s12607_s1 + $0x244] sm:$0xf] }
  0xd6   :  { %1696 = vmatmul.bf16.gmra.mxu1 %v8910_v49  ;;  %1972 = vmatpush.bf16.msra.mxu3 %v6651_v38  ;;  %v6392_v49 = vld [vmem:[%s12607_s1 + $0x250] sm:$0xf0] }
  0xd7   :  { %v6395_v12 = vor.u32 %v7630_v50, %v6392_v49  ;;  %v121_v49 = vld [vmem:[%s12608_s0 + $0x1f0] sm:$0xff]  ;;  %v128_v50 = vld [vmem:[%s12608_s0 + $0x228] sm:$0xff] }
  0xd8   :  { %1794 = vmatmul.bf16.gmra.mxu3 %v8463_v0  ;;  %v1550_v31 = vpop.f32.mrf.mxu2 }
  0xd9   :  { %v1551_v43 = vadd.f32 %v1550_v31, %v1502_v10  ;;  %v1454_v58 = vpop.f32.mrf.mxu0  ;;  %v119_v10 = vld [vmem:[%s12608_s0 + $0x1e0] sm:$0xff]  ;;  %1874 = vmatpush.bf16.msra.mxu1 %v6395_v12  ;;  %v6504_v12 = vld [vmem:[%s12607_s1 + $0x330] sm:$0xf0] }
  0xda   :  { %v8965_v31 = vpack.c.bf16 %v126_v14, %v119_v10  ;;  %v7594_v10 = vld [vmem:[%s12607_s1 + $0x124] sm:$0xf] }
  0xdb   :  { %v1599_v46 = vpop.f32.mrf.mxu3  ;;  %v1503_v5 = vpop.f32.mrf.mxu1 }
  0xdc   :  { %v8939_v13 = vadd.f32 %v1599_v46, %v1551_v43  ;;  %v1504_v0 = vadd.f32 %v1503_v5, %v1454_v58  ;;  %12834 = vst [vmem:[#allocation47_spill] sm:$0xff] %v8965_v31  ;;  %v8967_v46 = vpack.c.bf16 %v127_v29, %v120_v23  ;;  %v8969_v58 = vpack.c.bf16 %v128_v50, %v121_v49  ;;  %v6248_v23 = vld [vmem:[%s12607_s1 + $0x130] sm:$0xf0]  ;;  %v7690_v29 = vld [vmem:[%s12607_s1 + $0x424] sm:$0xf] }
  0xdd   :  { %v6632_v49 = vld [vmem:[%s12607_s1 + $0x430] sm:$0xf0] }
  0xde   :  { %12835 = vst [vmem:[#allocation48_spill] sm:$0xff] %v8967_v46 }
  0xdf   :  { %12836 = vst [vmem:[#allocation49_spill] sm:$0xff] %v8969_v58 }
  0xe0   :  { %v1552_v30 = vpop.f32.mrf.mxu2 }
  0xe1   :  { %v1553_v32 = vadd.f32 %v1552_v30, %v1504_v0  ;;  %v1457_v43 = vpop.f32.mrf.mxu0  ;;  %v7658_v0 = vld [vmem:[%s12607_s1 + $0x324] sm:$0xf]  ;;  %v6251_v30 = vor.u32 %v7594_v10, %v6248_v23  ;;  %v134_v23 = vld [vmem:[%s12608_s0 + $0x258] sm:$0xff] }
  0xe2   :  { %v6507_v14 = vor.u32 %v7658_v0, %v6504_v12 }
  0xe3   :  { %v1601_v38 = vpop.f32.mrf.mxu3  ;;  %v1506_v5 = vpop.f32.mrf.mxu1  ;;  %1826 = vmatpush.bf16.msra.mxu0 %v6251_v30 }
  0xe4   :  { %v8971_v39 = vadd.f32 %v1601_v38, %v1553_v32  ;;  %v1507_v8 = vadd.f32 %v1506_v5, %v1457_v43  ;;  %1652 = vmatmul.bf16.gmra.mxu0 %v8965_v31  ;;  %v6635_v32 = vor.u32 %v7690_v29, %v6632_v49  ;;  %1924 = vmatpush.bf16.msra.mxu2 %v6507_v14  ;;  %v140_v14 = vld [vmem:[%s12608_s0 + $0x288] sm:$0xff]  ;;  %v141_v29 = vld [vmem:[%s12608_s0 + $0x290] sm:$0xff] }
  0xe5   :  { %6888 = vmatmul.msk.bf16.gmra.mxu2 %vm1403_vm0, %v8969_v58  ;;  %v7626_v58 = vld [vmem:[%s12607_s1 + $0x224] sm:$0xf] }
  0xe6   :  { %1701 = vmatmul.bf16.gmra.mxu1 %v8967_v46  ;;  %1973 = vmatpush.bf16.msra.mxu3 %v6635_v32  ;;  %v6376_v46 = vld [vmem:[%s12607_s1 + $0x230] sm:$0xf0] }
  0xe7   :  { %v6379_v10 = vor.u32 %v7626_v58, %v6376_v46  ;;  %v135_v46 = vld [vmem:[%s12608_s0 + $0x260] sm:$0xff]  ;;  %v142_v58 = vld [vmem:[%s12608_s0 + $0x298] sm:$0xff] }
  0xe8   :  { %1799 = vmatmul.bf16.gmra.mxu3 %v8517_v25  ;;  %v1555_v50 = vpop.f32.mrf.mxu2 }
  0xe9   :  { %v1556_v38 = vadd.f32 %v1555_v50, %v1507_v8  ;;  %v1459_v5 = vpop.f32.mrf.mxu0  ;;  %v133_v8 = vld [vmem:[%s12608_s0 + $0x250] sm:$0xff]  ;;  %1875 = vmatpush.bf16.msra.mxu1 %v6379_v10 }
  0xea   :  { %v9022_v50 = vpack.c.bf16 %v140_v14, %v133_v8  ;;  %v6488_v10 = vld [vmem:[%s12607_s1 + $0x310] sm:$0xf0]  ;;  %v7590_v8 = vld [vmem:[%s12607_s1 + $0x104] sm:$0xf] }
  0xeb   :  { %v1604_v43 = vpop.f32.mrf.mxu3  ;;  %v1508_v0 = vpop.f32.mrf.mxu1 }
  0xec   :  { %v8996_v12 = vadd.f32 %v1604_v43, %v1556_v38  ;;  %v1509_v25 = vadd.f32 %v1508_v0, %v1459_v5  ;;  %12837 = vst [vmem:[#allocation50_spill] sm:$0xff] %v9022_v50  ;;  %v9024_v43 = vpack.c.bf16 %v141_v29, %v134_v23  ;;  %v9026_v5 = vpack.c.bf16 %v142_v58, %v135_v46  ;;  %v6232_v23 = vld [vmem:[%s12607_s1 + $0x110] sm:$0xf0]  ;;  %v7686_v29 = vld [vmem:[%s12607_s1 + $0x404] sm:$0xf] }
  0xed   :  { %v6616_v46 = vld [vmem:[%s12607_s1 + $0x410] sm:$0xf0] }
  0xee   :  { %12838 = vst [vmem:[#allocation51_spill] sm:$0xff] %v9024_v43 }
  0xef   :  { %12839 = vst [vmem:[#allocation52_spill] sm:$0xff] %v9026_v5 }
  0xf0   :  { %v1557_v49 = vpop.f32.mrf.mxu2 }
  0xf1   :  { %v1558_v30 = vadd.f32 %v1557_v49, %v1509_v25  ;;  %v1462_v38 = vpop.f32.mrf.mxu0  ;;  %v7654_v25 = vld [vmem:[%s12607_s1 + $0x304] sm:$0xf]  ;;  %v6235_v49 = vor.u32 %v7590_v8, %v6232_v23  ;;  %v148_v23 = vld [vmem:[%s12608_s0 + $0x2c8] sm:$0xff] }
  0xf2   :  { %v6491_v14 = vor.u32 %v7654_v25, %v6488_v10 }
  0xf3   :  { %v1606_v32 = vpop.f32.mrf.mxu3  ;;  %v1511_v0 = vpop.f32.mrf.mxu1  ;;  %1827 = vmatpush.bf16.msra.mxu0 %v6235_v49 }
  0xf4   :  { %v9028_v7 = vadd.f32 %v1606_v32, %v1558_v30  ;;  %v1512_v18 = vadd.f32 %v1511_v0, %v1462_v38  ;;  %1657 = vmatmul.bf16.gmra.mxu0 %v9022_v50  ;;  %v6619_v30 = vor.u32 %v7686_v29, %v6616_v46  ;;  %1925 = vmatpush.bf16.msra.mxu2 %v6491_v14  ;;  %v154_v14 = vld [vmem:[%s12608_s0 + $0x2f8] sm:$0xff]  ;;  %v155_v29 = vld [vmem:[%s12608_s0 + $0x300] sm:$0xff] }
  0xf5   :  { %6889 = vmatmul.msk.bf16.gmra.mxu2 %vm1403_vm0, %v9026_v5  ;;  %v7622_v5 = vld [vmem:[%s12607_s1 + $0x204] sm:$0xf] }
  0xf6   :  { %1706 = vmatmul.bf16.gmra.mxu1 %v9024_v43  ;;  %1974 = vmatpush.bf16.msra.mxu3 %v6619_v30  ;;  %v6360_v43 = vld [vmem:[%s12607_s1 + $0x210] sm:$0xf0] }
  0xf7   :  { %v6363_v8 = vor.u32 %v7622_v5, %v6360_v43  ;;  %v149_v43 = vld [vmem:[%s12608_s0 + $0x2d0] sm:$0xff]  ;;  %v156_v5 = vld [vmem:[%s12608_s0 + $0x308] sm:$0xff] }
  0xf8   :  { %1804 = vmatmul.bf16.gmra.mxu3 %v8571_v53  ;;  %v1560_v58 = vpop.f32.mrf.mxu2 }
  0xf9   :  { %v1561_v32 = vadd.f32 %v1560_v58, %v1512_v18  ;;  %v1464_v0 = vpop.f32.mrf.mxu0  ;;  %v147_v18 = vld [vmem:[%s12608_s0 + $0x2c0] sm:$0xff]  ;;  %1876 = vmatpush.bf16.msra.mxu1 %v6363_v8  ;;  %v7589_v8 = vld [vmem:[%s12607_s1 + $0xf4] sm:$0xf0] }
  0xfa   :  { %v9079_v58 = vpack.c.bf16 %v154_v14, %v147_v18  ;;  %v7746_v18 = vld [vmem:[%s12607_s1 + $0x5e4] sm:$0xf] }
  0xfb   :  { %v1609_v38 = vpop.f32.mrf.mxu3  ;;  %v1513_v25 = vpop.f32.mrf.mxu1 }
  0xfc   :  { %v9053_v10 = vadd.f32 %v1609_v38, %v1561_v32  ;;  %v1514_v53 = vadd.f32 %v1513_v25, %v1464_v0  ;;  %v9081_v38 = vpack.c.bf16 %v155_v29, %v148_v23  ;;  %v9083_v0 = vpack.c.bf16 %v156_v5, %v149_v43  ;;  %v6856_v23 = vld [vmem:[%s12607_s1 + $0x5f0] sm:$0xf0]  ;;  %v6350_v29 = vld [vmem:[%s12607_s1 + $0x1e8] sm:$0xf]  ;;  %v7621_v43 = vld [vmem:[%s12607_s1 + $0x1f4] sm:$0xf0] }
  0xfe   :  { %12840 = vst [vmem:[#allocation53_spill] sm:$0xff] %v9081_v38 }
  0xff   :  { %12841 = vst [vmem:[#allocation54_spill] sm:$0xff] %v9083_v0 }
 0x100   :  { %v1562_v46 = vpop.f32.mrf.mxu2 }
 0x101   :  { %v1563_v49 = vadd.f32 %v1562_v46, %v1514_v53  ;;  %v1467_v32 = vpop.f32.mrf.mxu0  ;;  %v6222_v53 = vld [vmem:[%s12607_s1 + $0xe8] sm:$0xf]  ;;  %v6859_v46 = vor.u32 %v7746_v18, %v6856_v23  ;;  %v162_v23 = vld [vmem:[%s12608_s0 + $0x338] sm:$0xff] }
 0x102   :  { %v6223_v14 = vor.u32 %v7589_v8, %v6222_v53 }
 0x103   :  { %v1611_v30 = vpop.f32.mrf.mxu3  ;;  %v1516_v25 = vpop.f32.mrf.mxu1  ;;  %2016 = vmatpush.bf16.msrb.mxu0 %v6859_v46 }
 0x104   :  { %v9085_v45 = vadd.f32 %v1611_v30, %v1563_v49  ;;  %v1517_v44 = vadd.f32 %v1516_v25, %v1467_v32  ;;  %1662 = vmatmul.bf16.gmra.mxu0 %v9079_v58  ;;  %v6351_v49 = vor.u32 %v7621_v43, %v6350_v29  ;;  %2114 = vmatpush.bf16.msrb.mxu2 %v6223_v14  ;;  %v168_v14 = vld [vmem:[%s12608_s0 + $0x368] sm:$0xff]  ;;  %v169_v29 = vld [vmem:[%s12608_s0 + $0x370] sm:$0xff] }
 0x105   :  { %6890 = vmatmul.msk.bf16.gmra.mxu2 %vm1403_vm0, %v9083_v0  ;;  %v7750_v0 = vld [vmem:[%s12607_s1 + $0x604] sm:$0xf] }
 0x106   :  { %1711 = vmatmul.bf16.gmra.mxu1 %v9081_v38  ;;  %2163 = vmatpush.bf16.msrb.mxu3 %v6351_v49  ;;  %v6872_v38 = vld [vmem:[%s12607_s1 + $0x610] sm:$0xf0] }
 0x107   :  { %v6875_v18 = vor.u32 %v7750_v0, %v6872_v38  ;;  %v163_v38 = vld [vmem:[%s12608_s0 + $0x340] sm:$0xff]  ;;  %v170_v0 = vld [vmem:[%s12608_s0 + $0x378] sm:$0xff] }
 0x108   :  { %1809 = vmatmul.bf16.gmra.mxu3 %v8625_v15  ;;  %v1565_v5 = vpop.f32.mrf.mxu2 }
 0x109   :  { %v1566_v30 = vadd.f32 %v1565_v5, %v1517_v44  ;;  %v1469_v25 = vpop.f32.mrf.mxu0  ;;  %v161_v44 = vld [vmem:[%s12608_s0 + $0x330] sm:$0xff]  ;;  %2072 = vmatpush.bf16.msrb.mxu1 %v6875_v18  ;;  %v7585_v18 = vld [vmem:[%s12607_s1 + $0xd4] sm:$0xf0] }
 0x10a   :  { %v9136_v5 = vpack.c.bf16 %v168_v14, %v161_v44  ;;  %v7742_v44 = vld [vmem:[%s12607_s1 + $0x5c4] sm:$0xf] }
 0x10b   :  { %v1614_v32 = vpop.f32.mrf.mxu3  ;;  %v1518_v53 = vpop.f32.mrf.mxu1 }
 0x10c   :  { %v9110_v8 = vadd.f32 %v1614_v32, %v1566_v30  ;;  %v1519_v15 = vadd.f32 %v1518_v53, %v1469_v25  ;;  %12842 = vst [vmem:[#allocation55_spill] sm:$0xff] %v9136_v5  ;;  %v9138_v32 = vpack.c.bf16 %v169_v29, %v162_v23  ;;  %v9140_v25 = vpack.c.bf16 %v170_v0, %v163_v38  ;;  %v6840_v23 = vld [vmem:[%s12607_s1 + $0x5d0] sm:$0xf0]  ;;  %v6334_v29 = vld [vmem:[%s12607_s1 + $0x1c8] sm:$0xf] }
 0x10d   :  { %v7617_v38 = vld [vmem:[%s12607_s1 + $0x1d4] sm:$0xf0] }
 0x10e   :  { %12843 = vst [vmem:[#allocation56_spill] sm:$0xff] %v9138_v32 }
 0x10f   :  { %12844 = vst [vmem:[#allocation57_spill] sm:$0xff] %v9140_v25 }
 0x110   :  { %v1567_v43 = vpop.f32.mrf.mxu2 }
 0x111   :  { %v1568_v46 = vadd.f32 %v1567_v43, %v1519_v15  ;;  %v1472_v30 = vpop.f32.mrf.mxu0  ;;  %v6206_v15 = vld [vmem:[%s12607_s1 + $0xc8] sm:$0xf]  ;;  %v6843_v43 = vor.u32 %v7742_v44, %v6840_v23 }
 0x112   :  { %v6207_v14 = vor.u32 %v7585_v18, %v6206_v15 }
 0x113   :  { %v1616_v49 = vpop.f32.mrf.mxu3  ;;  %v1521_v53 = vpop.f32.mrf.mxu1  ;;  %2017 = vmatpush.bf16.msrb.mxu0 %v6843_v43 }
 0x114   :  { %v9142_v47 = vadd.f32 %v1616_v49, %v1568_v46  ;;  %v1522_v36 = vadd.f32 %v1521_v53, %v1472_v30  ;;  %1667 = vmatmul.bf16.gmra.mxu0 %v9136_v5  ;;  %v6335_v46 = vor.u32 %v7617_v38, %v6334_v29  ;;  %2115 = vmatpush.bf16.msrb.mxu2 %v6207_v14 }
 0x115   :  { %6891 = vmatmul.msk.bf16.gmra.mxu2 %vm1403_vm0, %v9140_v25 }
 0x116   :  { %1716 = vmatmul.bf16.gmra.mxu1 %v9138_v32  ;;  %2164 = vmatpush.bf16.msrb.mxu3 %v6335_v46 }
 0x118   :  { %1814 = vmatmul.bf16.gmra.mxu3 %v8685_v59  ;;  %v1570_v0 = vpop.f32.mrf.mxu2 }
 0x119   :  { %v1571_v49 = vadd.f32 %v1570_v0, %v1522_v36  ;;  %v1474_v53 = vpop.f32.mrf.mxu0  ;;  %v7581_v36 = vld [vmem:[%s12607_s1 + $0xb4] sm:$0xf0] }
 0x11b   :  { %v1619_v30 = vpop.f32.mrf.mxu3  ;;  %v1523_v15 = vpop.f32.mrf.mxu1 }
 0x11c   :  { %v9167_v18 = vadd.f32 %v1619_v30, %v1571_v49  ;;  %v1524_v59 = vadd.f32 %v1523_v15, %v1474_v53 }
 0x120   :  { %v1572_v25 = vpop.f32.mrf.mxu2 }
 0x121   :  { %v1573_v32 = vadd.f32 %v1572_v25, %v1524_v59  ;;  %v1633_v5 = vpop.f32.mrf.mxu0  ;;  %v6190_v59 = vld [vmem:[%s12607_s1 + $0xa8] sm:$0xf] }
 0x122   :  { %v1634_v62 = vadd.f32 %v1633_v5, %v8768_v9  ;;  %v6318_v9 = vld [vmem:[%s12607_s1 + $0x1a8] sm:$0xf]  ;;  %v7613_v5 = vld [vmem:[%s12607_s1 + $0x1b4] sm:$0xf0] }
 0x123   :  { %v1621_v35 = vpop.f32.mrf.mxu3  ;;  %v1682_v61 = vpop.f32.mrf.mxu1  ;;  %v6319_v14 = vor.u32 %v7613_v5, %v6318_v9  ;;  %v6302_v9 = vld [vmem:[%s12607_s1 + $0x188] sm:$0xf]  ;;  %v7609_v5 = vld [vmem:[%s12607_s1 + $0x194] sm:$0xf0] }
 0x124   :  { %v9170_v60 = vadd.f32 %v1621_v35, %v1573_v32  ;;  %v1683_v44 = vadd.f32 %v1682_v61, %v1634_v62  ;;  %1828 = vmatmul.bf16.vlgmr.msra.gmra.mxu0 %v8285_v51  ;;  %v7738_v61 = vld [vmem:[%s12607_s1 + $0x5a4] sm:$0xf]  ;;  %v6191_v62 = vor.u32 %v7581_v36, %v6190_v59  ;;  %v6824_v35 = vld [vmem:[%s12607_s1 + $0x5b0] sm:$0xf0] }
 0x125   :  { %1926 = vmatmul.bf16.vlgmr.msra.gmra.mxu2 %v8295_v55  ;;  %v6827_v25 = vor.u32 %v7738_v61, %v6824_v35  ;;  %2165 = vmatpush.bf16.msrb.mxu3 %v6319_v14  ;;  %v7577_v61 = vld [vmem:[%s12607_s1 + $0x94] sm:$0xf0]  ;;  %v6808_v35 = vld [vmem:[%s12607_s1 + $0x590] sm:$0xf0]  ;;  %v6303_v14 = vor.u32 %v7609_v5, %v6302_v9 }
 0x126   :  { %1877 = vmatmul.bf16.vlgmr.msra.gmra.mxu1 %v8287_v52  ;;  %2116 = vmatpush.bf16.msrb.mxu2 %v6191_v62  ;;  %v6792_v5 = vld [vmem:[%s12607_s1 + $0x570] sm:$0xf0] }
 0x127   :  { %2018 = vmatpush.bf16.msrb.mxu0 %v6827_v25 }
 0x128   :  { %1975 = vmatmul.bf16.vlgmr.msra.gmra.mxu3 %v8739_v33  ;;  %v1731_v32 = vpop.f32.mrf.mxu2 }
 0x129   :  { %v9194_v23 = vadd.f32 %v1731_v32, %v1683_v44  ;;  %v1635_v38 = vpop.f32.mrf.mxu0  ;;  %2166 = vmatpush.bf16.msrb.mxu3 %v6303_v14 }
 0x12a   :  { %v1636_v0 = vadd.f32 %v1635_v38, %v8800_v48  ;;  %v6174_v48 = vld [vmem:[%s12607_s1 + $0x88] sm:$0xf] }
 0x12b   :  { %12845 = vst [vmem:[#allocation58_spill] sm:$0xff] %v9194_v23  ;;  %v9196_v29 = vpop.f32.mrf.mxu3  ;;  %v1684_v43 = vpop.f32.mrf.mxu1  ;;  %v6175_v62 = vor.u32 %v7577_v61, %v6174_v48 }
 0x12c   :  { %v1685_v46 = vadd.f32 %v1684_v43, %v1636_v0 }
 0x12d   :  { %2117 = vmatpush.bf16.msrb.mxu2 %v6175_v62  ;;  %v7573_v62 = vld [vmem:[%s12607_s1 + $0x74] sm:$0xf0] }
 0x130   :  { %v1733_v49 = vpop.f32.mrf.mxu2 }
 0x131   :  { %v9199_v30 = vadd.f32 %v1733_v49, %v1685_v46  ;;  %v1638_v15 = vpop.f32.mrf.mxu0 }
 0x132   :  { %v1639_v59 = vadd.f32 %v1638_v15, %v8825_v24  ;;  %v7734_v24 = vld [vmem:[%s12607_s1 + $0x584] sm:$0xf] }
 0x133   :  { %12846 = vst [vmem:[#allocation59_spill] sm:$0xff] %v9199_v30  ;;  %v9201_v53 = vpop.f32.mrf.mxu3  ;;  %v1687_v44 = vpop.f32.mrf.mxu1  ;;  %v6811_v25 = vor.u32 %v7734_v24, %v6808_v35 }
 0x134   :  { %v1688_v36 = vadd.f32 %v1687_v44, %v1639_v59  ;;  %1833 = vmatmul.bf16.gmra.mxu0 %v8357_v19 }
 0x135   :  { %1931 = vmatmul.bf16.gmra.mxu2 %v8361_v21  ;;  %2019 = vmatpush.bf16.msrb.mxu0 %v6811_v25  ;;  %v7605_v25 = vld [vmem:[%s12607_s1 + $0x174] sm:$0xf0] }
 0x136   :  { %1882 = vmatmul.bf16.gmra.mxu1 %v8359_v20 }
 0x138   :  { %1980 = vmatmul.bf16.gmra.mxu3 %v8794_v34  ;;  %v1736_v32 = vpop.f32.mrf.mxu2 }
 0x139   :  { %v9226_v38 = vadd.f32 %v1736_v32, %v1688_v36  ;;  %v1640_v43 = vpop.f32.mrf.mxu0  ;;  %v6286_v32 = vld [vmem:[%s12607_s1 + $0x168] sm:$0xf] }
 0x13a   :  { %v1641_v46 = vadd.f32 %v1640_v43, %v8857_v11  ;;  %v6158_v11 = vld [vmem:[%s12607_s1 + $0x68] sm:$0xf] }
 0x13b   :  { %12847 = vst [vmem:[#allocation60_spill] sm:$0xff] %v9226_v38  ;;  %v9228_v0 = vpop.f32.mrf.mxu3  ;;  %v1689_v49 = vpop.f32.mrf.mxu1  ;;  %v6159_v9 = vor.u32 %v7573_v62, %v6158_v11 }
 0x13c   :  { %v1690_v15 = vadd.f32 %v1689_v49, %v1641_v46  ;;  %v6287_v46 = vor.u32 %v7605_v25, %v6286_v32  ;;  %v6776_v32 = vld [vmem:[%s12607_s1 + $0x550] sm:$0xf0]  ;;  %v6270_v25 = vld [vmem:[%s12607_s1 + $0x148] sm:$0xf] }
 0x13d   :  { %2118 = vmatpush.bf16.msrb.mxu2 %v6159_v9  ;;  %v7569_v9 = vld [vmem:[%s12607_s1 + $0x54] sm:$0xf0] }
 0x13e   :  { %2167 = vmatpush.bf16.msrb.mxu3 %v6287_v46 }
 0x140   :  { %v1738_v59 = vpop.f32.mrf.mxu2 }
 0x141   :  { %v9231_v44 = vadd.f32 %v1738_v59, %v1690_v15  ;;  %v1643_v61 = vpop.f32.mrf.mxu0 }
 0x142   :  { %v1644_v24 = vadd.f32 %v1643_v61, %v8882_v4  ;;  %v7730_v4 = vld [vmem:[%s12607_s1 + $0x564] sm:$0xf] }
 0x143   :  { %12848 = vst [vmem:[#allocation61_spill] sm:$0xff] %v9231_v44  ;;  %v9233_v48 = vpop.f32.mrf.mxu3  ;;  %v1692_v36 = vpop.f32.mrf.mxu1  ;;  %v6795_v43 = vor.u32 %v7730_v4, %v6792_v5 }
 0x144   :  { %v1693_v35 = vadd.f32 %v1692_v36, %v1644_v24  ;;  %1838 = vmatmul.bf16.gmra.mxu0 %v8411_v40 }
 0x145   :  { %1936 = vmatmul.bf16.gmra.mxu2 %v8415_v42  ;;  %2020 = vmatpush.bf16.msrb.mxu0 %v6795_v43 }
 0x146   :  { %1887 = vmatmul.bf16.gmra.mxu1 %v8413_v41 }
 0x148   :  { %1985 = vmatmul.bf16.gmra.mxu3 %v8851_v63  ;;  %v1741_v14 = vpop.f32.mrf.mxu2 }
 0x149   :  { %v9258_v49 = vadd.f32 %v1741_v14, %v1693_v35  ;;  %v1645_v59 = vpop.f32.mrf.mxu0  ;;  %v7601_v14 = vld [vmem:[%s12607_s1 + $0x154] sm:$0xf0] }
 0x14a   :  { %v1646_v61 = vadd.f32 %v1645_v59, %v8914_v6  ;;  %v6142_v6 = vld [vmem:[%s12607_s1 + $0x48] sm:$0xf]  ;;  %v6271_v59 = vor.u32 %v7601_v14, %v6270_v25  ;;  %v6760_v25 = vld [vmem:[%s12607_s1 + $0x530] sm:$0xf0] }
 0x14b   :  { %12849 = vst [vmem:[#allocation62_spill] sm:$0xff] %v9258_v49  ;;  %v9260_v15 = vpop.f32.mrf.mxu3  ;;  %v1694_v24 = vpop.f32.mrf.mxu1  ;;  %v6254_v14 = vld [vmem:[%s12607_s1 + $0x128] sm:$0xf] }
 0x14c   :  { %v1695_v36 = vadd.f32 %v1694_v24, %v1646_v61  ;;  %2168 = vmatpush.bf16.msrb.mxu3 %v6271_v59 }
 0x150   :  { %v1743_v11 = vpop.f32.mrf.mxu2 }
 0x151   :  { %v9263_v62 = vadd.f32 %v1743_v11, %v1695_v36  ;;  %v1648_v42 = vpop.f32.mrf.mxu0 }
 0x152   :  { %v1649_v4 = vadd.f32 %v1648_v42, %v8939_v13  ;;  %v7726_v42 = vld [vmem:[%s12607_s1 + $0x544] sm:$0xf]  ;;  %v6143_v13 = vor.u32 %v7569_v9, %v6142_v6 }
 0x153   :  { %12850 = vst [vmem:[#allocation63_spill] sm:$0xff] %v9263_v62  ;;  %v9265_v63 = vpop.f32.mrf.mxu3  ;;  %v1697_v35 = vpop.f32.mrf.mxu1  ;;  %v6779_v46 = vor.u32 %v7726_v42, %v6776_v32 }
 0x154   :  { %v1698_v5 = vadd.f32 %v1697_v35, %v1649_v4  ;;  %1843 = vmatmul.bf16.gmra.mxu0 %v8465_v1  ;;  %2119 = vmatpush.bf16.msrb.mxu2 %v6143_v13  ;;  %v7565_v13 = vld [vmem:[%s12607_s1 + $0x34] sm:$0xf0] }
 0x155   :  { %1941 = vmatmul.bf16.gmra.mxu2 %v8469_v3  ;;  %2021 = vmatpush.bf16.msrb.mxu0 %v6779_v46 }
 0x156   :  { %1892 = vmatmul.bf16.gmra.mxu1 %v8467_v2 }
 0x158   :  { %1990 = vmatmul.bf16.gmra.mxu3 %v8908_v37  ;;  %v1746_v43 = vpop.f32.mrf.mxu2 }
 0x159   :  { %v9290_v61 = vadd.f32 %v1746_v43, %v1698_v5  ;;  %v1650_v36 = vpop.f32.mrf.mxu0  ;;  %v7597_v43 = vld [vmem:[%s12607_s1 + $0x134] sm:$0xf0] }
 0x15a   :  { %v1651_v11 = vadd.f32 %v1650_v36, %v8971_v39  ;;  %v6126_v39 = vld [vmem:[%s12607_s1 + $0x28] sm:$0xf]  ;;  %v6255_v36 = vor.u32 %v7597_v43, %v6254_v14  ;;  %v2894_v43 = vmul.f32 %v9226_v38, %v9226_v38 }
 0x15b   :  { %12851 = vst [vmem:[#allocation64_spill] sm:$0xff] %v9290_v61  ;;  %v9292_v24 = vpop.f32.mrf.mxu3  ;;  %v1699_v4 = vpop.f32.mrf.mxu1 }
 0x15c   :  { %v1700_v35 = vadd.f32 %v1699_v4, %v1651_v11  ;;  %2169 = vmatpush.bf16.msrb.mxu3 %v6255_v36 }
 0x160   :  { %v1748_v6 = vpop.f32.mrf.mxu2 }
 0x161   :  { %v9295_v9 = vadd.f32 %v1748_v6, %v1700_v35  ;;  %v1653_v3 = vpop.f32.mrf.mxu0 }
 0x162   :  { %v1654_v42 = vadd.f32 %v1653_v3, %v8996_v12  ;;  %v7722_v3 = vld [vmem:[%s12607_s1 + $0x524] sm:$0xf]  ;;  %v6127_v12 = vor.u32 %v7565_v13, %v6126_v39 }
 0x163   :  { %12852 = vst [vmem:[#allocation65_spill] sm:$0xff] %v9295_v9  ;;  %v9297_v37 = vpop.f32.mrf.mxu3  ;;  %v1702_v5 = vpop.f32.mrf.mxu1  ;;  %v6763_v59 = vor.u32 %v7722_v3, %v6760_v25  ;;  %v2890_v25 = vmul.f32 %v9199_v30, %v9199_v30 }
 0x164   :  { %v1703_v32 = vadd.f32 %v1702_v5, %v1654_v42  ;;  %1848 = vmatmul.bf16.gmra.mxu0 %v8519_v26  ;;  %2120 = vmatpush.bf16.msrb.mxu2 %v6127_v12  ;;  %v2802_v12 = vadd.f32 %v9199_v30, %v9194_v23 }
 0x165   :  { %1946 = vmatmul.bf16.gmra.mxu2 %v8523_v28  ;;  %2022 = vmatpush.bf16.msrb.mxu0 %v6763_v59 }
 0x166   :  { %1897 = vmatmul.bf16.gmra.mxu1 %v8521_v27  ;;  %v2803_v36 = vadd.f32 %v2802_v12, %v9226_v38 }
 0x168   :  { %1995 = vmatmul.bf16.gmra.mxu3 %v8965_v31  ;;  %v1751_v46 = vpop.f32.mrf.mxu2  ;;  %v2804_v12 = vadd.f32 %v2803_v36, %v9231_v44 }
 0x169   :  { %v9322_v11 = vadd.f32 %v1751_v46, %v1703_v32  ;;  %v1655_v35 = vpop.f32.mrf.mxu0  ;;  %v7718_v46 = vld [vmem:[%s12607_s1 + $0x504] sm:$0xf] }
 0x16a   :  { %v1656_v6 = vadd.f32 %v1655_v35, %v9028_v7  ;;  %v2886_v7 = vmul.f32 %v9194_v23, %v9194_v23  ;;  %v2898_v35 = vmul.f32 %v9231_v44, %v9231_v44 }
 0x16b   :  { %12853 = vst [vmem:[#allocation66_spill] sm:$0xff] %v9322_v11  ;;  %v9324_v4 = vpop.f32.mrf.mxu3  ;;  %v1704_v42 = vpop.f32.mrf.mxu1 }
 0x16c   :  { %v1705_v5 = vadd.f32 %v1704_v42, %v1656_v6  ;;  %v2950_v59 = vadd.f32 %v2890_v25, %v2886_v7  ;;  %v6744_v42 = vld [vmem:[%s12607_s1 + $0x510] sm:$0xf0] }
 0x16e   :  { %v2951_v7 = vadd.f32 %v2950_v59, %v2894_v43  ;;  %v2906_v43 = vmul.f32 %v9263_v62, %v9263_v62 }
 0x170   :  { %v1753_v39 = vpop.f32.mrf.mxu2 }
 0x171   :  { %v9327_v13 = vadd.f32 %v1753_v39, %v1705_v5  ;;  %v1658_v28 = vpop.f32.mrf.mxu0  ;;  %v6238_v5 = vld [vmem:[%s12607_s1 + $0x108] sm:$0xf]  ;;  %v7593_v39 = vld [vmem:[%s12607_s1 + $0x114] sm:$0xf0] }
 0x172   :  { %v1659_v3 = vadd.f32 %v1658_v28, %v9053_v10  ;;  %v6110_v28 = vld [vmem:[%s12607_s1 + $0x8] sm:$0xf]  ;;  %v7561_v10 = vld [vmem:[%s12607_s1 + $0x14] sm:$0xf0]  ;;  %v6239_v25 = vor.u32 %v7593_v39, %v6238_v5 }
 0x173   :  { %12854 = vst [vmem:[#allocation67_spill] sm:$0xff] %v9327_v13  ;;  %v9329_v31 = vpop.f32.mrf.mxu3  ;;  %v1707_v32 = vpop.f32.mrf.mxu1  ;;  %v6111_v6 = vor.u32 %v7561_v10, %v6110_v28  ;;  %v2902_v28 = vmul.f32 %v9258_v49, %v9258_v49 }
 0x174   :  { %v1708_v14 = vadd.f32 %v1707_v32, %v1659_v3  ;;  %1853 = vmatmul.bf16.gmra.mxu0 %v8573_v54  ;;  %v6747_v32 = vor.u32 %v7718_v46, %v6744_v42  ;;  %2170 = vmatpush.bf16.msrb.mxu3 %v6239_v25  ;;  %v2805_v46 = vadd.f32 %v2804_v12, %v9258_v49 }
 0x175   :  { %1951 = vmatmul.bf16.gmra.mxu2 %v8577_v57  ;;  %v2952_v57 = vadd.f32 %v2951_v7, %v2898_v35  ;;  %v2910_v42 = vmul.f32 %v9290_v61, %v9290_v61 }
 0x176   :  { %1902 = vmatmul.bf16.gmra.mxu1 %v8575_v56  ;;  %2121 = vmatpush.bf16.msrb.mxu2 %v6111_v6 }
 0x177   :  { %2023 = vmatpush.bf16.msrb.mxu0 %v6747_v32  ;;  %v2953_v36 = vadd.f32 %v2952_v57, %v2902_v28  ;;  %v2922_v28 = vmul.f32 %v9327_v13, %v9327_v13 }
 0x178   :  { %2000 = vmatmul.bf16.gmra.mxu3 %v9022_v50  ;;  %v1756_v3 = vpop.f32.mrf.mxu2 }
 0x179   :  { %v9368_v10 = vadd.f32 %v1756_v3, %v1708_v14  ;;  %v1660_v30 = vpop.f32.mrf.mxu0  ;;  %v2806_v14 = vadd.f32 %v2805_v46, %v9263_v62  ;;  %v2954_v5 = vadd.f32 %v2953_v36, %v2906_v43  ;;  %v2918_v3 = vmul.f32 %v9322_v11, %v9322_v11 }
 0x17a   :  { %v1661_v23 = vadd.f32 %v1660_v30, %v9085_v45  ;;  %v2914_v45 = vmul.f32 %v9295_v9, %v9295_v9 }
 0x17b   :  { %12855 = vst [vmem:[#allocation68_spill] sm:$0xff] %v9368_v10  ;;  %v9370_v38 = vpop.f32.mrf.mxu3  ;;  %v1709_v50 = vpop.f32.mrf.mxu1  ;;  %v2807_v6 = vadd.f32 %v2806_v14, %v9290_v61  ;;  %v2955_v35 = vadd.f32 %v2954_v5, %v2910_v42  ;;  %v6462_v61 = vld [vmem:[%s12607_s1 + $0x2c8] sm:$0xf] }
 0x17c   :  { %v1710_v59 = vadd.f32 %v1709_v50, %v1661_v23 }
 0x17d   :  { %v2808_v39 = vadd.f32 %v2807_v6, %v9295_v9  ;;  %v2956_v7 = vadd.f32 %v2955_v35, %v2914_v45  ;;  %v6734_v9 = vld [vmem:[%s12607_s1 + $0x4e8] sm:$0xf] }
 0x17f   :  { %v2809_v12 = vadd.f32 %v2808_v39, %v9322_v11  ;;  %v2957_v43 = vadd.f32 %v2956_v7, %v2918_v3 }
 0x180   :  { %v1758_v30 = vpop.f32.mrf.mxu2 }
 0x181   :  { %v9385_v50 = vadd.f32 %v1758_v30, %v1710_v59  ;;  %v1663_v23 = vpop.f32.mrf.mxu0  ;;  %v2810_v36 = vadd.f32 %v2809_v12, %v9327_v13  ;;  %v2926_v59 = vmul.f32 %v9368_v10, %v9368_v10 }
 0x182   :  { %v1664_v32 = vadd.f32 %v1663_v23, %v9110_v8  ;;  %v2958_v8 = vadd.f32 %v2957_v43, %v2922_v28 }
 0x183   :  { %12856 = vst [vmem:[#allocation69_spill] sm:$0xff] %v9385_v50  ;;  %v9387_v57 = vpop.f32.mrf.mxu3  ;;  %v1712_v25 = vpop.f32.mrf.mxu1  ;;  %v2811_v14 = vadd.f32 %v2810_v36, %v9368_v10  ;;  %v2930_v42 = vmul.f32 %v9385_v50, %v9385_v50 }
 0x184   :  { %v1713_v46 = vadd.f32 %v1712_v25, %v1664_v32  ;;  %1858 = vmatmul.bf16.gmra.mxu0 %v8627_v16  ;;  %v2959_v6 = vadd.f32 %v2958_v8, %v2926_v59 }
 0x185   :  { %1956 = vmatmul.bf16.gmra.mxu2 %v8631_v22  ;;  %v2812_v45 = vadd.f32 %v2811_v14, %v9385_v50 }
 0x186   :  { %1907 = vmatmul.bf16.gmra.mxu1 %v8629_v17  ;;  %v2960_v32 = vadd.f32 %v2959_v6, %v2930_v42  ;;  %v12859_v6 = vld [vmem:[#allocation32_spill] sm:$0xff] }
 0x188   :  { %2005 = vmatmul.bf16.gmra.mxu3 %v9079_v58  ;;  %v1761_v5 = vpop.f32.mrf.mxu2 }
 0x189   :  { %v9404_v30 = vadd.f32 %v1761_v5, %v1713_v46  ;;  %v1665_v39 = vpop.f32.mrf.mxu0 }
 0x18a   :  { %v1666_v3 = vadd.f32 %v1665_v39, %v9142_v47  ;;  %v12860_v39 = vld [vmem:[#allocation33_spill] sm:$0xff] }
 0x18b   :  { %12857 = vst [vmem:[#allocation70_spill] sm:$0xff] %v9404_v30  ;;  %v9406_v35 = vpop.f32.mrf.mxu3  ;;  %v1714_v23 = vpop.f32.mrf.mxu1  ;;  %v2813_v25 = vadd.f32 %v2812_v45, %v9404_v30  ;;  %v2934_v7 = vmul.f32 %v9404_v30, %v9404_v30 }
 0x18c   :  { %v1715_v12 = vadd.f32 %v1714_v23, %v1666_v3  ;;  %v12861_v3 = vld [vmem:[#allocation34_spill] sm:$0xff]  ;;  %v12862_v23 = vld [vmem:[#allocation55_spill] sm:$0xff] }
 0x18d   :  { %v2961_v28 = vadd.f32 %v2960_v32, %v2934_v7 }
 0x190   :  { %v1763_v43 = vpop.f32.mrf.mxu2 }
 0x191   :  { %v9412_v36 = vadd.f32 %v1763_v43, %v1715_v12  ;;  %v1668_v46 = vpop.f32.mrf.mxu0 }
 0x192   :  { %v1669_v8 = vadd.f32 %v1668_v46, %v9167_v18 }
 0x193   :  { %12858 = vst [vmem:[#allocation71_spill] sm:$0xff] %v9412_v36  ;;  %v9414_v59 = vpop.f32.mrf.mxu3  ;;  %v1717_v14 = vpop.f32.mrf.mxu1  ;;  %v2814_v47 = vadd.f32 %v2813_v25, %v9412_v36  ;;  %v2938_v42 = vmul.f32 %v9412_v36, %v9412_v36 }
 0x194   :  { %v1718_v5 = vadd.f32 %v1717_v14, %v1669_v8  ;;  %1863 = vmatmul.bf16.gmra.mxu0 %v12859_v6 }
 0x195   :  { %v2962_v45 = vadd.f32 %v2961_v28, %v2938_v42  ;;  %1961 = vmatmul.bf16.gmra.mxu2 %v12861_v3 }
 0x196   :  { %1912 = vmatmul.bf16.gmra.mxu1 %v12860_v39 }
 0x198   :  { %2010 = vmatmul.bf16.gmra.mxu3 %v12862_v23  ;;  %v1766_v32 = vpop.f32.mrf.mxu2 }
 0x199   :  { %v9424_v7 = vadd.f32 %v1766_v32, %v1718_v5  ;;  %v1670_v12 = vpop.f32.mrf.mxu0 }
 0x19a   :  { %v1671_v25 = vadd.f32 %v1670_v12, %v9170_v60  ;;  %v12865_v12 = vld [vmem:[#allocation36_spill] sm:$0xff] }
 0x19b   :  { %12863 = vst [vmem:[#allocation33_spill] sm:$0xff] %v9424_v7  ;;  %v9426_v18 = vpop.f32.mrf.mxu3  ;;  %v1719_v43 = vpop.f32.mrf.mxu1  ;;  %v2815_v46 = vadd.f32 %v2814_v47, %v9424_v7  ;;  %v2942_v28 = vmul.f32 %v9424_v7, %v9424_v7 }
 0x19c   :  { %v1720_v8 = vadd.f32 %v1719_v43, %v1671_v25  ;;  %v12867_v43 = vld [vmem:[#allocation13_spill] sm:$0xff] }
 0x19d   :  { %v2963_v14 = vadd.f32 %v2962_v45, %v2942_v28  ;;  %v12866_v45 = vld [vmem:[#allocation37_spill] sm:$0xff] }
 0x1a0   :  { %v1768_v42 = vpop.f32.mrf.mxu2 }
 0x1a1   :  { %v9432_v36 = vadd.f32 %v1768_v42, %v1720_v8  ;;  %v1829_v5 = vpop.f32.mrf.mxu0 }
 0x1a2   :  { %v1830_v32 = vadd.f32 %v1829_v5, %v9196_v29 }
 0x1a3   :  { %12864 = vst [vmem:[#allocation34_spill] sm:$0xff] %v9432_v36  ;;  %v9434_v30 = vpop.f32.mrf.mxu3  ;;  %v1878_v50 = vpop.f32.mrf.mxu1  ;;  %v2816_v10 = vadd.f32 %v2815_v46, %v9432_v36  ;;  %v2946_v60 = vmul.f32 %v9432_v36, %v9432_v36 }
 0x1a4   :  { %v1879_v47 = vadd.f32 %v1878_v50, %v1830_v32  ;;  %2024 = vmatmul.bf16.vlgmr.msrb.gmra.mxu0 %v12865_v12 }
 0x1a5   :  { %v2817_v7 = vrot.slane %v2816_v10, 4  ;;  %v2964_v25 = vadd.f32 %v2963_v14, %v2946_v60  ;;  %2122 = vmatmul.bf16.vlgmr.msrb.gmra.mxu2 %v12867_v43 }
 0x1a6   :  { %6892 = vmatmul.msk.bf16.vlgmr.msrb.gmra.mxu1 %vm1403_vm0, %v12866_v45 }
 0x1a7   :  { %v2818_v28 = vadd.f32 %v2817_v7, %v2816_v10  ;;  %v2965_v29 = vrot.slane %v2964_v25, 4  ;;  %v7717_v10 = vld [vmem:[%s12607_s1 + $0x4f4] sm:$0xf0]  ;;  %v6478_v7 = vld [vmem:[%s12607_s1 + $0x2e8] sm:$0xf] }
 0x1a8   :  { %2171 = vmatmul.bf16.vlgmr.msrb.gmra.mxu3 %v8285_v51  ;;  %v1927_v8 = vpop.f32.mrf.mxu2 }
 0x1a9   :  { %v2819_v42 = vrot.slane %v2818_v28, 2  ;;  %v2966_v46 = vadd.f32 %v2965_v29, %v2964_v25  ;;  %v1928_v5 = vadd.f32 %v1927_v8, %v1879_v47  ;;  %v1831_v36 = vpop.f32.mrf.mxu0  ;;  %v7749_v8 = vld [vmem:[%s12607_s1 + $0x5f4] sm:$0xf0] }
 0x1aa   :  { %v1832_v50 = vadd.f32 %v1831_v36, %v9201_v53  ;;  %v6735_v36 = vor.u32 %v7717_v10, %v6734_v9  ;;  %v7685_v9 = vld [vmem:[%s12607_s1 + $0x3f4] sm:$0xf0] }
 0x1ab   :  { %v1976_v13 = vpop.f32.mrf.mxu3  ;;  %v1880_v32 = vpop.f32.mrf.mxu1  ;;  %v2820_v11 = vadd.f32 %v2819_v42, %v2818_v28  ;;  %v2967_v14 = vrot.slane %v2966_v46, 2  ;;  %v6862_v28 = vld [vmem:[%s12607_s1 + $0x5e8] sm:$0xf]  ;;  %v7713_v10 = vld [vmem:[%s12607_s1 + $0x4d4] sm:$0xf0] }
 0x1ac   :  { %v9446_v60 = vadd.f32 %v1976_v13, %v1928_v5  ;;  %v1881_v47 = vadd.f32 %v1880_v32, %v1832_v50  ;;  %v7653_v13 = vld [vmem:[%s12607_s1 + $0x2f4] sm:$0xf0]  ;;  %v6606_v42 = vld [vmem:[%s12607_s1 + $0x3e8] sm:$0xf]  ;;  %2310 = vmatpush.bf16.msra.mxu2 %v6735_v36  ;;  %v6863_v50 = vor.u32 %v7749_v8, %v6862_v28 }
 0x1ad   :  { %v2821_v25 = vrot.slane %v2820_v11, 1  ;;  %v2968_v53 = vadd.f32 %v2967_v14, %v2966_v46  ;;  %v6479_v29 = vor.u32 %v7653_v13, %v6478_v7  ;;  %v6607_v32 = vor.u32 %v7685_v9, %v6606_v42  ;;  %v6718_v14 = vld [vmem:[%s12607_s1 + $0x4c8] sm:$0xf]  ;;  %v7745_v9 = vld [vmem:[%s12607_s1 + $0x5d4] sm:$0xf0] }
 0x1ae   :  { %v6719_v13 = vor.u32 %v7713_v10, %v6718_v14  ;;  %2359 = vmatpush.bf16.msra.mxu3 %v6863_v50  ;;  %v6590_v14 = vld [vmem:[%s12607_s1 + $0x3c8] sm:$0xf] }
 0x1af   :  { %v2822_v46 = vadd.f32 %v2821_v25, %v2820_v11  ;;  %v2969_v5 = vrot.slane %v2968_v53, 1  ;;  %2212 = vmatpush.bf16.msra.mxu0 %v6479_v29  ;;  %v7649_v11 = vld [vmem:[%s12607_s1 + $0x2d4] sm:$0xf0]  ;;  %v6846_v25 = vld [vmem:[%s12607_s1 + $0x5c8] sm:$0xf]  ;;  %2261 = vmatpush.bf16.msra.mxu1 %v6607_v32 }
 0x1b0   :  { %v1929_v7 = vpop.f32.mrf.mxu2  ;;  %v6463_v49 = vor.u32 %v7649_v11, %v6462_v61  ;;  %2311 = vmatpush.bf16.msra.mxu2 %v6719_v13  ;;  %v7645_v11 = vld [vmem:[%s12607_s1 + $0x2b4] sm:$0xf0] }
 0x1b1   :  { %v2970_v36 = vadd.f32 %v2969_v5, %v2968_v53  ;;  %v9487_v28 = vmul.f32 0.0078125, %v2822_v46  ;;  %v1930_v29 = vadd.f32 %v1929_v7, %v1881_v47  ;;  %v1834_v42 = vpop.f32.mrf.mxu0  ;;  %v6847_v53 = vor.u32 %v7745_v9, %v6846_v25  ;;  %v7681_v46 = vld [vmem:[%s12607_s1 + $0x3d4] sm:$0xf0]  ;;  %v6702_v47 = vld [vmem:[%s12607_s1 + $0x4a8] sm:$0xf] }
 0x1b2   :  { %v1835_v10 = vadd.f32 %v1834_v42, %v9228_v0  ;;  %v7709_v5 = vld [vmem:[%s12607_s1 + $0x4b4] sm:$0xf0]  ;;  %v6591_v32 = vor.u32 %v7681_v46, %v6590_v14  ;;  %v6446_v7 = vld [vmem:[%s12607_s1 + $0x2a8] sm:$0xf]  ;;  %v12869_v42 = vld [vmem:[#allocation39_spill] sm:$0xff] }
 0x1b3   :  { %12868 = vst [vmem:[#allocation55_spill] sm:$0xff] %v9487_v28  ;;  %v1978_v8 = vpop.f32.mrf.mxu3  ;;  %v1883_v62 = vpop.f32.mrf.mxu1  ;;  %v9505_v50 = vmul.f32 0.0078125, %v2970_v36  ;;  %v9509_v0 = vmul.f32 %v9487_v28, %v9487_v28  ;;  %v6703_v36 = vor.u32 %v7709_v5, %v6702_v47  ;;  %v6830_v9 = vld [vmem:[%s12607_s1 + $0x5a8] sm:$0xf]  ;;  %v7741_v13 = vld [vmem:[%s12607_s1 + $0x5b4] sm:$0xf0]  ;;  %2213 = vmatpush.bf16.msra.mxu0 %v6463_v49  ;;  %v6447_v46 = vor.u32 %v7645_v11, %v6446_v7 }
 0x1b4   :  { %v9511_v61 = vadd.f32 %v1978_v8, %v1930_v29  ;;  %v1884_v25 = vadd.f32 %v1883_v62, %v1835_v10  ;;  %2029 = vmatmul.bf16.gmra.mxu0 %v12869_v42  ;;  %v6574_v29 = vld [vmem:[%s12607_s1 + $0x3a8] sm:$0xf]  ;;  %v12870_v14 = vld [vmem:[#allocation40_spill] sm:$0xff]  ;;  %2360 = vmatpush.bf16.msra.mxu3 %v6847_v53  ;;  %v6831_v8 = vor.u32 %v7741_v13, %v6830_v9 }
 0x1b5   :  { %v12871_v62 = vld [vmem:[#allocation14_spill] sm:$0xff]  ;;  %v7677_v10 = vld [vmem:[%s12607_s1 + $0x3b4] sm:$0xf0]  ;;  %2262 = vmatpush.bf16.msra.mxu1 %v6591_v32  ;;  %2312 = vmatpush.bf16.msra.mxu2 %v6703_v36 }
 0x1b6   :  { %6893 = vmatmul.msk.bf16.gmra.mxu1 %vm1403_vm0, %v12870_v14  ;;  %2127 = vmatmul.bf16.gmra.mxu2 %v12871_v62  ;;  %v6686_v47 = vld [vmem:[%s12607_s1 + $0x488] sm:$0xf]  ;;  %v7705_v5 = vld [vmem:[%s12607_s1 + $0x494] sm:$0xf0]  ;;  %v6575_v44 = vor.u32 %v7677_v10, %v6574_v29 }
 0x1b7   :  { %v6430_v28 = vld [vmem:[%s12607_s1 + $0x288] sm:$0xf]  ;;  %v7641_v49 = vld [vmem:[%s12607_s1 + $0x294] sm:$0xf0]  ;;  %v6687_v11 = vor.u32 %v7705_v5, %v6686_v47  ;;  %2214 = vmatpush.bf16.msra.mxu0 %v6447_v46 }
 0x1b8   :  { %2176 = vmatmul.bf16.gmra.mxu3 %v8357_v19  ;;  %v1932_v7 = vpop.f32.mrf.mxu2  ;;  %v6814_v19 = vld [vmem:[%s12607_s1 + $0x588] sm:$0xf]  ;;  %v7737_v53 = vld [vmem:[%s12607_s1 + $0x594] sm:$0xf0]  ;;  %v6431_v62 = vor.u32 %v7641_v49, %v6430_v28 }
 0x1b9   :  { %v1933_v32 = vadd.f32 %v1932_v7, %v1884_v25  ;;  %v1836_v13 = vpop.f32.mrf.mxu0  ;;  %2361 = vmatpush.bf16.msra.mxu3 %v6831_v8  ;;  %2263 = vmatpush.bf16.msra.mxu1 %v6575_v44  ;;  %v6815_v36 = vor.u32 %v7737_v53, %v6814_v19  ;;  %v6558_v47 = vld [vmem:[%s12607_s1 + $0x388] sm:$0xf]  ;;  %v7673_v25 = vld [vmem:[%s12607_s1 + $0x394] sm:$0xf0] }
 0x1ba   :  { %v1837_v29 = vadd.f32 %v1836_v13, %v9233_v48  ;;  %2313 = vmatpush.bf16.msra.mxu2 %v6687_v11  ;;  %v6559_v7 = vor.u32 %v7673_v25, %v6558_v47  ;;  %v12874_v11 = vld [vmem:[#allocation17_spill] sm:$0xff] }
 0x1bb   :  { %v1981_v9 = vpop.f32.mrf.mxu3  ;;  %v1885_v10 = vpop.f32.mrf.mxu1  ;;  %2215 = vmatpush.bf16.msra.mxu0 %v6431_v62  ;;  %v6670_v62 = vld [vmem:[%s12607_s1 + $0x468] sm:$0xf] }
 0x1bc   :  { %v9557_v14 = vadd.f32 %v1981_v9, %v1933_v32  ;;  %v1886_v5 = vadd.f32 %v1885_v10, %v1837_v29  ;;  %v12872_v32 = vld [vmem:[#allocation42_spill] sm:$0xff]  ;;  %v12873_v9 = vld [vmem:[#allocation43_spill] sm:$0xff]  ;;  %v7637_v10 = vld [vmem:[%s12607_s1 + $0x274] sm:$0xf0] }
 0x1bd   :  { %2362 = vmatpush.bf16.msra.mxu3 %v6815_v36  ;;  %2264 = vmatpush.bf16.msra.mxu1 %v6559_v7  ;;  %v6414_v29 = vld [vmem:[%s12607_s1 + $0x268] sm:$0xf] }
 0x1be   :  { %v6798_v36 = vld [vmem:[%s12607_s1 + $0x568] sm:$0xf]  ;;  %v6415_v25 = vor.u32 %v7637_v10, %v6414_v29 }
 0x1c0   :  { %v1934_v48 = vpop.f32.mrf.mxu2  ;;  %2216 = vmatpush.bf16.msra.mxu0 %v6415_v25 }
 0x1c1   :  { %v1935_v28 = vadd.f32 %v1934_v48, %v1886_v5  ;;  %v1839_v8 = vpop.f32.mrf.mxu0  ;;  %v7733_v5 = vld [vmem:[%s12607_s1 + $0x574] sm:$0xf0] }
 0x1c2   :  { %v1840_v19 = vadd.f32 %v1839_v8, %v9260_v15  ;;  %v7701_v15 = vld [vmem:[%s12607_s1 + $0x474] sm:$0xf0] }
 0x1c3   :  { %v1983_v46 = vpop.f32.mrf.mxu3  ;;  %v1888_v44 = vpop.f32.mrf.mxu1  ;;  %v6671_v13 = vor.u32 %v7701_v15, %v6670_v62  ;;  %v6542_v62 = vld [vmem:[%s12607_s1 + $0x368] sm:$0xf]  ;;  %v7669_v15 = vld [vmem:[%s12607_s1 + $0x374] sm:$0xf0] }
 0x1c4   :  { %v9566_v49 = vadd.f32 %v1983_v46, %v1935_v28  ;;  %v1889_v53 = vadd.f32 %v1888_v44, %v1840_v19  ;;  %2034 = vmatmul.bf16.gmra.mxu0 %v12872_v32  ;;  %v6799_v46 = vor.u32 %v7733_v5, %v6798_v36  ;;  %v6543_v29 = vor.u32 %v7669_v15, %v6542_v62  ;;  %v7633_v15 = vld [vmem:[%s12607_s1 + $0x254] sm:$0xf0] }
 0x1c5   :  { %2314 = vmatpush.bf16.msra.mxu2 %v6671_v13 }
 0x1c6   :  { %6894 = vmatmul.msk.bf16.gmra.mxu1 %vm1403_vm0, %v12873_v9  ;;  %2132 = vmatmul.bf16.gmra.mxu2 %v12874_v11 }
 0x1c7   :  { %2363 = vmatpush.bf16.msra.mxu3 %v6799_v46  ;;  %2265 = vmatpush.bf16.msra.mxu1 %v6543_v29  ;;  %v12877_v46 = vld [vmem:[#allocation20_spill] sm:$0xff] }
 0x1c8   :  { %2181 = vmatmul.bf16.gmra.mxu3 %v8411_v40  ;;  %v1937_v47 = vpop.f32.mrf.mxu2  ;;  %v7729_v29 = vld [vmem:[%s12607_s1 + $0x554] sm:$0xf0]  ;;  %v12888_v40 = vld [vmem:[#allocation57_spill] sm:$0xff] }
 0x1c9   :  { %v1938_v7 = vadd.f32 %v1937_v47, %v1889_v53  ;;  %v1841_v28 = vpop.f32.mrf.mxu0 }
 0x1ca   :  { %v1842_v8 = vadd.f32 %v1841_v28, %v9265_v63  ;;  %v12876_v28 = vld [vmem:[#allocation46_spill] sm:$0xff] }
 0x1cb   :  { %v1986_v48 = vpop.f32.mrf.mxu3  ;;  %v1890_v19 = vpop.f32.mrf.mxu1 }
 0x1cc   :  { %v9592_v44 = vadd.f32 %v1986_v48, %v1938_v7  ;;  %v1891_v53 = vadd.f32 %v1890_v19, %v1842_v8  ;;  %v12875_v48 = vld [vmem:[#allocation45_spill] sm:$0xff]  ;;  %v6654_v8 = vld [vmem:[%s12607_s1 + $0x448] sm:$0xf] }
 0x1cd   :  { %v6398_v19 = vld [vmem:[%s12607_s1 + $0x248] sm:$0xf] }
 0x1d0   :  { %v1939_v13 = vpop.f32.mrf.mxu2 }
 0x1d1   :  { %v1940_v10 = vadd.f32 %v1939_v13, %v1891_v53  ;;  %v1844_v63 = vpop.f32.mrf.mxu0  ;;  %v6782_v53 = vld [vmem:[%s12607_s1 + $0x548] sm:$0xf] }
 0x1d2   :  { %v1845_v47 = vadd.f32 %v1844_v63, %v9292_v24  ;;  %v7697_v24 = vld [vmem:[%s12607_s1 + $0x454] sm:$0xf0] }
 0x1d3   :  { %v1988_v36 = vpop.f32.mrf.mxu3  ;;  %v1893_v25 = vpop.f32.mrf.mxu1  ;;  %v6655_v62 = vor.u32 %v7697_v24, %v6654_v8 }
 0x1d4   :  { %v9601_v5 = vadd.f32 %v1988_v36, %v1940_v10  ;;  %v1894_v7 = vadd.f32 %v1893_v25, %v1845_v47  ;;  %2039 = vmatmul.bf16.gmra.mxu0 %v12875_v48  ;;  %v6399_v10 = vor.u32 %v7633_v15, %v6398_v19  ;;  %v6783_v36 = vor.u32 %v7729_v29, %v6782_v53  ;;  %v7665_v19 = vld [vmem:[%s12607_s1 + $0x354] sm:$0xf0] }
 0x1d5   :  { %2315 = vmatpush.bf16.msra.mxu2 %v6655_v62 }
 0x1d6   :  { %6895 = vmatmul.msk.bf16.gmra.mxu1 %vm1403_vm0, %v12876_v28  ;;  %2137 = vmatmul.bf16.gmra.mxu2 %v12877_v46  ;;  %v6526_v46 = vld [vmem:[%s12607_s1 + $0x348] sm:$0xf]  ;;  %v12880_v28 = vld [vmem:[#allocation23_spill] sm:$0xff] }
 0x1d7   :  { %2217 = vmatpush.bf16.msra.mxu0 %v6399_v10  ;;  %2364 = vmatpush.bf16.msra.mxu3 %v6783_v36 }
 0x1d8   :  { %2186 = vmatmul.bf16.gmra.mxu3 %v8465_v1  ;;  %v1942_v13 = vpop.f32.mrf.mxu2 }
 0x1d9   :  { %v1943_v63 = vadd.f32 %v1942_v13, %v1894_v7  ;;  %v1846_v25 = vpop.f32.mrf.mxu0  ;;  %v6527_v7 = vor.u32 %v7665_v19, %v6526_v46  ;;  %v6638_v46 = vld [vmem:[%s12607_s1 + $0x428] sm:$0xf]  ;;  %v7629_v19 = vld [vmem:[%s12607_s1 + $0x234] sm:$0xf0] }
 0x1da   :  { %v1847_v8 = vadd.f32 %v1846_v25, %v9297_v37  ;;  %v12879_v25 = vld [vmem:[#allocation49_spill] sm:$0xff] }
 0x1db   :  { %v1991_v47 = vpop.f32.mrf.mxu3  ;;  %v1895_v24 = vpop.f32.mrf.mxu1  ;;  %2266 = vmatpush.bf16.msra.mxu1 %v6527_v7  ;;  %v7725_v7 = vld [vmem:[%s12607_s1 + $0x534] sm:$0xf0] }
 0x1dc   :  { %v9627_v1 = vadd.f32 %v1991_v47, %v1943_v63  ;;  %v1896_v15 = vadd.f32 %v1895_v24, %v1847_v8  ;;  %v12878_v47 = vld [vmem:[#allocation48_spill] sm:$0xff]  ;;  %v6382_v8 = vld [vmem:[%s12607_s1 + $0x228] sm:$0xf] }
 0x1e0   :  { %v1944_v53 = vpop.f32.mrf.mxu2 }
 0x1e1   :  { %v1945_v62 = vadd.f32 %v1944_v53, %v1896_v15  ;;  %v1849_v37 = vpop.f32.mrf.mxu0  ;;  %v6766_v15 = vld [vmem:[%s12607_s1 + $0x528] sm:$0xf] }
 0x1e2   :  { %v1850_v13 = vadd.f32 %v1849_v37, %v9324_v4  ;;  %v7693_v4 = vld [vmem:[%s12607_s1 + $0x434] sm:$0xf0] }
 0x1e3   :  { %v1993_v29 = vpop.f32.mrf.mxu3  ;;  %v1898_v10 = vpop.f32.mrf.mxu1  ;;  %v6639_v24 = vor.u32 %v7693_v4, %v6638_v46 }
 0x1e4   :  { %v9636_v36 = vadd.f32 %v1993_v29, %v1945_v62  ;;  %v1899_v63 = vadd.f32 %v1898_v10, %v1850_v13  ;;  %2044 = vmatmul.bf16.gmra.mxu0 %v12878_v47  ;;  %v6383_v62 = vor.u32 %v7629_v19, %v6382_v8  ;;  %v6767_v29 = vor.u32 %v7725_v7, %v6766_v15  ;;  %v7661_v8 = vld [vmem:[%s12607_s1 + $0x334] sm:$0xf0] }
 0x1e5   :  { %2316 = vmatpush.bf16.msra.mxu2 %v6639_v24 }
 0x1e6   :  { %6896 = vmatmul.msk.bf16.gmra.mxu1 %vm1403_vm0, %v12879_v25  ;;  %2142 = vmatmul.bf16.gmra.mxu2 %v12880_v28  ;;  %v6510_v28 = vld [vmem:[%s12607_s1 + $0x328] sm:$0xf] }
 0x1e7   :  { %2218 = vmatpush.bf16.msra.mxu0 %v6383_v62  ;;  %2365 = vmatpush.bf16.msra.mxu3 %v6767_v29  ;;  %v12883_v25 = vld [vmem:[#allocation26_spill] sm:$0xff] }
 0x1e8   :  { %2191 = vmatmul.bf16.gmra.mxu3 %v8519_v26  ;;  %v1947_v53 = vpop.f32.mrf.mxu2 }
 0x1e9   :  { %v1948_v37 = vadd.f32 %v1947_v53, %v1899_v63  ;;  %v1851_v10 = vpop.f32.mrf.mxu0  ;;  %v6511_v63 = vor.u32 %v7661_v8, %v6510_v28  ;;  %v6622_v28 = vld [vmem:[%s12607_s1 + $0x408] sm:$0xf]  ;;  %v7625_v8 = vld [vmem:[%s12607_s1 + $0x214] sm:$0xf0] }
 0x1ea   :  { %v1852_v46 = vadd.f32 %v1851_v10, %v9329_v31  ;;  %v12882_v10 = vld [vmem:[#allocation52_spill] sm:$0xff] }
 0x1eb   :  { %v1996_v13 = vpop.f32.mrf.mxu3  ;;  %v1900_v4 = vpop.f32.mrf.mxu1  ;;  %2267 = vmatpush.bf16.msra.mxu1 %v6511_v63  ;;  %v7721_v63 = vld [vmem:[%s12607_s1 + $0x514] sm:$0xf0] }
 0x1ec   :  { %v9662_v26 = vadd.f32 %v1996_v13, %v1948_v37  ;;  %v1901_v19 = vadd.f32 %v1900_v4, %v1852_v46  ;;  %v12881_v13 = vld [vmem:[#allocation51_spill] sm:$0xff]  ;;  %v6366_v46 = vld [vmem:[%s12607_s1 + $0x208] sm:$0xf] }
 0x1f0   :  { %v1949_v15 = vpop.f32.mrf.mxu2 }
 0x1f1   :  { %v1950_v24 = vadd.f32 %v1949_v15, %v1901_v19  ;;  %v1854_v31 = vpop.f32.mrf.mxu0  ;;  %v6750_v19 = vld [vmem:[%s12607_s1 + $0x508] sm:$0xf] }
 0x1f2   :  { %v1855_v53 = vadd.f32 %v1854_v31, %v9370_v38  ;;  %v7689_v38 = vld [vmem:[%s12607_s1 + $0x414] sm:$0xf0] }
 0x1f3   :  { %v1998_v7 = vpop.f32.mrf.mxu3  ;;  %v1903_v62 = vpop.f32.mrf.mxu1  ;;  %v6623_v4 = vor.u32 %v7689_v38, %v6622_v28 }
 0x1f4   :  { %v9671_v29 = vadd.f32 %v1998_v7, %v1950_v24  ;;  %v1904_v37 = vadd.f32 %v1903_v62, %v1855_v53  ;;  %2049 = vmatmul.bf16.gmra.mxu0 %v12881_v13  ;;  %v6367_v24 = vor.u32 %v7625_v8, %v6366_v46  ;;  %v6751_v7 = vor.u32 %v7721_v63, %v6750_v19  ;;  %v7657_v46 = vld [vmem:[%s12607_s1 + $0x314] sm:$0xf0] }
 0x1f5   :  { %2317 = vmatpush.bf16.msra.mxu2 %v6623_v4 }
 0x1f6   :  { %6897 = vmatmul.msk.bf16.gmra.mxu1 %vm1403_vm0, %v12882_v10  ;;  %2147 = vmatmul.bf16.gmra.mxu2 %v12883_v25  ;;  %v6494_v25 = vld [vmem:[%s12607_s1 + $0x308] sm:$0xf]  ;;  %v12886_v10 = vld [vmem:[#allocation29_spill] sm:$0xff] }
 0x1f7   :  { %2219 = vmatpush.bf16.msra.mxu0 %v6367_v24  ;;  %2366 = vmatpush.bf16.msra.mxu3 %v6751_v7 }
 0x1f8   :  { %2196 = vmatmul.bf16.gmra.mxu3 %v8573_v54  ;;  %v1952_v15 = vpop.f32.mrf.mxu2 }
 0x1f9   :  { %v1953_v31 = vadd.f32 %v1952_v15, %v1904_v37  ;;  %v1856_v62 = vpop.f32.mrf.mxu0  ;;  %v6495_v37 = vor.u32 %v7657_v46, %v6494_v25  ;;  %v7619_v25 = vld [vmem:[%s12607_s1 + $0x1ec] sm:$0xf]  ;;  %v7753_v46 = vld [vmem:[%s12607_s1 + $0x614] sm:$0xf0] }
 0x1fa   :  { %v1857_v28 = vadd.f32 %v1856_v62, %v9387_v57  ;;  %v12885_v62 = vld [vmem:[#allocation54_spill] sm:$0xff] }
 0x1fb   :  { %v2001_v53 = vpop.f32.mrf.mxu3  ;;  %v1905_v38 = vpop.f32.mrf.mxu1  ;;  %2268 = vmatpush.bf16.msra.mxu1 %v6495_v37  ;;  %v6480_v37 = vld [vmem:[%s12607_s1 + $0x2f8] sm:$0xf0] }
 0x1fc   :  { %v9697_v54 = vadd.f32 %v2001_v53, %v1953_v31  ;;  %v1906_v8 = vadd.f32 %v1905_v38, %v1857_v28  ;;  %v12884_v53 = vld [vmem:[#allocation53_spill] sm:$0xff]  ;;  %v6878_v28 = vld [vmem:[%s12607_s1 + $0x608] sm:$0xf] }
 0x200   :  { %v1954_v19 = vpop.f32.mrf.mxu2 }
 0x201   :  { %v1955_v4 = vadd.f32 %v1954_v19, %v1906_v8  ;;  %v1859_v57 = vpop.f32.mrf.mxu0  ;;  %v7651_v8 = vld [vmem:[%s12607_s1 + $0x2ec] sm:$0xf] }
 0x202   :  { %v1860_v15 = vadd.f32 %v1859_v57, %v9406_v35  ;;  %v6352_v35 = vld [vmem:[%s12607_s1 + $0x1f8] sm:$0xf0] }
 0x203   :  { %v2003_v63 = vpop.f32.mrf.mxu3  ;;  %v1908_v24 = vpop.f32.mrf.mxu1  ;;  %v6355_v38 = vor.u32 %v7619_v25, %v6352_v35 }
 0x204   :  { %v9706_v7 = vadd.f32 %v2003_v63, %v1955_v4  ;;  %v1909_v31 = vadd.f32 %v1908_v24, %v1860_v15  ;;  %2054 = vmatmul.bf16.gmra.mxu0 %v12884_v53  ;;  %v6879_v4 = vor.u32 %v7753_v46, %v6878_v28  ;;  %v6483_v63 = vor.u32 %v7651_v8, %v6480_v37 }
 0x205   :  { %2506 = vmatpush.bf16.msrb.mxu2 %v6355_v38 }
 0x206   :  { %6898 = vmatmul.msk.bf16.gmra.mxu1 %vm1403_vm0, %v12885_v62  ;;  %2152 = vmatmul.bf16.gmra.mxu2 %v12886_v10  ;;  %v6224_v10 = vld [vmem:[%s12607_s1 + $0xf8] sm:$0xf0] }
 0x207   :  { %2415 = vmatpush.bf16.msrb.mxu0 %v6879_v4  ;;  %2555 = vmatpush.bf16.msrb.mxu3 %v6483_v63 }
 0x208   :  { %2201 = vmatmul.bf16.gmra.mxu3 %v8627_v16  ;;  %v1957_v19 = vpop.f32.mrf.mxu2  ;;  %v7587_v16 = vld [vmem:[%s12607_s1 + $0xec] sm:$0xf] }
 0x209   :  { %v1958_v57 = vadd.f32 %v1957_v19, %v1909_v31  ;;  %v1861_v24 = vpop.f32.mrf.mxu0  ;;  %v6227_v28 = vor.u32 %v7587_v16, %v6224_v10  ;;  %v7615_v10 = vld [vmem:[%s12607_s1 + $0x1cc] sm:$0xf] }
 0x20a   :  { %v1862_v25 = vadd.f32 %v1861_v24, %v9414_v59  ;;  %v12887_v24 = vld [vmem:[#allocation56_spill] sm:$0xff] }
 0x20b   :  { %v2006_v15 = vpop.f32.mrf.mxu3  ;;  %v1910_v35 = vpop.f32.mrf.mxu1  ;;  %2457 = vmatpush.bf16.msrb.mxu1 %v6227_v28 }
 0x20c   :  { %v9738_v62 = vadd.f32 %v2006_v15, %v1958_v57  ;;  %v1911_v31 = vadd.f32 %v1910_v35, %v1862_v25  ;;  %v12889_v57 = vld [vmem:[#allocation31_spill] sm:$0xff]  ;;  %v7647_v15 = vld [vmem:[%s12607_s1 + $0x2cc] sm:$0xf] }
 0x210   :  { %v1959_v46 = vpop.f32.mrf.mxu2 }
 0x211   :  { %v1960_v38 = vadd.f32 %v1959_v46, %v1911_v31  ;;  %v1864_v59 = vpop.f32.mrf.mxu0  ;;  %v6464_v46 = vld [vmem:[%s12607_s1 + $0x2d8] sm:$0xf0] }
 0x212   :  { %v1865_v37 = vadd.f32 %v1864_v59, %v9426_v18  ;;  %v6336_v18 = vld [vmem:[%s12607_s1 + $0x1d8] sm:$0xf0]  ;;  %v6467_v59 = vor.u32 %v7647_v15, %v6464_v46 }
 0x213   :  { %v2008_v8 = vpop.f32.mrf.mxu3  ;;  %v1913_v19 = vpop.f32.mrf.mxu1  ;;  %v6339_v31 = vor.u32 %v7615_v10, %v6336_v18 }
 0x214   :  { %v9741_v4 = vadd.f32 %v2008_v8, %v1960_v38  ;;  %v1914_v63 = vadd.f32 %v1913_v19, %v1865_v37  ;;  %2059 = vmatmul.bf16.gmra.mxu0 %v12887_v24  ;;  %v7583_v37 = vld [vmem:[%s12607_s1 + $0xcc] sm:$0xf]  ;;  %v6208_v19 = vld [vmem:[%s12607_s1 + $0xd8] sm:$0xf0]  ;;  %2556 = vmatpush.bf16.msrb.mxu3 %v6467_v59 }
 0x215   :  { %2507 = vmatpush.bf16.msrb.mxu2 %v6339_v31  ;;  %v6448_v59 = vld [vmem:[%s12607_s1 + $0x2b8] sm:$0xf0] }
 0x216   :  { %6899 = vmatmul.msk.bf16.gmra.mxu1 %vm1403_vm0, %v12888_v40  ;;  %2157 = vmatmul.bf16.gmra.mxu2 %v12889_v57 }
 0x218   :  { %2206 = vmatmul.bf16.gmra.mxu3 %v12859_v6  ;;  %v1962_v16 = vpop.f32.mrf.mxu2 }
 0x219   :  { %v1963_v25 = vadd.f32 %v1962_v16, %v1914_v63  ;;  %v1866_v28 = vpop.f32.mrf.mxu0  ;;  %v6211_v16 = vor.u32 %v7583_v37, %v6208_v19 }
 0x21a   :  { %v1867_v38 = vadd.f32 %v1866_v28, %v9434_v30 }
 0x21b   :  { %v2011_v35 = vpop.f32.mrf.mxu3  ;;  %v1915_v8 = vpop.f32.mrf.mxu1  ;;  %2458 = vmatpush.bf16.msrb.mxu1 %v6211_v16 }
 0x21c   :  { %v9767_v63 = vadd.f32 %v2011_v35, %v1963_v25  ;;  %v1916_v10 = vadd.f32 %v1915_v8, %v1867_v38  ;;  %v7611_v35 = vld [vmem:[%s12607_s1 + $0x1ac] sm:$0xf] }
 0x220   :  { %v1964_v18 = vpop.f32.mrf.mxu2 }
 0x221   :  { %v1965_v6 = vadd.f32 %v1964_v18, %v1916_v10  ;;  %v2025_v28 = vpop.f32.mrf.mxu0  ;;  %v7579_v18 = vld [vmem:[%s12607_s1 + $0xac] sm:$0xf] }
 0x222   :  { %v2026_v15 = vadd.f32 %v2025_v28, %v9446_v60  ;;  %v7643_v60 = vld [vmem:[%s12607_s1 + $0x2ac] sm:$0xf] }
 0x223   :  { %v2013_v30 = vpop.f32.mrf.mxu3  ;;  %v2074_v46 = vpop.f32.mrf.mxu1  ;;  %v6451_v10 = vor.u32 %v7643_v60, %v6448_v59  ;;  %v7639_v59 = vld [vmem:[%s12607_s1 + $0x28c] sm:$0xf] }
 0x224   :  { %v9770_v57 = vadd.f32 %v2013_v30, %v1965_v6  ;;  %v9772_v40 = vadd.f32 %v2074_v46, %v2026_v15  ;;  %2220 = vmatmul.bf16.vlgmr.msra.gmra.mxu0 %v8287_v52  ;;  %v6320_v6 = vld [vmem:[%s12607_s1 + $0x1b8] sm:$0xf0] }
 0x225   :  { %v6323_v8 = vor.u32 %v7611_v35, %v6320_v6  ;;  %v6192_v30 = vld [vmem:[%s12607_s1 + $0xb8] sm:$0xf0]  ;;  %2557 = vmatpush.bf16.msrb.mxu3 %v6451_v10 }
 0x226   :  { %12890 = vst [vmem:[#allocation37_spill] sm:$0xff] %v9772_v40  ;;  %2269 = vmatmul.bf16.vlgmr.msra.gmra.mxu1 %v8295_v55  ;;  %2318 = vmatmul.bf16.vlgmr.msra.gmra.mxu2 %v8739_v33  ;;  %v6195_v28 = vor.u32 %v7579_v18, %v6192_v30  ;;  %v6432_v18 = vld [vmem:[%s12607_s1 + $0x298] sm:$0xf0] }
 0x227   :  { %2508 = vmatpush.bf16.msrb.mxu2 %v6323_v8  ;;  %v7607_v8 = vld [vmem:[%s12607_s1 + $0x18c] sm:$0xf] }
 0x228   :  { %2367 = vmatmul.bf16.vlgmr.msra.gmra.mxu3 %v12865_v12  ;;  %v2123_v25 = vpop.f32.mrf.mxu2  ;;  %2459 = vmatpush.bf16.msrb.mxu1 %v6195_v28 }
 0x229   :  { %v2027_v38 = vpop.f32.mrf.mxu0 }
 0x22a   :  { %v2028_v19 = vadd.f32 %v2027_v38, %v9511_v61 }
 0x22b   :  { %v2172_v31 = vpop.f32.mrf.mxu3  ;;  %v2076_v16 = vpop.f32.mrf.mxu1 }
 0x22c   :  { %v9790_v37 = vadd.f32 %v2172_v31, %v2123_v25  ;;  %v9799_v15 = vadd.f32 %v2076_v16, %v2028_v19 }
 0x22e   :  { %12891 = vst [vmem:[#allocation13_spill] sm:$0xff] %v9799_v15 }
 0x230   :  { %v2125_v46 = vpop.f32.mrf.mxu2 }
 0x231   :  { %v2030_v35 = vpop.f32.mrf.mxu0 }
 0x232   :  { %v2031_v6 = vadd.f32 %v2030_v35, %v9557_v14  ;;  %v6304_v14 = vld [vmem:[%s12607_s1 + $0x198] sm:$0xf0]  ;;  %v7575_v35 = vld [vmem:[%s12607_s1 + $0x8c] sm:$0xf] }
 0x233   :  { %v2174_v25 = vpop.f32.mrf.mxu3  ;;  %v2079_v60 = vpop.f32.mrf.mxu1  ;;  %v6307_v10 = vor.u32 %v7607_v8, %v6304_v14 }
 0x234   :  { %v9801_v61 = vadd.f32 %v2174_v25, %v2125_v46  ;;  %v9804_v31 = vadd.f32 %v2079_v60, %v2031_v6  ;;  %2225 = vmatmul.bf16.gmra.mxu0 %v8359_v20  ;;  %v6435_v25 = vor.u32 %v7639_v59, %v6432_v18  ;;  %v6176_v6 = vld [vmem:[%s12607_s1 + $0x98] sm:$0xf0] }
 0x235   :  { %2509 = vmatpush.bf16.msrb.mxu2 %v6307_v10  ;;  %v6179_v60 = vor.u32 %v7575_v35, %v6176_v6  ;;  %v12894_v10 = vld [vmem:[#allocation41_spill] sm:$0xff] }
 0x236   :  { %12892 = vst [vmem:[#allocation43_spill] sm:$0xff] %v9804_v31  ;;  %2274 = vmatmul.bf16.gmra.mxu1 %v8361_v21  ;;  %2323 = vmatmul.bf16.gmra.mxu2 %v8794_v34  ;;  %v12896_v34 = vld [vmem:[#allocation22_spill] sm:$0xff]  ;;  %v12900_v21 = vld [vmem:[#allocation25_spill] sm:$0xff] }
 0x237   :  { %2558 = vmatpush.bf16.msrb.mxu3 %v6435_v25  ;;  %2460 = vmatpush.bf16.msrb.mxu1 %v6179_v60  ;;  %v7635_v25 = vld [vmem:[%s12607_s1 + $0x26c] sm:$0xf] }
 0x238   :  { %2372 = vmatmul.bf16.gmra.mxu3 %v12869_v42  ;;  %v12893_v42 = vld [vmem:[#allocation19_spill] sm:$0xff] }
 0x239   :  { %v2128_v38 = vpop.f32.mrf.mxu2  ;;  %v2032_v16 = vpop.f32.mrf.mxu0 }
 0x23a   :  { %v2033_v28 = vadd.f32 %v2032_v16, %v9566_v49 }
 0x23b   :  { %v2177_v19 = vpop.f32.mrf.mxu3  ;;  %v2081_v46 = vpop.f32.mrf.mxu1 }
 0x23c   :  { %v9822_v30 = vadd.f32 %v2177_v19, %v2128_v38  ;;  %v9831_v8 = vadd.f32 %v2081_v46, %v2033_v28  ;;  %v7603_v46 = vld [vmem:[%s12607_s1 + $0x16c] sm:$0xf] }
 0x241   :  { %v2130_v38 = vpop.f32.mrf.mxu2  ;;  %v2035_v19 = vpop.f32.mrf.mxu0 }
 0x242   :  { %v2036_v59 = vadd.f32 %v2035_v19, %v9592_v44  ;;  %v6288_v44 = vld [vmem:[%s12607_s1 + $0x178] sm:$0xf0] }
 0x243   :  { %v2179_v14 = vpop.f32.mrf.mxu3  ;;  %v2084_v16 = vpop.f32.mrf.mxu1  ;;  %v6291_v60 = vor.u32 %v7603_v46, %v6288_v44 }
 0x244   :  { %v9833_v49 = vadd.f32 %v2179_v14, %v2130_v38  ;;  %v9836_v18 = vadd.f32 %v2084_v16, %v2036_v59  ;;  %2230 = vmatmul.bf16.gmra.mxu0 %v8413_v41  ;;  %v6416_v38 = vld [vmem:[%s12607_s1 + $0x278] sm:$0xf0] }
 0x245   :  { %v6419_v16 = vor.u32 %v7635_v25, %v6416_v38  ;;  %2510 = vmatpush.bf16.msrb.mxu2 %v6291_v60  ;;  %v12897_v60 = vld [vmem:[#allocation44_spill] sm:$0xff] }
 0x246   :  { %2279 = vmatmul.bf16.gmra.mxu1 %v12893_v42  ;;  %2328 = vmatmul.bf16.gmra.mxu2 %v12894_v10  ;;  %v6160_v10 = vld [vmem:[%s12607_s1 + $0x78] sm:$0xf0] }
 0x247   :  { %2559 = vmatpush.bf16.msrb.mxu3 %v6419_v16 }
 0x248   :  { %2377 = vmatmul.bf16.gmra.mxu3 %v12872_v32  ;;  %v7571_v32 = vld [vmem:[%s12607_s1 + $0x6c] sm:$0xf] }
 0x249   :  { %v2133_v28 = vpop.f32.mrf.mxu2  ;;  %v2037_v6 = vpop.f32.mrf.mxu0  ;;  %v6163_v46 = vor.u32 %v7571_v32, %v6160_v10  ;;  %v7599_v10 = vld [vmem:[%s12607_s1 + $0x14c] sm:$0xf] }
 0x24a   :  { %v2038_v19 = vadd.f32 %v2037_v6, %v9601_v5 }
 0x24b   :  { %v2182_v35 = vpop.f32.mrf.mxu3  ;;  %v2086_v59 = vpop.f32.mrf.mxu1  ;;  %2461 = vmatpush.bf16.msrb.mxu1 %v6163_v46  ;;  %v6400_v46 = vld [vmem:[%s12607_s1 + $0x258] sm:$0xf0] }
 0x24c   :  { %v9854_v14 = vadd.f32 %v2182_v35, %v2133_v28  ;;  %v9863_v44 = vadd.f32 %v2086_v59, %v2038_v19 }
 0x251   :  { %v2135_v28 = vpop.f32.mrf.mxu2  ;;  %v2040_v42 = vpop.f32.mrf.mxu0 }
 0x252   :  { %v2041_v25 = vadd.f32 %v2040_v42, %v9627_v1  ;;  %v6272_v1 = vld [vmem:[%s12607_s1 + $0x158] sm:$0xf0]  ;;  %v7631_v42 = vld [vmem:[%s12607_s1 + $0x24c] sm:$0xf] }
 0x253   :  { %v2184_v35 = vpop.f32.mrf.mxu3  ;;  %v2089_v6 = vpop.f32.mrf.mxu1  ;;  %v6275_v16 = vor.u32 %v7599_v10, %v6272_v1 }
 0x254   :  { %v9865_v5 = vadd.f32 %v2184_v35, %v2135_v28  ;;  %v9868_v38 = vadd.f32 %v2089_v6, %v2041_v25  ;;  %2235 = vmatmul.bf16.gmra.mxu0 %v8467_v2  ;;  %v6403_v6 = vor.u32 %v7631_v42, %v6400_v46 }
 0x255   :  { %2511 = vmatpush.bf16.msrb.mxu2 %v6275_v16  ;;  %v12901_v16 = vld [vmem:[#allocation47_spill] sm:$0xff] }
 0x256   :  { %12895 = vst [vmem:[#allocation17_spill] sm:$0xff] %v9868_v38  ;;  %2284 = vmatmul.bf16.gmra.mxu1 %v12896_v34  ;;  %2333 = vmatmul.bf16.gmra.mxu2 %v12897_v60  ;;  %v6144_v60 = vld [vmem:[%s12607_s1 + $0x58] sm:$0xf0] }
 0x257   :  { %2560 = vmatpush.bf16.msrb.mxu3 %v6403_v6 }
 0x258   :  { %2382 = vmatmul.bf16.gmra.mxu3 %v12875_v48  ;;  %v7567_v48 = vld [vmem:[%s12607_s1 + $0x4c] sm:$0xf] }
 0x259   :  { %v2138_v32 = vpop.f32.mrf.mxu2  ;;  %v2042_v59 = vpop.f32.mrf.mxu0  ;;  %v6147_v10 = vor.u32 %v7567_v48, %v6144_v60  ;;  %v7595_v60 = vld [vmem:[%s12607_s1 + $0x12c] sm:$0xf] }
 0x25a   :  { %v2043_v35 = vadd.f32 %v2042_v59, %v9636_v36 }
 0x25b   :  { %v2187_v19 = vpop.f32.mrf.mxu3  ;;  %v2091_v25 = vpop.f32.mrf.mxu1  ;;  %2462 = vmatpush.bf16.msrb.mxu1 %v6147_v10  ;;  %v6384_v10 = vld [vmem:[%s12607_s1 + $0x238] sm:$0xf0] }
 0x25c   :  { %v9886_v28 = vadd.f32 %v2187_v19, %v2138_v32  ;;  %v9895_v1 = vadd.f32 %v2091_v25, %v2043_v35 }
 0x25e   :  { %12898 = vst [vmem:[#allocation53_spill] sm:$0xff] %v9895_v1 }
 0x261   :  { %v2140_v32 = vpop.f32.mrf.mxu2  ;;  %v2045_v34 = vpop.f32.mrf.mxu0 }
 0x262   :  { %v2046_v42 = vadd.f32 %v2045_v34, %v9662_v26  ;;  %v6256_v26 = vld [vmem:[%s12607_s1 + $0x138] sm:$0xf0]  ;;  %v7627_v34 = vld [vmem:[%s12607_s1 + $0x22c] sm:$0xf] }
 0x263   :  { %v2189_v19 = vpop.f32.mrf.mxu3  ;;  %v2094_v59 = vpop.f32.mrf.mxu1  ;;  %v6259_v6 = vor.u32 %v7595_v60, %v6256_v26 }
 0x264   :  { %v9897_v36 = vadd.f32 %v2189_v19, %v2140_v32  ;;  %v9900_v46 = vadd.f32 %v2094_v59, %v2046_v42  ;;  %2240 = vmatmul.bf16.gmra.mxu0 %v8521_v27  ;;  %v6387_v59 = vor.u32 %v7627_v34, %v6384_v10  ;;  %v2891_v10 = vmul.f32 %v9799_v15, %v9799_v15 }
 0x265   :  { %2512 = vmatpush.bf16.msrb.mxu2 %v6259_v6  ;;  %v12904_v6 = vld [vmem:[#allocation28_spill] sm:$0xff] }
 0x266   :  { %12899 = vst [vmem:[#allocation56_spill] sm:$0xff] %v9900_v46  ;;  %2289 = vmatmul.bf16.gmra.mxu1 %v12900_v21  ;;  %2338 = vmatmul.bf16.gmra.mxu2 %v12901_v16  ;;  %v6128_v16 = vld [vmem:[%s12607_s1 + $0x38] sm:$0xf0] }
 0x267   :  { %2561 = vmatpush.bf16.msrb.mxu3 %v6387_v59 }
 0x268   :  { %2387 = vmatmul.bf16.gmra.mxu3 %v12878_v47  ;;  %v7563_v47 = vld [vmem:[%s12607_s1 + $0x2c] sm:$0xf] }
 0x269   :  { %v2143_v48 = vpop.f32.mrf.mxu2  ;;  %v2047_v25 = vpop.f32.mrf.mxu0  ;;  %v6131_v60 = vor.u32 %v7563_v47, %v6128_v16  ;;  %v2887_v47 = vmul.f32 %v9772_v40, %v9772_v40  ;;  %v2895_v16 = vmul.f32 %v9804_v31, %v9804_v31 }
 0x26a   :  { %v2048_v19 = vadd.f32 %v2047_v25, %v9671_v29 }
 0x26b   :  { %v2192_v35 = vpop.f32.mrf.mxu3  ;;  %v2096_v42 = vpop.f32.mrf.mxu1  ;;  %2463 = vmatpush.bf16.msrb.mxu1 %v6131_v60 }
 0x26c   :  { %v9918_v32 = vadd.f32 %v2192_v35, %v2143_v48  ;;  %v9927_v26 = vadd.f32 %v2096_v42, %v2048_v19  ;;  %v12905_v19 = vld [vmem:[#allocation50_spill] sm:$0xff]  ;;  %v2899_v42 = vmul.f32 %v9831_v8, %v9831_v8 }
 0x26e   :  { %12902 = vst [vmem:[#allocation72_spill] sm:$0xff] %v9927_v26 }
 0x271   :  { %v2145_v48 = vpop.f32.mrf.mxu2  ;;  %v2050_v21 = vpop.f32.mrf.mxu0 }
 0x272   :  { %v2051_v34 = vadd.f32 %v2050_v21, %v9697_v54  ;;  %v2823_v21 = vadd.f32 %v9799_v15, %v9772_v40  ;;  %v2971_v54 = vadd.f32 %v2891_v10, %v2887_v47  ;;  %v2903_v10 = vmul.f32 %v9836_v18, %v9836_v18 }
 0x273   :  { %v2194_v35 = vpop.f32.mrf.mxu3  ;;  %v2099_v25 = vpop.f32.mrf.mxu1 }
 0x274   :  { %v9929_v29 = vadd.f32 %v2194_v35, %v2145_v48  ;;  %v9934_v12 = vadd.f32 %v2099_v25, %v2051_v34  ;;  %2245 = vmatmul.bf16.gmra.mxu0 %v8575_v56  ;;  %v2824_v59 = vadd.f32 %v2823_v21, %v9804_v31  ;;  %v7591_v48 = vld [vmem:[%s12607_s1 + $0x10c] sm:$0xf]  ;;  %v6240_v35 = vld [vmem:[%s12607_s1 + $0x118] sm:$0xf0]  ;;  %v2972_v25 = vadd.f32 %v2971_v54, %v2895_v16 }
 0x275   :  { %v7623_v34 = vld [vmem:[%s12607_s1 + $0x20c] sm:$0xf]  ;;  %v6243_v21 = vor.u32 %v7591_v48, %v6240_v35  ;;  %v6368_v31 = vld [vmem:[%s12607_s1 + $0x218] sm:$0xf0]  ;;  %v2907_v35 = vmul.f32 %v9863_v44, %v9863_v44 }
 0x276   :  { %12903 = vst [vmem:[#allocation73_spill] sm:$0xff] %v9934_v12  ;;  %2294 = vmatmul.bf16.gmra.mxu1 %v12904_v6  ;;  %2343 = vmatmul.bf16.gmra.mxu2 %v12905_v19  ;;  %v2825_v40 = vadd.f32 %v2824_v59, %v9831_v8  ;;  %v6371_v33 = vor.u32 %v7623_v34, %v6368_v31  ;;  %v7559_v16 = vld [vmem:[%s12607_s1 + $0xc] sm:$0xf]  ;;  %v6112_v54 = vld [vmem:[%s12607_s1 + $0x18] sm:$0xf0] }
 0x277   :  { %v2973_v48 = vadd.f32 %v2972_v25, %v2899_v42  ;;  %2513 = vmatpush.bf16.msrb.mxu2 %v6243_v21  ;;  %v6115_v59 = vor.u32 %v7559_v16, %v6112_v54  ;;  %v2915_v42 = vmul.f32 %v9895_v1, %v9895_v1 }
 0x278   :  { %2392 = vmatmul.bf16.gmra.mxu3 %v12881_v13 }
 0x279   :  { %v2148_v60 = vpop.f32.mrf.mxu2  ;;  %v2052_v15 = vpop.f32.mrf.mxu0  ;;  %2562 = vmatpush.bf16.msrb.mxu3 %v6371_v33  ;;  %2464 = vmatpush.bf16.msrb.mxu1 %v6115_v59  ;;  %v2923_v59 = vmul.f32 %v9927_v26, %v9927_v26 }
 0x27a   :  { %v2053_v19 = vadd.f32 %v2052_v15, %v9706_v7  ;;  %v2974_v7 = vadd.f32 %v2973_v48, %v2903_v10  ;;  %v2911_v15 = vmul.f32 %v9868_v38, %v9868_v38 }
 0x27b   :  { %v2197_v47 = vpop.f32.mrf.mxu3  ;;  %v2101_v6 = vpop.f32.mrf.mxu1 }
 0x27c   :  { %v9964_v13 = vadd.f32 %v2197_v47, %v2148_v60  ;;  %v2826_v60 = vadd.f32 %v2825_v40, %v9836_v18  ;;  %v9976_v47 = vadd.f32 %v2101_v6, %v2053_v19  ;;  %v2975_v34 = vadd.f32 %v2974_v7, %v2907_v35 }
 0x27d   :  { %v2919_v40 = vmul.f32 %v9900_v46, %v9900_v46 }
 0x27e   :  { %12906 = vst [vmem:[#allocation74_spill] sm:$0xff] %v9976_v47  ;;  %v2827_v31 = vadd.f32 %v2826_v60, %v9863_v44  ;;  %v2976_v16 = vadd.f32 %v2975_v34, %v2911_v15 }
 0x280   :  { %v2828_v25 = vadd.f32 %v2827_v31, %v9868_v38  ;;  %v2977_v35 = vadd.f32 %v2976_v16, %v2915_v42  ;;  %v2927_v31 = vmul.f32 %v9934_v12, %v9934_v12 }
 0x281   :  { %v2150_v21 = vpop.f32.mrf.mxu2  ;;  %v2055_v33 = vpop.f32.mrf.mxu0 }
 0x282   :  { %v2829_v19 = vadd.f32 %v2828_v25, %v9895_v1  ;;  %v2056_v54 = vadd.f32 %v2055_v33, %v9738_v62  ;;  %v2978_v15 = vadd.f32 %v2977_v35, %v2919_v40  ;;  %v2931_v25 = vmul.f32 %v9976_v47, %v9976_v47 }
 0x283   :  { %v2199_v6 = vpop.f32.mrf.mxu3  ;;  %v2104_v48 = vpop.f32.mrf.mxu1 }
 0x284   :  { %v9987_v10 = vadd.f32 %v2199_v6, %v2150_v21  ;;  %v2830_v60 = vadd.f32 %v2829_v19, %v9900_v46  ;;  %v9993_v7 = vadd.f32 %v2104_v48, %v2056_v54  ;;  %2250 = vmatmul.bf16.gmra.mxu0 %v8629_v17  ;;  %v2979_v34 = vadd.f32 %v2978_v15, %v2923_v59 }
 0x286   :  { %12907 = vst [vmem:[#allocation75_spill] sm:$0xff] %v9993_v7  ;;  %2299 = vmatmul.bf16.gmra.mxu1 %v8631_v22  ;;  %2348 = vmatmul.bf16.gmra.mxu2 %v9079_v58  ;;  %v2831_v62 = vadd.f32 %v2830_v60, %v9927_v26  ;;  %v2980_v16 = vadd.f32 %v2979_v34, %v2927_v31 }
 0x287   :  { %v2935_v19 = vmul.f32 %v9993_v7, %v9993_v7 }
 0x288   :  { %2397 = vmatmul.bf16.gmra.mxu3 %v12884_v53  ;;  %v2832_v42 = vadd.f32 %v2831_v62, %v9934_v12  ;;  %v2981_v59 = vadd.f32 %v2980_v16, %v2931_v25 }
 0x289   :  { %v2153_v21 = vpop.f32.mrf.mxu2  ;;  %v2057_v6 = vpop.f32.mrf.mxu0 }
 0x28a   :  { %v2833_v33 = vadd.f32 %v2832_v42, %v9976_v47  ;;  %v2058_v48 = vadd.f32 %v2057_v6, %v9741_v4  ;;  %v2982_v62 = vadd.f32 %v2981_v59, %v2935_v19 }
 0x28b   :  { %v2202_v40 = vpop.f32.mrf.mxu3  ;;  %v2106_v35 = vpop.f32.mrf.mxu1 }
 0x28c   :  { %v10008_v54 = vadd.f32 %v2202_v40, %v2153_v21  ;;  %v2834_v60 = vadd.f32 %v2833_v33, %v9993_v7  ;;  %v10012_v15 = vadd.f32 %v2106_v35, %v2058_v48 }
 0x28e   :  { %12908 = vst [vmem:[#allocation76_spill] sm:$0xff] %v10012_v15  ;;  %v2835_v31 = vadd.f32 %v2834_v60, %v10012_v15  ;;  %v2939_v34 = vmul.f32 %v10012_v15, %v10012_v15 }
 0x290   :  { %v2983_v42 = vadd.f32 %v2982_v62, %v2939_v34 }
 0x291   :  { %v2155_v47 = vpop.f32.mrf.mxu2  ;;  %v2060_v26 = vpop.f32.mrf.mxu0 }
 0x292   :  { %v2061_v4 = vadd.f32 %v2060_v26, %v9767_v63 }
 0x293   :  { %v2204_v12 = vpop.f32.mrf.mxu3  ;;  %v2109_v40 = vpop.f32.mrf.mxu1 }
 0x294   :  { %v10017_v21 = vadd.f32 %v2204_v12, %v2155_v47  ;;  %v10020_v25 = vadd.f32 %v2109_v40, %v2061_v4  ;;  %2255 = vmatmul.bf16.gmra.mxu0 %v12860_v39 }
 0x296   :  { %12909 = vst [vmem:[#allocation77_spill] sm:$0xff] %v10020_v25  ;;  %2304 = vmatmul.bf16.gmra.mxu1 %v12861_v3  ;;  %2353 = vmatmul.bf16.gmra.mxu2 %v12862_v23  ;;  %v2836_v16 = vadd.f32 %v2835_v31, %v10020_v25  ;;  %v2943_v6 = vmul.f32 %v10020_v25, %v10020_v25 }
 0x298   :  { %2402 = vmatmul.bf16.gmra.mxu3 %v12887_v24  ;;  %v2984_v12 = vadd.f32 %v2983_v42, %v2943_v6 }
 0x299   :  { %v2158_v47 = vpop.f32.mrf.mxu2  ;;  %v2062_v63 = vpop.f32.mrf.mxu0 }
 0x29a   :  { %v2063_v19 = vadd.f32 %v2062_v63, %v9770_v57 }
 0x29b   :  { %v2207_v33 = vpop.f32.mrf.mxu3  ;;  %v2111_v48 = vpop.f32.mrf.mxu1 }
 0x29c   :  { %v10029_v26 = vadd.f32 %v2207_v33, %v2158_v47  ;;  %v10032_v35 = vadd.f32 %v2111_v48, %v2063_v19  ;;  %v12911_v33 = vsub.f32 %v9505_v50, %v9509_v0  ;;  %v7747_v50 = vld [vmem:[%s12607_s1 + $0x5ec] sm:$0xf]  ;;  %v6864_v0 = vld [vmem:[%s12607_s1 + $0x5f8] sm:$0xf0] }
 0x29e   :  { %12910 = vst [vmem:[#allocation78_spill] sm:$0xff] %v10032_v35  ;;  %v2837_v59 = vadd.f32 %v2836_v16, %v10032_v35  ;;  %v2947_v60 = vmul.f32 %v10032_v35, %v10032_v35  ;;  %v3050_v63 = vmax.f32 %v12911_v33, 0.0  ;;  %v6880_v33 = vld [vmem:[%s12607_s1 + $0x618] sm:$0xf0] }
 0x29f   :  { %v12912_v35 = vld [vmem:[#allocation40_spill] sm:$0xff] }
 0x2a0   :  { %v2838_v62 = vrot.slane %v2837_v59, 4  ;;  %v2985_v31 = vadd.f32 %v2984_v12, %v2947_v60 }
 0x2a1   :  { %v2160_v34 = vpop.f32.mrf.mxu2  ;;  %v2221_v42 = vpop.f32.mrf.mxu0 }
 0x2a2   :  { %v2839_v40 = vadd.f32 %v2838_v62, %v2837_v59  ;;  %v2986_v6 = vrot.slane %v2985_v31, 4  ;;  %v2222_v47 = vadd.f32 %v2221_v42, %v9790_v37  ;;  %v10048_v37 = vadd.f32 1e-05, %v3050_v63  ;;  %v7715_v63 = vld [vmem:[%s12607_s1 + $0x4ec] sm:$0xf] }
 0x2a3   :  { %v2209_v4 = vpop.f32.mrf.mxu3  ;;  %v2270_v57 = vpop.f32.mrf.mxu1 }
 0x2a4   :  { %v10037_v25 = vadd.f32 %v2209_v4, %v2160_v34  ;;  %v2840_v16 = vrot.slane %v2839_v40, 2  ;;  %v2987_v19 = vadd.f32 %v2986_v6, %v2985_v31  ;;  %v2271_v48 = vadd.f32 %v2270_v57, %v2222_v47  ;;  %6900 = vmatmul.msk.bf16.vlgmr.msrb.gmra.mxu0 %vm1403_vm0, %v12866_v45  ;;  %v7751_v34 = vld [vmem:[%s12607_s1 + $0x60c] sm:$0xf] }
 0x2a5   :  { %7916 = vrsqrt.f32 %v10048_v37  ;;  %vm3064_vm5 = vweird.f32 %v10048_v37 }
 0x2a6   :  { %2465 = vmatmul.bf16.vlgmr.msrb.gmra.mxu1 %v12867_v43  ;;  %2514 = vmatmul.bf16.vlgmr.msrb.gmra.mxu2 %v8285_v51  ;;  %v2841_v12 = vadd.f32 %v2840_v16, %v2839_v40  ;;  %v2988_v59 = vrot.slane %v2987_v19, 2  ;;  %v6867_v43 = vor.u32 %v7747_v50, %v6864_v0  ;;  %v7683_v51 = vld [vmem:[%s12607_s1 + $0x3ec] sm:$0xf]  ;;  %v6848_v50 = vld [vmem:[%s12607_s1 + $0x5d8] sm:$0xf0] }
 0x2a8   :  { %2563 = vmatmul.bf16.vlgmr.msrb.gmra.mxu3 %v8287_v52  ;;  %v2842_v60 = vrot.slane %v2841_v12, 1  ;;  %v2989_v62 = vadd.f32 %v2988_v59, %v2987_v19  ;;  %v6608_v52 = vld [vmem:[%s12607_s1 + $0x3f8] sm:$0xf0]  ;;  %2702 = vmatpush.bf16.msra.mxu2 %v6867_v43 }
 0x2a9   :  { %v2319_v31 = vpop.f32.mrf.mxu2  ;;  %v2223_v40 = vpop.f32.mrf.mxu0  ;;  %v6611_v57 = vor.u32 %v7683_v51, %v6608_v52  ;;  %v7679_v51 = vld [vmem:[%s12607_s1 + $0x3cc] sm:$0xf]  ;;  %v6592_v52 = vld [vmem:[%s12607_s1 + $0x3d8] sm:$0xf0] }
 0x2aa   :  { %v2320_v4 = vadd.f32 %v2319_v31, %v2271_v48  ;;  %v2843_v6 = vadd.f32 %v2842_v60, %v2841_v12  ;;  %v2990_v47 = vrot.slane %v2989_v62, 1  ;;  %v2224_v16 = vadd.f32 %v2223_v40, %v9801_v61  ;;  %v6736_v12 = vld [vmem:[%s12607_s1 + $0x4f8] sm:$0xf0]  ;;  %v7743_v60 = vld [vmem:[%s12607_s1 + $0x5cc] sm:$0xf] }
 0x2ab   :  { %v2368_v42 = vpop.f32.mrf.mxu3  ;;  %v2272_v19 = vpop.f32.mrf.mxu1  ;;  %v6883_v48 = vor.u32 %v7751_v34, %v6880_v33  ;;  %2604 = vmatpush.bf16.msra.mxu0 %v6611_v57  ;;  %v6739_v31 = vor.u32 %v7715_v63, %v6736_v12  ;;  %v6851_v34 = vor.u32 %v7743_v60, %v6848_v50  ;;  %v7739_v40 = vld [vmem:[%s12607_s1 + $0x5ac] sm:$0xf]  ;;  %v6832_v33 = vld [vmem:[%s12607_s1 + $0x5b8] sm:$0xf0] }
 0x2ac   :  { %v10073_v59 = vadd.f32 %v2368_v42, %v2320_v4  ;;  %v2991_v61 = vadd.f32 %v2990_v47, %v2989_v62  ;;  %v10084_v0 = vmul.f32 0.0078125, %v2843_v6  ;;  %v2273_v43 = vadd.f32 %v2272_v19, %v2224_v16  ;;  %v7711_v62 = vld [vmem:[%s12607_s1 + $0x4cc] sm:$0xf]  ;;  %v6720_v42 = vld [vmem:[%s12607_s1 + $0x4d8] sm:$0xf0] }
 0x2ad   :  { %2758 = vmatpush.bf16.msra.mxu3 %v6883_v48  ;;  %v6595_v4 = vor.u32 %v7679_v51, %v6592_v52  ;;  %2653 = vmatpush.bf16.msra.mxu1 %v6739_v31  ;;  %v6723_v57 = vor.u32 %v7711_v62, %v6720_v42  ;;  %v6835_v63 = vor.u32 %v7739_v40, %v6832_v33  ;;  %v7675_v16 = vld [vmem:[%s12607_s1 + $0x3ac] sm:$0xf]  ;;  %v6576_v19 = vld [vmem:[%s12607_s1 + $0x3b8] sm:$0xf0] }
 0x2ae   :  { %v3039_v6 = vmul.f32 0.0078125, %v2991_v61  ;;  %v3043_v47 = vmul.f32 %v10084_v0, %v10084_v0  ;;  %2703 = vmatpush.bf16.msra.mxu2 %v6851_v34  ;;  %v7707_v60 = vld [vmem:[%s12607_s1 + $0x4ac] sm:$0xf]  ;;  %v6704_v50 = vld [vmem:[%s12607_s1 + $0x4b8] sm:$0xf0]  ;;  %v10118_v61 = vpop.eup %7916  ;;  %v6579_v40 = vor.u32 %v7675_v16, %v6576_v19 }
 0x2af   :  { %2605 = vmatpush.bf16.msra.mxu0 %v6595_v4  ;;  %v6560_v19 = vld [vmem:[%s12607_s1 + $0x398] sm:$0xf0]  ;;  %vm3065_vm3 = vweird.f32 %v10118_v61 }
 0x2b0   :  { %v3047_v48 = vsub.f32 %v3039_v6, %v3043_v47  ;;  %v6707_v6 = vor.u32 %v7707_v60, %v6704_v50  ;;  %vm3066_vm7 = vmor %vm3064_vm5, %vm3065_vm3 }
 0x2b1   :  { %v2321_v12 = vpop.f32.mrf.mxu2  ;;  %v2226_v52 = vpop.f32.mrf.mxu0  ;;  %2654 = vmatpush.bf16.msra.mxu1 %v6723_v57  ;;  %v6816_v57 = vld [vmem:[%s12607_s1 + $0x598] sm:$0xf0] }
 0x2b2   :  { %v2322_v31 = vadd.f32 %v2321_v12, %v2273_v43  ;;  %v3051_v34 = vmax.f32 %v3047_v48, 0.0  ;;  %v2227_v62 = vadd.f32 %v2226_v52, %v9822_v30  ;;  %2704 = vmatpush.bf16.msra.mxu2 %v6835_v63  ;;  %v3059_v43 = vmul.f32 %v10118_v61, %v10048_v37  ;;  %v12913_v12 = vld [vmem:[#allocation14_spill] sm:$0xff]  ;;  %v12914_v48 = vld [vmem:[#allocation15_spill] sm:$0xff] }
 0x2b3   :  { %v2370_v51 = vpop.f32.mrf.mxu3  ;;  %v2275_v42 = vpop.f32.mrf.mxu1  ;;  %2606 = vmatpush.bf16.msra.mxu0 %v6579_v40  ;;  %v7735_v30 = vld [vmem:[%s12607_s1 + $0x58c] sm:$0xf] }
 0x2b4   :  { %v10121_v4 = vadd.f32 %v2370_v51, %v2322_v31  ;;  %v3055_v47 = vadd.f32 1e-05, %v3051_v34  ;;  %v2276_v33 = vadd.f32 %v2275_v42, %v2227_v62  ;;  %6901 = vmatmul.msk.bf16.gmra.mxu0 %vm1403_vm0, %v12912_v35  ;;  %v7671_v63 = vld [vmem:[%s12607_s1 + $0x38c] sm:$0xf]  ;;  %v6819_v16 = vor.u32 %v7735_v30, %v6816_v57 }
 0x2b5   :  { %2655 = vmatpush.bf16.msra.mxu1 %v6707_v6  ;;  %v6563_v60 = vor.u32 %v7671_v63, %v6560_v19  ;;  %v3060_v50 = vmul.f32 %v10118_v61, %v3059_v43  ;;  %v7703_v40 = vld [vmem:[%s12607_s1 + $0x48c] sm:$0xf]  ;;  %v6688_v6 = vld [vmem:[%s12607_s1 + $0x498] sm:$0xf0] }
 0x2b6   :  { %2470 = vmatmul.bf16.gmra.mxu1 %v12913_v12  ;;  %2519 = vmatmul.bf16.gmra.mxu2 %v12914_v48  ;;  %7918 = vrsqrt.f32 %v3055_v47  ;;  %vm3074_vm2 = vweird.f32 %v3055_v47 }
 0x2b7   :  { %2705 = vmatpush.bf16.msra.mxu2 %v6819_v16  ;;  %2607 = vmatpush.bf16.msra.mxu0 %v6563_v60  ;;  %v3061_v48 = vmul.f32 0.5, %v3060_v50 }
 0x2b8   :  { %2568 = vmatmul.bf16.gmra.mxu3 %v8359_v20 }
 0x2b9   :  { %v2324_v20 = vpop.f32.mrf.mxu2  ;;  %v2228_v52 = vpop.f32.mrf.mxu0  ;;  %v3062_v63 = vsub.f32 1.5, %v3061_v48 }
 0x2ba   :  { %v2325_v31 = vadd.f32 %v2324_v20, %v2276_v33  ;;  %v2229_v34 = vadd.f32 %v2228_v52, %v9833_v49  ;;  %v6691_v33 = vor.u32 %v7703_v40, %v6688_v6  ;;  %v12915_v40 = vld [vmem:[#allocation18_spill] sm:$0xff] }
 0x2bb   :  { %v2373_v51 = vpop.f32.mrf.mxu3  ;;  %v2277_v62 = vpop.f32.mrf.mxu1  ;;  %v3063_v50 = vmul.f32 %v10118_v61, %v3062_v63  ;;  %v7667_v6 = vld [vmem:[%s12607_s1 + $0x36c] sm:$0xf] }
 0x2bc   :  { %v10144_v42 = vadd.f32 %v2373_v51, %v2325_v31  ;;  %v7919_v12 = vpop.eup %7918  ;;  %v2278_v43 = vadd.f32 %v2277_v62, %v2229_v34  ;;  %2656 = vmatpush.bf16.msra.mxu1 %v6691_v33 }
 0x2bd   :  { %v3069_v30 = vmul.f32 %v7919_v12, %v3055_v47  ;;  %vm3075_vm1 = vweird.f32 %v7919_v12  ;;  %v6800_v47 = vld [vmem:[%s12607_s1 + $0x578] sm:$0xf0] }
 0x2be   :  { %vm3076_vm4 = vmor %vm3074_vm2, %vm3075_vm1 }
 0x2bf   :  { %v3070_v57 = vmul.f32 %v7919_v12, %v3069_v30 }
 0x2c1   :  { %v2326_v49 = vpop.f32.mrf.mxu2  ;;  %v3071_v16 = vmul.f32 0.5, %v3070_v57  ;;  %v2231_v60 = vpop.f32.mrf.mxu0  ;;  %v3067_v57 = vsel %vm3066_vm7, %v10118_v61, %v3063_v50  ;;  %v6672_v61 = vld [vmem:[%s12607_s1 + $0x478] sm:$0xf0] }
 0x2c2   :  { %v2327_v19 = vadd.f32 %v2326_v49, %v2278_v43  ;;  %v2232_v31 = vadd.f32 %v2231_v60, %v9854_v14  ;;  %v7731_v14 = vld [vmem:[%s12607_s1 + $0x56c] sm:$0xf] }
 0x2c3   :  { %v2375_v20 = vpop.f32.mrf.mxu3  ;;  %v2280_v51 = vpop.f32.mrf.mxu1  ;;  %v3072_v52 = vsub.f32 1.5, %v3071_v16  ;;  %v7699_v60 = vld [vmem:[%s12607_s1 + $0x46c] sm:$0xf] }
 0x2c4   :  { %v10153_v15 = vadd.f32 %v2375_v20, %v2327_v19  ;;  %v2281_v34 = vadd.f32 %v2280_v51, %v2232_v31  ;;  %6902 = vmatmul.msk.bf16.gmra.mxu0 %vm1403_vm0, %v12873_v9  ;;  %v6675_v51 = vor.u32 %v7699_v60, %v6672_v61  ;;  %v7695_v61 = vld [vmem:[%s12607_s1 + $0x44c] sm:$0xf] }
 0x2c5   :  { %v3073_v62 = vmul.f32 %v7919_v12, %v3072_v52 }
 0x2c6   :  { %2475 = vmatmul.bf16.gmra.mxu1 %v12874_v11  ;;  %2524 = vmatmul.bf16.gmra.mxu2 %v12915_v40  ;;  %v6803_v11 = vor.u32 %v7731_v14, %v6800_v47 }
 0x2c7   :  { %v3077_v43 = vsel %vm3076_vm4, %v7919_v12, %v3073_v62  ;;  %2657 = vmatpush.bf16.msra.mxu1 %v6675_v51 }
 0x2c8   :  { %2573 = vmatmul.bf16.gmra.mxu3 %v8413_v41  ;;  %v6544_v41 = vld [vmem:[%s12607_s1 + $0x378] sm:$0xf0]  ;;  %v3102_v33 = vrot.slane %v3077_v43, 7  ;;  %2706 = vmatpush.bf16.msra.mxu2 %v6803_v11  ;;  %v12918_v11 = vld [vmem:[#allocation21_spill] sm:$0xff] }
 0x2c9   :  { %v2329_v48 = vpop.f32.mrf.mxu2  ;;  %v6547_v30 = vor.u32 %v7667_v6, %v6544_v41  ;;  %v2233_v16 = vpop.f32.mrf.mxu0  ;;  %v12916_v6 = vld [vmem:[#allocation46_spill] sm:$0xff]  ;;  %v12917_v43 = vld [vmem:[#allocation20_spill] sm:$0xff] }
 0x2ca   :  { %v2330_v49 = vadd.f32 %v2329_v48, %v2281_v34  ;;  %v2234_v19 = vadd.f32 %v2233_v16, %v9865_v5  ;;  %v10178_v12 = vsel %vm3105_vm6, %v3067_v57, %v3102_v33  ;;  %v7727_v41 = vld [vmem:[%s12607_s1 + $0x54c] sm:$0xf] }
 0x2cb   :  { %v2378_v63 = vpop.f32.mrf.mxu3  ;;  %v2282_v37 = vpop.f32.mrf.mxu1  ;;  %2608 = vmatpush.bf16.msra.mxu0 %v6547_v30  ;;  %v7663_v33 = vld [vmem:[%s12607_s1 + $0x34c] sm:$0xf]  ;;  %v6528_v30 = vld [vmem:[%s12607_s1 + $0x358] sm:$0xf0] }
 0x2cc   :  { %v10180_v20 = vadd.f32 %v2378_v63, %v2330_v49  ;;  %v2283_v31 = vadd.f32 %v2282_v37, %v2234_v19  ;;  %v6531_v49 = vor.u32 %v7663_v33, %v6528_v30  ;;  %v7723_v33 = vld [vmem:[%s12607_s1 + $0x52c] sm:$0xf] }
 0x2cf   :  { %2609 = vmatpush.bf16.msra.mxu0 %v6531_v49 }
 0x2d1   :  { %v2331_v52 = vpop.f32.mrf.mxu2  ;;  %v2236_v50 = vpop.f32.mrf.mxu0 }
 0x2d2   :  { %v2332_v5 = vadd.f32 %v2331_v52, %v2283_v31  ;;  %v2237_v62 = vadd.f32 %v2236_v50, %v9886_v28  ;;  %v6784_v28 = vld [vmem:[%s12607_s1 + $0x558] sm:$0xf0] }
 0x2d3   :  { %v2380_v34 = vpop.f32.mrf.mxu3  ;;  %v2285_v40 = vpop.f32.mrf.mxu1  ;;  %v6787_v48 = vor.u32 %v7727_v41, %v6784_v28  ;;  %v6656_v31 = vld [vmem:[%s12607_s1 + $0x458] sm:$0xf0]  ;;  %v12920_v41 = vld [vmem:[#allocation23_spill] sm:$0xff] }
 0x2d4   :  { %v10189_v14 = vadd.f32 %v2380_v34, %v2332_v5  ;;  %v2286_v47 = vadd.f32 %v2285_v40, %v2237_v62  ;;  %6903 = vmatmul.msk.bf16.gmra.mxu0 %vm1403_vm0, %v12916_v6  ;;  %v6659_v52 = vor.u32 %v7695_v61, %v6656_v31  ;;  %v12921_v28 = vld [vmem:[#allocation24_spill] sm:$0xff]  ;;  %v7691_v31 = vld [vmem:[%s12607_s1 + $0x42c] sm:$0xf] }
 0x2d5   :  { %2707 = vmatpush.bf16.msra.mxu2 %v6787_v48  ;;  %v7659_v48 = vld [vmem:[%s12607_s1 + $0x32c] sm:$0xf] }
 0x2d6   :  { %2480 = vmatmul.bf16.gmra.mxu1 %v12917_v43  ;;  %2529 = vmatmul.bf16.gmra.mxu2 %v12918_v11  ;;  %v12919_v11 = vld [vmem:[#allocation49_spill] sm:$0xff] }
 0x2d7   :  { %2658 = vmatpush.bf16.msra.mxu1 %v6659_v52 }
 0x2d8   :  { %2578 = vmatmul.bf16.gmra.mxu3 %v8467_v2 }
 0x2d9   :  { %v2334_v57 = vpop.f32.mrf.mxu2  ;;  %v2238_v16 = vpop.f32.mrf.mxu0 }
 0x2da   :  { %v2335_v2 = vadd.f32 %v2334_v57, %v2286_v47  ;;  %v2239_v19 = vadd.f32 %v2238_v16, %v9897_v36  ;;  %v6512_v57 = vld [vmem:[%s12607_s1 + $0x338] sm:$0xf0] }
 0x2db   :  { %v2383_v63 = vpop.f32.mrf.mxu3  ;;  %v2287_v37 = vpop.f32.mrf.mxu1 }
 0x2dc   :  { %v10209_v60 = vadd.f32 %v2383_v63, %v2335_v2  ;;  %v2288_v51 = vadd.f32 %v2287_v37, %v2239_v19  ;;  %v6515_v2 = vor.u32 %v7659_v48, %v6512_v57  ;;  %v7719_v48 = vld [vmem:[%s12607_s1 + $0x50c] sm:$0xf] }
 0x2de   :  { %2610 = vmatpush.bf16.msra.mxu0 %v6515_v2 }
 0x2e1   :  { %v2336_v5 = vpop.f32.mrf.mxu2  ;;  %v2241_v62 = vpop.f32.mrf.mxu0 }
 0x2e2   :  { %v2337_v34 = vadd.f32 %v2336_v5, %v2288_v51  ;;  %v2242_v36 = vadd.f32 %v2241_v62, %v9918_v32  ;;  %v6768_v32 = vld [vmem:[%s12607_s1 + $0x538] sm:$0xf0] }
 0x2e3   :  { %v2385_v50 = vpop.f32.mrf.mxu3  ;;  %v2290_v40 = vpop.f32.mrf.mxu1  ;;  %v6771_v30 = vor.u32 %v7723_v33, %v6768_v32  ;;  %v6640_v51 = vld [vmem:[%s12607_s1 + $0x438] sm:$0xf0]  ;;  %v12923_v33 = vld [vmem:[#allocation26_spill] sm:$0xff]  ;;  %v12924_v32 = vld [vmem:[#allocation27_spill] sm:$0xff] }
 0x2e4   :  { %v10218_v47 = vadd.f32 %v2385_v50, %v2337_v34  ;;  %v2291_v43 = vadd.f32 %v2290_v40, %v2242_v36  ;;  %6904 = vmatmul.msk.bf16.gmra.mxu0 %vm1403_vm0, %v12919_v11  ;;  %v6643_v5 = vor.u32 %v7691_v31, %v6640_v51  ;;  %v7687_v51 = vld [vmem:[%s12607_s1 + $0x40c] sm:$0xf] }
 0x2e5   :  { %2708 = vmatpush.bf16.msra.mxu2 %v6771_v30  ;;  %v7655_v30 = vld [vmem:[%s12607_s1 + $0x30c] sm:$0xf] }
 0x2e6   :  { %2485 = vmatmul.bf16.gmra.mxu1 %v12920_v41  ;;  %2534 = vmatmul.bf16.gmra.mxu2 %v12921_v28  ;;  %v12922_v28 = vld [vmem:[#allocation52_spill] sm:$0xff] }
 0x2e7   :  { %2659 = vmatpush.bf16.msra.mxu1 %v6643_v5 }
 0x2e8   :  { %2583 = vmatmul.bf16.gmra.mxu3 %v8521_v27 }
 0x2e9   :  { %v2339_v49 = vpop.f32.mrf.mxu2  ;;  %v2243_v16 = vpop.f32.mrf.mxu0 }
 0x2ea   :  { %v2340_v27 = vadd.f32 %v2339_v49, %v2291_v43  ;;  %v2244_v19 = vadd.f32 %v2243_v16, %v9929_v29  ;;  %v6496_v49 = vld [vmem:[%s12607_s1 + $0x318] sm:$0xf0] }
 0x2eb   :  { %v2388_v63 = vpop.f32.mrf.mxu3  ;;  %v2292_v37 = vpop.f32.mrf.mxu1 }
 0x2ec   :  { %v10238_v61 = vadd.f32 %v2388_v63, %v2340_v27  ;;  %v2293_v52 = vadd.f32 %v2292_v37, %v2244_v19  ;;  %v6499_v27 = vor.u32 %v7655_v30, %v6496_v49 }
 0x2ee   :  { %2611 = vmatpush.bf16.msra.mxu0 %v6499_v27 }
 0x2f1   :  { %v2341_v34 = vpop.f32.mrf.mxu2  ;;  %v2246_v36 = vpop.f32.mrf.mxu0 }
 0x2f2   :  { %v2342_v50 = vadd.f32 %v2341_v34, %v2293_v52  ;;  %v2247_v29 = vadd.f32 %v2246_v36, %v9964_v13  ;;  %v6752_v13 = vld [vmem:[%s12607_s1 + $0x518] sm:$0xf0] }
 0x2f3   :  { %v2390_v62 = vpop.f32.mrf.mxu3  ;;  %v2295_v40 = vpop.f32.mrf.mxu1  ;;  %v6755_v57 = vor.u32 %v7719_v48, %v6752_v13  ;;  %v6624_v52 = vld [vmem:[%s12607_s1 + $0x418] sm:$0xf0]  ;;  %v12926_v48 = vld [vmem:[#allocation29_spill] sm:$0xff]  ;;  %v12927_v13 = vld [vmem:[#allocation30_spill] sm:$0xff] }
 0x2f4   :  { %v10247_v43 = vadd.f32 %v2390_v62, %v2342_v50  ;;  %v2296_v41 = vadd.f32 %v2295_v40, %v2247_v29  ;;  %6905 = vmatmul.msk.bf16.gmra.mxu0 %vm1403_vm0, %v12922_v28  ;;  %v6627_v34 = vor.u32 %v7687_v51, %v6624_v52 }
 0x2f5   :  { %2709 = vmatpush.bf16.msra.mxu2 %v6755_v57 }
 0x2f6   :  { %2490 = vmatmul.bf16.gmra.mxu1 %v12923_v33  ;;  %2539 = vmatmul.bf16.gmra.mxu2 %v12924_v32  ;;  %v12925_v32 = vld [vmem:[#allocation54_spill] sm:$0xff] }
 0x2f7   :  { %2660 = vmatpush.bf16.msra.mxu1 %v6627_v34 }
 0x2f8   :  { %2588 = vmatmul.bf16.gmra.mxu3 %v8575_v56 }
 0x2f9   :  { %v2344_v2 = vpop.f32.mrf.mxu2  ;;  %v2248_v16 = vpop.f32.mrf.mxu0 }
 0x2fa   :  { %v2345_v56 = vadd.f32 %v2344_v2, %v2296_v41  ;;  %v2249_v19 = vadd.f32 %v2248_v16, %v9987_v10 }
 0x2fb   :  { %v2393_v63 = vpop.f32.mrf.mxu3  ;;  %v2297_v37 = vpop.f32.mrf.mxu1 }
 0x2fc   :  { %v10267_v31 = vadd.f32 %v2393_v63, %v2345_v56  ;;  %v2298_v5 = vadd.f32 %v2297_v37, %v2249_v19 }
 0x301   :  { %v2346_v50 = vpop.f32.mrf.mxu2  ;;  %v2251_v29 = vpop.f32.mrf.mxu0 }
 0x302   :  { %v2347_v62 = vadd.f32 %v2346_v50, %v2298_v5  ;;  %v2252_v10 = vadd.f32 %v2251_v29, %v10008_v54  ;;  %v12928_v50 = vld [vmem:[#allocation57_spill] sm:$0xff] }
 0x303   :  { %v2395_v36 = vpop.f32.mrf.mxu3  ;;  %v2300_v40 = vpop.f32.mrf.mxu1 }
 0x304   :  { %v10276_v41 = vadd.f32 %v2395_v36, %v2347_v62  ;;  %v2301_v33 = vadd.f32 %v2300_v40, %v2252_v10  ;;  %6906 = vmatmul.msk.bf16.gmra.mxu0 %vm1403_vm0, %v12925_v32  ;;  %v12929_v62 = vld [vmem:[#allocation31_spill] sm:$0xff] }
 0x306   :  { %2495 = vmatmul.bf16.gmra.mxu1 %v12926_v48  ;;  %2544 = vmatmul.bf16.gmra.mxu2 %v12927_v13 }
 0x308   :  { %2593 = vmatmul.bf16.gmra.mxu3 %v8629_v17 }
 0x309   :  { %v2349_v30 = vpop.f32.mrf.mxu2  ;;  %v2253_v2 = vpop.f32.mrf.mxu0 }
 0x30a   :  { %v2350_v57 = vadd.f32 %v2349_v30, %v2301_v33  ;;  %v2254_v27 = vadd.f32 %v2253_v2, %v10017_v21  ;;  %v12930_v21 = vld [vmem:[#allocation32_spill] sm:$0xff] }
 0x30b   :  { %v2398_v49 = vpop.f32.mrf.mxu3  ;;  %v2302_v54 = vpop.f32.mrf.mxu1 }
 0x30c   :  { %v10284_v56 = vadd.f32 %v2398_v49, %v2350_v57  ;;  %v2303_v63 = vadd.f32 %v2302_v54, %v2254_v27 }
 0x311   :  { %v2351_v16 = vpop.f32.mrf.mxu2  ;;  %v2256_v51 = vpop.f32.mrf.mxu0 }
 0x312   :  { %v2352_v19 = vadd.f32 %v2351_v16, %v2303_v63  ;;  %v2257_v52 = vadd.f32 %v2256_v51, %v10029_v26  ;;  %v12932_v16 = vld [vmem:[#allocation36_spill] sm:$0xff] }
 0x313   :  { %v2400_v37 = vpop.f32.mrf.mxu3  ;;  %v2305_v5 = vpop.f32.mrf.mxu1 }
 0x314   :  { %v10287_v34 = vadd.f32 %v2400_v37, %v2352_v19  ;;  %v2306_v17 = vadd.f32 %v2305_v5, %v2257_v52  ;;  %6907 = vmatmul.msk.bf16.gmra.mxu0 %vm1403_vm0, %v12928_v50 }
 0x316   :  { %2500 = vmatmul.bf16.gmra.mxu1 %v12929_v62  ;;  %2549 = vmatmul.bf16.gmra.mxu2 %v12930_v21 }
 0x318   :  { %2598 = vmatmul.bf16.gmra.mxu3 %v12860_v39  ;;  %v12931_v39 = vld [vmem:[#allocation35_spill] sm:$0xff] }
 0x319   :  { %v2354_v36 = vpop.f32.mrf.mxu2  ;;  %v2258_v40 = vpop.f32.mrf.mxu0 }
 0x31a   :  { %v2355_v29 = vadd.f32 %v2354_v36, %v2306_v17  ;;  %v2259_v33 = vadd.f32 %v2258_v40, %v10037_v25  ;;  %v12934_v40 = vld [vmem:[#allocation38_spill] sm:$0xff] }
 0x31b   :  { %v2403_v10 = vpop.f32.mrf.mxu3  ;;  %v2307_v26 = vpop.f32.mrf.mxu1 }
 0x31c   :  { %v10295_v48 = vadd.f32 %v2403_v10, %v2355_v29  ;;  %v2308_v13 = vadd.f32 %v2307_v26, %v2259_v33  ;;  %v12935_v33 = vld [vmem:[#allocation39_spill] sm:$0xff] }
 0x321   :  { %v2356_v30 = vpop.f32.mrf.mxu2  ;;  %v2417_v2 = vpop.f32.mrf.mxu0 }
 0x322   :  { %v2357_v57 = vadd.f32 %v2356_v30, %v2308_v13  ;;  %v10298_v27 = vadd.f32 %v2417_v2, %v10073_v59 }
 0x323   :  { %v2405_v49 = vpop.f32.mrf.mxu3  ;;  %v2466_v54 = vpop.f32.mrf.mxu1 }
 0x324   :  { %v10300_v63 = vadd.f32 %v2405_v49, %v2357_v57  ;;  %2612 = vmatmul.bf16.vlgmr.msra.gmra.mxu0 %v8295_v55 }
 0x326   :  { %2661 = vmatmul.bf16.vlgmr.msra.gmra.mxu1 %v12931_v39  ;;  %2710 = vmatmul.bf16.vlgmr.msra.gmra.mxu2 %v12932_v16 }
 0x328   :  { %6908 = vmatmul.msk.bf16.vlgmr.msra.gmra.mxu3 %vm1403_vm0, %v12866_v45  ;;  %v12933_v45 = vld [vmem:[#allocation16_spill] sm:$0xff] }
 0x329   :  { %v2515_v25 = vpop.f32.mrf.mxu2  ;;  %v2419_v51 = vpop.f32.mrf.mxu0 }
 0x32a   :  { %v2516_v19 = vadd.f32 %v2515_v25, %v2466_v54  ;;  %v10308_v52 = vadd.f32 %v2419_v51, %v10121_v4  ;;  %v12937_v51 = vld [vmem:[#allocation41_spill] sm:$0xff] }
 0x32b   :  { %v2564_v37 = vpop.f32.mrf.mxu3  ;;  %v2468_v59 = vpop.f32.mrf.mxu1 }
 0x32c   :  { %v10310_v5 = vadd.f32 %v2564_v37, %v2516_v19 }
 0x331   :  { %v2517_v17 = vpop.f32.mrf.mxu2  ;;  %v2422_v21 = vpop.f32.mrf.mxu0 }
 0x332   :  { %v2518_v62 = vadd.f32 %v2517_v17, %v2468_v59  ;;  %v10313_v36 = vadd.f32 %v2422_v21, %v10144_v42  ;;  %v12938_v59 = vld [vmem:[#allocation42_spill] sm:$0xff] }
 0x333   :  { %v2566_v55 = vpop.f32.mrf.mxu3  ;;  %v2471_v29 = vpop.f32.mrf.mxu1 }
 0x334   :  { %v10315_v10 = vadd.f32 %v2566_v55, %v2518_v62  ;;  %2617 = vmatmul.bf16.gmra.mxu0 %v12933_v45 }
 0x336   :  { %2666 = vmatmul.bf16.gmra.mxu1 %v12934_v40  ;;  %2715 = vmatmul.bf16.gmra.mxu2 %v12935_v33 }
 0x338   :  { %6909 = vmatmul.msk.bf16.gmra.mxu3 %vm1403_vm0, %v12912_v35  ;;  %v12936_v35 = vld [vmem:[#allocation19_spill] sm:$0xff] }
 0x339   :  { %v2520_v4 = vpop.f32.mrf.mxu2  ;;  %v2424_v30 = vpop.f32.mrf.mxu0 }
 0x33a   :  { %v2521_v26 = vadd.f32 %v2520_v4, %v2471_v29  ;;  %v10323_v57 = vadd.f32 %v2424_v30, %v10153_v15 }
 0x33b   :  { %v2569_v13 = vpop.f32.mrf.mxu3  ;;  %v2473_v42 = vpop.f32.mrf.mxu1 }
 0x33c   :  { %v10325_v49 = vadd.f32 %v2569_v13, %v2521_v26 }
 0x341   :  { %v2522_v2 = vpop.f32.mrf.mxu2  ;;  %v2427_v16 = vpop.f32.mrf.mxu0 }
 0x342   :  { %v2523_v54 = vadd.f32 %v2522_v2, %v2473_v42  ;;  %v10328_v25 = vadd.f32 %v2427_v16, %v10180_v20  ;;  %v12942_v42 = vld [vmem:[#allocation44_spill] sm:$0xff]  ;;  %v12943_v2 = vld [vmem:[#allocation45_spill] sm:$0xff] }
 0x343   :  { %v2571_v39 = vpop.f32.mrf.mxu3  ;;  %v2476_v19 = vpop.f32.mrf.mxu1 }
 0x344   :  { %v10330_v37 = vadd.f32 %v2571_v39, %v2523_v54  ;;  %2622 = vmatmul.bf16.gmra.mxu0 %v12936_v35 }
 0x346   :  { %2671 = vmatmul.bf16.gmra.mxu1 %v12937_v51  ;;  %2720 = vmatmul.bf16.gmra.mxu2 %v12938_v59 }
 0x348   :  { %6910 = vmatmul.msk.bf16.gmra.mxu3 %vm1403_vm0, %v12873_v9  ;;  %v12941_v9 = vld [vmem:[#allocation22_spill] sm:$0xff] }
 0x349   :  { %v2525_v15 = vpop.f32.mrf.mxu2  ;;  %v2429_v55 = vpop.f32.mrf.mxu0 }
 0x34a   :  { %v2526_v17 = vadd.f32 %v2525_v15, %v2476_v19  ;;  %v10338_v21 = vadd.f32 %v2429_v55, %v10189_v14 }
 0x34b   :  { %v2574_v62 = vpop.f32.mrf.mxu3  ;;  %v2478_v20 = vpop.f32.mrf.mxu1 }
 0x34c   :  { %12939 = vst [vmem:[#allocation40_spill] sm:$0xff] %v10338_v21  ;;  %v10340_v29 = vadd.f32 %v2574_v62, %v2526_v17 }
 0x351   :  { %v2527_v45 = vpop.f32.mrf.mxu2  ;;  %v2432_v4 = vpop.f32.mrf.mxu0 }
 0x352   :  { %v2528_v40 = vadd.f32 %v2527_v45, %v2478_v20  ;;  %v10343_v26 = vadd.f32 %v2432_v4, %v10209_v60  ;;  %v12947_v45 = vld [vmem:[#allocation47_spill] sm:$0xff] }
 0x353   :  { %v2576_v33 = vpop.f32.mrf.mxu3  ;;  %v2481_v13 = vpop.f32.mrf.mxu1 }
 0x354   :  { %12940 = vst [vmem:[#allocation14_spill] sm:$0xff] %v10343_v26  ;;  %v10345_v30 = vadd.f32 %v2576_v33, %v2528_v40  ;;  %2627 = vmatmul.bf16.gmra.mxu0 %v12941_v9  ;;  %v12948_v40 = vld [vmem:[#allocation48_spill] sm:$0xff] }
 0x356   :  { %2676 = vmatmul.bf16.gmra.mxu1 %v12942_v42  ;;  %2725 = vmatmul.bf16.gmra.mxu2 %v12943_v2 }
 0x358   :  { %6911 = vmatmul.msk.bf16.gmra.mxu3 %vm1403_vm0, %v12916_v6  ;;  %v12946_v6 = vld [vmem:[#allocation25_spill] sm:$0xff] }
 0x359   :  { %v2530_v14 = vpop.f32.mrf.mxu2  ;;  %v2434_v16 = vpop.f32.mrf.mxu0 }
 0x35a   :  { %v2531_v54 = vadd.f32 %v2530_v14, %v2481_v13  ;;  %v10353_v19 = vadd.f32 %v2434_v16, %v10218_v47  ;;  %v2892_v16 = vmul.f32 %v10308_v52, %v10308_v52 }
 0x35b   :  { %v2579_v39 = vpop.f32.mrf.mxu3  ;;  %v2483_v60 = vpop.f32.mrf.mxu1 }
 0x35c   :  { %12944 = vst [vmem:[#allocation15_spill] sm:$0xff] %v10353_v19  ;;  %v10355_v35 = vadd.f32 %v2579_v39, %v2531_v54 }
 0x361   :  { %v2532_v51 = vpop.f32.mrf.mxu2  ;;  %v2437_v17 = vpop.f32.mrf.mxu0 }
 0x362   :  { %v2533_v59 = vadd.f32 %v2532_v51, %v2483_v60  ;;  %v10358_v62 = vadd.f32 %v2437_v17, %v10238_v61  ;;  %v12951_v17 = vld [vmem:[#allocation28_spill] sm:$0xff] }
 0x363   :  { %v2581_v15 = vpop.f32.mrf.mxu3  ;;  %v2486_v55 = vpop.f32.mrf.mxu1 }
 0x364   :  { %12945 = vst [vmem:[#allocation18_spill] sm:$0xff] %v10358_v62  ;;  %v10360_v20 = vadd.f32 %v2581_v15, %v2533_v59  ;;  %2632 = vmatmul.bf16.gmra.mxu0 %v12946_v6  ;;  %v2844_v59 = vadd.f32 %v10308_v52, %v10298_v27  ;;  %v2896_v15 = vmul.f32 %v10313_v36, %v10313_v36  ;;  %v12953_v6 = vld [vmem:[#allocation51_spill] sm:$0xff] }
 0x366   :  { %2681 = vmatmul.bf16.gmra.mxu1 %v12947_v45  ;;  %2730 = vmatmul.bf16.gmra.mxu2 %v12948_v40  ;;  %v2845_v45 = vadd.f32 %v2844_v59, %v10313_v36  ;;  %v2900_v40 = vmul.f32 %v10323_v57, %v10323_v57 }
 0x368   :  { %6912 = vmatmul.msk.bf16.gmra.mxu3 %vm1403_vm0, %v12919_v11 }
 0x369   :  { %v2535_v47 = vpop.f32.mrf.mxu2  ;;  %v2439_v13 = vpop.f32.mrf.mxu0 }
 0x36a   :  { %v2536_v33 = vadd.f32 %v2535_v47, %v2486_v55  ;;  %v10368_v9 = vadd.f32 %v2439_v13, %v10247_v43  ;;  %v2888_v43 = vmul.f32 %v10298_v27, %v10298_v27  ;;  %v12952_v55 = vld [vmem:[#allocation50_spill] sm:$0xff] }
 0x36b   :  { %v2584_v4 = vpop.f32.mrf.mxu3  ;;  %v2488_v61 = vpop.f32.mrf.mxu1 }
 0x36c   :  { %12949 = vst [vmem:[#allocation46_spill] sm:$0xff] %v10368_v9  ;;  %v10370_v42 = vadd.f32 %v2584_v4, %v2536_v33  ;;  %v2846_v33 = vadd.f32 %v2845_v45, %v10323_v57  ;;  %v2904_v4 = vmul.f32 %v10328_v25, %v10328_v25 }
 0x371   :  { %v2537_v2 = vpop.f32.mrf.mxu2  ;;  %v2442_v39 = vpop.f32.mrf.mxu0 }
 0x372   :  { %v2538_v14 = vadd.f32 %v2537_v2, %v2488_v61  ;;  %v10375_v60 = vadd.f32 %v2442_v39, %v10267_v31  ;;  %v2992_v31 = vadd.f32 %v2892_v16, %v2888_v43  ;;  %v2847_v39 = vadd.f32 %v2846_v33, %v10328_v25 }
 0x373   :  { %v2586_v54 = vpop.f32.mrf.mxu3  ;;  %v2491_v11 = vpop.f32.mrf.mxu1  ;;  %v2908_v16 = vmul.f32 %v10338_v21, %v10338_v21 }
 0x374   :  { %12950 = vst [vmem:[#allocation20_spill] sm:$0xff] %v10375_v60  ;;  %v10377_v51 = vadd.f32 %v2586_v54, %v2538_v14  ;;  %2637 = vmatmul.bf16.gmra.mxu0 %v12951_v17  ;;  %v2993_v47 = vadd.f32 %v2992_v31, %v2896_v15  ;;  %v2848_v17 = vadd.f32 %v2847_v39, %v10338_v21 }
 0x375   :  { %v2916_v31 = vmul.f32 %v10353_v19, %v10353_v19 }
 0x376   :  { %2686 = vmatmul.bf16.gmra.mxu1 %v12952_v55  ;;  %2735 = vmatmul.bf16.gmra.mxu2 %v12953_v6  ;;  %v2994_v54 = vadd.f32 %v2993_v47, %v2900_v40  ;;  %v2849_v6 = vadd.f32 %v2848_v17, %v10343_v26 }
 0x378   :  { %6913 = vmatmul.msk.bf16.gmra.mxu3 %vm1403_vm0, %v12922_v28  ;;  %v2995_v15 = vadd.f32 %v2994_v54, %v2904_v4  ;;  %v2850_v40 = vadd.f32 %v2849_v6, %v10353_v19 }
 0x379   :  { %v2540_v13 = vpop.f32.mrf.mxu2  ;;  %v2444_v14 = vpop.f32.mrf.mxu0 }
 0x37a   :  { %v2541_v61 = vadd.f32 %v2540_v13, %v2491_v11  ;;  %v10400_v43 = vadd.f32 %v2444_v14, %v10276_v41  ;;  %v2912_v11 = vmul.f32 %v10343_v26, %v10343_v26  ;;  %v2996_v55 = vadd.f32 %v2995_v15, %v2908_v16 }
 0x37b   :  { %v2589_v2 = vpop.f32.mrf.mxu3  ;;  %v2493_v28 = vpop.f32.mrf.mxu1  ;;  %v2920_v41 = vmul.f32 %v10358_v62, %v10358_v62  ;;  %v2924_v14 = vmul.f32 %v10368_v9, %v10368_v9 }
 0x37c   :  { %12954 = vst [vmem:[#allocation21_spill] sm:$0xff] %v10400_v43  ;;  %v10402_v59 = vadd.f32 %v2589_v2, %v2541_v61  ;;  %v2997_v45 = vadd.f32 %v2996_v55, %v2912_v11  ;;  %v2851_v2 = vadd.f32 %v2850_v40, %v10358_v62 }
 0x37e   :  { %v2998_v61 = vadd.f32 %v2997_v45, %v2916_v31  ;;  %v2852_v17 = vadd.f32 %v2851_v2, %v10368_v9 }
 0x380   :  { %v2999_v15 = vadd.f32 %v2998_v61, %v2920_v41  ;;  %v2853_v55 = vadd.f32 %v2852_v17, %v10375_v60 }
 0x381   :  { %v2542_v47 = vpop.f32.mrf.mxu2  ;;  %v2447_v13 = vpop.f32.mrf.mxu0 }
 0x382   :  { %v2543_v33 = vadd.f32 %v2542_v47, %v2493_v28  ;;  %v10417_v54 = vadd.f32 %v2447_v13, %v10284_v56  ;;  %v2928_v28 = vmul.f32 %v10375_v60, %v10375_v60  ;;  %v3000_v11 = vadd.f32 %v2999_v15, %v2924_v14 }
 0x383   :  { %v2591_v4 = vpop.f32.mrf.mxu3  ;;  %v2496_v39 = vpop.f32.mrf.mxu1  ;;  %v2932_v56 = vmul.f32 %v10400_v43, %v10400_v43  ;;  %v2854_v31 = vadd.f32 %v2853_v55, %v10400_v43 }
 0x384   :  { %12955 = vst [vmem:[#allocation49_spill] sm:$0xff] %v10417_v54  ;;  %v10419_v16 = vadd.f32 %v2591_v4, %v2543_v33  ;;  %2642 = vmatmul.bf16.gmra.mxu0 %v8631_v22  ;;  %v3001_v6 = vadd.f32 %v3000_v11, %v2928_v28  ;;  %v2936_v45 = vmul.f32 %v10417_v54, %v10417_v54 }
 0x385   :  { %v2855_v47 = vadd.f32 %v2854_v31, %v10417_v54 }
 0x386   :  { %2691 = vmatmul.bf16.gmra.mxu1 %v9079_v58  ;;  %2740 = vmatmul.bf16.gmra.mxu2 %v12884_v53  ;;  %v3002_v53 = vadd.f32 %v3001_v6, %v2932_v56 }
 0x388   :  { %6914 = vmatmul.msk.bf16.gmra.mxu3 %vm1403_vm0, %v12925_v32  ;;  %v3003_v32 = vadd.f32 %v3002_v53, %v2936_v45 }
 0x389   :  { %v2545_v22 = vpop.f32.mrf.mxu2  ;;  %v2449_v41 = vpop.f32.mrf.mxu0 }
 0x38a   :  { %v2546_v40 = vadd.f32 %v2545_v22, %v2496_v39  ;;  %v10437_v33 = vadd.f32 %v2449_v41, %v10287_v34 }
 0x38b   :  { %v2594_v58 = vpop.f32.mrf.mxu3  ;;  %v2498_v4 = vpop.f32.mrf.mxu1 }
 0x38c   :  { %12956 = vst [vmem:[#allocation23_spill] sm:$0xff] %v10437_v33  ;;  %v10439_v13 = vadd.f32 %v2594_v58, %v2546_v40  ;;  %v2856_v61 = vadd.f32 %v2855_v47, %v10437_v33  ;;  %v2940_v2 = vmul.f32 %v10437_v33, %v10437_v33 }
 0x38e   :  { %v3004_v14 = vadd.f32 %v3003_v32, %v2940_v2 }
 0x391   :  { %v2547_v15 = vpop.f32.mrf.mxu2  ;;  %v2452_v28 = vpop.f32.mrf.mxu0 }
 0x392   :  { %v2548_v39 = vadd.f32 %v2547_v15, %v2498_v4  ;;  %v10445_v11 = vadd.f32 %v2452_v28, %v10295_v48 }
 0x393   :  { %v2596_v17 = vpop.f32.mrf.mxu3  ;;  %v2501_v55 = vpop.f32.mrf.mxu1 }
 0x394   :  { %12957 = vst [vmem:[#allocation24_spill] sm:$0xff] %v10445_v11  ;;  %v10447_v34 = vadd.f32 %v2596_v17, %v2548_v39  ;;  %v2857_v56 = vadd.f32 %v2856_v61, %v10445_v11  ;;  %v2944_v6 = vmul.f32 %v10445_v11, %v10445_v11  ;;  %2647 = vmatmul.bf16.gmra.mxu0 %v12861_v3 }
 0x396   :  { %2696 = vmatmul.bf16.gmra.mxu1 %v12862_v23  ;;  %2745 = vmatmul.bf16.gmra.mxu2 %v12887_v24  ;;  %v3005_v31 = vadd.f32 %v3004_v14, %v2944_v6 }
 0x398   :  { %6915 = vmatmul.msk.bf16.gmra.mxu3 %vm1403_vm0, %v12928_v50 }
 0x399   :  { %v2550_v48 = vpop.f32.mrf.mxu2  ;;  %v2454_v40 = vpop.f32.mrf.mxu0 }
 0x39a   :  { %v2551_v45 = vadd.f32 %v2550_v48, %v2501_v55  ;;  %v10458_v58 = vadd.f32 %v2454_v40, %v10300_v63 }
 0x39b   :  { %v2599_v22 = vpop.f32.mrf.mxu3  ;;  %v2503_v41 = vpop.f32.mrf.mxu1 }
 0x39c   :  { %12958 = vst [vmem:[#allocation52_spill] sm:$0xff] %v10458_v58  ;;  %v10460_v53 = vadd.f32 %v2599_v22, %v2551_v45  ;;  %v2858_v3 = vadd.f32 %v2857_v56, %v10458_v58  ;;  %v2948_v23 = vmul.f32 %v10458_v58, %v10458_v58 }
 0x39e   :  { %v2859_v24 = vrot.slane %v2858_v3, 4  ;;  %v3006_v47 = vadd.f32 %v3005_v31, %v2948_v23 }
 0x3a0   :  { %v2860_v4 = vadd.f32 %v2859_v24, %v2858_v3  ;;  %v3007_v32 = vrot.slane %v3006_v47, 4 }
 0x3a1   :  { %v2552_v50 = vpop.f32.mrf.mxu2  ;;  %v2613_v14 = vpop.f32.mrf.mxu0 }
 0x3a2   :  { %v2553_v61 = vadd.f32 %v2552_v50, %v2503_v41  ;;  %v2861_v15 = vrot.slane %v2860_v4, 2  ;;  %v3008_v39 = vadd.f32 %v3007_v32, %v3006_v47  ;;  %v2614_v63 = vadd.f32 %v2613_v14, %v10310_v5 }
 0x3a3   :  { %v2601_v2 = vpop.f32.mrf.mxu3  ;;  %v2662_v17 = vpop.f32.mrf.mxu1 }
 0x3a4   :  { %v10466_v28 = vadd.f32 %v2601_v2, %v2553_v61  ;;  %v2862_v55 = vadd.f32 %v2861_v15, %v2860_v4  ;;  %v3009_v56 = vrot.slane %v3008_v39, 2  ;;  %v2663_v6 = vadd.f32 %v2662_v17, %v2614_v63 }
 0x3a6   :  { %v2863_v48 = vrot.slane %v2862_v55, 1  ;;  %v3010_v45 = vadd.f32 %v3009_v56, %v3008_v39 }
 0x3a8   :  { %v2864_v22 = vadd.f32 %v2863_v48, %v2862_v55  ;;  %v3011_v31 = vrot.slane %v3010_v45, 1 }
 0x3a9   :  { %v2711_v40 = vpop.f32.mrf.mxu2  ;;  %v2615_v41 = vpop.f32.mrf.mxu0 }
 0x3aa   :  { %v2712_v3 = vadd.f32 %v2711_v40, %v2663_v6  ;;  %v3012_v24 = vadd.f32 %v3011_v31, %v3010_v45  ;;  %v10468_v50 = vmul.f32 0.0078125, %v2864_v22  ;;  %v2616_v47 = vadd.f32 %v2615_v41, %v10315_v10 }
 0x3ab   :  { %v2760_v23 = vpop.f32.mrf.mxu3  ;;  %v2664_v5 = vpop.f32.mrf.mxu1 }
 0x3ac   :  { %v10471_v32 = vadd.f32 %v2760_v23, %v2712_v3  ;;  %v10473_v61 = vmul.f32 0.0078125, %v3012_v24  ;;  %v10477_v4 = vmul.f32 %v10468_v50, %v10468_v50  ;;  %v2665_v2 = vadd.f32 %v2664_v5, %v2616_v47 }
 0x3ae   :  { %v2889_v21 = vmul.f32 %v10471_v32, %v10471_v32 }
 0x3b1   :  { %v2713_v15 = vpop.f32.mrf.mxu2  ;;  %v2618_v17 = vpop.f32.mrf.mxu0 }
 0x3b2   :  { %v2714_v39 = vadd.f32 %v2713_v15, %v2665_v2  ;;  %v2619_v55 = vadd.f32 %v2618_v17, %v10325_v49 }
 0x3b3   :  { %v2762_v63 = vpop.f32.mrf.mxu3  ;;  %v2667_v10 = vpop.f32.mrf.mxu1 }
 0x3b4   :  { %v10482_v56 = vadd.f32 %v2762_v63, %v2714_v39  ;;  %v2668_v6 = vadd.f32 %v2667_v10, %v2619_v55 }
 0x3b6   :  { %v2893_v46 = vmul.f32 %v10482_v56, %v10482_v56 }
 0x3b9   :  { %v2716_v48 = vpop.f32.mrf.mxu2  ;;  %v2620_v31 = vpop.f32.mrf.mxu0 }
 0x3ba   :  { %v2717_v45 = vadd.f32 %v2716_v48, %v2668_v6  ;;  %v2621_v40 = vadd.f32 %v2620_v31, %v10330_v37 }
 0x3bb   :  { %v2765_v22 = vpop.f32.mrf.mxu3  ;;  %v2669_v3 = vpop.f32.mrf.mxu1 }
 0x3bc   :  { %v10485_v23 = vadd.f32 %v2765_v22, %v2717_v45  ;;  %v2670_v41 = vadd.f32 %v2669_v3, %v2621_v40 }
 0x3c1   :  { %v2718_v24 = vpop.f32.mrf.mxu2  ;;  %v2623_v2 = vpop.f32.mrf.mxu0 }
 0x3c2   :  { %v2719_v47 = vadd.f32 %v2718_v24, %v2670_v41  ;;  %v2624_v49 = vadd.f32 %v2623_v2, %v10340_v29 }
 0x3c3   :  { %v2767_v5 = vpop.f32.mrf.mxu3  ;;  %v2672_v15 = vpop.f32.mrf.mxu1 }
 0x3c4   :  { %v10488_v39 = vadd.f32 %v2767_v5, %v2719_v47  ;;  %v2673_v63 = vadd.f32 %v2672_v15, %v2624_v49 }
 0x3c9   :  { %v2721_v17 = vpop.f32.mrf.mxu2  ;;  %v2625_v6 = vpop.f32.mrf.mxu0 }
 0x3ca   :  { %v2722_v55 = vadd.f32 %v2721_v17, %v2673_v63  ;;  %v2626_v33 = vadd.f32 %v2625_v6, %v10345_v30  ;;  %v2897_v30 = vmul.f32 %v10485_v23, %v10485_v23 }
 0x3cb   :  { %v2770_v10 = vpop.f32.mrf.mxu3  ;;  %v2674_v48 = vpop.f32.mrf.mxu1 }
 0x3cc   :  { %v10490_v37 = vadd.f32 %v2770_v10, %v2722_v55  ;;  %v2675_v7 = vadd.f32 %v2674_v48, %v2626_v33  ;;  %v3013_v48 = vadd.f32 %v2893_v46, %v2889_v21 }
 0x3d1   :  { %v2723_v45 = vpop.f32.mrf.mxu2  ;;  %v2628_v31 = vpop.f32.mrf.mxu0 }
 0x3d2   :  { %v2629_v54 = vadd.f32 %v2628_v31, %v10355_v35  ;;  %v2724_v19 = vadd.f32 %v2723_v45, %v2675_v7  ;;  %v2901_v7 = vmul.f32 %v10488_v39, %v10488_v39 }
 0x3d3   :  { %v2772_v22 = vpop.f32.mrf.mxu3  ;;  %v2677_v40 = vpop.f32.mrf.mxu1 }
 0x3d4   :  { %v2678_v1 = vadd.f32 %v2677_v40, %v2629_v54  ;;  %v10507_v54 = vadd.f32 %v2772_v22, %v2724_v19 }
 0x3d9   :  { %v2726_v3 = vpop.f32.mrf.mxu2  ;;  %v2630_v24 = vpop.f32.mrf.mxu0 }
 0x3da   :  { %v2631_v43 = vadd.f32 %v2630_v24, %v10360_v20  ;;  %v2727_v35 = vadd.f32 %v2726_v3, %v2678_v1  ;;  %v2865_v20 = vadd.f32 %v10482_v56, %v10471_v32  ;;  %v3014_v24 = vadd.f32 %v3013_v48, %v2897_v30 }
 0x3db   :  { %v2775_v41 = vpop.f32.mrf.mxu3  ;;  %v2679_v14 = vpop.f32.mrf.mxu1  ;;  %v2905_v1 = vmul.f32 %v10490_v37, %v10490_v37 }
 0x3dc   :  { %v2680_v33 = vadd.f32 %v2679_v14, %v2631_v43  ;;  %v2866_v45 = vadd.f32 %v2865_v20, %v10485_v23  ;;  %v10513_v43 = vadd.f32 %v2775_v41, %v2727_v35 }
 0x3de   :  { %v2867_v46 = vadd.f32 %v2866_v45, %v10488_v39 }
 0x3e1   :  { %v2728_v29 = vpop.f32.mrf.mxu2  ;;  %v2633_v47 = vpop.f32.mrf.mxu0 }
 0x3e2   :  { %v2634_v38 = vadd.f32 %v2633_v47, %v10370_v42  ;;  %v2729_v42 = vadd.f32 %v2728_v29, %v2680_v33  ;;  %v3015_v29 = vadd.f32 %v3014_v24, %v2901_v7 }
 0x3e3   :  { %v2777_v2 = vpop.f32.mrf.mxu3  ;;  %v2682_v5 = vpop.f32.mrf.mxu1 }
 0x3e4   :  { %v2683_v31 = vadd.f32 %v2682_v5, %v2634_v38  ;;  %v2909_v38 = vmul.f32 %v10507_v54, %v10507_v54  ;;  %v2868_v5 = vadd.f32 %v2867_v46, %v10490_v37  ;;  %v3016_v30 = vadd.f32 %v3015_v29, %v2905_v1 }
 0x3e6   :  { %v3017_v33 = vadd.f32 %v3016_v30, %v2909_v38 }
 0x3e9   :  { %v2731_v49 = vpop.f32.mrf.mxu2  ;;  %v2635_v63 = vpop.f32.mrf.mxu0 }
 0x3ea   :  { %v2636_v6 = vadd.f32 %v2635_v63, %v10377_v51  ;;  %v2732_v21 = vadd.f32 %v2731_v49, %v2683_v31  ;;  %v2913_v49 = vmul.f32 %v10513_v43, %v10513_v43 }
 0x3eb   :  { %v2780_v15 = vpop.f32.mrf.mxu3  ;;  %v2684_v17 = vpop.f32.mrf.mxu1 }
 0x3ec   :  { %v2685_v51 = vadd.f32 %v2684_v17, %v2636_v6  ;;  %v3018_v6 = vadd.f32 %v3017_v33, %v2913_v49 }
 0x3f1   :  { %v2733_v58 = vpop.f32.mrf.mxu2  ;;  %v2638_v55 = vpop.f32.mrf.mxu0 }
 0x3f2   :  { %v2639_v40 = vadd.f32 %v2638_v55, %v10402_v59  ;;  %v10519_v59 = vadd.f32 %v2777_v2, %v2729_v42  ;;  %v2734_v41 = vadd.f32 %v2733_v58, %v2685_v51 }
 0x3f3   :  { %v2782_v11 = vpop.f32.mrf.mxu3  ;;  %v2687_v10 = vpop.f32.mrf.mxu1 }
 0x3f4   :  { %v2688_v63 = vadd.f32 %v2687_v10, %v2639_v40  ;;  %v2917_v2 = vmul.f32 %v10519_v59, %v10519_v59  ;;  %v10531_v58 = vadd.f32 %v2782_v11, %v2734_v41 }
 0x3f6   :  { %v3019_v31 = vadd.f32 %v3018_v6, %v2917_v2  ;;  %v2925_v11 = vmul.f32 %v10531_v58, %v10531_v58 }
 0x3f9   :  { %v2736_v60 = vpop.f32.mrf.mxu2  ;;  %v2640_v62 = vpop.f32.mrf.mxu0 }
 0x3fa   :  { %v2641_v19 = vadd.f32 %v2640_v62, %v10419_v16  ;;  %v2869_v62 = vadd.f32 %v2868_v5, %v10507_v54  ;;  %v10526_v16 = vadd.f32 %v2780_v15, %v2732_v21  ;;  %v2737_v17 = vadd.f32 %v2736_v60, %v2688_v63 }
 0x3fb   :  { %v2785_v9 = vpop.f32.mrf.mxu3  ;;  %v2689_v26 = vpop.f32.mrf.mxu1 }
 0x3fc   :  { %v2690_v35 = vadd.f32 %v2689_v26, %v2641_v19  ;;  %v2870_v20 = vadd.f32 %v2869_v62, %v10513_v43  ;;  %v2921_v15 = vmul.f32 %v10526_v16, %v10526_v16  ;;  %v10536_v42 = vadd.f32 %v2785_v9, %v2737_v17 }
 0x3fe   :  { %v2871_v7 = vadd.f32 %v2870_v20, %v10519_v59  ;;  %v3020_v46 = vadd.f32 %v3019_v31, %v2921_v15  ;;  %v2929_v9 = vmul.f32 %v10536_v42, %v10536_v42 }
 0x400   :  { %v2872_v24 = vadd.f32 %v2871_v7, %v10526_v16  ;;  %v3021_v19 = vadd.f32 %v3020_v46, %v2925_v11 }
 0x401   :  { %v2738_v14 = vpop.f32.mrf.mxu2  ;;  %v2643_v3 = vpop.f32.mrf.mxu0 }
 0x402   :  { %v2644_v55 = vadd.f32 %v2643_v3, %v10439_v13  ;;  %v2739_v10 = vadd.f32 %v2738_v14, %v2690_v35  ;;  %v2873_v21 = vadd.f32 %v2872_v24, %v10531_v58 }
 0x403   :  { %v2787_v22 = vpop.f32.mrf.mxu3  ;;  %v2692_v47 = vpop.f32.mrf.mxu1 }
 0x404   :  { %v2693_v13 = vadd.f32 %v2692_v47, %v2644_v55  ;;  %v10541_v1 = vadd.f32 %v2787_v22, %v2739_v10  ;;  %v2874_v3 = vadd.f32 %v2873_v21, %v10536_v42  ;;  %v3022_v22 = vadd.f32 %v3021_v19, %v2929_v9 }
 0x406   :  { %v2933_v29 = vmul.f32 %v10541_v1, %v10541_v1  ;;  %v2875_v47 = vadd.f32 %v2874_v3, %v10541_v1 }
 0x408   :  { %v3023_v30 = vadd.f32 %v3022_v22, %v2933_v29 }
 0x409   :  { %v2741_v48 = vpop.f32.mrf.mxu2  ;;  %v2645_v45 = vpop.f32.mrf.mxu0 }
 0x40a   :  { %v2742_v26 = vadd.f32 %v2741_v48, %v2693_v13  ;;  %v2646_v14 = vadd.f32 %v2645_v45, %v10447_v34 }
 0x40b   :  { %v2790_v60 = vpop.f32.mrf.mxu3  ;;  %v2694_v40 = vpop.f32.mrf.mxu1 }
 0x40c   :  { %v10547_v51 = vadd.f32 %v2790_v60, %v2742_v26  ;;  %v2695_v38 = vadd.f32 %v2694_v40, %v2646_v14 }
 0x40e   :  { %v2937_v5 = vmul.f32 %v10547_v51, %v10547_v51  ;;  %v2876_v49 = vadd.f32 %v2875_v47, %v10547_v51 }
 0x410   :  { %v3024_v33 = vadd.f32 %v3023_v30, %v2937_v5 }
 0x411   :  { %v2743_v34 = vpop.f32.mrf.mxu2  ;;  %v2648_v55 = vpop.f32.mrf.mxu0 }
 0x412   :  { %v2744_v41 = vadd.f32 %v2743_v34, %v2695_v38  ;;  %v2649_v17 = vadd.f32 %v2648_v55, %v10460_v53 }
 0x413   :  { %v2792_v63 = vpop.f32.mrf.mxu3  ;;  %v2697_v35 = vpop.f32.mrf.mxu1 }
 0x414   :  { %v10562_v62 = vadd.f32 %v2792_v63, %v2744_v41  ;;  %v2698_v13 = vadd.f32 %v2697_v35, %v2649_v17 }
 0x416   :  { %v2877_v2 = vadd.f32 %v2876_v49, %v10562_v62  ;;  %v2941_v20 = vmul.f32 %v10562_v62, %v10562_v62 }
 0x418   :  { %v3025_v10 = vadd.f32 %v3024_v33, %v2941_v20 }
 0x419   :  { %v2746_v6 = vpop.f32.mrf.mxu2  ;;  %v2650_v15 = vpop.f32.mrf.mxu0 }
 0x41a   :  { %v2747_v48 = vadd.f32 %v2746_v6, %v2698_v13  ;;  %v2651_v53 = vadd.f32 %v2650_v15, %v10466_v28  ;;  %v12959_v28 = vsub.f32 %v10473_v61, %v10477_v4 }
 0x41b   :  { %v2795_v7 = vpop.f32.mrf.mxu3  ;;  %v2699_v31 = vpop.f32.mrf.mxu1 }
 0x41c   :  { %v10568_v26 = vadd.f32 %v2795_v7, %v2747_v48  ;;  %v2700_v24 = vadd.f32 %v2699_v31, %v2651_v53  ;;  %v3052_v3 = vmax.f32 %v12959_v28, 0.0 }
 0x41e   :  { %v2878_v60 = vadd.f32 %v2877_v2, %v10568_v26  ;;  %v2945_v45 = vmul.f32 %v10568_v26, %v10568_v26  ;;  %v3056_v47 = vadd.f32 1e-05, %v3052_v3  ;;  %v2800_v3 = vld [vmem:[%s12616_s2] sm:$0xf] }
 0x420   :  { %v3026_v40 = vadd.f32 %v3025_v10, %v2945_v45  ;;  %7920 = vrsqrt.f32 %v3056_v47  ;;  %vm3084_vm9 = vweird.f32 %v3056_v47 }
 0x421   :  { %v2748_v11 = vpop.f32.mrf.mxu2 }
 0x422   :  { %v2749_v14 = vadd.f32 %v2748_v11, %v2700_v24 }
 0x423   :  { %v2797_v46 = vpop.f32.mrf.mxu3 }
 0x424   :  { %v10574_v21 = vadd.f32 %v2797_v46, %v2749_v14 }
 0x426   :  { %v2879_v9 = vadd.f32 %v2878_v60, %v10574_v21  ;;  %v2949_v19 = vmul.f32 %v10574_v21, %v10574_v21  ;;  %v7921_v20 = vpop.eup %7920 }
 0x427   :  { %v3079_v13 = vmul.f32 %v7921_v20, %v3056_v47  ;;  %vm3085_vm8 = vweird.f32 %v7921_v20 }
 0x428   :  { %v2880_v29 = vrot.slane %v2879_v9, 4  ;;  %v3027_v38 = vadd.f32 %v3026_v40, %v2949_v19  ;;  %vm3086_vm11 = vmor %vm3084_vm9, %vm3085_vm8 }
 0x429   :  { %v3080_v7 = vmul.f32 %v7921_v20, %v3079_v13  ;;  %v12963_v13 = vld [vmem:[#allocation59_spill] sm:$0xff] }
 0x42a   :  { %v2881_v34 = vadd.f32 %v2880_v29, %v2879_v9  ;;  %v3028_v22 = vrot.slane %v3027_v38, 4 }
 0x42b   :  { %v3081_v15 = vmul.f32 0.5, %v3080_v7 }
 0x42c   :  { %v2882_v5 = vrot.slane %v2881_v34, 2  ;;  %v3029_v41 = vadd.f32 %v3028_v22, %v3027_v38 }
 0x42d   :  { %v3082_v60 = vsub.f32 1.5, %v3081_v15 }
 0x42e   :  { %v2883_v63 = vadd.f32 %v2882_v5, %v2881_v34  ;;  %v3030_v55 = vrot.slane %v3029_v41, 2 }
 0x42f   :  { %v3083_v40 = vmul.f32 %v7921_v20, %v3082_v60  ;;  %v12965_v60 = vld [vmem:[#allocation60_spill] sm:$0xff] }
 0x430   :  { %v2884_v30 = vrot.slane %v2883_v63, 1  ;;  %v3031_v49 = vadd.f32 %v3030_v55, %v3029_v41 }
 0x431   :  { %v3087_v14 = vsel %vm3086_vm11, %v7921_v20, %v3083_v40 }
 0x432   :  { %v2885_v17 = vadd.f32 %v2884_v30, %v2883_v63  ;;  %v3032_v35 = vrot.slane %v3031_v49, 1  ;;  %v3103_v19 = vrot.slane %v3087_v14, 6  ;;  %v12960_v63 = vld [vmem:[#allocation55_spill] sm:$0xff] }
 0x434   :  { %v3033_v33 = vadd.f32 %v3032_v35, %v3031_v49  ;;  %v3037_v2 = vmul.f32 0.0078125, %v2885_v17  ;;  %v12961_v17 = vld [vmem:[#allocation58_spill] sm:$0xff] }
 0x436   :  { %v3041_v10 = vmul.f32 0.0078125, %v3033_v33  ;;  %v3045_v61 = vmul.f32 %v3037_v2, %v3037_v2  ;;  %v12962_v33 = vld [vmem:[#allocation37_spill] sm:$0xff] }
 0x438   :  { %v3049_v4 = vsub.f32 %v3041_v10, %v3045_v61 }
 0x43a   :  { %v3053_v6 = vmax.f32 %v3049_v4, 0.0 }
 0x43c   :  { %v3057_v48 = vadd.f32 1e-05, %v3053_v6 }
 0x43e   :  { %7922 = vrsqrt.f32 %v3057_v48  ;;  %vm3094_vm12 = vweird.f32 %v3057_v48 }
 0x444   :  { %v7923_v53 = vpop.eup %7922 }
 0x445   :  { %v3089_v45 = vmul.f32 %v7923_v53, %v3057_v48  ;;  %vm3095_vm10 = vweird.f32 %v7923_v53  ;;  %v12964_v48 = vld [vmem:[#allocation13_spill] sm:$0xff] }
 0x446   :  { %vm3096_vm13 = vmor %vm3094_vm12, %vm3095_vm10 }
 0x447   :  { %v3090_v31 = vmul.f32 %v7923_v53, %v3089_v45 }
 0x449   :  { %v3091_v24 = vmul.f32 0.5, %v3090_v31  ;;  %v12966_v31 = vld [vmem:[#allocation43_spill] sm:$0xff] }
 0x44b   :  { %v3092_v11 = vsub.f32 1.5, %v3091_v24 }
 0x44d   :  { %v3093_v46 = vmul.f32 %v7923_v53, %v3092_v11  ;;  %v12967_v11 = vld [vmem:[#allocation61_spill] sm:$0xff] }
 0x44f   :  { %v3097_v9 = vsel %vm3096_vm13, %v7923_v53, %v3093_v46 }
 0x450   :  { %v3104_v28 = vrot.slane %v3097_v9, 5 }
 0x452   :  { %v3108_v29 = vsel %vm3107_vm14, %v3103_v19, %v3104_v28  ;;  %v12968_v28 = vld [vmem:[#allocation62_spill] sm:$0xff] }
 0x453   :  { %v3110_v38 = vsel %vm3109_vm15, %v10178_v12, %v3108_v29  ;;  %v12969_v29 = vld [vmem:[#allocation63_spill] sm:$0xff] }
 0x454   :  { %v3112_v34 = vmul.f32 %v3110_v38, %v2800_v3 }
 0x456   :  { %v10588_v22 = vperm.slane %v3112_v34, 0  ;;  %v10590_v47 = vperm.slane %v3112_v34, 1  ;;  %v10592_v5 = vperm.slane %v3112_v34, 2  ;;  %v10594_v41 = vperm.slane %v3112_v34, 3  ;;  %v12970_v34 = vld [vmem:[#allocation40_spill] sm:$0xff] }
 0x458   :  { %v3122_v55 = vmul.f32 %v10588_v22, %v12960_v63  ;;  %v3123_v30 = vmul.f32 %v10590_v47, %v10084_v0  ;;  %v3124_v49 = vmul.f32 %v10592_v5, %v10468_v50  ;;  %v3125_v12 = vmul.f32 %v10594_v41, %v3037_v2  ;;  %v2801_v2 = vld [vmem:[%s12617_s3] sm:$0xf]  ;;  %v12971_v63 = vld [vmem:[#allocation64_spill] sm:$0xff] }
 0x459   :  { %v10605_v35 = vmul.f32 %v10588_v22, %v12961_v17  ;;  %v10609_v20 = vmul.f32 %v10590_v47, %v12962_v33  ;;  %v10613_v10 = vmul.f32 %v10592_v5, %v10298_v27  ;;  %v10617_v50 = vmul.f32 %v10594_v41, %v10471_v32  ;;  %v12974_v17 = vld [vmem:[#allocation65_spill] sm:$0xff] }
 0x45a   :  { %v3130_v61 = vrot.slane %v3123_v30, 7  ;;  %v3131_v4 = vrot.slane %v3124_v49, 6  ;;  %v3132_v0 = vrot.slane %v3125_v12, 5  ;;  %v10624_v6 = vmul.f32 %v10588_v22, %v12963_v13  ;;  %v12973_v49 = vld [vmem:[#allocation14_spill] sm:$0xff]  ;;  %v12975_v33 = vld [vmem:[#allocation53_spill] sm:$0xff] }
 0x45b   :  { %v10628_v7 = vmul.f32 %v10590_v47, %v12964_v48  ;;  %v10632_v27 = vmul.f32 %v10592_v5, %v10308_v52  ;;  %v10636_v32 = vmul.f32 %v10594_v41, %v10482_v56  ;;  %v10642_v45 = vmul.f32 %v10588_v22, %v12965_v60  ;;  %v12977_v13 = vld [vmem:[#allocation66_spill] sm:$0xff]  ;;  %v12978_v48 = vld [vmem:[#allocation56_spill] sm:$0xff] }
 0x45c   :  { %v3133_v15 = vsel %vm3105_vm6, %v3122_v55, %v3130_v61  ;;  %v3134_v53 = vsel %vm3107_vm14, %v3131_v4, %v3132_v0  ;;  %v10646_v40 = vmul.f32 %v10590_v47, %v12966_v31  ;;  %v10651_v52 = vmul.f32 %v10592_v5, %v10313_v36  ;;  %v12972_v55 = vld [vmem:[#allocation17_spill] sm:$0xff]  ;;  %v12976_v4 = vld [vmem:[#allocation15_spill] sm:$0xff] }
 0x45d   :  { %v3135_v24 = vsel %vm3109_vm15, %v3133_v15, %v3134_v53  ;;  %v10655_v56 = vmul.f32 %v10594_v41, %v10485_v23  ;;  %v3150_v14 = vmul.f32 %v10588_v22, %v12967_v11  ;;  %v10661_v9 = vmul.f32 %v10590_v47, %v9831_v8  ;;  %v12979_v53 = vld [vmem:[#allocation18_spill] sm:$0xff]  ;;  %v12981_v11 = vld [vmem:[#allocation72_spill] sm:$0xff] }
 0x45e   :  { %v3137_v46 = vsub.f32 %v2801_v2, %v3135_v24  ;;  %v10665_v19 = vmul.f32 %v10592_v5, %v10323_v57  ;;  %v10669_v36 = vmul.f32 %v10594_v41, %v10488_v39  ;;  %v10673_v23 = vmul.f32 %v10588_v22, %v12968_v28  ;;  %v12980_v24 = vld [vmem:[#allocation67_spill] sm:$0xff] }
 0x45f   :  { %v10677_v3 = vmul.f32 %v10590_v47, %v9836_v18  ;;  %v10681_v8 = vmul.f32 %v10592_v5, %v10328_v25  ;;  %v10685_v57 = vmul.f32 %v10594_v41, %v10490_v37  ;;  %v10689_v39 = vmul.f32 %v10588_v22, %v12969_v29  ;;  %v12982_v29 = vld [vmem:[#allocation46_spill] sm:$0xff] }
 0x460   :  { %v10693_v38 = vmul.f32 %v10590_v47, %v9863_v44  ;;  %v10697_v18 = vmul.f32 %v10592_v5, %v12970_v34  ;;  %v10701_v25 = vmul.f32 %v10594_v41, %v10507_v54  ;;  %v10705_v37 = vmul.f32 %v10588_v22, %v12971_v63 }
 0x461   :  { %v10709_v30 = vmul.f32 %v10590_v47, %v12972_v55  ;;  %v10713_v44 = vmul.f32 %v10592_v5, %v12973_v49  ;;  %v10717_v12 = vmul.f32 %v10594_v41, %v10513_v43  ;;  %v10721_v54 = vmul.f32 %v10588_v22, %v12974_v17  ;;  %v12983_v55 = vld [vmem:[#allocation68_spill] sm:$0xff]  ;;  %v12984_v49 = vld [vmem:[#allocation73_spill] sm:$0xff] }
 0x462   :  { %v10725_v61 = vmul.f32 %v10590_v47, %v12975_v33  ;;  %v10729_v0 = vmul.f32 %v10592_v5, %v12976_v4  ;;  %v10733_v2 = vmul.f32 %v10594_v41, %v10519_v59  ;;  %v10737_v43 = vmul.f32 %v10588_v22, %v12977_v13  ;;  %v12985_v33 = vld [vmem:[#allocation20_spill] sm:$0xff]  ;;  %v12986_v13 = vld [vmem:[#allocation69_spill] sm:$0xff] }
 0x463   :  { %v10741_v15 = vmul.f32 %v10590_v47, %v12978_v48  ;;  %v10745_v60 = vmul.f32 %v10592_v5, %v12979_v53  ;;  %v10749_v31 = vmul.f32 %v10594_v41, %v10526_v16  ;;  %v10753_v59 = vmul.f32 %v10588_v22, %v12980_v24  ;;  %v12988_v53 = vld [vmem:[#allocation74_spill] sm:$0xff] }
 0x464   :  { %v10757_v28 = vmul.f32 %v10590_v47, %v12981_v11  ;;  %v10761_v34 = vmul.f32 %v10592_v5, %v12982_v29  ;;  %v10765_v63 = vmul.f32 %v10594_v41, %v10531_v58  ;;  %v10769_v16 = vmul.f32 %v10588_v22, %v12983_v55  ;;  %v12990_v11 = vld [vmem:[#allocation21_spill] sm:$0xff]  ;;  %v12992_v55 = vld [vmem:[#allocation70_spill] sm:$0xff] }
 0x465   :  { %v10773_v17 = vmul.f32 %v10590_v47, %v12984_v49  ;;  %v10777_v4 = vmul.f32 %v10592_v5, %v12985_v33  ;;  %v10781_v48 = vmul.f32 %v10588_v22, %v12986_v13  ;;  %v10785_v58 = vmul.f32 %v10594_v41, %v10536_v42  ;;  %v12994_v33 = vld [vmem:[#allocation75_spill] sm:$0xff] }
 0x466   :  { %v10789_v24 = vmul.f32 %v10590_v47, %v12988_v53  ;;  %v10793_v29 = vmul.f32 %v10592_v5, %v12990_v11  ;;  %v10797_v49 = vmul.f32 %v10588_v22, %v12992_v55  ;;  %v10801_v13 = vmul.f32 %v10590_v47, %v12994_v33 }
 0x467   :  { %12987 = vst [vmem:[#allocation26_spill] sm:$0xff] %v10781_v48  ;;  %v12995_v48 = vld [vmem:[#allocation49_spill] sm:$0xff]  ;;  %v10809_v53 = vmul.f32 %v10594_v41, %v10547_v51 }
 0x468   :  { %12989 = vst [vmem:[#allocation27_spill] sm:$0xff] %v10789_v24  ;;  %v10805_v42 = vmul.f32 %v10592_v5, %v12995_v48  ;;  %v12998_v24 = vld [vmem:[#allocation71_spill] sm:$0xff]  ;;  %v10825_v48 = vmul.f32 %v10594_v41, %v10562_v62 }
 0x469   :  { %12991 = vst [vmem:[#allocation54_spill] sm:$0xff] %v10793_v29  ;;  %v10813_v11 = vmul.f32 %v10588_v22, %v12998_v24  ;;  %v13000_v29 = vld [vmem:[#allocation76_spill] sm:$0xff] }
 0x46a   :  { %12993 = vst [vmem:[#allocation29_spill] sm:$0xff] %v10797_v49  ;;  %v10817_v55 = vmul.f32 %v10590_v47, %v13000_v29  ;;  %v13001_v49 = vld [vmem:[#allocation23_spill] sm:$0xff] }
 0x46b   :  { %12996 = vst [vmem:[#allocation30_spill] sm:$0xff] %v10805_v42  ;;  %v10821_v33 = vmul.f32 %v10592_v5, %v13001_v49  ;;  %v13004_v42 = vld [vmem:[#allocation33_spill] sm:$0xff]  ;;  %v10841_v49 = vmul.f32 %v10594_v41, %v10568_v26  ;;  %v3185_v26 = vmul.f32 %v10594_v41, %v10541_v1 }
 0x46c   :  { %12997 = vst [vmem:[#allocation57_spill] sm:$0xff] %v10809_v53  ;;  %v10829_v51 = vmul.f32 %v10588_v22, %v13004_v42  ;;  %v13006_v53 = vld [vmem:[#allocation77_spill] sm:$0xff] }
 0x46d   :  { %12999 = vst [vmem:[#allocation31_spill] sm:$0xff] %v10813_v11  ;;  %v10833_v24 = vmul.f32 %v10590_v47, %v13006_v53  ;;  %v13007_v11 = vld [vmem:[#allocation24_spill] sm:$0xff] }
 0x46e   :  { %13002 = vst [vmem:[#allocation32_spill] sm:$0xff] %v10821_v33  ;;  %v10837_v29 = vmul.f32 %v10592_v5, %v13007_v11  ;;  %v13010_v33 = vld [vmem:[#allocation34_spill] sm:$0xff]  ;;  %v10857_v11 = vmul.f32 %v10594_v41, %v10574_v21 }
 0x46f   :  { %13003 = vst [vmem:[#allocation35_spill] sm:$0xff] %v10825_v48  ;;  %v10845_v62 = vmul.f32 %v10588_v22, %v13010_v33  ;;  %v13011_v48 = vld [vmem:[#allocation78_spill] sm:$0xff]  ;;  %v10865_v22 = vperm.slane %v3137_v46, 2  ;;  %v10867_v33 = vperm.slane %v3137_v46, 3 }
 0x470   :  { %13005 = vst [vmem:[#allocation36_spill] sm:$0xff] %v10829_v51  ;;  %v10849_v42 = vmul.f32 %v10590_v47, %v13011_v48  ;;  %v13012_v51 = vld [vmem:[#allocation52_spill] sm:$0xff]  ;;  %v13021_v48 = vld [vmem:[#allocation27_spill] sm:$0xff] }
 0x471   :  { %13008 = vst [vmem:[#allocation16_spill] sm:$0xff] %v10837_v29  ;;  %v10853_v53 = vmul.f32 %v10592_v5, %v13012_v51  ;;  %v10859_v29 = vperm.slane %v3137_v46, 0  ;;  %v13023_v51 = vld [vmem:[#allocation54_spill] sm:$0xff] }
 0x472   :  { %13009 = vst [vmem:[#allocation38_spill] sm:$0xff] %v10841_v49  ;;  %v10863_v49 = vperm.slane %v3137_v46, 1  ;;  %v10890_v46 = vadd.f32 %v10865_v22, %v10613_v10 }
 0x473   :  { %v10871_v47 = vadd.f32 %v10859_v29, %v10605_v35  ;;  %v10875_v5 = vadd.f32 %v10859_v29, %v10624_v6  ;;  %v10879_v21 = vadd.f32 %v10859_v29, %v10642_v45  ;;  %v10882_v1 = vadd.f32 %v10859_v29, %v3150_v14 }
 0x474   :  { %v10886_v41 = vadd.f32 %v10863_v49, %v10609_v20  ;;  %13015 = vst [vmem:[#allocation41_spill] sm:$0xff] %v10890_v46  ;;  %v10894_v35 = vadd.f32 %v10867_v33, %v10617_v50  ;;  %v10898_v6 = vadd.f32 %v10863_v49, %v10628_v7  ;;  %v10902_v45 = vadd.f32 %v10865_v22, %v10632_v27 }
 0x475   :  { %13013 = vst [vmem:[#allocation39_spill] sm:$0xff] %v10871_v47  ;;  %v10906_v20 = vadd.f32 %v10867_v33, %v10636_v32  ;;  %v10910_v10 = vadd.f32 %v10863_v49, %v10646_v40  ;;  %v10914_v50 = vadd.f32 %v10865_v22, %v10651_v52  ;;  %v10918_v7 = vadd.f32 %v10867_v33, %v10655_v56 }
 0x476   :  { %13014 = vst [vmem:[#allocation19_spill] sm:$0xff] %v10886_v41  ;;  %v10922_v27 = vadd.f32 %v10863_v49, %v10661_v9  ;;  %v10926_v32 = vadd.f32 %v10865_v22, %v10665_v19  ;;  %v10930_v40 = vadd.f32 %v10867_v33, %v10669_v36  ;;  %v10934_v52 = vadd.f32 %v10859_v29, %v10673_v23 }
 0x477   :  { %13016 = vst [vmem:[#allocation42_spill] sm:$0xff] %v10894_v35  ;;  %v10938_v56 = vadd.f32 %v10863_v49, %v10677_v3  ;;  %v10942_v14 = vadd.f32 %v10865_v22, %v10681_v8  ;;  %v10946_v9 = vadd.f32 %v10867_v33, %v10685_v57  ;;  %v10950_v19 = vadd.f32 %v10859_v29, %v10689_v39 }
 0x478   :  { %v10954_v36 = vadd.f32 %v10863_v49, %v10693_v38  ;;  %v10958_v23 = vadd.f32 %v10865_v22, %v10697_v18  ;;  %v10962_v3 = vadd.f32 %v10867_v33, %v10701_v25  ;;  %v10966_v8 = vadd.f32 %v10859_v29, %v10705_v37 }
 0x479   :  { %v10970_v57 = vadd.f32 %v10863_v49, %v10709_v30  ;;  %v10974_v39 = vadd.f32 %v10865_v22, %v10713_v44  ;;  %v10978_v38 = vadd.f32 %v10867_v33, %v10717_v12  ;;  %v10982_v18 = vadd.f32 %v10859_v29, %v10721_v54 }
 0x47a   :  { %v10986_v25 = vadd.f32 %v10863_v49, %v10725_v61  ;;  %v10990_v37 = vadd.f32 %v10865_v22, %v10729_v0  ;;  %v10994_v30 = vadd.f32 %v10867_v33, %v10733_v2  ;;  %v10998_v44 = vadd.f32 %v10859_v29, %v10737_v43 }
 0x47b   :  { %v11002_v12 = vadd.f32 %v10863_v49, %v10741_v15  ;;  %v11006_v54 = vadd.f32 %v10865_v22, %v10745_v60  ;;  %v11010_v61 = vadd.f32 %v10867_v33, %v10749_v31  ;;  %v11014_v0 = vadd.f32 %v10859_v29, %v10753_v59 }
 0x47c   :  { %v11018_v2 = vadd.f32 %v10863_v49, %v10757_v28  ;;  %v11022_v43 = vadd.f32 %v10865_v22, %v10761_v34  ;;  %v11026_v15 = vadd.f32 %v10867_v33, %v10765_v63  ;;  %v11030_v60 = vadd.f32 %v10859_v29, %v10769_v16  ;;  %v13019_v34 = vld [vmem:[#allocation26_spill] sm:$0xff] }
 0x47d   :  { %v11034_v31 = vadd.f32 %v10863_v49, %v10773_v17  ;;  %v11038_v59 = vadd.f32 %v10865_v22, %v10777_v4  ;;  %v11042_v28 = vadd.f32 %v10867_v33, %v10785_v58  ;;  %v11046_v63 = vadd.f32 %v10859_v29, %v13019_v34  ;;  %v13024_v4 = vld [vmem:[#allocation29_spill] sm:$0xff]  ;;  %v13027_v34 = vld [vmem:[#allocation30_spill] sm:$0xff] }
 0x47e   :  { %v11050_v16 = vadd.f32 %v10863_v49, %v13021_v48  ;;  %v11054_v17 = vadd.f32 %v10865_v22, %v13023_v51  ;;  %v11065_v58 = vadd.f32 %v10863_v49, %v10801_v13  ;;  %v13029_v48 = vld [vmem:[#allocation57_spill] sm:$0xff]  ;;  %v13030_v51 = vld [vmem:[#allocation31_spill] sm:$0xff] }
 0x47f   :  { %13017 = vst [vmem:[#allocation22_spill] sm:$0xff] %v11034_v31  ;;  %v11057_v31 = vadd.f32 %v10867_v33, %v3185_v26  ;;  %v11077_v26 = vadd.f32 %v10859_v29, %v13030_v51  ;;  %v11097_v51 = vadd.f32 %v10863_v49, %v10833_v24  ;;  %v11117_v24 = vadd.f32 %v10865_v22, %v10853_v53 }
 0x480   :  { %13018 = vst [vmem:[#allocation44_spill] sm:$0xff] %v11038_v59  ;;  %v11061_v59 = vadd.f32 %v10859_v29, %v13024_v4  ;;  %v11081_v4 = vadd.f32 %v10863_v49, %v10817_v55  ;;  %v3282_v53 = vmax.f32 %v10906_v20, 0.0  ;;  %v3292_v20 = vmax.f32 %v10938_v56, 0.0 }
 0x481   :  { %13020 = vst [vmem:[#allocation45_spill] sm:$0xff] %v11046_v63  ;;  %v11069_v63 = vadd.f32 %v10865_v22, %v13027_v34  ;;  %v3302_v56 = vmax.f32 %v10978_v38, 0.0  ;;  %v3312_v38 = vmax.f32 %v11018_v2, 0.0  ;;  %v3322_v2 = vmax.f32 %v11057_v31, 0.0 }
 0x482   :  { %13022 = vst [vmem:[#allocation25_spill] sm:$0xff] %v11050_v16  ;;  %v11073_v16 = vadd.f32 %v10867_v33, %v13029_v48  ;;  %v3332_v31 = vmax.f32 %v11097_v51, 0.0 }
 0x483   :  { %13025 = vst [vmem:[#allocation47_spill] sm:$0xff] %v11061_v59  ;;  %v13033_v59 = vld [vmem:[#allocation32_spill] sm:$0xff] }
 0x484   :  { %13026 = vst [vmem:[#allocation48_spill] sm:$0xff] %v11065_v58  ;;  %v11085_v13 = vadd.f32 %v10865_v22, %v13033_v59  ;;  %v13034_v58 = vld [vmem:[#allocation35_spill] sm:$0xff] }
 0x485   :  { %13028 = vst [vmem:[#allocation28_spill] sm:$0xff] %v11069_v63  ;;  %v11089_v34 = vadd.f32 %v10867_v33, %v13034_v58  ;;  %v13035_v63 = vld [vmem:[#allocation36_spill] sm:$0xff]  ;;  %v11109_v58 = vadd.f32 %v10859_v29, %v10845_v62  ;;  %v3279_v62 = vmax.f32 %v10875_v5, 0.0  ;;  %v3289_v5 = vmax.f32 %v10926_v32, 0.0 }
 0x486   :  { %13031 = vst [vmem:[#allocation50_spill] sm:$0xff] %v11077_v26  ;;  %v11093_v48 = vadd.f32 %v10859_v29, %v13035_v63  ;;  %v13036_v26 = vld [vmem:[#allocation16_spill] sm:$0xff]  ;;  %v11113_v63 = vadd.f32 %v10863_v49, %v10849_v42  ;;  %v3280_v49 = vmax.f32 %v10898_v6, 0.0  ;;  %v3281_v42 = vmax.f32 %v10902_v45, 0.0 }
 0x487   :  { %13032 = vst [vmem:[#allocation51_spill] sm:$0xff] %v11081_v4  ;;  %v11101_v55 = vadd.f32 %v10865_v22, %v13036_v26  ;;  %v13038_v4 = vld [vmem:[#allocation38_spill] sm:$0xff]  ;;  %v11121_v26 = vadd.f32 %v10867_v33, %v10857_v11  ;;  %v3283_v22 = vmax.f32 %v10879_v21, 0.0  ;;  %v3284_v11 = vmax.f32 %v10910_v10, 0.0  ;;  %v13045_v35 = vld [vmem:[#allocation44_spill] sm:$0xff] }
 0x488   :  { %v11105_v59 = vadd.f32 %v10867_v33, %v13038_v4  ;;  %13040 = vst [vmem:[#allocation37_spill] sm:$0xff] %v11109_v58  ;;  %v3285_v33 = vmax.f32 %v10914_v50, 0.0  ;;  %v3286_v4 = vmax.f32 %v10918_v7, 0.0  ;;  %v3288_v29 = vmax.f32 %v10922_v27, 0.0  ;;  %v13046_v46 = vld [vmem:[#allocation45_spill] sm:$0xff] }
 0x489   :  { %13037 = vst [vmem:[#allocation55_spill] sm:$0xff] %v11101_v55  ;;  %v3290_v6 = vmax.f32 %v10930_v40, 0.0  ;;  %v3291_v45 = vmax.f32 %v10934_v52, 0.0  ;;  %v3293_v21 = vmax.f32 %v10942_v14, 0.0  ;;  %v3294_v10 = vmax.f32 %v10946_v9, 0.0  ;;  %v13044_v55 = vld [vmem:[#allocation22_spill] sm:$0xff] }
 0x48a   :  { %13039 = vst [vmem:[#allocation58_spill] sm:$0xff] %v11105_v59  ;;  %v3287_v59 = vmax.f32 %v10882_v1, 0.0  ;;  %v3295_v50 = vmax.f32 %v10950_v19, 0.0  ;;  %v3296_v7 = vmax.f32 %v10954_v36, 0.0  ;;  %v3297_v1 = vmax.f32 %v10958_v23, 0.0  ;;  %v13047_v41 = vld [vmem:[#allocation25_spill] sm:$0xff] }
 0x48b   :  { %13041 = vst [vmem:[#allocation59_spill] sm:$0xff] %v11113_v63  ;;  %v3298_v27 = vmax.f32 %v10962_v3, 0.0  ;;  %v3299_v32 = vmax.f32 %v10966_v8, 0.0  ;;  %v3300_v40 = vmax.f32 %v10970_v57, 0.0  ;;  %v3301_v52 = vmax.f32 %v10974_v39, 0.0  ;;  %v13048_v47 = vld [vmem:[#allocation47_spill] sm:$0xff] }
 0x48c   :  { %13042 = vst [vmem:[#allocation13_spill] sm:$0xff] %v11117_v24  ;;  %v3303_v14 = vmax.f32 %v10982_v18, 0.0  ;;  %v3304_v9 = vmax.f32 %v10986_v25, 0.0  ;;  %v3305_v19 = vmax.f32 %v10990_v37, 0.0  ;;  %v3306_v36 = vmax.f32 %v10994_v30, 0.0  ;;  %v13050_v24 = vld [vmem:[#allocation28_spill] sm:$0xff] }
 0x48d   :  { %13043 = vst [vmem:[#allocation60_spill] sm:$0xff] %v11121_v26  ;;  %v3307_v23 = vmax.f32 %v10998_v44, 0.0  ;;  %v3308_v3 = vmax.f32 %v11002_v12, 0.0  ;;  %v3309_v8 = vmax.f32 %v11006_v54, 0.0  ;;  %v3310_v57 = vmax.f32 %v11010_v61, 0.0  ;;  %v13049_v26 = vld [vmem:[#allocation48_spill] sm:$0xff] }
 0x48e   :  { %v3311_v39 = vmax.f32 %v11014_v0, 0.0  ;;  %v3313_v18 = vmax.f32 %v11022_v43, 0.0  ;;  %v3314_v25 = vmax.f32 %v11026_v15, 0.0  ;;  %v3315_v37 = vmax.f32 %v11030_v60, 0.0  ;;  %v13051_v63 = vld [vmem:[#allocation50_spill] sm:$0xff]  ;;  %v13052_v58 = vld [vmem:[#allocation51_spill] sm:$0xff] }
 0x48f   :  { %v3316_v30 = vmax.f32 %v13044_v55, 0.0  ;;  %v3317_v44 = vmax.f32 %v13045_v35, 0.0  ;;  %v3318_v12 = vmax.f32 %v11042_v28, 0.0  ;;  %v3319_v54 = vmax.f32 %v13046_v46, 0.0 }
 0x490   :  { %v3320_v61 = vmax.f32 %v13047_v41, 0.0  ;;  %v3321_v0 = vmax.f32 %v11054_v17, 0.0  ;;  %v3323_v43 = vmax.f32 %v13048_v47, 0.0  ;;  %v3324_v15 = vmax.f32 %v13049_v26, 0.0  ;;  %v13053_v47 = vld [vmem:[#allocation55_spill] sm:$0xff] }
 0x491   :  { %v3325_v60 = vmax.f32 %v13050_v24, 0.0  ;;  %v3326_v55 = vmax.f32 %v11073_v16, 0.0  ;;  %v3327_v35 = vmax.f32 %v13051_v63, 0.0  ;;  %v3328_v28 = vmax.f32 %v13052_v58, 0.0  ;;  %v13054_v24 = vld [vmem:[#allocation58_spill] sm:$0xff]  ;;  %v13055_v63 = vld [vmem:[#allocation37_spill] sm:$0xff] }
 0x492   :  { %v3329_v46 = vmax.f32 %v11085_v13, 0.0  ;;  %v3330_v41 = vmax.f32 %v11089_v34, 0.0  ;;  %v3331_v17 = vmax.f32 %v11093_v48, 0.0  ;;  %v3333_v26 = vmax.f32 %v13053_v47, 0.0  ;;  %v13056_v13 = vld [vmem:[#allocation59_spill] sm:$0xff] }
 0x493   :  { %v3334_v16 = vmax.f32 %v13054_v24, 0.0  ;;  %v3335_v58 = vmax.f32 %v13055_v63, 0.0  ;;  %v3336_v34 = vmax.f32 %v13056_v13, 0.0  ;;  %v13057_v48 = vld [vmem:[#allocation13_spill] sm:$0xff]  ;;  %v13059_v63 = vld [vmem:[#allocation39_spill] sm:$0xff] }
 0x494   :  { %v3337_v51 = vmax.f32 %v13057_v48, 0.0  ;;  %v13058_v47 = vld [vmem:[#allocation60_spill] sm:$0xff]  ;;  %v13060_v13 = vmax.f32 %v13059_v63, 0.0 }
 0x495   :  { %v3338_v24 = vmax.f32 %v13058_v47, 0.0  ;;  %v13062_v47 = vld [vmem:[#allocation19_spill] sm:$0xff] }
 0x496   :  { %v11189_v48 = vpack.c.bf16 %v3279_v62, %v13060_v13  ;;  %v13063_v63 = vmax.f32 %v13062_v47, 0.0  ;;  %v13065_v62 = vld [vmem:[#allocation41_spill] sm:$0xff] }
 0x498   :  { %13061 = vst [vmem:[#allocation43_spill] sm:$0xff] %v11189_v48  ;;  %v11193_v13 = vpack.c.bf16 %v3280_v49, %v13063_v63  ;;  %v13066_v48 = vmax.f32 %v13065_v62, 0.0  ;;  %v13068_v49 = vld [vmem:[#allocation42_spill] sm:$0xff]  ;;  %v11203_v62 = vpack.c.bf16 %v3287_v59, %v3283_v22  ;;  %v11219_v22 = vpack.c.bf16 %v3303_v14, %v3299_v32 }
 0x499   :  { %v13069_v63 = vmax.f32 %v13068_v49, 0.0  ;;  %v11211_v49 = vpack.c.bf16 %v3295_v50, %v3291_v45  ;;  %v11221_v59 = vpack.c.bf16 %v3304_v9, %v3300_v40  ;;  %v11237_v45 = vpack.c.bf16 %v3320_v61, %v3316_v30 }
 0x49a   :  { %13064 = vst [vmem:[#allocation61_spill] sm:$0xff] %v11193_v13  ;;  %v11197_v47 = vpack.c.bf16 %v3281_v42, %v13066_v48  ;;  %v11205_v42 = vpack.c.bf16 %v3288_v29, %v3284_v11  ;;  %v11207_v48 = vpack.c.bf16 %v3289_v5, %v3285_v33  ;;  %v11225_v29 = vpack.c.bf16 %v3306_v36, %v3302_v56 }
 0x49b   :  { %v11201_v13 = vpack.c.bf16 %v3282_v53, %v13069_v63  ;;  %13071 = vst [vmem:[#allocation40_spill] sm:$0xff] %v11203_v62  ;;  %v11213_v53 = vpack.c.bf16 %v3296_v7, %v3292_v20  ;;  %v11215_v63 = vpack.c.bf16 %v3297_v1, %v3293_v21  ;;  %v11223_v62 = vpack.c.bf16 %v3305_v19, %v3301_v52 }
 0x49c   :  { %13067 = vst [vmem:[#allocation62_spill] sm:$0xff] %v11197_v47  ;;  %v11209_v47 = vpack.c.bf16 %v3290_v6, %v3286_v4  ;;  %v11227_v11 = vpack.c.bf16 %v3311_v39, %v3307_v23  ;;  %v11229_v4 = vpack.c.bf16 %v3312_v38, %v3308_v3  ;;  %v11231_v33 = vpack.c.bf16 %v3313_v18, %v3309_v8 }
 0x49d   :  { %13070 = vst [vmem:[#allocation63_spill] sm:$0xff] %v11201_v13  ;;  %v11217_v13 = vpack.c.bf16 %v3298_v27, %v3294_v10  ;;  %v11233_v5 = vpack.c.bf16 %v3314_v25, %v3310_v57  ;;  %v11235_v6 = vpack.c.bf16 %v3319_v54, %v3315_v37  ;;  %v11239_v20 = vpack.c.bf16 %v3321_v0, %v3317_v44 }
 0x49e   :  { %v11241_v21 = vpack.c.bf16 %v3322_v2, %v3318_v12  ;;  %v11243_v10 = vpack.c.bf16 %v3327_v35, %v3323_v43  ;;  %v11245_v50 = vpack.c.bf16 %v3328_v28, %v3324_v15  ;;  %v11247_v7 = vpack.c.bf16 %v3329_v46, %v3325_v60 }
 0x49f   :  { %v11249_v1 = vpack.c.bf16 %v3330_v41, %v3326_v55  ;;  %v11251_v27 = vpack.c.bf16 %v3335_v58, %v3331_v17  ;;  %v11253_v32 = vpack.c.bf16 %v3336_v34, %v3332_v31  ;;  %v11255_v40 = vpack.c.bf16 %v3337_v51, %v3333_v26 }
 0x4a0   :  { %v11257_v52 = vpack.c.bf16 %v3338_v24, %v3334_v16 }
 0x4a1   :  { %7982 = dma.done.wait [#allocation4], 16384 }
 0x4a2   :  { %7983 = vsyncadd [#allocation4], 4294950912  ;;  %v7030_v56 = vld [vmem:[#allocation2 + $0xe0] sm:$0xf]  ;;  %v7784_v14 = vld [vmem:[#allocation2 + $0xec] sm:$0xf0] }
 0x4a3   :  { %v7158_v9 = vld [vmem:[#allocation2 + $0x1e0] sm:$0xf]  ;;  %v7031_v19 = vor.u32 %v7784_v14, %v7030_v56  ;;  %v7816_v36 = vld [vmem:[#allocation2 + $0x1ec] sm:$0xf0] }
 0x4a4   :  { %v7286_v23 = vld [vmem:[#allocation2 + $0x2e0] sm:$0xf]  ;;  %v7848_v3 = vld [vmem:[#allocation2 + $0x2ec] sm:$0xf0]  ;;  %v7159_v8 = vor.u32 %v7816_v36, %v7158_v9 }
 0x4a5   :  { %v7287_v57 = vor.u32 %v7848_v3, %v7286_v23  ;;  %v7414_v39 = vld [vmem:[#allocation2 + $0x3e0] sm:$0xf]  ;;  %v7880_v38 = vld [vmem:[#allocation2 + $0x3ec] sm:$0xf0]  ;;  %4143 = vmatpush.bf16.msrb.mxu0 %v7031_v19 }
 0x4a6   :  { %v7014_v18 = vld [vmem:[#allocation2 + $0xc0] sm:$0xf]  ;;  %v7415_v25 = vor.u32 %v7880_v38, %v7414_v39  ;;  %v7780_v37 = vld [vmem:[#allocation2 + $0xcc] sm:$0xf0]  ;;  %4192 = vmatpush.bf16.msrb.mxu1 %v7159_v8 }
 0x4a7   :  { %v7142_v30 = vld [vmem:[#allocation2 + $0x1c0] sm:$0xf]  ;;  %v7812_v44 = vld [vmem:[#allocation2 + $0x1cc] sm:$0xf0]  ;;  %4241 = vmatpush.bf16.msrb.mxu2 %v7287_v57  ;;  %v7015_v12 = vor.u32 %v7780_v37, %v7014_v18 }
 0x4a8   :  { %v7143_v54 = vor.u32 %v7812_v44, %v7142_v30  ;;  %v7270_v61 = vld [vmem:[#allocation2 + $0x2c0] sm:$0xf]  ;;  %v7844_v0 = vld [vmem:[#allocation2 + $0x2cc] sm:$0xf0]  ;;  %4290 = vmatpush.bf16.msrb.mxu3 %v7415_v25 }
 0x4a9   :  { %v7398_v2 = vld [vmem:[#allocation2 + $0x3c0] sm:$0xf]  ;;  %v7271_v43 = vor.u32 %v7844_v0, %v7270_v61  ;;  %v7876_v15 = vld [vmem:[#allocation2 + $0x3cc] sm:$0xf0]  ;;  %4144 = vmatpush.bf16.msrb.mxu0 %v7015_v12 }
 0x4aa   :  { %v6998_v60 = vld [vmem:[#allocation2 + $0xa0] sm:$0xf]  ;;  %v7776_v55 = vld [vmem:[#allocation2 + $0xac] sm:$0xf0]  ;;  %v7399_v35 = vor.u32 %v7876_v15, %v7398_v2  ;;  %4193 = vmatpush.bf16.msrb.mxu1 %v7143_v54 }
 0x4ab   :  { %v7126_v28 = vld [vmem:[#allocation2 + $0x1a0] sm:$0xf]  ;;  %v7808_v46 = vld [vmem:[#allocation2 + $0x1ac] sm:$0xf0]  ;;  %v6999_v17 = vor.u32 %v7776_v55, %v6998_v60  ;;  %4242 = vmatpush.bf16.msrb.mxu2 %v7271_v43 }
 0x4ac   :  { %v7254_v41 = vld [vmem:[#allocation2 + $0x2a0] sm:$0xf]  ;;  %v7840_v31 = vld [vmem:[#allocation2 + $0x2ac] sm:$0xf0]  ;;  %v7127_v58 = vor.u32 %v7808_v46, %v7126_v28  ;;  %4291 = vmatpush.bf16.msrb.mxu3 %v7399_v35 }
 0x4ad   :  { %v7382_v26 = vld [vmem:[#allocation2 + $0x3a0] sm:$0xf]  ;;  %v7872_v16 = vld [vmem:[#allocation2 + $0x3ac] sm:$0xf0]  ;;  %v7255_v34 = vor.u32 %v7840_v31, %v7254_v41  ;;  %4145 = vmatpush.bf16.msrb.mxu0 %v6999_v17 }
 0x4ae   :  { %v6982_v51 = vld [vmem:[#allocation2 + $0x80] sm:$0xf]  ;;  %v7772_v24 = vld [vmem:[#allocation2 + $0x8c] sm:$0xf0]  ;;  %v7383_v14 = vor.u32 %v7872_v16, %v7382_v26  ;;  %4194 = vmatpush.bf16.msrb.mxu1 %v7127_v58 }
 0x4af   :  { %v7110_v56 = vld [vmem:[#allocation2 + $0x180] sm:$0xf]  ;;  %v7804_v9 = vld [vmem:[#allocation2 + $0x18c] sm:$0xf0]  ;;  %v6983_v8 = vor.u32 %v7772_v24, %v6982_v51  ;;  %4243 = vmatpush.bf16.msrb.mxu2 %v7255_v34 }
 0x4b0   :  { %v7238_v19 = vld [vmem:[#allocation2 + $0x280] sm:$0xf]  ;;  %v7836_v36 = vld [vmem:[#allocation2 + $0x28c] sm:$0xf0]  ;;  %v7111_v57 = vor.u32 %v7804_v9, %v7110_v56  ;;  %4292 = vmatpush.bf16.msrb.mxu3 %v7383_v14 }
 0x4b1   :  { %v7366_v23 = vld [vmem:[#allocation2 + $0x380] sm:$0xf]  ;;  %v7868_v3 = vld [vmem:[#allocation2 + $0x38c] sm:$0xf0]  ;;  %v7239_v39 = vor.u32 %v7836_v36, %v7238_v19  ;;  %4146 = vmatpush.bf16.msrb.mxu0 %v6983_v8 }
 0x4b2   :  { %v6966_v38 = vld [vmem:[#allocation2 + $0x60] sm:$0xf]  ;;  %v7768_v18 = vld [vmem:[#allocation2 + $0x6c] sm:$0xf0]  ;;  %v7367_v37 = vor.u32 %v7868_v3, %v7366_v23  ;;  %4195 = vmatpush.bf16.msrb.mxu1 %v7111_v57 }
 0x4b3   :  { %v7094_v25 = vld [vmem:[#allocation2 + $0x160] sm:$0xf]  ;;  %v7800_v30 = vld [vmem:[#allocation2 + $0x16c] sm:$0xf0]  ;;  %v6967_v0 = vor.u32 %v7768_v18, %v6966_v38  ;;  %4244 = vmatpush.bf16.msrb.mxu2 %v7239_v39 }
 0x4b4   :  { %v7222_v44 = vld [vmem:[#allocation2 + $0x260] sm:$0xf]  ;;  %v7832_v12 = vld [vmem:[#allocation2 + $0x26c] sm:$0xf0]  ;;  %v7095_v2 = vor.u32 %v7800_v30, %v7094_v25  ;;  %4293 = vmatpush.bf16.msrb.mxu3 %v7367_v37 }
 0x4b5   :  { %v7350_v54 = vld [vmem:[#allocation2 + $0x360] sm:$0xf]  ;;  %v7864_v61 = vld [vmem:[#allocation2 + $0x36c] sm:$0xf0]  ;;  %v7223_v43 = vor.u32 %v7832_v12, %v7222_v44  ;;  %4147 = vmatpush.bf16.msrb.mxu0 %v6967_v0  ;;  %v7288_v0 = vld [vmem:[#allocation2 + $0x2f0] sm:$0xf0] }
 0x4b6   :  { %v6950_v15 = vld [vmem:[#allocation2 + $0x40] sm:$0xf]  ;;  %v7764_v60 = vld [vmem:[#allocation2 + $0x4c] sm:$0xf0]  ;;  %v7351_v35 = vor.u32 %v7864_v61, %v7350_v54  ;;  %4196 = vmatpush.bf16.msrb.mxu1 %v7095_v2  ;;  %v7846_v61 = vld [vmem:[#allocation2 + $0x2e4] sm:$0xf] }
 0x4b7   :  { %v7078_v55 = vld [vmem:[#allocation2 + $0x140] sm:$0xf]  ;;  %v7796_v28 = vld [vmem:[#allocation2 + $0x14c] sm:$0xf0]  ;;  %v6951_v26 = vor.u32 %v7764_v60, %v6950_v15  ;;  %4245 = vmatpush.bf16.msrb.mxu2 %v7223_v43  ;;  %v7878_v43 = vld [vmem:[#allocation2 + $0x3e4] sm:$0xf] }
 0x4b8   :  { %v7206_v46 = vld [vmem:[#allocation2 + $0x240] sm:$0xf]  ;;  %v7828_v41 = vld [vmem:[#allocation2 + $0x24c] sm:$0xf0]  ;;  %v7079_v16 = vor.u32 %v7796_v28, %v7078_v55  ;;  %4294 = vmatpush.bf16.msrb.mxu3 %v7351_v35  ;;  %v7416_v15 = vld [vmem:[#allocation2 + $0x3f0] sm:$0xf0]  ;;  %v7291_v28 = vor.u32 %v7846_v61, %v7288_v0 }
 0x4b9   :  { %v7334_v17 = vld [vmem:[#allocation2 + $0x340] sm:$0xf]  ;;  %v7860_v31 = vld [vmem:[#allocation2 + $0x34c] sm:$0xf0]  ;;  %v7207_v58 = vor.u32 %v7828_v41, %v7206_v46  ;;  %4148 = vmatpush.bf16.msrb.mxu0 %v6951_v26  ;;  %v7782_v46 = vld [vmem:[#allocation2 + $0xe4] sm:$0xf] }
 0x4ba   :  { %v6934_v34 = vld [vmem:[#allocation2 + $0x20] sm:$0xf]  ;;  %v7760_v51 = vld [vmem:[#allocation2 + $0x2c] sm:$0xf0]  ;;  %v7335_v56 = vor.u32 %v7860_v31, %v7334_v17  ;;  %4197 = vmatpush.bf16.msrb.mxu1 %v7079_v16  ;;  %v7032_v41 = vld [vmem:[#allocation2 + $0xf0] sm:$0xf0]  ;;  %v7419_v31 = vor.u32 %v7878_v43, %v7416_v15 }
 0x4bb   :  { %v7062_v24 = vld [vmem:[#allocation2 + $0x120] sm:$0xf]  ;;  %v7792_v14 = vld [vmem:[#allocation2 + $0x12c] sm:$0xf0]  ;;  %v6935_v3 = vor.u32 %v7760_v51, %v6934_v34  ;;  %4246 = vmatpush.bf16.msrb.mxu2 %v7207_v58  ;;  %v7814_v17 = vld [vmem:[#allocation2 + $0x1e4] sm:$0xf] }
 0x4bc   :  { %v7190_v9 = vld [vmem:[#allocation2 + $0x220] sm:$0xf]  ;;  %v7824_v19 = vld [vmem:[#allocation2 + $0x22c] sm:$0xf0]  ;;  %v7063_v57 = vor.u32 %v7792_v14, %v7062_v24  ;;  %4295 = vmatpush.bf16.msrb.mxu3 %v7335_v56  ;;  %v7160_v26 = vld [vmem:[#allocation2 + $0x1f0] sm:$0xf0]  ;;  %v7035_v24 = vor.u32 %v7782_v46, %v7032_v41 }
 0x4bd   :  { %v7318_v36 = vld [vmem:[#allocation2 + $0x320] sm:$0xf]  ;;  %v7856_v23 = vld [vmem:[#allocation2 + $0x32c] sm:$0xf0]  ;;  %v7191_v39 = vor.u32 %v7824_v19, %v7190_v9  ;;  %4149 = vmatpush.bf16.msrb.mxu0 %v6935_v3  ;;  %v7842_v16 = vld [vmem:[#allocation2 + $0x2c4] sm:$0xf]  ;;  %v7163_v56 = vor.u32 %v7814_v17, %v7160_v26 }
 0x4be   :  { %v6918_v8 = vld [vmem:[#allocation2] sm:$0xf]  ;;  %v7756_v38 = vld [vmem:[#allocation2 + $0xc] sm:$0xf0]  ;;  %v7319_v37 = vor.u32 %v7856_v23, %v7318_v36  ;;  %4198 = vmatpush.bf16.msrb.mxu1 %v7063_v57  ;;  %v7272_v58 = vld [vmem:[#allocation2 + $0x2d0] sm:$0xf0] }
 0x4bf   :  { %v7046_v18 = vld [vmem:[#allocation2 + $0x100] sm:$0xf]  ;;  %v7788_v25 = vld [vmem:[#allocation2 + $0x10c] sm:$0xf0]  ;;  %v6919_v2 = vor.u32 %v7756_v38, %v6918_v8  ;;  %4247 = vmatpush.bf16.msrb.mxu2 %v7191_v39  ;;  %v7874_v34 = vld [vmem:[#allocation2 + $0x3c4] sm:$0xf]  ;;  %v7275_v14 = vor.u32 %v7842_v16, %v7272_v58 }
 0x4c0   :  { %v7174_v30 = vld [vmem:[#allocation2 + $0x200] sm:$0xf]  ;;  %v7820_v44 = vld [vmem:[#allocation2 + $0x20c] sm:$0xf0]  ;;  %v7047_v60 = vor.u32 %v7788_v25, %v7046_v18  ;;  %4296 = vmatpush.bf16.msrb.mxu3 %v7319_v37  ;;  %v7400_v51 = vld [vmem:[#allocation2 + $0x3d0] sm:$0xf0] }
 0x4c1   :  { %v7302_v12 = vld [vmem:[#allocation2 + $0x300] sm:$0xf]  ;;  %v7852_v54 = vld [vmem:[#allocation2 + $0x30c] sm:$0xf0]  ;;  %v7175_v55 = vor.u32 %v7820_v44, %v7174_v30  ;;  %4150 = vmatpush.bf16.msrb.mxu0 %v6919_v2  ;;  %v7778_v9 = vld [vmem:[#allocation2 + $0xc4] sm:$0xf]  ;;  %v7403_v23 = vor.u32 %v7874_v34, %v7400_v51 }
 0x4c2   :  { %v7303_v35 = vor.u32 %v7852_v54, %v7302_v12  ;;  %4199 = vmatpush.bf16.msrb.mxu1 %v7047_v60  ;;  %v7016_v19 = vld [vmem:[#allocation2 + $0xd0] sm:$0xf0]  ;;  %v7810_v3 = vld [vmem:[#allocation2 + $0x1c4] sm:$0xf]  ;;  %v13074_v39 = vld [vmem:[#allocation62_spill] sm:$0xff] }
 0x4c3   :  { %4248 = vmatpush.bf16.msrb.mxu2 %v7175_v55  ;;  %v13072_v36 = vld [vmem:[#allocation43_spill] sm:$0xff]  ;;  %v13073_v57 = vld [vmem:[#allocation61_spill] sm:$0xff]  ;;  %v7019_v18 = vor.u32 %v7778_v9, %v7016_v19 }
 0x4c4   :  { %4297 = vmatpush.bf16.msrb.mxu3 %v7303_v35  ;;  %4151 = vmatmul.bf16.vlgmr.msrb.gmra.mxu0 %v13072_v36  ;;  %v7144_v8 = vld [vmem:[#allocation2 + $0x1d0] sm:$0xf0]  ;;  %v7838_v25 = vld [vmem:[#allocation2 + $0x2a4] sm:$0xf]  ;;  %v13076_v35 = vld [vmem:[#allocation40_spill] sm:$0xff] }
 0x4c5   :  { %4200 = vmatmul.bf16.vlgmr.msrb.gmra.mxu1 %v13073_v57  ;;  %v13075_v38 = vld [vmem:[#allocation63_spill] sm:$0xff]  ;;  %4339 = vmatpush.bf16.msra.mxu0 %v7035_v24  ;;  %v7870_v30 = vld [vmem:[#allocation2 + $0x3a4] sm:$0xf]  ;;  %v7147_v44 = vor.u32 %v7810_v3, %v7144_v8 }
 0x4c6   :  { %4249 = vmatmul.bf16.vlgmr.msrb.gmra.mxu2 %v13074_v39  ;;  %v7256_v37 = vld [vmem:[#allocation2 + $0x2b0] sm:$0xf0]  ;;  %4388 = vmatpush.bf16.msra.mxu1 %v7163_v56  ;;  %v7774_v61 = vld [vmem:[#allocation2 + $0xa4] sm:$0xf] }
 0x4c7   :  { %4437 = vmatpush.bf16.msra.mxu2 %v7291_v28  ;;  %4298 = vmatmul.bf16.vlgmr.msrb.gmra.mxu3 %v13075_v38  ;;  %v7259_v12 = vor.u32 %v7838_v25, %v7256_v37  ;;  %v7384_v54 = vld [vmem:[#allocation2 + $0x3b0] sm:$0xf0]  ;;  %v7806_v43 = vld [vmem:[#allocation2 + $0x1a4] sm:$0xf] }
 0x4c8   :  { %4486 = vmatpush.bf16.msra.mxu3 %v7419_v31  ;;  %v7000_v0 = vld [vmem:[#allocation2 + $0xb0] sm:$0xf0]  ;;  %v7387_v2 = vor.u32 %v7870_v30, %v7384_v54  ;;  %v7834_v28 = vld [vmem:[#allocation2 + $0x284] sm:$0xf] }
 0x4c9   :  { %v7128_v15 = vld [vmem:[#allocation2 + $0x1b0] sm:$0xf0]  ;;  %4340 = vmatpush.bf16.msra.mxu0 %v7019_v18  ;;  %v7003_v60 = vor.u32 %v7774_v61, %v7000_v0  ;;  %v7866_v41 = vld [vmem:[#allocation2 + $0x384] sm:$0xf] }
 0x4ca   :  { %4389 = vmatpush.bf16.msra.mxu1 %v7147_v44  ;;  %v7131_v55 = vor.u32 %v7806_v43, %v7128_v15  ;;  %v7240_v46 = vld [vmem:[#allocation2 + $0x290] sm:$0xf0]  ;;  %v7770_v26 = vld [vmem:[#allocation2 + $0x84] sm:$0xf] }
 0x4cb   :  { %4438 = vmatpush.bf16.msra.mxu2 %v7275_v14  ;;  %v7243_v17 = vor.u32 %v7834_v28, %v7240_v46  ;;  %v7368_v31 = vld [vmem:[#allocation2 + $0x390] sm:$0xf0]  ;;  %v7802_v51 = vld [vmem:[#allocation2 + $0x184] sm:$0xf] }
 0x4cc   :  { %4487 = vmatpush.bf16.msra.mxu3 %v7403_v23  ;;  %v6984_v16 = vld [vmem:[#allocation2 + $0x90] sm:$0xf0]  ;;  %v7371_v58 = vor.u32 %v7866_v41, %v7368_v31  ;;  %v7830_v14 = vld [vmem:[#allocation2 + $0x264] sm:$0xf] }
 0x4cd   :  { %4341 = vmatpush.bf16.msra.mxu0 %v7003_v60  ;;  %v6987_v34 = vor.u32 %v7770_v26, %v6984_v16  ;;  %v7112_v24 = vld [vmem:[#allocation2 + $0x190] sm:$0xf0]  ;;  %v7862_v19 = vld [vmem:[#allocation2 + $0x364] sm:$0xf] }
 0x4ce   :  { %4390 = vmatpush.bf16.msra.mxu1 %v7131_v55  ;;  %v7115_v56 = vor.u32 %v7802_v51, %v7112_v24  ;;  %v7224_v9 = vld [vmem:[#allocation2 + $0x270] sm:$0xf0]  ;;  %v7766_v8 = vld [vmem:[#allocation2 + $0x64] sm:$0xf] }
 0x4cf   :  { %4439 = vmatpush.bf16.msra.mxu2 %v7259_v12  ;;  %v7227_v23 = vor.u32 %v7830_v14, %v7224_v9  ;;  %v7352_v3 = vld [vmem:[#allocation2 + $0x370] sm:$0xf0]  ;;  %v7798_v30 = vld [vmem:[#allocation2 + $0x164] sm:$0xf] }
 0x4d0   :  { %4488 = vmatpush.bf16.msra.mxu3 %v7387_v2  ;;  %v6968_v18 = vld [vmem:[#allocation2 + $0x70] sm:$0xf0]  ;;  %v7355_v25 = vor.u32 %v7862_v19, %v7352_v3  ;;  %v7826_v54 = vld [vmem:[#allocation2 + $0x244] sm:$0xf] }
 0x4d1   :  { %4342 = vmatpush.bf16.msra.mxu0 %v6987_v34  ;;  %v6971_v37 = vor.u32 %v7766_v8, %v6968_v18  ;;  %v7096_v44 = vld [vmem:[#allocation2 + $0x170] sm:$0xf0]  ;;  %v7858_v0 = vld [vmem:[#allocation2 + $0x344] sm:$0xf] }
 0x4d2   :  { %4391 = vmatpush.bf16.msra.mxu1 %v7115_v56  ;;  %v7099_v12 = vor.u32 %v7798_v30, %v7096_v44  ;;  %v7208_v61 = vld [vmem:[#allocation2 + $0x250] sm:$0xf0]  ;;  %v7762_v15 = vld [vmem:[#allocation2 + $0x44] sm:$0xf] }
 0x4d3   :  { %4440 = vmatpush.bf16.msra.mxu2 %v7243_v17  ;;  %v7211_v2 = vor.u32 %v7826_v54, %v7208_v61  ;;  %v7336_v43 = vld [vmem:[#allocation2 + $0x350] sm:$0xf0]  ;;  %v7794_v46 = vld [vmem:[#allocation2 + $0x144] sm:$0xf] }
 0x4d4   :  { %4156 = vmatmul.bf16.gmra.mxu0 %v13076_v35  ;;  %4489 = vmatpush.bf16.msra.mxu3 %v7371_v58  ;;  %v6952_v60 = vld [vmem:[#allocation2 + $0x50] sm:$0xf0]  ;;  %v7339_v55 = vor.u32 %v7858_v0, %v7336_v43  ;;  %v7822_v31 = vld [vmem:[#allocation2 + $0x224] sm:$0xf]  ;;  %v7294_v43 = vld [vmem:[#allocation2 + $0x2e8] sm:$0xf] }
 0x4d5   :  { %4205 = vmatmul.bf16.gmra.mxu1 %v11205_v42  ;;  %4343 = vmatpush.bf16.msra.mxu0 %v6971_v37  ;;  %v6955_v28 = vor.u32 %v7762_v15, %v6952_v60  ;;  %v7080_v41 = vld [vmem:[#allocation2 + $0x150] sm:$0xf0]  ;;  %v7854_v16 = vld [vmem:[#allocation2 + $0x324] sm:$0xf]  ;;  %v7849_v15 = vld [vmem:[#allocation2 + $0x2f4] sm:$0xf0] }
 0x4d6   :  { %4254 = vmatmul.bf16.gmra.mxu2 %v11207_v48  ;;  %4392 = vmatpush.bf16.msra.mxu1 %v7099_v12  ;;  %v7083_v17 = vor.u32 %v7794_v46, %v7080_v41  ;;  %v7192_v26 = vld [vmem:[#allocation2 + $0x230] sm:$0xf0]  ;;  %v7758_v51 = vld [vmem:[#allocation2 + $0x24] sm:$0xf]  ;;  %v7422_v60 = vld [vmem:[#allocation2 + $0x3e8] sm:$0xf] }
 0x4d7   :  { %4303 = vmatmul.bf16.gmra.mxu3 %v11209_v47  ;;  %4441 = vmatpush.bf16.msra.mxu2 %v7227_v23  ;;  %v7195_v58 = vor.u32 %v7822_v31, %v7192_v26  ;;  %v7320_v34 = vld [vmem:[#allocation2 + $0x330] sm:$0xf0]  ;;  %v7790_v9 = vld [vmem:[#allocation2 + $0x124] sm:$0xf]  ;;  %v7038_v41 = vld [vmem:[#allocation2 + $0xe8] sm:$0xf] }
 0x4d8   :  { %4490 = vmatpush.bf16.msra.mxu3 %v7355_v25  ;;  %v6936_v24 = vld [vmem:[#allocation2 + $0x30] sm:$0xf0]  ;;  %v7323_v56 = vor.u32 %v7854_v16, %v7320_v34  ;;  %v7818_v3 = vld [vmem:[#allocation2 + $0x204] sm:$0xf]  ;;  %v7166_v31 = vld [vmem:[#allocation2 + $0x1e8] sm:$0xf] }
 0x4d9   :  { %4344 = vmatpush.bf16.msra.mxu0 %v6955_v28  ;;  %v6939_v14 = vor.u32 %v7758_v51, %v6936_v24  ;;  %v7064_v19 = vld [vmem:[#allocation2 + $0x130] sm:$0xf0]  ;;  %v7850_v18 = vld [vmem:[#allocation2 + $0x304] sm:$0xf]  ;;  %v7881_v28 = vld [vmem:[#allocation2 + $0x3f4] sm:$0xf0] }
 0x4da   :  { %4393 = vmatpush.bf16.msra.mxu1 %v7083_v17  ;;  %v7067_v23 = vor.u32 %v7790_v9, %v7064_v19  ;;  %v7176_v8 = vld [vmem:[#allocation2 + $0x210] sm:$0xf0]  ;;  %v7754_v30 = vld [vmem:[#allocation2 + $0x4] sm:$0xf]  ;;  %v7423_v46 = vor.u32 %v7881_v28, %v7422_v60  ;;  %v7785_v17 = vld [vmem:[#allocation2 + $0xf4] sm:$0xf0] }
 0x4db   :  { %4442 = vmatpush.bf16.msra.mxu2 %v7211_v2  ;;  %v7179_v25 = vor.u32 %v7818_v3, %v7176_v8  ;;  %v7304_v37 = vld [vmem:[#allocation2 + $0x310] sm:$0xf0]  ;;  %v7786_v61 = vld [vmem:[#allocation2 + $0x104] sm:$0xf]  ;;  %v7039_v26 = vor.u32 %v7785_v17, %v7038_v41  ;;  %v7817_v16 = vld [vmem:[#allocation2 + $0x1f4] sm:$0xf0] }
 0x4dc   :  { %4491 = vmatpush.bf16.msra.mxu3 %v7339_v55  ;;  %v6920_v44 = vld [vmem:[#allocation2 + $0x10] sm:$0xf0]  ;;  %v7307_v12 = vor.u32 %v7850_v18, %v7304_v37  ;;  %v7295_v55 = vor.u32 %v7849_v15, %v7294_v43  ;;  %v7278_v34 = vld [vmem:[#allocation2 + $0x2c8] sm:$0xf]  ;;  %v7845_v51 = vld [vmem:[#allocation2 + $0x2d4] sm:$0xf0] }
 0x4dd   :  { %4345 = vmatpush.bf16.msra.mxu0 %v6939_v14  ;;  %v6923_v54 = vor.u32 %v7754_v30, %v6920_v44  ;;  %v7048_v0 = vld [vmem:[#allocation2 + $0x110] sm:$0xf0]  ;;  %v7406_v24 = vld [vmem:[#allocation2 + $0x3c8] sm:$0xf]  ;;  %v7877_v14 = vld [vmem:[#allocation2 + $0x3d4] sm:$0xf0] }
 0x4de   :  { %4394 = vmatpush.bf16.msra.mxu1 %v7067_v23  ;;  %v7051_v2 = vor.u32 %v7786_v61, %v7048_v0  ;;  %v7407_v9 = vor.u32 %v7877_v14, %v7406_v24  ;;  %v7022_v19 = vld [vmem:[#allocation2 + $0xc8] sm:$0xf]  ;;  %v7781_v23 = vld [vmem:[#allocation2 + $0xd4] sm:$0xf0] }
 0x4df   :  { %4443 = vmatpush.bf16.msra.mxu2 %v7195_v58  ;;  %v7167_v58 = vor.u32 %v7817_v16, %v7166_v31  ;;  %v7150_v3 = vld [vmem:[#allocation2 + $0x1c8] sm:$0xf]  ;;  %v7023_v8 = vor.u32 %v7781_v23, %v7022_v19  ;;  %v7813_v18 = vld [vmem:[#allocation2 + $0x1d4] sm:$0xf0] }
 0x4e0   :  { %4492 = vmatpush.bf16.msra.mxu3 %v7323_v56  ;;  %v7279_v56 = vor.u32 %v7845_v51, %v7278_v34  ;;  %v7151_v37 = vor.u32 %v7813_v18, %v7150_v3  ;;  %v7390_v61 = vld [vmem:[#allocation2 + $0x3a8] sm:$0xf]  ;;  %v7873_v43 = vld [vmem:[#allocation2 + $0x3b4] sm:$0xf0] }
 0x4e1   :  { %4346 = vmatpush.bf16.msra.mxu0 %v6923_v54  ;;  %v7841_v54 = vld [vmem:[#allocation2 + $0x2b4] sm:$0xf0]  ;;  %v7391_v28 = vor.u32 %v7873_v43, %v7390_v61  ;;  %v7006_v31 = vld [vmem:[#allocation2 + $0xa8] sm:$0xf] }
 0x4e2   :  { %4395 = vmatpush.bf16.msra.mxu1 %v7051_v2  ;;  %v7134_v16 = vld [vmem:[#allocation2 + $0x1a8] sm:$0xf]  ;;  %v7809_v51 = vld [vmem:[#allocation2 + $0x1b4] sm:$0xf0] }
 0x4e3   :  { %4444 = vmatpush.bf16.msra.mxu2 %v7179_v25  ;;  %v7837_v18 = vld [vmem:[#allocation2 + $0x294] sm:$0xf0] }
 0x4e4   :  { %4161 = vmatmul.bf16.gmra.mxu0 %v11211_v49  ;;  %4493 = vmatpush.bf16.msra.mxu3 %v7307_v12  ;;  %v7262_v12 = vld [vmem:[#allocation2 + $0x2a8] sm:$0xf] }
 0x4e5   :  { %4210 = vmatmul.bf16.gmra.mxu1 %v11213_v53  ;;  %4535 = vmatpush.bf16.msrb.mxu0 %v7039_v26  ;;  %v7263_v2 = vor.u32 %v7841_v54, %v7262_v12  ;;  %v7777_v26 = vld [vmem:[#allocation2 + $0xb4] sm:$0xf0] }
 0x4e6   :  { %4259 = vmatmul.bf16.gmra.mxu2 %v11215_v63  ;;  %4584 = vmatpush.bf16.msrb.mxu1 %v7167_v58  ;;  %v7007_v34 = vor.u32 %v7777_v26, %v7006_v31  ;;  %v7805_v31 = vld [vmem:[#allocation2 + $0x194] sm:$0xf0] }
 0x4e7   :  { %4308 = vmatmul.bf16.gmra.mxu3 %v11217_v13  ;;  %4633 = vmatpush.bf16.msrb.mxu2 %v7295_v55 }
 0x4e8   :  { %4682 = vmatpush.bf16.msrb.mxu3 %v7423_v46 }
 0x4e9   :  { %4536 = vmatpush.bf16.msrb.mxu0 %v7023_v8  ;;  %v7246_v8 = vld [vmem:[#allocation2 + $0x288] sm:$0xf] }
 0x4ea   :  { %4585 = vmatpush.bf16.msrb.mxu1 %v7151_v37 }
 0x4eb   :  { %4634 = vmatpush.bf16.msrb.mxu2 %v7279_v56 }
 0x4ec   :  { %4683 = vmatpush.bf16.msrb.mxu3 %v7407_v9  ;;  %v7135_v9 = vor.u32 %v7809_v51, %v7134_v16 }
 0x4ed   :  { %4537 = vmatpush.bf16.msrb.mxu0 %v7007_v34 }
 0x4ee   :  { %4586 = vmatpush.bf16.msrb.mxu1 %v7135_v9  ;;  %v7833_v9 = vld [vmem:[#allocation2 + $0x274] sm:$0xf0] }
 0x4ef   :  { %4635 = vmatpush.bf16.msrb.mxu2 %v7263_v2 }
 0x4f0   :  { %4684 = vmatpush.bf16.msrb.mxu3 %v7391_v28  ;;  %v7118_v28 = vld [vmem:[#allocation2 + $0x188] sm:$0xf] }
 0x4f1   :  { %v7119_v34 = vor.u32 %v7805_v31, %v7118_v28  ;;  %v7801_v28 = vld [vmem:[#allocation2 + $0x174] sm:$0xf0] }
 0x4f3   :  { %4587 = vmatpush.bf16.msrb.mxu1 %v7119_v34 }
 0x4f4   :  { %4166 = vmatmul.bf16.gmra.mxu0 %v11219_v22 }
 0x4f5   :  { %4215 = vmatmul.bf16.gmra.mxu1 %v11221_v59 }
 0x4f6   :  { %4264 = vmatmul.bf16.gmra.mxu2 %v11223_v62 }
 0x4f7   :  { %4313 = vmatmul.bf16.gmra.mxu3 %v11225_v29 }
 0x504   :  { %4171 = vmatmul.bf16.gmra.mxu0 %v11227_v11 }
 0x505   :  { %4220 = vmatmul.bf16.gmra.mxu1 %v11229_v4 }
 0x506   :  { %4269 = vmatmul.bf16.gmra.mxu2 %v11231_v33 }
 0x507   :  { %4318 = vmatmul.bf16.gmra.mxu3 %v11233_v5 }
 0x514   :  { %4176 = vmatmul.bf16.gmra.mxu0 %v11235_v6 }
 0x515   :  { %4225 = vmatmul.bf16.gmra.mxu1 %v11237_v45 }
 0x516   :  { %4274 = vmatmul.bf16.gmra.mxu2 %v11239_v20 }
 0x517   :  { %4323 = vmatmul.bf16.gmra.mxu3 %v11241_v21 }
 0x524   :  { %4181 = vmatmul.bf16.gmra.mxu0 %v11243_v10 }
 0x525   :  { %4230 = vmatmul.bf16.gmra.mxu1 %v11245_v50 }
 0x526   :  { %4279 = vmatmul.bf16.gmra.mxu2 %v11247_v7 }
 0x527   :  { %4328 = vmatmul.bf16.gmra.mxu3 %v11249_v1 }
 0x534   :  { %4186 = vmatmul.bf16.gmra.mxu0 %v11251_v27 }
 0x535   :  { %4235 = vmatmul.bf16.gmra.mxu1 %v11253_v32 }
 0x536   :  { %4284 = vmatmul.bf16.gmra.mxu2 %v11255_v40 }
 0x537   :  { %4333 = vmatmul.bf16.gmra.mxu3 %v11257_v52 }
 0x541   :  { %v4152_v25 = vpop.f32.mrf.mxu0 }
 0x542   :  { %v4201_v30 = vpop.f32.mrf.mxu1 }
 0x543   :  { %v4202_v44 = vadd.f32 %v4201_v30, %v4152_v25  ;;  %v7374_v25 = vld [vmem:[#allocation2 + $0x388] sm:$0xf]  ;;  %v7247_v30 = vor.u32 %v7837_v18, %v7246_v8  ;;  %v7865_v18 = vld [vmem:[#allocation2 + $0x374] sm:$0xf0] }
 0x544   :  { %4347 = vmatmul.bf16.vlgmr.msra.gmra.mxu0 %v13072_v36 }
 0x545   :  { %4396 = vmatmul.bf16.vlgmr.msra.gmra.mxu1 %v13073_v57  ;;  %4636 = vmatpush.bf16.msrb.mxu2 %v7247_v30 }
 0x546   :  { %4445 = vmatmul.bf16.vlgmr.msra.gmra.mxu2 %v13074_v39 }
 0x547   :  { %4494 = vmatmul.bf16.vlgmr.msra.gmra.mxu3 %v13075_v38 }
 0x549   :  { %v4250_v0 = vpop.f32.mrf.mxu2  ;;  %v4154_v55 = vpop.f32.mrf.mxu0 }
 0x54a   :  { %v4251_v15 = vadd.f32 %v4250_v0, %v4202_v44  ;;  %v4299_v60 = vpop.f32.mrf.mxu3  ;;  %v4203_v46 = vpop.f32.mrf.mxu1  ;;  %v7869_v44 = vld [vmem:[#allocation2 + $0x394] sm:$0xf0] }
 0x54b   :  { %v4204_v17 = vadd.f32 %v4203_v46, %v4154_v55  ;;  %v7375_v0 = vor.u32 %v7869_v44, %v7374_v25  ;;  %v7773_v55 = vld [vmem:[#allocation2 + $0x94] sm:$0xf0] }
 0x54c   :  { %v11295_v41 = vadd.f32 %v4299_v60, %v4251_v15  ;;  %v6990_v60 = vld [vmem:[#allocation2 + $0x88] sm:$0xf] }
 0x54d   :  { %4685 = vmatpush.bf16.msrb.mxu3 %v7375_v0  ;;  %v6974_v0 = vld [vmem:[#allocation2 + $0x68] sm:$0xf] }
 0x54e   :  { %13077 = vst [vmem:[#allocation64_spill] sm:$0xff] %v11295_v41 }
 0x551   :  { %v4252_v58 = vpop.f32.mrf.mxu2  ;;  %v4157_v14 = vpop.f32.mrf.mxu0 }
 0x552   :  { %v4253_v24 = vadd.f32 %v4252_v58, %v4204_v17  ;;  %v4301_v56 = vpop.f32.mrf.mxu3  ;;  %v4206_v19 = vpop.f32.mrf.mxu1  ;;  %v6991_v17 = vor.u32 %v7773_v55, %v6990_v60 }
 0x553   :  { %v4207_v3 = vadd.f32 %v4206_v19, %v4157_v14  ;;  %v7230_v14 = vld [vmem:[#allocation2 + $0x268] sm:$0xf] }
 0x554   :  { %v11297_v23 = vadd.f32 %v4301_v56, %v4253_v24  ;;  %4352 = vmatmul.bf16.gmra.mxu0 %v13076_v35  ;;  %v7358_v19 = vld [vmem:[#allocation2 + $0x368] sm:$0xf]  ;;  %v7231_v8 = vor.u32 %v7833_v9, %v7230_v14 }
 0x555   :  { %4401 = vmatmul.bf16.gmra.mxu1 %v11205_v42  ;;  %4538 = vmatpush.bf16.msrb.mxu0 %v6991_v17  ;;  %v7359_v44 = vor.u32 %v7865_v18, %v7358_v19  ;;  %v7342_v14 = vld [vmem:[#allocation2 + $0x348] sm:$0xf] }
 0x556   :  { %13078 = vst [vmem:[#allocation17_spill] sm:$0xff] %v11297_v23  ;;  %4450 = vmatmul.bf16.gmra.mxu2 %v11207_v48 }
 0x557   :  { %4499 = vmatmul.bf16.gmra.mxu3 %v11209_v47  ;;  %4637 = vmatpush.bf16.msrb.mxu2 %v7231_v8 }
 0x558   :  { %4686 = vmatpush.bf16.msrb.mxu3 %v7359_v44 }
 0x559   :  { %v4255_v37 = vpop.f32.mrf.mxu2  ;;  %v4159_v61 = vpop.f32.mrf.mxu0 }
 0x55a   :  { %v4256_v12 = vadd.f32 %v4255_v37, %v4207_v3  ;;  %v4304_v54 = vpop.f32.mrf.mxu3  ;;  %v4208_v2 = vpop.f32.mrf.mxu1 }
 0x55b   :  { %v4209_v15 = vadd.f32 %v4208_v2, %v4159_v61  ;;  %v7769_v2 = vld [vmem:[#allocation2 + $0x74] sm:$0xf0] }
 0x55c   :  { %v11303_v43 = vadd.f32 %v4304_v54, %v4256_v12  ;;  %v6975_v55 = vor.u32 %v7769_v2, %v6974_v0  ;;  %v7765_v0 = vld [vmem:[#allocation2 + $0x54] sm:$0xf0]  ;;  %v7086_v2 = vld [vmem:[#allocation2 + $0x148] sm:$0xf] }
 0x55e   :  { %13079 = vst [vmem:[#allocation14_spill] sm:$0xff] %v11303_v43  ;;  %4539 = vmatpush.bf16.msrb.mxu0 %v6975_v55  ;;  %v7797_v55 = vld [vmem:[#allocation2 + $0x154] sm:$0xf0] }
 0x561   :  { %v4257_v46 = vpop.f32.mrf.mxu2  ;;  %v4162_v58 = vpop.f32.mrf.mxu0 }
 0x562   :  { %v4258_v26 = vadd.f32 %v4257_v46, %v4209_v15  ;;  %v4306_v16 = vpop.f32.mrf.mxu3  ;;  %v4211_v51 = vpop.f32.mrf.mxu1  ;;  %v7102_v15 = vld [vmem:[#allocation2 + $0x168] sm:$0xf] }
 0x563   :  { %v4212_v56 = vadd.f32 %v4211_v51, %v4162_v58  ;;  %v7214_v51 = vld [vmem:[#allocation2 + $0x248] sm:$0xf] }
 0x564   :  { %v11305_v24 = vadd.f32 %v4306_v16, %v4258_v26  ;;  %4357 = vmatmul.bf16.gmra.mxu0 %v11211_v49  ;;  %v7103_v26 = vor.u32 %v7801_v28, %v7102_v15 }
 0x565   :  { %4406 = vmatmul.bf16.gmra.mxu1 %v11213_v53 }
 0x566   :  { %13080 = vst [vmem:[#allocation65_spill] sm:$0xff] %v11305_v24  ;;  %4455 = vmatmul.bf16.gmra.mxu2 %v11215_v63  ;;  %4588 = vmatpush.bf16.msrb.mxu1 %v7103_v26 }
 0x567   :  { %4504 = vmatmul.bf16.gmra.mxu3 %v11217_v13 }
 0x569   :  { %v4260_v3 = vpop.f32.mrf.mxu2  ;;  %v4164_v30 = vpop.f32.mrf.mxu0 }
 0x56a   :  { %v4261_v25 = vadd.f32 %v4260_v3, %v4212_v56  ;;  %v4309_v37 = vpop.f32.mrf.mxu3  ;;  %v4213_v12 = vpop.f32.mrf.mxu1  ;;  %v7829_v56 = vld [vmem:[#allocation2 + $0x254] sm:$0xf0] }
 0x56b   :  { %v4214_v61 = vadd.f32 %v4213_v12, %v4164_v30  ;;  %v7215_v19 = vor.u32 %v7829_v56, %v7214_v51  ;;  %v7861_v3 = vld [vmem:[#allocation2 + $0x354] sm:$0xf0]  ;;  %v7198_v51 = vld [vmem:[#allocation2 + $0x228] sm:$0xf] }
 0x56c   :  { %v11311_v54 = vadd.f32 %v4309_v37, %v4261_v25  ;;  %v7343_v37 = vor.u32 %v7861_v3, %v7342_v14  ;;  %v7825_v56 = vld [vmem:[#allocation2 + $0x234] sm:$0xf0]  ;;  %v7326_v14 = vld [vmem:[#allocation2 + $0x328] sm:$0xf] }
 0x56d   :  { %4638 = vmatpush.bf16.msrb.mxu2 %v7215_v19  ;;  %v7199_v19 = vor.u32 %v7825_v56, %v7198_v51  ;;  %v7857_v3 = vld [vmem:[#allocation2 + $0x334] sm:$0xf0] }
 0x56e   :  { %13081 = vst [vmem:[#allocation53_spill] sm:$0xff] %v11311_v54  ;;  %4687 = vmatpush.bf16.msrb.mxu3 %v7343_v37  ;;  %v7327_v37 = vor.u32 %v7857_v3, %v7326_v14  ;;  %v5017_v14 = vmul.f32 %v11297_v23, %v11297_v23  ;;  %v4929_v3 = vadd.f32 %v11297_v23, %v11295_v41 }
 0x571   :  { %v4262_v60 = vpop.f32.mrf.mxu2  ;;  %v4167_v31 = vpop.f32.mrf.mxu0  ;;  %4639 = vmatpush.bf16.msrb.mxu2 %v7199_v19  ;;  %v5021_v19 = vmul.f32 %v11303_v43, %v11303_v43 }
 0x572   :  { %v4263_v46 = vadd.f32 %v4262_v60, %v4214_v61  ;;  %v4311_v17 = vpop.f32.mrf.mxu3  ;;  %v4216_v16 = vpop.f32.mrf.mxu1  ;;  %v6958_v61 = vld [vmem:[#allocation2 + $0x48] sm:$0xf]  ;;  %4688 = vmatpush.bf16.msrb.mxu3 %v7327_v37 }
 0x573   :  { %v4217_v34 = vadd.f32 %v4216_v16, %v4167_v31  ;;  %v6959_v60 = vor.u32 %v7765_v0, %v6958_v61  ;;  %v7087_v31 = vor.u32 %v7797_v55, %v7086_v2  ;;  %v6942_v0 = vld [vmem:[#allocation2 + $0x28] sm:$0xf]  ;;  %v7761_v2 = vld [vmem:[#allocation2 + $0x34] sm:$0xf0] }
 0x574   :  { %v11313_v58 = vadd.f32 %v4311_v17, %v4263_v46  ;;  %4362 = vmatmul.bf16.gmra.mxu0 %v11219_v22  ;;  %v6943_v55 = vor.u32 %v7761_v2, %v6942_v0  ;;  %v7853_v2 = vld [vmem:[#allocation2 + $0x314] sm:$0xf0] }
 0x575   :  { %4411 = vmatmul.bf16.gmra.mxu1 %v11221_v59  ;;  %4540 = vmatpush.bf16.msrb.mxu0 %v6959_v60 }
 0x576   :  { %13082 = vst [vmem:[#allocation15_spill] sm:$0xff] %v11313_v58  ;;  %4460 = vmatmul.bf16.gmra.mxu2 %v11223_v62  ;;  %4589 = vmatpush.bf16.msrb.mxu1 %v7087_v31 }
 0x577   :  { %4509 = vmatmul.bf16.gmra.mxu3 %v11225_v29 }
 0x579   :  { %v4265_v9 = vpop.f32.mrf.mxu2  ;;  %v4169_v25 = vpop.f32.mrf.mxu0  ;;  %4541 = vmatpush.bf16.msrb.mxu0 %v6943_v55 }
 0x57a   :  { %v4266_v8 = vadd.f32 %v4265_v9, %v4217_v34  ;;  %v4314_v18 = vpop.f32.mrf.mxu3  ;;  %v4218_v30 = vpop.f32.mrf.mxu1 }
 0x57b   :  { %v4219_v12 = vadd.f32 %v4218_v30, %v4169_v25 }
 0x57c   :  { %v11319_v44 = vadd.f32 %v4314_v18, %v4266_v8 }
 0x57e   :  { %13083 = vst [vmem:[#allocation66_spill] sm:$0xff] %v11319_v44 }
 0x581   :  { %v4267_v15 = vpop.f32.mrf.mxu2  ;;  %v4172_v17 = vpop.f32.mrf.mxu0 }
 0x582   :  { %v4268_v28 = vadd.f32 %v4267_v15, %v4219_v12  ;;  %v4316_v46 = vpop.f32.mrf.mxu3  ;;  %v4221_v26 = vpop.f32.mrf.mxu1  ;;  %v7070_v15 = vld [vmem:[#allocation2 + $0x128] sm:$0xf] }
 0x583   :  { %v4222_v34 = vadd.f32 %v4221_v26, %v4172_v17 }
 0x584   :  { %v11321_v16 = vadd.f32 %v4316_v46, %v4268_v28  ;;  %4367 = vmatmul.bf16.gmra.mxu0 %v11227_v11  ;;  %v7793_v28 = vld [vmem:[#allocation2 + $0x134] sm:$0xf0] }
 0x585   :  { %4416 = vmatmul.bf16.gmra.mxu1 %v11229_v4  ;;  %v7071_v26 = vor.u32 %v7793_v28, %v7070_v15  ;;  %v4930_v15 = vadd.f32 %v4929_v3, %v11303_v43  ;;  %v5033_v3 = vmul.f32 %v11313_v58, %v11313_v58 }
 0x586   :  { %13084 = vst [vmem:[#allocation56_spill] sm:$0xff] %v11321_v16  ;;  %4465 = vmatmul.bf16.gmra.mxu2 %v11231_v33 }
 0x587   :  { %4514 = vmatmul.bf16.gmra.mxu3 %v11233_v5  ;;  %4590 = vmatpush.bf16.msrb.mxu1 %v7071_v26 }
 0x589   :  { %v4270_v9 = vpop.f32.mrf.mxu2  ;;  %v4174_v25 = vpop.f32.mrf.mxu0 }
 0x58a   :  { %v4271_v8 = vadd.f32 %v4270_v9, %v4222_v34  ;;  %v4319_v18 = vpop.f32.mrf.mxu3  ;;  %v4223_v30 = vpop.f32.mrf.mxu1  ;;  %v5013_v9 = vmul.f32 %v11295_v41, %v11295_v41 }
 0x58b   :  { %v4224_v61 = vadd.f32 %v4223_v30, %v4174_v25  ;;  %v7310_v25 = vld [vmem:[#allocation2 + $0x308] sm:$0xf]  ;;  %v5025_v30 = vmul.f32 %v11305_v24, %v11305_v24 }
 0x58c   :  { %v11327_v12 = vadd.f32 %v4319_v18, %v4271_v8  ;;  %v7182_v8 = vld [vmem:[#allocation2 + $0x208] sm:$0xf]  ;;  %v7821_v18 = vld [vmem:[#allocation2 + $0x214] sm:$0xf0]  ;;  %v5077_v37 = vadd.f32 %v5017_v14, %v5013_v9 }
 0x58d   :  { %v7183_v0 = vor.u32 %v7821_v18, %v7182_v8 }
 0x58e   :  { %13085 = vst [vmem:[#allocation18_spill] sm:$0xff] %v11327_v12 }
 0x58f   :  { %4640 = vmatpush.bf16.msrb.mxu2 %v7183_v0  ;;  %v7054_v0 = vld [vmem:[#allocation2 + $0x108] sm:$0xf] }
 0x591   :  { %v4272_v60 = vpop.f32.mrf.mxu2  ;;  %v4177_v31 = vpop.f32.mrf.mxu0 }
 0x592   :  { %v4273_v46 = vadd.f32 %v4272_v60, %v4224_v61  ;;  %v4321_v17 = vpop.f32.mrf.mxu3  ;;  %v4226_v34 = vpop.f32.mrf.mxu1 }
 0x593   :  { %v4227_v56 = vadd.f32 %v4226_v34, %v4177_v31  ;;  %v5029_v31 = vmul.f32 %v11311_v54, %v11311_v54  ;;  %v4931_v34 = vadd.f32 %v4930_v15, %v11305_v24 }
 0x594   :  { %v11329_v51 = vadd.f32 %v4321_v17, %v4273_v46  ;;  %4372 = vmatmul.bf16.gmra.mxu0 %v11235_v6  ;;  %v7311_v46 = vor.u32 %v7853_v2, %v7310_v25  ;;  %v5078_v17 = vadd.f32 %v5077_v37, %v5021_v19  ;;  %v5037_v19 = vmul.f32 %v11319_v44, %v11319_v44  ;;  %v6926_v37 = vld [vmem:[#allocation2 + $0x8] sm:$0xf] }
 0x595   :  { %4421 = vmatmul.bf16.gmra.mxu1 %v11237_v45 }
 0x596   :  { %13086 = vst [vmem:[#allocation67_spill] sm:$0xff] %v11329_v51  ;;  %4470 = vmatmul.bf16.gmra.mxu2 %v11239_v20  ;;  %4689 = vmatpush.bf16.msrb.mxu3 %v7311_v46  ;;  %v5079_v8 = vadd.f32 %v5078_v17, %v5025_v30 }
 0x597   :  { %4519 = vmatmul.bf16.gmra.mxu3 %v11241_v21 }
 0x598   :  { %v5080_v18 = vadd.f32 %v5079_v8, %v5029_v31 }
 0x599   :  { %v4275_v61 = vpop.f32.mrf.mxu2  ;;  %v4179_v28 = vpop.f32.mrf.mxu0 }
 0x59a   :  { %v4276_v60 = vadd.f32 %v4275_v61, %v4227_v56  ;;  %v4324_v55 = vpop.f32.mrf.mxu3  ;;  %v4228_v26 = vpop.f32.mrf.mxu1  ;;  %v4932_v56 = vadd.f32 %v4931_v34, %v11311_v54  ;;  %v7757_v61 = vld [vmem:[#allocation2 + $0x14] sm:$0xf0]  ;;  %v5081_v2 = vadd.f32 %v5080_v18, %v5033_v3  ;;  %v5045_v3 = vmul.f32 %v11327_v12, %v11327_v12 }
 0x59b   :  { %v4229_v9 = vadd.f32 %v4228_v26, %v4179_v28  ;;  %v5041_v28 = vmul.f32 %v11321_v16, %v11321_v16 }
 0x59c   :  { %v11349_v14 = vadd.f32 %v4324_v55, %v4276_v60  ;;  %v4933_v25 = vadd.f32 %v4932_v56, %v11313_v58  ;;  %v6927_v60 = vor.u32 %v7757_v61, %v6926_v37  ;;  %v7789_v55 = vld [vmem:[#allocation2 + $0x114] sm:$0xf0]  ;;  %v5082_v34 = vadd.f32 %v5081_v2, %v5037_v19 }
 0x59d   :  { %v7055_v26 = vor.u32 %v7789_v55, %v7054_v0  ;;  %v5049_v61 = vmul.f32 %v11329_v51, %v11329_v51 }
 0x59e   :  { %13087 = vst [vmem:[#allocation72_spill] sm:$0xff] %v11349_v14  ;;  %v4934_v30 = vadd.f32 %v4933_v25, %v11319_v44  ;;  %4542 = vmatpush.bf16.msrb.mxu0 %v6927_v60  ;;  %v5083_v25 = vadd.f32 %v5082_v34, %v5041_v28  ;;  %v5053_v2 = vmul.f32 %v11349_v14, %v11349_v14 }
 0x59f   :  { %4591 = vmatpush.bf16.msrb.mxu1 %v7055_v26 }
 0x5a0   :  { %v4935_v56 = vadd.f32 %v4934_v30, %v11321_v16  ;;  %v5084_v19 = vadd.f32 %v5083_v25, %v5045_v3  ;;  %v7168_v16 = vld [vmem:[#allocation2 + $0x1f8] sm:$0xf0] }
 0x5a1   :  { %v4277_v15 = vpop.f32.mrf.mxu2  ;;  %v4182_v31 = vpop.f32.mrf.mxu0 }
 0x5a2   :  { %v4278_v46 = vadd.f32 %v4277_v15, %v4229_v9  ;;  %v4326_v17 = vpop.f32.mrf.mxu3  ;;  %v4231_v8 = vpop.f32.mrf.mxu1  ;;  %v4936_v9 = vadd.f32 %v4935_v56, %v11327_v12  ;;  %v5085_v60 = vadd.f32 %v5084_v19, %v5049_v61 }
 0x5a3   :  { %v4232_v37 = vadd.f32 %v4231_v8, %v4182_v31 }
 0x5a4   :  { %v11363_v18 = vadd.f32 %v4326_v17, %v4278_v46  ;;  %4377 = vmatmul.bf16.gmra.mxu0 %v11243_v10  ;;  %v4937_v0 = vadd.f32 %v4936_v9, %v11329_v51  ;;  %v5086_v26 = vadd.f32 %v5085_v60, %v5053_v2 }
 0x5a5   :  { %4426 = vmatmul.bf16.gmra.mxu1 %v11245_v50 }
 0x5a6   :  { %13088 = vst [vmem:[#allocation46_spill] sm:$0xff] %v11363_v18  ;;  %4475 = vmatmul.bf16.gmra.mxu2 %v11247_v7  ;;  %v4938_v55 = vadd.f32 %v4937_v0, %v11349_v14  ;;  %v5057_v30 = vmul.f32 %v11363_v18, %v11363_v18 }
 0x5a7   :  { %4524 = vmatmul.bf16.gmra.mxu3 %v11249_v1 }
 0x5a8   :  { %v4939_v34 = vadd.f32 %v4938_v55, %v11363_v18  ;;  %v5087_v3 = vadd.f32 %v5086_v26, %v5057_v30 }
 0x5a9   :  { %v4280_v15 = vpop.f32.mrf.mxu2  ;;  %v4184_v17 = vpop.f32.mrf.mxu0 }
 0x5aa   :  { %v4281_v28 = vadd.f32 %v4280_v15, %v4232_v37  ;;  %v4329_v46 = vpop.f32.mrf.mxu3  ;;  %v4233_v31 = vpop.f32.mrf.mxu1 }
 0x5ab   :  { %v4234_v56 = vadd.f32 %v4233_v31, %v4184_v17 }
 0x5ac   :  { %v11379_v8 = vadd.f32 %v4329_v46, %v4281_v28 }
 0x5ae   :  { %13089 = vst [vmem:[#allocation68_spill] sm:$0xff] %v11379_v8  ;;  %v4940_v25 = vadd.f32 %v4939_v34, %v11379_v8  ;;  %v5061_v9 = vmul.f32 %v11379_v8, %v11379_v8  ;;  %v7879_v8 = vld [vmem:[#allocation2 + $0x3ec] sm:$0xf] }
 0x5b0   :  { %v5088_v61 = vadd.f32 %v5087_v3, %v5061_v9 }
 0x5b1   :  { %v4282_v19 = vpop.f32.mrf.mxu2  ;;  %v4187_v37 = vpop.f32.mrf.mxu0 }
 0x5b2   :  { %v4283_v0 = vadd.f32 %v4282_v19, %v4234_v56  ;;  %v4331_v14 = vpop.f32.mrf.mxu3  ;;  %v4236_v15 = vpop.f32.mrf.mxu1 }
 0x5b3   :  { %v4237_v2 = vadd.f32 %v4236_v15, %v4187_v37 }
 0x5b4   :  { %v11384_v51 = vadd.f32 %v4331_v14, %v4283_v0  ;;  %4382 = vmatmul.bf16.gmra.mxu0 %v11251_v27 }
 0x5b5   :  { %4431 = vmatmul.bf16.gmra.mxu1 %v11253_v32 }
 0x5b6   :  { %13090 = vst [vmem:[#allocation73_spill] sm:$0xff] %v11384_v51  ;;  %v4941_v60 = vadd.f32 %v4940_v25, %v11384_v51  ;;  %v5065_v55 = vmul.f32 %v11384_v51, %v11384_v51  ;;  %4480 = vmatmul.bf16.gmra.mxu2 %v11255_v40  ;;  %v7296_v51 = vld [vmem:[#allocation2 + $0x2f8] sm:$0xf0] }
 0x5b7   :  { %4529 = vmatmul.bf16.gmra.mxu3 %v11257_v52 }
 0x5b8   :  { %v5089_v30 = vadd.f32 %v5088_v61, %v5065_v55 }
 0x5b9   :  { %v4285_v28 = vpop.f32.mrf.mxu2  ;;  %v4189_v14 = vpop.f32.mrf.mxu0 }
 0x5ba   :  { %v4286_v46 = vadd.f32 %v4285_v28, %v4237_v2  ;;  %v4334_v17 = vpop.f32.mrf.mxu3  ;;  %v4238_v31 = vpop.f32.mrf.mxu1 }
 0x5bb   :  { %v4239_v34 = vadd.f32 %v4238_v31, %v4189_v14 }
 0x5bc   :  { %v11393_v26 = vadd.f32 %v4334_v17, %v4286_v46 }
 0x5be   :  { %13091 = vst [vmem:[#allocation20_spill] sm:$0xff] %v11393_v26  ;;  %v4942_v56 = vadd.f32 %v4941_v60, %v11393_v26  ;;  %v5069_v3 = vmul.f32 %v11393_v26, %v11393_v26  ;;  %v7847_v26 = vld [vmem:[#allocation2 + $0x2ec] sm:$0xf] }
 0x5c0   :  { %v5090_v25 = vadd.f32 %v5089_v30, %v5069_v3 }
 0x5c1   :  { %v4287_v9 = vpop.f32.mrf.mxu2  ;;  %v4348_v37 = vpop.f32.mrf.mxu0 }
 0x5c2   :  { %v4288_v19 = vadd.f32 %v4287_v9, %v4239_v34  ;;  %v4336_v0 = vpop.f32.mrf.mxu3  ;;  %v4397_v15 = vpop.f32.mrf.mxu1 }
 0x5c3   :  { %v4398_v2 = vadd.f32 %v4397_v15, %v4348_v37 }
 0x5c4   :  { %v11398_v61 = vadd.f32 %v4336_v0, %v4288_v19  ;;  %4543 = vmatmul.bf16.vlgmr.msrb.gmra.mxu0 %v13072_v36 }
 0x5c5   :  { %4592 = vmatmul.bf16.vlgmr.msrb.gmra.mxu1 %v13073_v57 }
 0x5c6   :  { %13092 = vst [vmem:[#allocation69_spill] sm:$0xff] %v11398_v61  ;;  %v4943_v55 = vadd.f32 %v4942_v56, %v11398_v61  ;;  %v5073_v28 = vmul.f32 %v11398_v61, %v11398_v61  ;;  %4641 = vmatmul.bf16.vlgmr.msrb.gmra.mxu2 %v13074_v39 }
 0x5c7   :  { %4690 = vmatmul.bf16.vlgmr.msrb.gmra.mxu3 %v13075_v38 }
 0x5c8   :  { %v4944_v60 = vrot.slane %v4943_v55, 4  ;;  %v5091_v30 = vadd.f32 %v5090_v25, %v5073_v28  ;;  %v7299_v25 = vor.u32 %v7847_v26, %v7296_v51  ;;  %v7424_v28 = vld [vmem:[#allocation2 + $0x3f8] sm:$0xf0]  ;;  %v7875_v26 = vld [vmem:[#allocation2 + $0x3cc] sm:$0xf] }
 0x5c9   :  { %v4446_v46 = vpop.f32.mrf.mxu2  ;;  %v4350_v3 = vpop.f32.mrf.mxu0 }
 0x5ca   :  { %v4945_v17 = vadd.f32 %v4944_v60, %v4943_v55  ;;  %v5092_v14 = vrot.slane %v5091_v30, 4  ;;  %v4447_v31 = vadd.f32 %v4446_v46, %v4398_v2  ;;  %v4495_v34 = vpop.f32.mrf.mxu3  ;;  %v4399_v9 = vpop.f32.mrf.mxu1  ;;  %v7783_v55 = vld [vmem:[#allocation2 + $0xec] sm:$0xf]  ;;  %v7427_v60 = vor.u32 %v7879_v8, %v7424_v28  ;;  %v7040_v2 = vld [vmem:[#allocation2 + $0xf8] sm:$0xf0]  ;;  %4829 = vmatpush.bf16.msra.mxu2 %v7299_v25 }
 0x5cb   :  { %v4400_v37 = vadd.f32 %v4399_v9, %v4350_v3  ;;  %v7815_v46 = vld [vmem:[#allocation2 + $0x1ec] sm:$0xf]  ;;  %v7280_v9 = vld [vmem:[#allocation2 + $0x2d8] sm:$0xf0] }
 0x5cc   :  { %v4946_v19 = vrot.slane %v4945_v17, 2  ;;  %v5093_v56 = vadd.f32 %v5092_v14, %v5091_v30  ;;  %v11407_v0 = vadd.f32 %v4495_v34, %v4447_v31  ;;  %v7043_v14 = vor.u32 %v7783_v55, %v7040_v2  ;;  %v7843_v3 = vld [vmem:[#allocation2 + $0x2cc] sm:$0xf]  ;;  %4878 = vmatpush.bf16.msra.mxu3 %v7427_v60  ;;  %v7024_v25 = vld [vmem:[#allocation2 + $0xd8] sm:$0xf0] }
 0x5cd   :  { %v7171_v31 = vor.u32 %v7815_v46, %v7168_v16  ;;  %v7283_v51 = vor.u32 %v7843_v3, %v7280_v9  ;;  %v7779_v8 = vld [vmem:[#allocation2 + $0xcc] sm:$0xf]  ;;  %v7264_v2 = vld [vmem:[#allocation2 + $0x2b8] sm:$0xf0] }
 0x5ce   :  { %13093 = vst [vmem:[#allocation74_spill] sm:$0xff] %v11407_v0  ;;  %v4947_v15 = vadd.f32 %v4946_v19, %v4945_v17  ;;  %v5094_v61 = vrot.slane %v5093_v56, 2  ;;  %4731 = vmatpush.bf16.msra.mxu0 %v7043_v14  ;;  %v7811_v16 = vld [vmem:[#allocation2 + $0x1cc] sm:$0xf]  ;;  %v7027_v60 = vor.u32 %v7779_v8, %v7024_v25  ;;  %v7392_v14 = vld [vmem:[#allocation2 + $0x3b8] sm:$0xf0] }
 0x5cf   :  { %4780 = vmatpush.bf16.msra.mxu1 %v7171_v31  ;;  %4830 = vmatpush.bf16.msra.mxu2 %v7283_v51  ;;  %v7807_v3 = vld [vmem:[#allocation2 + $0x1ac] sm:$0xf]  ;;  %v7248_v8 = vld [vmem:[#allocation2 + $0x298] sm:$0xf0] }
 0x5d0   :  { %v4948_v18 = vrot.slane %v4947_v15, 1  ;;  %v5095_v12 = vadd.f32 %v5094_v61, %v5093_v56  ;;  %v7408_v56 = vld [vmem:[#allocation2 + $0x3d8] sm:$0xf0] }
 0x5d1   :  { %v4448_v44 = vpop.f32.mrf.mxu2  ;;  %v4353_v34 = vpop.f32.mrf.mxu0 }
 0x5d2   :  { %v4949_v58 = vadd.f32 %v4948_v18, %v4947_v15  ;;  %v5096_v30 = vrot.slane %v5095_v12, 1  ;;  %v4497_v17 = vpop.f32.mrf.mxu3  ;;  %v4449_v19 = vadd.f32 %v4448_v44, %v4400_v37  ;;  %v4402_v61 = vpop.f32.mrf.mxu1  ;;  %v7411_v15 = vor.u32 %v7875_v26, %v7408_v56  ;;  %v7152_v44 = vld [vmem:[#allocation2 + $0x1d8] sm:$0xf0]  ;;  %v7839_v37 = vld [vmem:[#allocation2 + $0x2ac] sm:$0xf]  ;;  %4732 = vmatpush.bf16.msra.mxu0 %v7027_v60 }
 0x5d3   :  { %v4403_v18 = vadd.f32 %v4402_v61, %v4353_v34  ;;  %v7267_v31 = vor.u32 %v7839_v37, %v7264_v2  ;;  %v7008_v34 = vld [vmem:[#allocation2 + $0xb8] sm:$0xf0]  ;;  %v7835_v56 = vld [vmem:[#allocation2 + $0x28c] sm:$0xf] }
 0x5d4   :  { %v5097_v28 = vadd.f32 %v5096_v30, %v5095_v12  ;;  %v11409_v54 = vmul.f32 0.0078125, %v4949_v58  ;;  %v11411_v55 = vadd.f32 %v4497_v17, %v4449_v19  ;;  %4548 = vmatmul.bf16.gmra.mxu0 %v13076_v35  ;;  %v7155_v12 = vor.u32 %v7811_v16, %v7152_v44  ;;  %v7871_v30 = vld [vmem:[#allocation2 + $0x3ac] sm:$0xf]  ;;  %4879 = vmatpush.bf16.msra.mxu3 %v7411_v15  ;;  %v7136_v26 = vld [vmem:[#allocation2 + $0x1b8] sm:$0xf0] }
 0x5d5   :  { %4597 = vmatmul.bf16.gmra.mxu1 %v11205_v42  ;;  %v7775_v17 = vld [vmem:[#allocation2 + $0xac] sm:$0xf]  ;;  %v7395_v19 = vor.u32 %v7871_v30, %v7392_v14  ;;  %v7139_v25 = vor.u32 %v7807_v3, %v7136_v26  ;;  %v7376_v44 = vld [vmem:[#allocation2 + $0x398] sm:$0xf0]  ;;  %4831 = vmatpush.bf16.msra.mxu2 %v7267_v31  ;;  %v7251_v43 = vor.u32 %v7835_v56, %v7248_v8 }
 0x5d6   :  { %13094 = vst [vmem:[#allocation21_spill] sm:$0xff] %v11409_v54  ;;  %v11414_v46 = vmul.f32 0.0078125, %v5097_v28  ;;  %v11418_v58 = vmul.f32 %v11409_v54, %v11409_v54  ;;  %4646 = vmatmul.bf16.gmra.mxu2 %v11207_v48  ;;  %v7011_v61 = vor.u32 %v7775_v17, %v7008_v34  ;;  %4781 = vmatpush.bf16.msra.mxu1 %v7155_v12  ;;  %v7867_v16 = vld [vmem:[#allocation2 + $0x38c] sm:$0xf]  ;;  %v6992_v12 = vld [vmem:[#allocation2 + $0x98] sm:$0xf0] }
 0x5d7   :  { %13095 = vst [vmem:[#allocation70_spill] sm:$0xff] %v11411_v55  ;;  %4695 = vmatmul.bf16.gmra.mxu3 %v11209_v47  ;;  %v7379_v60 = vor.u32 %v7867_v16, %v7376_v44  ;;  %v7771_v30 = vld [vmem:[#allocation2 + $0x8c] sm:$0xf]  ;;  %v7360_v44 = vld [vmem:[#allocation2 + $0x378] sm:$0xf0] }
 0x5d8   :  { %4880 = vmatpush.bf16.msra.mxu3 %v7395_v19  ;;  %4733 = vmatpush.bf16.msra.mxu0 %v7011_v61  ;;  %v7803_v14 = vld [vmem:[#allocation2 + $0x18c] sm:$0xf]  ;;  %v6995_v34 = vor.u32 %v7771_v30, %v6992_v12  ;;  %v7232_v19 = vld [vmem:[#allocation2 + $0x278] sm:$0xf0] }
 0x5d9   :  { %v4451_v28 = vpop.f32.mrf.mxu2  ;;  %v4355_v2 = vpop.f32.mrf.mxu0  ;;  %4832 = vmatpush.bf16.msra.mxu2 %v7251_v43  ;;  %v7831_v43 = vld [vmem:[#allocation2 + $0x26c] sm:$0xf] }
 0x5da   :  { %v4452_v51 = vadd.f32 %v4451_v28, %v4403_v18  ;;  %v4500_v37 = vpop.f32.mrf.mxu3  ;;  %v4404_v24 = vpop.f32.mrf.mxu1  ;;  %4782 = vmatpush.bf16.msra.mxu1 %v7139_v25  ;;  %v7120_v18 = vld [vmem:[#allocation2 + $0x198] sm:$0xf0]  ;;  %v7863_v61 = vld [vmem:[#allocation2 + $0x36c] sm:$0xf]  ;;  %v7235_v16 = vor.u32 %v7831_v43, %v7232_v19 }
 0x5db   :  { %v4405_v15 = vadd.f32 %v4404_v24, %v4355_v2  ;;  %v7123_v31 = vor.u32 %v7803_v14, %v7120_v18  ;;  %v7767_v14 = vld [vmem:[#allocation2 + $0x6c] sm:$0xf] }
 0x5dc   :  { %v11425_v23 = vadd.f32 %v4500_v37, %v4452_v51  ;;  %4881 = vmatpush.bf16.msra.mxu3 %v7379_v60  ;;  %4734 = vmatpush.bf16.msra.mxu0 %v6995_v34  ;;  %v7799_v34 = vld [vmem:[#allocation2 + $0x16c] sm:$0xf] }
 0x5dd   :  { %4833 = vmatpush.bf16.msra.mxu2 %v7235_v16  ;;  %v7216_v16 = vld [vmem:[#allocation2 + $0x258] sm:$0xf0] }
 0x5de   :  { %13096 = vst [vmem:[#allocation75_spill] sm:$0xff] %v11425_v23  ;;  %4783 = vmatpush.bf16.msra.mxu1 %v7123_v31 }
 0x5e1   :  { %v4453_v17 = vpop.f32.mrf.mxu2  ;;  %v4358_v28 = vpop.f32.mrf.mxu0 }
 0x5e2   :  { %v4454_v3 = vadd.f32 %v4453_v17, %v4405_v15  ;;  %v4502_v26 = vpop.f32.mrf.mxu3  ;;  %v4407_v56 = vpop.f32.mrf.mxu1  ;;  %v7363_v15 = vor.u32 %v7863_v61, %v7360_v44  ;;  %v6976_v17 = vld [vmem:[#allocation2 + $0x78] sm:$0xf0]  ;;  %v7859_v44 = vld [vmem:[#allocation2 + $0x34c] sm:$0xf] }
 0x5e3   :  { %v4408_v24 = vadd.f32 %v4407_v56, %v4358_v28 }
 0x5e4   :  { %v11427_v8 = vadd.f32 %v4502_v26, %v4454_v3  ;;  %4553 = vmatmul.bf16.gmra.mxu0 %v11211_v49  ;;  %4882 = vmatpush.bf16.msra.mxu3 %v7363_v15  ;;  %v6979_v3 = vor.u32 %v7767_v14, %v6976_v17  ;;  %v7104_v26 = vld [vmem:[#allocation2 + $0x178] sm:$0xf0] }
 0x5e5   :  { %4602 = vmatmul.bf16.gmra.mxu1 %v11213_v53  ;;  %v7107_v43 = vor.u32 %v7799_v34, %v7104_v26  ;;  %v6960_v26 = vld [vmem:[#allocation2 + $0x58] sm:$0xf0] }
 0x5e6   :  { %4651 = vmatmul.bf16.gmra.mxu2 %v11215_v63  ;;  %4735 = vmatpush.bf16.msra.mxu0 %v6979_v3  ;;  %v7763_v3 = vld [vmem:[#allocation2 + $0x4c] sm:$0xf] }
 0x5e7   :  { %4700 = vmatmul.bf16.gmra.mxu3 %v11217_v13  ;;  %4784 = vmatpush.bf16.msra.mxu1 %v7107_v43  ;;  %v7088_v43 = vld [vmem:[#allocation2 + $0x158] sm:$0xf0] }
 0x5e9   :  { %v4456_v25 = vpop.f32.mrf.mxu2  ;;  %v4360_v2 = vpop.f32.mrf.mxu0 }
 0x5ea   :  { %v4457_v51 = vadd.f32 %v4456_v25, %v4408_v24  ;;  %v4505_v37 = vpop.f32.mrf.mxu3  ;;  %v4409_v60 = vpop.f32.mrf.mxu1  ;;  %v7827_v25 = vld [vmem:[#allocation2 + $0x24c] sm:$0xf] }
 0x5eb   :  { %v4410_v12 = vadd.f32 %v4409_v60, %v4360_v2  ;;  %v7344_v2 = vld [vmem:[#allocation2 + $0x358] sm:$0xf0] }
 0x5ec   :  { %v11433_v30 = vadd.f32 %v4505_v37, %v4457_v51  ;;  %v7219_v37 = vor.u32 %v7827_v25, %v7216_v16  ;;  %v7347_v14 = vor.u32 %v7859_v44, %v7344_v2  ;;  %v7200_v2 = vld [vmem:[#allocation2 + $0x238] sm:$0xf0] }
 0x5ee   :  { %4834 = vmatpush.bf16.msra.mxu2 %v7219_v37  ;;  %4883 = vmatpush.bf16.msra.mxu3 %v7347_v14  ;;  %v7823_v37 = vld [vmem:[#allocation2 + $0x22c] sm:$0xf]  ;;  %v7328_v14 = vld [vmem:[#allocation2 + $0x338] sm:$0xf0] }
 0x5f1   :  { %v4458_v18 = vpop.f32.mrf.mxu2  ;;  %v4363_v56 = vpop.f32.mrf.mxu0 }
 0x5f2   :  { %v4459_v28 = vadd.f32 %v4458_v18, %v4410_v12  ;;  %v4507_v31 = vpop.f32.mrf.mxu3  ;;  %v4412_v24 = vpop.f32.mrf.mxu1 }
 0x5f3   :  { %v4413_v61 = vadd.f32 %v4412_v24, %v4363_v56  ;;  %v6963_v56 = vor.u32 %v7763_v3, %v6960_v26 }
 0x5f4   :  { %v11435_v19 = vadd.f32 %v4507_v31, %v4459_v28  ;;  %4558 = vmatmul.bf16.gmra.mxu0 %v11219_v22  ;;  %v7795_v28 = vld [vmem:[#allocation2 + $0x14c] sm:$0xf] }
 0x5f5   :  { %4607 = vmatmul.bf16.gmra.mxu1 %v11221_v59  ;;  %v7091_v16 = vor.u32 %v7795_v28, %v7088_v43  ;;  %4736 = vmatpush.bf16.msra.mxu0 %v6963_v56  ;;  %v7759_v56 = vld [vmem:[#allocation2 + $0x2c] sm:$0xf]  ;;  %v6944_v43 = vld [vmem:[#allocation2 + $0x38] sm:$0xf0] }
 0x5f6   :  { %4656 = vmatmul.bf16.gmra.mxu2 %v11223_v62 }
 0x5f7   :  { %4705 = vmatmul.bf16.gmra.mxu3 %v11225_v29  ;;  %4785 = vmatpush.bf16.msra.mxu1 %v7091_v16  ;;  %v6947_v16 = vor.u32 %v7759_v56, %v6944_v43  ;;  %v5018_v56 = vmul.f32 %v11411_v55, %v11411_v55 }
 0x5f9   :  { %v4461_v51 = vpop.f32.mrf.mxu2  ;;  %v4365_v12 = vpop.f32.mrf.mxu0  ;;  %4737 = vmatpush.bf16.msra.mxu0 %v6947_v16  ;;  %v5014_v16 = vmul.f32 %v11407_v0, %v11407_v0 }
 0x5fa   :  { %v4462_v15 = vadd.f32 %v4461_v51, %v4413_v61  ;;  %v4510_v60 = vpop.f32.mrf.mxu3  ;;  %v4414_v17 = vpop.f32.mrf.mxu1 }
 0x5fb   :  { %v4415_v18 = vadd.f32 %v4414_v17, %v4365_v12  ;;  %v7203_v12 = vor.u32 %v7823_v37, %v7200_v2 }
 0x5fc   :  { %v11441_v34 = vadd.f32 %v4510_v60, %v4462_v15  ;;  %v7855_v15 = vld [vmem:[#allocation2 + $0x32c] sm:$0xf] }
 0x5fd   :  { %v7331_v3 = vor.u32 %v7855_v15, %v7328_v14  ;;  %4835 = vmatpush.bf16.msra.mxu2 %v7203_v12  ;;  %v7819_v12 = vld [vmem:[#allocation2 + $0x20c] sm:$0xf]  ;;  %v7184_v14 = vld [vmem:[#allocation2 + $0x218] sm:$0xf0] }
 0x5fe   :  { %13097 = vst [vmem:[#allocation49_spill] sm:$0xff] %v11441_v34 }
 0x5ff   :  { %4884 = vmatpush.bf16.msra.mxu3 %v7331_v3  ;;  %v7312_v3 = vld [vmem:[#allocation2 + $0x318] sm:$0xf0] }
 0x601   :  { %v4463_v31 = vpop.f32.mrf.mxu2  ;;  %v4368_v25 = vpop.f32.mrf.mxu0 }
 0x602   :  { %v4464_v24 = vadd.f32 %v4463_v31, %v4415_v18  ;;  %v4512_v9 = vpop.f32.mrf.mxu3  ;;  %v4417_v61 = vpop.f32.mrf.mxu1 }
 0x603   :  { %v4418_v44 = vadd.f32 %v4417_v61, %v4368_v25  ;;  %v7072_v61 = vld [vmem:[#allocation2 + $0x138] sm:$0xf0] }
 0x604   :  { %v11443_v51 = vadd.f32 %v4512_v9, %v4464_v24  ;;  %4563 = vmatmul.bf16.gmra.mxu0 %v11227_v11  ;;  %v7791_v24 = vld [vmem:[#allocation2 + $0x12c] sm:$0xf] }
 0x605   :  { %4612 = vmatmul.bf16.gmra.mxu1 %v11229_v4  ;;  %v7075_v2 = vor.u32 %v7791_v24, %v7072_v61  ;;  %v5022_v61 = vmul.f32 %v11425_v23, %v11425_v23 }
 0x606   :  { %13098 = vst [vmem:[#allocation71_spill] sm:$0xff] %v11443_v51  ;;  %4661 = vmatmul.bf16.gmra.mxu2 %v11231_v33 }
 0x607   :  { %4710 = vmatmul.bf16.gmra.mxu3 %v11233_v5  ;;  %4786 = vmatpush.bf16.msra.mxu1 %v7075_v2  ;;  %v5098_v2 = vadd.f32 %v5018_v56, %v5014_v16 }
 0x609   :  { %v4466_v60 = vpop.f32.mrf.mxu2  ;;  %v4370_v9 = vpop.f32.mrf.mxu0 }
 0x60a   :  { %v4467_v17 = vadd.f32 %v4466_v60, %v4418_v44  ;;  %v4515_v18 = vpop.f32.mrf.mxu3  ;;  %v4419_v26 = vpop.f32.mrf.mxu1 }
 0x60b   :  { %v4420_v31 = vadd.f32 %v4419_v26, %v4370_v9  ;;  %v7187_v9 = vor.u32 %v7819_v12, %v7184_v14  ;;  %v7755_v12 = vld [vmem:[#allocation2 + $0xc] sm:$0xf]  ;;  %v6928_v14 = vld [vmem:[#allocation2 + $0x18] sm:$0xf0] }
 0x60c   :  { %v11449_v28 = vadd.f32 %v4515_v18, %v4467_v17  ;;  %v7851_v17 = vld [vmem:[#allocation2 + $0x30c] sm:$0xf] }
 0x60d   :  { %4836 = vmatpush.bf16.msra.mxu2 %v7187_v9  ;;  %v5030_v9 = vmul.f32 %v11433_v30, %v11433_v30 }
 0x60e   :  { %13099 = vst [vmem:[#allocation76_spill] sm:$0xff] %v11449_v28 }
 0x611   :  { %v4468_v25 = vpop.f32.mrf.mxu2  ;;  %v4373_v37 = vpop.f32.mrf.mxu0 }
 0x612   :  { %v4469_v41 = vadd.f32 %v4468_v25, %v4420_v31  ;;  %v4517_v54 = vpop.f32.mrf.mxu3  ;;  %v4422_v44 = vpop.f32.mrf.mxu1 }
 0x613   :  { %v4423_v15 = vadd.f32 %v4422_v44, %v4373_v37  ;;  %v4950_v37 = vadd.f32 %v11411_v55, %v11407_v0  ;;  %v5026_v44 = vmul.f32 %v11427_v8, %v11427_v8 }
 0x614   :  { %v11451_v60 = vadd.f32 %v4517_v54, %v4469_v41  ;;  %4568 = vmatmul.bf16.gmra.mxu0 %v11235_v6  ;;  %v7315_v54 = vor.u32 %v7851_v17, %v7312_v3  ;;  %v7787_v17 = vld [vmem:[#allocation2 + $0x10c] sm:$0xf] }
 0x615   :  { %4617 = vmatmul.bf16.gmra.mxu1 %v11237_v45 }
 0x616   :  { %13100 = vst [vmem:[#allocation23_spill] sm:$0xff] %v11451_v60  ;;  %4666 = vmatmul.bf16.gmra.mxu2 %v11239_v20  ;;  %4885 = vmatpush.bf16.msra.mxu3 %v7315_v54 }
 0x617   :  { %4715 = vmatmul.bf16.gmra.mxu3 %v11241_v21 }
 0x619   :  { %v4471_v18 = vpop.f32.mrf.mxu2  ;;  %v4375_v41 = vpop.f32.mrf.mxu0 }
 0x61a   :  { %v4472_v26 = vadd.f32 %v4471_v18, %v4423_v15  ;;  %v4520_v31 = vpop.f32.mrf.mxu3  ;;  %v4424_v43 = vpop.f32.mrf.mxu1  ;;  %v4951_v15 = vadd.f32 %v4950_v37, %v11425_v23  ;;  %v5099_v18 = vadd.f32 %v5098_v2, %v5022_v61  ;;  %v5034_v37 = vmul.f32 %v11435_v19, %v11435_v19 }
 0x61b   :  { %v4425_v25 = vadd.f32 %v4424_v43, %v4375_v41 }
 0x61c   :  { %v11459_v24 = vadd.f32 %v4520_v31, %v4472_v26  ;;  %v6931_v26 = vor.u32 %v7755_v12, %v6928_v14  ;;  %v7056_v31 = vld [vmem:[#allocation2 + $0x118] sm:$0xf0]  ;;  %v4952_v41 = vadd.f32 %v4951_v15, %v11427_v8  ;;  %v5100_v55 = vadd.f32 %v5099_v18, %v5026_v44 }
 0x61d   :  { %v7059_v16 = vor.u32 %v7787_v17, %v7056_v31  ;;  %v5038_v15 = vmul.f32 %v11441_v34, %v11441_v34  ;;  %v5042_v14 = vmul.f32 %v11443_v51, %v11443_v51 }
 0x61e   :  { %13101 = vst [vmem:[#allocation33_spill] sm:$0xff] %v11459_v24  ;;  %4738 = vmatpush.bf16.msra.mxu0 %v6931_v26  ;;  %v4953_v61 = vadd.f32 %v4952_v41, %v11433_v30  ;;  %v5101_v12 = vadd.f32 %v5100_v55, %v5030_v9  ;;  %v5046_v9 = vmul.f32 %v11449_v28, %v11449_v28 }
 0x61f   :  { %4787 = vmatpush.bf16.msra.mxu1 %v7059_v16 }
 0x620   :  { %v5102_v44 = vadd.f32 %v5101_v12, %v5034_v37 }
 0x621   :  { %v4473_v3 = vpop.f32.mrf.mxu2  ;;  %v4378_v56 = vpop.f32.mrf.mxu0 }
 0x622   :  { %v4474_v54 = vadd.f32 %v4473_v3, %v4425_v25  ;;  %v4522_v43 = vpop.f32.mrf.mxu3  ;;  %v4427_v23 = vpop.f32.mrf.mxu1  ;;  %v4954_v25 = vadd.f32 %v4953_v61, %v11435_v19  ;;  %v5103_v55 = vadd.f32 %v5102_v44, %v5038_v15  ;;  %v5054_v15 = vmul.f32 %v11459_v24, %v11459_v24 }
 0x623   :  { %v4428_v0 = vadd.f32 %v4427_v23, %v4378_v56  ;;  %v5050_v56 = vmul.f32 %v11451_v60, %v11451_v60 }
 0x624   :  { %v11476_v2 = vadd.f32 %v4522_v43, %v4474_v54  ;;  %4573 = vmatmul.bf16.gmra.mxu0 %v11243_v10  ;;  %v4955_v23 = vadd.f32 %v4954_v25, %v11441_v34  ;;  %v5104_v41 = vadd.f32 %v5103_v55, %v5042_v14 }
 0x625   :  { %4622 = vmatmul.bf16.gmra.mxu1 %v11245_v50 }
 0x626   :  { %13102 = vst [vmem:[#allocation77_spill] sm:$0xff] %v11476_v2  ;;  %4671 = vmatmul.bf16.gmra.mxu2 %v11247_v7  ;;  %v4956_v18 = vadd.f32 %v4955_v23, %v11443_v51  ;;  %v5105_v61 = vadd.f32 %v5104_v41, %v5046_v9  ;;  %v5058_v44 = vmul.f32 %v11476_v2, %v11476_v2 }
 0x627   :  { %4720 = vmatmul.bf16.gmra.mxu3 %v11249_v1 }
 0x628   :  { %v4957_v43 = vadd.f32 %v4956_v18, %v11449_v28  ;;  %v5106_v25 = vadd.f32 %v5105_v61, %v5050_v56 }
 0x629   :  { %v4476_v17 = vpop.f32.mrf.mxu2  ;;  %v4380_v31 = vpop.f32.mrf.mxu0 }
 0x62a   :  { %v4477_v3 = vadd.f32 %v4476_v17, %v4428_v0  ;;  %v4525_v26 = vpop.f32.mrf.mxu3  ;;  %v4429_v54 = vpop.f32.mrf.mxu1  ;;  %v4958_v12 = vadd.f32 %v4957_v43, %v11451_v60  ;;  %v5107_v23 = vadd.f32 %v5106_v25, %v5054_v15 }
 0x62b   :  { %v4430_v37 = vadd.f32 %v4429_v54, %v4380_v31 }
 0x62c   :  { %v11494_v16 = vadd.f32 %v4525_v26, %v4477_v3  ;;  %v4959_v0 = vadd.f32 %v4958_v12, %v11459_v24  ;;  %v5108_v31 = vadd.f32 %v5107_v23, %v5058_v44 }
 0x62e   :  { %13103 = vst [vmem:[#allocation24_spill] sm:$0xff] %v11494_v16  ;;  %v4960_v55 = vadd.f32 %v4959_v0, %v11476_v2  ;;  %v5062_v17 = vmul.f32 %v11494_v16, %v11494_v16 }
 0x630   :  { %v4961_v41 = vadd.f32 %v4960_v55, %v11494_v16  ;;  %v5109_v56 = vadd.f32 %v5108_v31, %v5062_v17 }
 0x631   :  { %v4478_v14 = vpop.f32.mrf.mxu2  ;;  %v4383_v3 = vpop.f32.mrf.mxu0 }
 0x632   :  { %v4479_v18 = vadd.f32 %v4478_v14, %v4430_v37  ;;  %v4527_v9 = vpop.f32.mrf.mxu3  ;;  %v4432_v26 = vpop.f32.mrf.mxu1 }
 0x633   :  { %v4433_v43 = vadd.f32 %v4432_v26, %v4383_v3 }
 0x634   :  { %v11506_v54 = vadd.f32 %v4527_v9, %v4479_v18  ;;  %4578 = vmatmul.bf16.gmra.mxu0 %v11251_v27 }
 0x635   :  { %4627 = vmatmul.bf16.gmra.mxu1 %v11253_v32 }
 0x636   :  { %13104 = vst [vmem:[#allocation34_spill] sm:$0xff] %v11506_v54  ;;  %v4962_v61 = vadd.f32 %v4961_v41, %v11506_v54  ;;  %v5066_v12 = vmul.f32 %v11506_v54, %v11506_v54  ;;  %4676 = vmatmul.bf16.gmra.mxu2 %v11255_v40 }
 0x637   :  { %4725 = vmatmul.bf16.gmra.mxu3 %v11257_v52 }
 0x638   :  { %v5110_v37 = vadd.f32 %v5109_v56, %v5066_v12 }
 0x639   :  { %v4481_v15 = vpop.f32.mrf.mxu2  ;;  %v4385_v44 = vpop.f32.mrf.mxu0 }
 0x63a   :  { %v4482_v25 = vadd.f32 %v4481_v15, %v4433_v43  ;;  %v4530_v0 = vpop.f32.mrf.mxu3  ;;  %v4434_v14 = vpop.f32.mrf.mxu1 }
 0x63b   :  { %v4435_v55 = vadd.f32 %v4434_v14, %v4385_v44 }
 0x63c   :  { %v11515_v23 = vadd.f32 %v4530_v0, %v4482_v25 }
 0x63e   :  { %13105 = vst [vmem:[#allocation78_spill] sm:$0xff] %v11515_v23  ;;  %v4963_v17 = vadd.f32 %v4962_v61, %v11515_v23  ;;  %v5070_v18 = vmul.f32 %v11515_v23, %v11515_v23 }
 0x640   :  { %v5111_v9 = vadd.f32 %v5110_v37, %v5070_v18 }
 0x641   :  { %v4483_v3 = vpop.f32.mrf.mxu2  ;;  %v4544_v41 = vpop.f32.mrf.mxu0 }
 0x642   :  { %v4484_v26 = vadd.f32 %v4483_v3, %v4435_v55  ;;  %v4532_v31 = vpop.f32.mrf.mxu3  ;;  %v4593_v54 = vpop.f32.mrf.mxu1 }
 0x643   :  { %v4594_v43 = vadd.f32 %v4593_v54, %v4544_v41 }
 0x644   :  { %v11520_v56 = vadd.f32 %v4532_v31, %v4484_v26  ;;  %4739 = vmatmul.bf16.vlgmr.msra.gmra.mxu0 %v13072_v36  ;;  %v13107_v36 = vsub.f32 %v11414_v46, %v11418_v58 }
 0x645   :  { %4788 = vmatmul.bf16.vlgmr.msra.gmra.mxu1 %v13073_v57 }
 0x646   :  { %13106 = vst [vmem:[#allocation52_spill] sm:$0xff] %v11520_v56  ;;  %v4964_v12 = vadd.f32 %v4963_v17, %v11520_v56  ;;  %v5074_v15 = vmul.f32 %v11520_v56, %v11520_v56  ;;  %4837 = vmatmul.bf16.vlgmr.msra.gmra.mxu2 %v13074_v39  ;;  %v5177_v17 = vmax.f32 %v13107_v36, 0.0 }
 0x647   :  { %4886 = vmatmul.bf16.vlgmr.msra.gmra.mxu3 %v13075_v38 }
 0x648   :  { %v4965_v61 = vrot.slane %v4964_v12, 4  ;;  %v5112_v37 = vadd.f32 %v5111_v9, %v5074_v15  ;;  %v11534_v41 = vadd.f32 1e-05, %v5177_v17 }
 0x649   :  { %v4642_v25 = vpop.f32.mrf.mxu2  ;;  %v4546_v55 = vpop.f32.mrf.mxu0 }
 0x64a   :  { %v4966_v0 = vadd.f32 %v4965_v61, %v4964_v12  ;;  %v5113_v44 = vrot.slane %v5112_v37, 4  ;;  %v4643_v14 = vadd.f32 %v4642_v25, %v4594_v43  ;;  %v4691_v54 = vpop.f32.mrf.mxu3  ;;  %v4595_v18 = vpop.f32.mrf.mxu1  ;;  %7924 = vrsqrt.f32 %v11534_v41 }
 0x64b   :  { %v4596_v39 = vadd.f32 %v4595_v18, %v4546_v55  ;;  %vm5191_vm4 = vweird.f32 %v11534_v41 }
 0x64c   :  { %v4967_v3 = vrot.slane %v4966_v0, 2  ;;  %v5114_v26 = vadd.f32 %v5113_v44, %v5112_v37  ;;  %v11532_v57 = vadd.f32 %v4691_v54, %v4643_v14 }
 0x64e   :  { %v4968_v31 = vadd.f32 %v4967_v3, %v4966_v0  ;;  %v5115_v38 = vrot.slane %v5114_v26, 2 }
 0x650   :  { %v4969_v9 = vrot.slane %v4968_v31, 1  ;;  %v5116_v12 = vadd.f32 %v5115_v38, %v5114_v26  ;;  %v7925_v36 = vpop.eup %7924 }
 0x651   :  { %v4644_v15 = vpop.f32.mrf.mxu2  ;;  %v4549_v23 = vpop.f32.mrf.mxu0  ;;  %v5186_v38 = vmul.f32 %v7925_v36, %v11534_v41  ;;  %vm5192_vm1 = vweird.f32 %v7925_v36 }
 0x652   :  { %v4970_v43 = vadd.f32 %v4969_v9, %v4968_v31  ;;  %v5117_v61 = vrot.slane %v5116_v12, 1  ;;  %v4645_v25 = vadd.f32 %v4644_v15, %v4596_v39  ;;  %v4693_v56 = vpop.f32.mrf.mxu3  ;;  %v4598_v46 = vpop.f32.mrf.mxu1  ;;  %vm5193_vm5 = vmor %vm5191_vm4, %vm5192_vm1 }
 0x653   :  { %v4599_v0 = vadd.f32 %v4598_v46, %v4549_v23 }
 0x654   :  { %v5118_v58 = vadd.f32 %v5117_v61, %v5116_v12  ;;  %v11537_v37 = vmul.f32 0.0078125, %v4970_v43  ;;  %v11539_v44 = vadd.f32 %v4693_v56, %v4645_v25  ;;  %4744 = vmatmul.bf16.gmra.mxu0 %v13076_v35 }
 0x655   :  { %4793 = vmatmul.bf16.gmra.mxu1 %v11205_v42  ;;  %v5187_v42 = vmul.f32 %v7925_v36, %v5186_v38 }
 0x656   :  { %v5166_v14 = vmul.f32 0.0078125, %v5118_v58  ;;  %v5170_v54 = vmul.f32 %v11537_v37, %v11537_v37  ;;  %4842 = vmatmul.bf16.gmra.mxu2 %v11207_v48 }
 0x657   :  { %4891 = vmatmul.bf16.gmra.mxu3 %v11209_v47  ;;  %v5188_v46 = vmul.f32 0.5, %v5187_v42 }
 0x658   :  { %v5174_v55 = vsub.f32 %v5166_v14, %v5170_v54 }
 0x659   :  { %v4647_v17 = vpop.f32.mrf.mxu2  ;;  %v4551_v26 = vpop.f32.mrf.mxu0  ;;  %v5189_v14 = vsub.f32 1.5, %v5188_v46 }
 0x65a   :  { %v5178_v18 = vmax.f32 %v5174_v55, 0.0  ;;  %v4648_v3 = vadd.f32 %v4647_v17, %v4599_v0  ;;  %v4696_v56 = vpop.f32.mrf.mxu3  ;;  %v4600_v23 = vpop.f32.mrf.mxu1 }
 0x65b   :  { %v4601_v31 = vadd.f32 %v4600_v23, %v4551_v26 }
 0x65c   :  { %v5182_v39 = vadd.f32 1e-05, %v5178_v18  ;;  %v11547_v35 = vadd.f32 %v4696_v56, %v4648_v3 }
 0x65e   :  { %7926 = vrsqrt.f32 %v5182_v39  ;;  %vm5201_vm2 = vweird.f32 %v5182_v39 }
 0x661   :  { %v4649_v9 = vpop.f32.mrf.mxu2  ;;  %v4554_v47 = vpop.f32.mrf.mxu0 }
 0x662   :  { %v4650_v48 = vadd.f32 %v4649_v9, %v4601_v31  ;;  %v4698_v12 = vpop.f32.mrf.mxu3  ;;  %v4603_v15 = vpop.f32.mrf.mxu1 }
 0x663   :  { %v4604_v25 = vadd.f32 %v4603_v15, %v4554_v47 }
 0x664   :  { %v7927_v43 = vpop.eup %7926  ;;  %v11550_v61 = vadd.f32 %v4698_v12, %v4650_v48  ;;  %4749 = vmatmul.bf16.gmra.mxu0 %v11211_v49  ;;  %v5190_v49 = vmul.f32 %v7925_v36, %v5189_v14 }
 0x665   :  { %v5196_v58 = vmul.f32 %v7927_v43, %v5182_v39  ;;  %4798 = vmatmul.bf16.gmra.mxu1 %v11213_v53  ;;  %vm5202_vm0 = vweird.f32 %v7927_v43 }
 0x666   :  { %4847 = vmatmul.bf16.gmra.mxu2 %v11215_v63  ;;  %vm5203_vm3 = vmor %vm5201_vm2, %vm5202_vm0  ;;  %v5194_v38 = vsel %vm5193_vm5, %v7925_v36, %v5190_v49 }
 0x667   :  { %v5197_v0 = vmul.f32 %v7927_v43, %v5196_v58  ;;  %4896 = vmatmul.bf16.gmra.mxu3 %v11217_v13 }
 0x669   :  { %v5198_v54 = vmul.f32 0.5, %v5197_v0  ;;  %v4652_v55 = vpop.f32.mrf.mxu2  ;;  %v4556_v3 = vpop.f32.mrf.mxu0 }
 0x66a   :  { %v4653_v17 = vadd.f32 %v4652_v55, %v4604_v25  ;;  %v4701_v18 = vpop.f32.mrf.mxu3  ;;  %v4605_v26 = vpop.f32.mrf.mxu1 }
 0x66b   :  { %v5199_v56 = vsub.f32 1.5, %v5198_v54  ;;  %v4606_v31 = vadd.f32 %v4605_v26, %v4556_v3 }
 0x66c   :  { %v11556_v23 = vadd.f32 %v4701_v18, %v4653_v17 }
 0x66d   :  { %v5200_v53 = vmul.f32 %v7927_v43, %v5199_v56 }
 0x66f   :  { %v5204_v13 = vsel %vm5203_vm3, %v7927_v43, %v5200_v53 }
 0x670   :  { %v5229_v63 = vrot.slane %v5204_v13, 7 }
 0x671   :  { %v4654_v42 = vpop.f32.mrf.mxu2  ;;  %v4559_v47 = vpop.f32.mrf.mxu0 }
 0x672   :  { %v11560_v9 = vsel %vm3105_vm6, %v5194_v38, %v5229_v63  ;;  %v4655_v48 = vadd.f32 %v4654_v42, %v4606_v31  ;;  %v4703_v12 = vpop.f32.mrf.mxu3  ;;  %v4608_v15 = vpop.f32.mrf.mxu1 }
 0x673   :  { %v4609_v46 = vadd.f32 %v4608_v15, %v4559_v47  ;;  %v5019_v15 = vmul.f32 %v11539_v44, %v11539_v44 }
 0x674   :  { %v11562_v25 = vadd.f32 %v4703_v12, %v4655_v48  ;;  %4754 = vmatmul.bf16.gmra.mxu0 %v11219_v22 }
 0x675   :  { %4803 = vmatmul.bf16.gmra.mxu1 %v11221_v59 }
 0x676   :  { %4852 = vmatmul.bf16.gmra.mxu2 %v11223_v62 }
 0x677   :  { %4901 = vmatmul.bf16.gmra.mxu3 %v11225_v29 }
 0x679   :  { %v4657_v41 = vpop.f32.mrf.mxu2  ;;  %v4561_v43 = vpop.f32.mrf.mxu0 }
 0x67a   :  { %v4658_v36 = vadd.f32 %v4657_v41, %v4609_v46  ;;  %v4706_v39 = vpop.f32.mrf.mxu3  ;;  %v4610_v58 = vpop.f32.mrf.mxu1 }
 0x67b   :  { %v4611_v14 = vadd.f32 %v4610_v58, %v4561_v43 }
 0x67c   :  { %v11568_v0 = vadd.f32 %v4706_v39, %v4658_v36  ;;  %v5027_v39 = vmul.f32 %v11550_v61, %v11550_v61 }
 0x67e   :  { %13108 = vst [vmem:[#allocation26_spill] sm:$0xff] %v11568_v0 }
 0x681   :  { %v4659_v54 = vpop.f32.mrf.mxu2  ;;  %v4564_v18 = vpop.f32.mrf.mxu0 }
 0x682   :  { %v4660_v55 = vadd.f32 %v4659_v54, %v4611_v14  ;;  %v4708_v17 = vpop.f32.mrf.mxu3  ;;  %v4613_v3 = vpop.f32.mrf.mxu1  ;;  %v5031_v14 = vmul.f32 %v11556_v23, %v11556_v23 }
 0x683   :  { %v4614_v59 = vadd.f32 %v4613_v3, %v4564_v18 }
 0x684   :  { %v11570_v22 = vadd.f32 %v4708_v17, %v4660_v55  ;;  %4759 = vmatmul.bf16.gmra.mxu0 %v11227_v11 }
 0x685   :  { %4808 = vmatmul.bf16.gmra.mxu1 %v11229_v4 }
 0x686   :  { %13109 = vst [vmem:[#allocation27_spill] sm:$0xff] %v11570_v22  ;;  %4857 = vmatmul.bf16.gmra.mxu2 %v11231_v33 }
 0x687   :  { %4906 = vmatmul.bf16.gmra.mxu3 %v11233_v5 }
 0x689   :  { %v4662_v62 = vpop.f32.mrf.mxu2  ;;  %v4566_v26 = vpop.f32.mrf.mxu0 }
 0x68a   :  { %v4663_v29 = vadd.f32 %v4662_v62, %v4614_v59  ;;  %v4711_v56 = vpop.f32.mrf.mxu3  ;;  %v4615_v31 = vpop.f32.mrf.mxu1  ;;  %v5035_v62 = vmul.f32 %v11562_v25, %v11562_v25 }
 0x68b   :  { %v4616_v53 = vadd.f32 %v4615_v31, %v4566_v26 }
 0x68c   :  { %v11576_v49 = vadd.f32 %v4711_v56, %v4663_v29 }
 0x68e   :  { %13110 = vst [vmem:[#allocation54_spill] sm:$0xff] %v11576_v49 }
 0x691   :  { %v4664_v13 = vpop.f32.mrf.mxu2  ;;  %v4569_v42 = vpop.f32.mrf.mxu0 }
 0x692   :  { %v4665_v63 = vadd.f32 %v4664_v13, %v4616_v53  ;;  %v4713_v38 = vpop.f32.mrf.mxu3  ;;  %v4618_v48 = vpop.f32.mrf.mxu1  ;;  %v5039_v13 = vmul.f32 %v11568_v0, %v11568_v0 }
 0x693   :  { %v4619_v4 = vadd.f32 %v4618_v48, %v4569_v42  ;;  %v5043_v42 = vmul.f32 %v11570_v22, %v11570_v22 }
 0x694   :  { %v11578_v11 = vadd.f32 %v4713_v38, %v4665_v63  ;;  %4764 = vmatmul.bf16.gmra.mxu0 %v11235_v6  ;;  %v5015_v6 = vmul.f32 %v11532_v57, %v11532_v57 }
 0x695   :  { %4813 = vmatmul.bf16.gmra.mxu1 %v11237_v45  ;;  %v5023_v45 = vmul.f32 %v11547_v35, %v11547_v35 }
 0x696   :  { %13111 = vst [vmem:[#allocation29_spill] sm:$0xff] %v11578_v11  ;;  %4862 = vmatmul.bf16.gmra.mxu2 %v11239_v20  ;;  %v4971_v20 = vadd.f32 %v11539_v44, %v11532_v57 }
 0x697   :  { %4911 = vmatmul.bf16.gmra.mxu3 %v11241_v21  ;;  %v5119_v21 = vadd.f32 %v5019_v15, %v5015_v6 }
 0x698   :  { %v4972_v43 = vadd.f32 %v4971_v20, %v11547_v35 }
 0x699   :  { %v4667_v33 = vpop.f32.mrf.mxu2  ;;  %v4571_v47 = vpop.f32.mrf.mxu0  ;;  %v5120_v58 = vadd.f32 %v5119_v21, %v5023_v45 }
 0x69a   :  { %v4668_v5 = vadd.f32 %v4667_v33, %v4619_v4  ;;  %v4716_v12 = vpop.f32.mrf.mxu3  ;;  %v4620_v46 = vpop.f32.mrf.mxu1  ;;  %v4973_v55 = vadd.f32 %v4972_v43, %v11550_v61 }
 0x69b   :  { %v4621_v36 = vadd.f32 %v4620_v46, %v4571_v47  ;;  %v5121_v59 = vadd.f32 %v5120_v58, %v5027_v39 }
 0x69c   :  { %v11586_v41 = vadd.f32 %v4716_v12, %v4668_v5  ;;  %v4974_v56 = vadd.f32 %v4973_v55, %v11556_v23 }
 0x69d   :  { %v5122_v53 = vadd.f32 %v5121_v59, %v5031_v14 }
 0x69e   :  { %13112 = vst [vmem:[#allocation30_spill] sm:$0xff] %v11586_v41  ;;  %v4975_v63 = vadd.f32 %v4974_v56, %v11562_v25  ;;  %v5055_v21 = vmul.f32 %v11586_v41, %v11586_v41 }
 0x69f   :  { %v5123_v38 = vadd.f32 %v5122_v53, %v5035_v62 }
 0x6a0   :  { %v4976_v48 = vadd.f32 %v4975_v63, %v11568_v0 }
 0x6a1   :  { %v4669_v54 = vpop.f32.mrf.mxu2  ;;  %v4574_v3 = vpop.f32.mrf.mxu0  ;;  %v5124_v4 = vadd.f32 %v5123_v38, %v5039_v13 }
 0x6a2   :  { %v4670_v17 = vadd.f32 %v4669_v54, %v4621_v36  ;;  %v4718_v18 = vpop.f32.mrf.mxu3  ;;  %v4623_v29 = vpop.f32.mrf.mxu1  ;;  %v4977_v5 = vadd.f32 %v4976_v48, %v11570_v22  ;;  %v5051_v36 = vmul.f32 %v11578_v11, %v11578_v11 }
 0x6a3   :  { %v4624_v31 = vadd.f32 %v4623_v29, %v4574_v3  ;;  %v5125_v15 = vadd.f32 %v5124_v4, %v5043_v42 }
 0x6a4   :  { %v11603_v26 = vadd.f32 %v4718_v18, %v4670_v17  ;;  %4769 = vmatmul.bf16.gmra.mxu0 %v11243_v10  ;;  %v5047_v10 = vmul.f32 %v11576_v49, %v11576_v49  ;;  %v4978_v46 = vadd.f32 %v4977_v5, %v11576_v49 }
 0x6a5   :  { %4818 = vmatmul.bf16.gmra.mxu1 %v11245_v50 }
 0x6a6   :  { %13113 = vst [vmem:[#allocation57_spill] sm:$0xff] %v11603_v26  ;;  %4867 = vmatmul.bf16.gmra.mxu2 %v11247_v7  ;;  %v5126_v45 = vadd.f32 %v5125_v15, %v5047_v10  ;;  %v4979_v20 = vadd.f32 %v4978_v46, %v11578_v11  ;;  %v5059_v58 = vmul.f32 %v11603_v26, %v11603_v26 }
 0x6a7   :  { %4916 = vmatmul.bf16.gmra.mxu3 %v11249_v1 }
 0x6a8   :  { %v5127_v39 = vadd.f32 %v5126_v45, %v5051_v36  ;;  %v4980_v43 = vadd.f32 %v4979_v20, %v11586_v41 }
 0x6a9   :  { %v4672_v33 = vpop.f32.mrf.mxu2  ;;  %v4576_v50 = vpop.f32.mrf.mxu0 }
 0x6aa   :  { %v4673_v12 = vadd.f32 %v4672_v33, %v4624_v31  ;;  %v4721_v47 = vpop.f32.mrf.mxu3  ;;  %v4625_v7 = vpop.f32.mrf.mxu1  ;;  %v5128_v54 = vadd.f32 %v5127_v39, %v5055_v21  ;;  %v4981_v55 = vadd.f32 %v4980_v43, %v11603_v26 }
 0x6ab   :  { %v4626_v6 = vadd.f32 %v4625_v7, %v4576_v50 }
 0x6ac   :  { %v11621_v1 = vadd.f32 %v4721_v47, %v4673_v12  ;;  %v5129_v29 = vadd.f32 %v5128_v54, %v5059_v58 }
 0x6ae   :  { %13114 = vst [vmem:[#allocation31_spill] sm:$0xff] %v11621_v1  ;;  %v5063_v17 = vmul.f32 %v11621_v1, %v11621_v1  ;;  %v4982_v56 = vadd.f32 %v4981_v55, %v11621_v1 }
 0x6b0   :  { %v5130_v13 = vadd.f32 %v5129_v29, %v5063_v17 }
 0x6b1   :  { %v4674_v14 = vpop.f32.mrf.mxu2  ;;  %v4579_v59 = vpop.f32.mrf.mxu0 }
 0x6b2   :  { %v4675_v18 = vadd.f32 %v4674_v14, %v4626_v6  ;;  %v4723_v3 = vpop.f32.mrf.mxu3  ;;  %v4628_v62 = vpop.f32.mrf.mxu1 }
 0x6b3   :  { %v4629_v53 = vadd.f32 %v4628_v62, %v4579_v59 }
 0x6b4   :  { %v11633_v31 = vadd.f32 %v4723_v3, %v4675_v18  ;;  %4774 = vmatmul.bf16.gmra.mxu0 %v11251_v27 }
 0x6b5   :  { %4823 = vmatmul.bf16.gmra.mxu1 %v11253_v32 }
 0x6b6   :  { %13115 = vst [vmem:[#allocation32_spill] sm:$0xff] %v11633_v31  ;;  %v4983_v63 = vadd.f32 %v4982_v56, %v11633_v31  ;;  %v5067_v38 = vmul.f32 %v11633_v31, %v11633_v31  ;;  %4872 = vmatmul.bf16.gmra.mxu2 %v11255_v40 }
 0x6b7   :  { %4921 = vmatmul.bf16.gmra.mxu3 %v11257_v52 }
 0x6b8   :  { %v5131_v42 = vadd.f32 %v5130_v13, %v5067_v38 }
 0x6b9   :  { %v4677_v48 = vpop.f32.mrf.mxu2  ;;  %v4581_v5 = vpop.f32.mrf.mxu0 }
 0x6ba   :  { %v4678_v4 = vadd.f32 %v4677_v48, %v4629_v53  ;;  %v4726_v33 = vpop.f32.mrf.mxu3  ;;  %v4630_v10 = vpop.f32.mrf.mxu1 }
 0x6bb   :  { %v4631_v27 = vadd.f32 %v4630_v10, %v4581_v5 }
 0x6bc   :  { %v11642_v12 = vadd.f32 %v4726_v33, %v4678_v4 }
 0x6be   :  { %13116 = vst [vmem:[#allocation35_spill] sm:$0xff] %v11642_v12  ;;  %v4984_v47 = vadd.f32 %v4983_v63, %v11642_v12  ;;  %v5071_v50 = vmul.f32 %v11642_v12, %v11642_v12 }
 0x6c0   :  { %v5132_v15 = vadd.f32 %v5131_v42, %v5071_v50 }
 0x6c1   :  { %v4679_v32 = vpop.f32.mrf.mxu2  ;;  %v4740_v46 = vpop.f32.mrf.mxu0 }
 0x6c2   :  { %v4680_v7 = vadd.f32 %v4679_v32, %v4631_v27  ;;  %v4728_v40 = vpop.f32.mrf.mxu3  ;;  %v4789_v52 = vpop.f32.mrf.mxu1 }
 0x6c3   :  { %v4790_v6 = vadd.f32 %v4789_v52, %v4740_v46 }
 0x6c4   :  { %v11647_v36 = vadd.f32 %v4728_v40, %v4680_v7 }
 0x6c6   :  { %13117 = vst [vmem:[#allocation36_spill] sm:$0xff] %v11647_v36  ;;  %v4985_v45 = vadd.f32 %v4984_v47, %v11647_v36  ;;  %v5075_v20 = vmul.f32 %v11647_v36, %v11647_v36 }
 0x6c8   :  { %v4986_v21 = vrot.slane %v4985_v45, 4  ;;  %v5133_v39 = vadd.f32 %v5132_v15, %v5075_v20 }
 0x6c9   :  { %v4838_v43 = vpop.f32.mrf.mxu2  ;;  %v4742_v17 = vpop.f32.mrf.mxu0 }
 0x6ca   :  { %v4987_v58 = vadd.f32 %v4986_v21, %v4985_v45  ;;  %v5134_v14 = vrot.slane %v5133_v39, 4  ;;  %v4839_v54 = vadd.f32 %v4838_v43, %v4790_v6  ;;  %v4887_v55 = vpop.f32.mrf.mxu3  ;;  %v4791_v18 = vpop.f32.mrf.mxu1 }
 0x6cb   :  { %v4792_v29 = vadd.f32 %v4791_v18, %v4742_v17 }
 0x6cc   :  { %v4988_v3 = vrot.slane %v4987_v58, 2  ;;  %v5135_v59 = vadd.f32 %v5134_v14, %v5133_v39  ;;  %v11652_v62 = vadd.f32 %v4887_v55, %v4839_v54 }
 0x6ce   :  { %v4989_v56 = vadd.f32 %v4988_v3, %v4987_v58  ;;  %v5136_v53 = vrot.slane %v5135_v59, 2  ;;  %v5016_v2 = vmul.f32 %v11652_v62, %v11652_v62 }
 0x6d0   :  { %v4990_v13 = vrot.slane %v4989_v56, 1  ;;  %v5137_v63 = vadd.f32 %v5136_v53, %v5135_v59 }
 0x6d1   :  { %v4840_v38 = vpop.f32.mrf.mxu2  ;;  %v4745_v5 = vpop.f32.mrf.mxu0 }
 0x6d2   :  { %v4991_v42 = vadd.f32 %v4990_v13, %v4989_v56  ;;  %v5138_v48 = vrot.slane %v5137_v63, 1  ;;  %v4841_v4 = vadd.f32 %v4840_v38, %v4792_v29  ;;  %v4889_v33 = vpop.f32.mrf.mxu3  ;;  %v4794_v10 = vpop.f32.mrf.mxu1 }
 0x6d3   :  { %v4795_v15 = vadd.f32 %v4794_v10, %v4745_v5 }
 0x6d4   :  { %v5139_v27 = vadd.f32 %v5138_v48, %v5137_v63  ;;  %v11654_v47 = vmul.f32 0.0078125, %v4991_v42  ;;  %v11656_v50 = vadd.f32 %v4889_v33, %v4841_v4 }
 0x6d6   :  { %v11658_v32 = vmul.f32 0.0078125, %v5139_v27  ;;  %v11662_v7 = vmul.f32 %v11654_v47, %v11654_v47  ;;  %v5020_v16 = vmul.f32 %v11656_v50, %v11656_v50  ;;  %v4992_v24 = vadd.f32 %v11656_v50, %v11652_v62 }
 0x6d8   :  { %v5140_v22 = vadd.f32 %v5020_v16, %v5016_v2 }
 0x6d9   :  { %v4843_v46 = vpop.f32.mrf.mxu2  ;;  %v4747_v45 = vpop.f32.mrf.mxu0 }
 0x6da   :  { %v4844_v52 = vadd.f32 %v4843_v46, %v4795_v15  ;;  %v4892_v6 = vpop.f32.mrf.mxu3  ;;  %v4796_v20 = vpop.f32.mrf.mxu1 }
 0x6db   :  { %v4797_v39 = vadd.f32 %v4796_v20, %v4747_v45 }
 0x6dc   :  { %v11666_v21 = vadd.f32 %v4892_v6, %v4844_v52 }
 0x6de   :  { %v5024_v41 = vmul.f32 %v11666_v21, %v11666_v21 }
 0x6e0   :  { %v5141_v0 = vadd.f32 %v5140_v22, %v5024_v41 }
 0x6e1   :  { %v4845_v43 = vpop.f32.mrf.mxu2  ;;  %v4750_v54 = vpop.f32.mrf.mxu0 }
 0x6e2   :  { %v4846_v58 = vadd.f32 %v4845_v43, %v4797_v39  ;;  %v4894_v14 = vpop.f32.mrf.mxu3  ;;  %v4799_v55 = vpop.f32.mrf.mxu1 }
 0x6e3   :  { %v4800_v18 = vadd.f32 %v4799_v55, %v4750_v54 }
 0x6e4   :  { %v11668_v17 = vadd.f32 %v4894_v14, %v4846_v58 }
 0x6e9   :  { %v4848_v3 = vpop.f32.mrf.mxu2  ;;  %v4752_v56 = vpop.f32.mrf.mxu0 }
 0x6ea   :  { %v4849_v59 = vadd.f32 %v4848_v3, %v4800_v18  ;;  %v4897_v29 = vpop.f32.mrf.mxu3  ;;  %v4801_v53 = vpop.f32.mrf.mxu1 }
 0x6eb   :  { %v4802_v31 = vadd.f32 %v4801_v53, %v4752_v56 }
 0x6ec   :  { %v11670_v13 = vadd.f32 %v4897_v29, %v4849_v59 }
 0x6f1   :  { %v4850_v63 = vpop.f32.mrf.mxu2  ;;  %v4755_v42 = vpop.f32.mrf.mxu0 }
 0x6f2   :  { %v4899_v38 = vpop.f32.mrf.mxu3  ;;  %v4804_v48 = vpop.f32.mrf.mxu1  ;;  %v4851_v26 = vadd.f32 %v4850_v63, %v4802_v31  ;;  %v5028_v31 = vmul.f32 %v11668_v17, %v11668_v17 }
 0x6f3   :  { %v4805_v1 = vadd.f32 %v4804_v48, %v4755_v42  ;;  %v4993_v42 = vadd.f32 %v4992_v24, %v11666_v21 }
 0x6f4   :  { %v11683_v63 = vadd.f32 %v4899_v38, %v4851_v26 }
 0x6f5   :  { %v4994_v34 = vadd.f32 %v4993_v42, %v11668_v17 }
 0x6f6   :  { %v5036_v26 = vmul.f32 %v11683_v63, %v11683_v63 }
 0x6f7   :  { %v4995_v24 = vadd.f32 %v4994_v34, %v11670_v13 }
 0x6f9   :  { %v4853_v4 = vpop.f32.mrf.mxu2  ;;  %v4757_v5 = vpop.f32.mrf.mxu0  ;;  %v4996_v41 = vadd.f32 %v4995_v24, %v11683_v63 }
 0x6fa   :  { %v4902_v33 = vpop.f32.mrf.mxu3  ;;  %v4806_v10 = vpop.f32.mrf.mxu1  ;;  %v4854_v11 = vadd.f32 %v4853_v4, %v4805_v1  ;;  %v5032_v1 = vmul.f32 %v11670_v13, %v11670_v13 }
 0x6fb   :  { %v4807_v60 = vadd.f32 %v4806_v10, %v4757_v5  ;;  %v5142_v10 = vadd.f32 %v5141_v0, %v5028_v31 }
 0x6fc   :  { %v11688_v4 = vadd.f32 %v4902_v33, %v4854_v11 }
 0x6fd   :  { %v5143_v22 = vadd.f32 %v5142_v10, %v5032_v1 }
 0x6ff   :  { %v5144_v34 = vadd.f32 %v5143_v22, %v5036_v26 }
 0x701   :  { %v4855_v27 = vpop.f32.mrf.mxu2  ;;  %v4760_v46 = vpop.f32.mrf.mxu0 }
 0x702   :  { %v4904_v15 = vpop.f32.mrf.mxu3  ;;  %v4809_v52 = vpop.f32.mrf.mxu1  ;;  %v4856_v48 = vadd.f32 %v4855_v27, %v4807_v60  ;;  %v5040_v27 = vmul.f32 %v11688_v4, %v11688_v4 }
 0x703   :  { %v4810_v49 = vadd.f32 %v4809_v52, %v4760_v46 }
 0x704   :  { %v11693_v38 = vadd.f32 %v4904_v15, %v4856_v48 }
 0x706   :  { %v5044_v15 = vmul.f32 %v11693_v38, %v11693_v38 }
 0x709   :  { %v4858_v6 = vpop.f32.mrf.mxu2  ;;  %v4762_v20 = vpop.f32.mrf.mxu0 }
 0x70a   :  { %v4907_v45 = vpop.f32.mrf.mxu3  ;;  %v4811_v39 = vpop.f32.mrf.mxu1  ;;  %v4859_v2 = vadd.f32 %v4858_v6, %v4810_v49  ;;  %v4997_v6 = vadd.f32 %v4996_v41, %v11688_v4 }
 0x70b   :  { %v4812_v16 = vadd.f32 %v4811_v39, %v4762_v20 }
 0x70c   :  { %v11698_v11 = vadd.f32 %v4907_v45, %v4859_v2  ;;  %v4998_v45 = vadd.f32 %v4997_v6, %v11693_v38 }
 0x70e   :  { %v4999_v31 = vadd.f32 %v4998_v45, %v11698_v11 }
 0x711   :  { %v4860_v43 = vpop.f32.mrf.mxu2  ;;  %v4765_v14 = vpop.f32.mrf.mxu0 }
 0x712   :  { %v4909_v58 = vpop.f32.mrf.mxu3  ;;  %v4814_v54 = vpop.f32.mrf.mxu1  ;;  %v4861_v60 = vadd.f32 %v4860_v43, %v4812_v16 }
 0x713   :  { %v4815_v5 = vadd.f32 %v4814_v54, %v4765_v14  ;;  %v5145_v54 = vadd.f32 %v5144_v34, %v5040_v27 }
 0x714   :  { %v11703_v43 = vadd.f32 %v4909_v58, %v4861_v60 }
 0x715   :  { %v5146_v42 = vadd.f32 %v5145_v54, %v5044_v15 }
 0x716   :  { %v5052_v48 = vmul.f32 %v11703_v43, %v11703_v43  ;;  %v5000_v16 = vadd.f32 %v4999_v31, %v11703_v43 }
 0x719   :  { %v4863_v55 = vpop.f32.mrf.mxu2  ;;  %v4767_v3 = vpop.f32.mrf.mxu0 }
 0x71a   :  { %v4912_v18 = vpop.f32.mrf.mxu3  ;;  %v4816_v59 = vpop.f32.mrf.mxu1  ;;  %v4864_v33 = vadd.f32 %v4863_v55, %v4815_v5  ;;  %v5048_v55 = vmul.f32 %v11698_v11, %v11698_v11 }
 0x71b   :  { %v4817_v46 = vadd.f32 %v4816_v59, %v4767_v3 }
 0x71c   :  { %v11708_v3 = vadd.f32 %v4912_v18, %v4864_v33  ;;  %v5147_v1 = vadd.f32 %v5146_v42, %v5048_v55 }
 0x71e   :  { %v5056_v18 = vmul.f32 %v11708_v3, %v11708_v3  ;;  %v5001_v10 = vadd.f32 %v5000_v16, %v11708_v3 }
 0x721   :  { %v4865_v29 = vpop.f32.mrf.mxu2  ;;  %v4770_v36 = vpop.f32.mrf.mxu0 }
 0x722   :  { %v4914_v40 = vpop.f32.mrf.mxu3  ;;  %v4819_v12 = vpop.f32.mrf.mxu1  ;;  %v4866_v14 = vadd.f32 %v4865_v29, %v4817_v46 }
 0x723   :  { %v4820_v0 = vadd.f32 %v4819_v12, %v4770_v36 }
 0x724   :  { %v11713_v58 = vadd.f32 %v4914_v40, %v4866_v14 }
 0x726   :  { %v5060_v24 = vmul.f32 %v11713_v58, %v11713_v58  ;;  %v5002_v41 = vadd.f32 %v5001_v10, %v11713_v58 }
 0x729   :  { %v4868_v28 = vpop.f32.mrf.mxu2  ;;  %v4772_v53 = vpop.f32.mrf.mxu0 }
 0x72a   :  { %v4917_v56 = vpop.f32.mrf.mxu3  ;;  %v4821_v51 = vpop.f32.mrf.mxu1  ;;  %v4869_v12 = vadd.f32 %v4868_v28, %v4820_v0 }
 0x72b   :  { %v4822_v36 = vadd.f32 %v4821_v51, %v4772_v53  ;;  %v5148_v53 = vadd.f32 %v5147_v1, %v5052_v48 }
 0x72c   :  { %v11718_v5 = vadd.f32 %v4917_v56, %v4869_v12 }
 0x72d   :  { %v5149_v22 = vadd.f32 %v5148_v53, %v5056_v18 }
 0x72e   :  { %v5064_v27 = vmul.f32 %v11718_v5, %v11718_v5  ;;  %v5003_v33 = vadd.f32 %v5002_v41, %v11718_v5 }
 0x731   :  { %v4870_v49 = vpop.f32.mrf.mxu2  ;;  %v4775_v20 = vpop.f32.mrf.mxu0 }
 0x732   :  { %v4919_v52 = vpop.f32.mrf.mxu3  ;;  %v4824_v39 = vpop.f32.mrf.mxu1  ;;  %v4871_v29 = vadd.f32 %v4870_v49, %v4822_v36  ;;  %v5150_v49 = vadd.f32 %v5149_v22, %v5060_v24 }
 0x733   :  { %v4825_v59 = vadd.f32 %v4824_v39, %v4775_v20 }
 0x734   :  { %v11723_v40 = vadd.f32 %v4919_v52, %v4871_v29  ;;  %v5151_v52 = vadd.f32 %v5150_v49, %v5064_v27 }
 0x736   :  { %v5068_v46 = vmul.f32 %v11723_v40, %v11723_v40  ;;  %v5004_v6 = vadd.f32 %v5003_v33, %v11723_v40 }
 0x738   :  { %v5152_v14 = vadd.f32 %v5151_v52, %v5068_v46 }
 0x739   :  { %v4873_v2 = vpop.f32.mrf.mxu2  ;;  %v4777_v26 = vpop.f32.mrf.mxu0 }
 0x73a   :  { %v4874_v51 = vadd.f32 %v4873_v2, %v4825_v59  ;;  %v4922_v28 = vpop.f32.mrf.mxu3  ;;  %v4826_v60 = vpop.f32.mrf.mxu1  ;;  %v13118_v59 = vsub.f32 %v11658_v32, %v11662_v7 }
 0x73b   :  { %v4827_v0 = vadd.f32 %v4826_v60, %v4777_v26 }
 0x73c   :  { %v11728_v56 = vadd.f32 %v4922_v28, %v4874_v51  ;;  %v5179_v42 = vmax.f32 %v13118_v59, 0.0 }
 0x73e   :  { %v5072_v15 = vmul.f32 %v11728_v56, %v11728_v56  ;;  %v5005_v54 = vadd.f32 %v5004_v6, %v11728_v56  ;;  %v5183_v2 = vadd.f32 1e-05, %v5179_v42 }
 0x740   :  { %v5153_v55 = vadd.f32 %v5152_v14, %v5072_v15  ;;  %7928 = vrsqrt.f32 %v5183_v2  ;;  %vm5211_vm8 = vweird.f32 %v5183_v2 }
 0x741   :  { %v4875_v34 = vpop.f32.mrf.mxu2 }
 0x742   :  { %v4876_v20 = vadd.f32 %v4875_v34, %v4827_v0  ;;  %v4924_v39 = vpop.f32.mrf.mxu3 }
 0x744   :  { %v11737_v45 = vadd.f32 %v4924_v39, %v4876_v20 }
 0x746   :  { %v5006_v12 = vadd.f32 %v5005_v54, %v11737_v45  ;;  %v5076_v36 = vmul.f32 %v11737_v45, %v11737_v45  ;;  %v7929_v41 = vpop.eup %7928 }
 0x747   :  { %v5206_v49 = vmul.f32 %v7929_v41, %v5183_v2  ;;  %vm5212_vm7 = vweird.f32 %v7929_v41 }
 0x748   :  { %v5007_v31 = vrot.slane %v5006_v12, 4  ;;  %v5154_v48 = vadd.f32 %v5153_v55, %v5076_v36  ;;  %vm5213_vm10 = vmor %vm5211_vm8, %vm5212_vm7 }
 0x749   :  { %v5207_v0 = vmul.f32 %v7929_v41, %v5206_v49 }
 0x74a   :  { %v5008_v29 = vadd.f32 %v5007_v31, %v5006_v12  ;;  %v5155_v1 = vrot.slane %v5154_v48, 4  ;;  %v4927_v31 = vld [vmem:[%s12611_s5] sm:$0xf] }
 0x74b   :  { %v5208_v34 = vmul.f32 0.5, %v5207_v0  ;;  %v13123_v0 = vld [vmem:[#allocation70_spill] sm:$0xff] }
 0x74c   :  { %v5009_v16 = vrot.slane %v5008_v29, 2  ;;  %v5156_v18 = vadd.f32 %v5155_v1, %v5154_v48 }
 0x74d   :  { %v5209_v6 = vsub.f32 1.5, %v5208_v34 }
 0x74e   :  { %v5010_v51 = vadd.f32 %v5009_v16, %v5008_v29  ;;  %v5157_v28 = vrot.slane %v5156_v18, 2 }
 0x74f   :  { %v5210_v39 = vmul.f32 %v7929_v41, %v5209_v6 }
 0x750   :  { %v5011_v53 = vrot.slane %v5010_v51, 1  ;;  %v5158_v10 = vadd.f32 %v5157_v28, %v5156_v18  ;;  %v13119_v28 = vld [vmem:[#allocation21_spill] sm:$0xff] }
 0x751   :  { %v5214_v55 = vsel %vm5213_vm10, %v7929_v41, %v5210_v39  ;;  %v13121_v41 = vld [vmem:[#allocation74_spill] sm:$0xff]  ;;  %v13125_v39 = vld [vmem:[#allocation75_spill] sm:$0xff] }
 0x752   :  { %v5012_v24 = vadd.f32 %v5011_v53, %v5010_v51  ;;  %v5159_v26 = vrot.slane %v5158_v10, 1  ;;  %v5230_v59 = vrot.slane %v5214_v55, 6  ;;  %v13126_v55 = vld [vmem:[#allocation65_spill] sm:$0xff] }
 0x754   :  { %v5160_v60 = vadd.f32 %v5159_v26, %v5158_v10  ;;  %v5164_v22 = vmul.f32 0.0078125, %v5012_v24  ;;  %v13120_v26 = vld [vmem:[#allocation64_spill] sm:$0xff] }
 0x756   :  { %v5168_v27 = vmul.f32 0.0078125, %v5160_v60  ;;  %v5172_v32 = vmul.f32 %v5164_v22, %v5164_v22 }
 0x758   :  { %v5176_v7 = vsub.f32 %v5168_v27, %v5172_v32 }
 0x75a   :  { %v5180_v33 = vmax.f32 %v5176_v7, 0.0 }
 0x75c   :  { %v5184_v46 = vadd.f32 1e-05, %v5180_v33  ;;  %v13122_v33 = vld [vmem:[#allocation17_spill] sm:$0xff] }
 0x75e   :  { %7930 = vrsqrt.f32 %v5184_v46  ;;  %vm5221_vm11 = vweird.f32 %v5184_v46 }
 0x764   :  { %v7931_v52 = vpop.eup %7930 }
 0x765   :  { %v5216_v15 = vmul.f32 %v7931_v52, %v5184_v46  ;;  %vm5222_vm9 = vweird.f32 %v7931_v52 }
 0x766   :  { %vm5223_vm12 = vmor %vm5221_vm11, %vm5222_vm9 }
 0x767   :  { %v5217_v20 = vmul.f32 %v7931_v52, %v5216_v15  ;;  %v13124_v15 = vld [vmem:[#allocation14_spill] sm:$0xff] }
 0x769   :  { %v5218_v14 = vmul.f32 0.5, %v5217_v20 }
 0x76b   :  { %v5219_v54 = vsub.f32 1.5, %v5218_v14 }
 0x76d   :  { %v5220_v12 = vmul.f32 %v7931_v52, %v5219_v54 }
 0x76f   :  { %v5224_v36 = vsel %vm5223_vm12, %v7931_v52, %v5220_v12 }
 0x770   :  { %v5231_v42 = vrot.slane %v5224_v36, 5 }
 0x772   :  { %v5233_v48 = vsel %vm3107_vm14, %v5230_v59, %v5231_v42 }
 0x773   :  { %v5234_v29 = vsel %vm3109_vm15, %v11560_v9, %v5233_v48 }
 0x774   :  { %v5236_v1 = vmul.f32 %v5234_v29, %v4927_v31  ;;  %v13127_v31 = vld [vmem:[#allocation53_spill] sm:$0xff]  ;;  %v13128_v29 = vld [vmem:[#allocation15_spill] sm:$0xff] }
 0x776   :  { %v11751_v2 = vperm.slane %v5236_v1, 0  ;;  %v11753_v16 = vperm.slane %v5236_v1, 1  ;;  %v11755_v18 = vperm.slane %v5236_v1, 2  ;;  %v11757_v51 = vperm.slane %v5236_v1, 3 }
 0x778   :  { %v5246_v53 = vmul.f32 %v11751_v2, %v13119_v28  ;;  %v5247_v10 = vmul.f32 %v11753_v16, %v11537_v37  ;;  %v5248_v24 = vmul.f32 %v11755_v18, %v11654_v47  ;;  %v5249_v9 = vmul.f32 %v11757_v51, %v5164_v22  ;;  %v4928_v22 = vld [vmem:[%s12612_s6] sm:$0xf]  ;;  %v13129_v28 = vld [vmem:[#allocation66_spill] sm:$0xff] }
 0x779   :  { %v11768_v60 = vmul.f32 %v11751_v2, %v13120_v26  ;;  %v11772_v27 = vmul.f32 %v11753_v16, %v13121_v41  ;;  %v11776_v32 = vmul.f32 %v11755_v18, %v11532_v57  ;;  %v11780_v47 = vmul.f32 %v11757_v51, %v11652_v62  ;;  %v13133_v26 = vld [vmem:[#allocation71_spill] sm:$0xff] }
 0x77a   :  { %v5254_v7 = vrot.slane %v5247_v10, 7  ;;  %v5255_v49 = vrot.slane %v5248_v24, 6  ;;  %v5256_v37 = vrot.slane %v5249_v9, 5  ;;  %v11787_v46 = vmul.f32 %v11751_v2, %v13122_v33  ;;  %v13131_v24 = vld [vmem:[#allocation26_spill] sm:$0xff]  ;;  %v13132_v9 = vld [vmem:[#allocation56_spill] sm:$0xff] }
 0x77b   :  { %v11791_v34 = vmul.f32 %v11753_v16, %v13123_v0  ;;  %v11795_v57 = vmul.f32 %v11755_v18, %v11539_v44  ;;  %v11799_v62 = vmul.f32 %v11757_v51, %v11656_v50  ;;  %v11805_v20 = vmul.f32 %v11751_v2, %v13124_v15  ;;  %v13136_v33 = vld [vmem:[#allocation76_spill] sm:$0xff] }
 0x77c   :  { %v5257_v52 = vsel %vm3105_vm6, %v5246_v53, %v5254_v7  ;;  %v5258_v6 = vsel %vm3107_vm14, %v5255_v49, %v5256_v37  ;;  %v11809_v14 = vmul.f32 %v11753_v16, %v13125_v39  ;;  %v11814_v44 = vmul.f32 %v11755_v18, %v11547_v35  ;;  %v13130_v53 = vld [vmem:[#allocation49_spill] sm:$0xff]  ;;  %v13134_v7 = vld [vmem:[#allocation27_spill] sm:$0xff] }
 0x77d   :  { %v5259_v54 = vsel %vm3109_vm15, %v5257_v52, %v5258_v6  ;;  %v11818_v50 = vmul.f32 %v11757_v51, %v11666_v21  ;;  %v5274_v12 = vmul.f32 %v11751_v2, %v13126_v55  ;;  %v11824_v59 = vmul.f32 %v11753_v16, %v11427_v8  ;;  %v13137_v52 = vld [vmem:[#allocation54_spill] sm:$0xff]  ;;  %v13138_v39 = vld [vmem:[#allocation67_spill] sm:$0xff] }
 0x77e   :  { %v5261_v36 = vsub.f32 %v4928_v22, %v5259_v54  ;;  %v11828_v42 = vmul.f32 %v11755_v18, %v11550_v61  ;;  %v11832_v35 = vmul.f32 %v11757_v51, %v11668_v17  ;;  %v11836_v21 = vmul.f32 %v11751_v2, %v13127_v31  ;;  %v13135_v22 = vld [vmem:[#allocation18_spill] sm:$0xff]  ;;  %v13139_v54 = vld [vmem:[#allocation23_spill] sm:$0xff]  ;;  %v13140_v31 = vld [vmem:[#allocation29_spill] sm:$0xff] }
 0x77f   :  { %v11840_v48 = vmul.f32 %v11753_v16, %v11433_v30  ;;  %v11844_v8 = vmul.f32 %v11755_v18, %v11556_v23  ;;  %v11848_v61 = vmul.f32 %v11757_v51, %v11670_v13  ;;  %v11852_v17 = vmul.f32 %v11751_v2, %v13128_v29 }
 0x780   :  { %v11856_v1 = vmul.f32 %v11753_v16, %v11435_v19  ;;  %v11860_v30 = vmul.f32 %v11755_v18, %v11562_v25  ;;  %v11864_v23 = vmul.f32 %v11757_v51, %v11683_v63  ;;  %v11868_v13 = vmul.f32 %v11751_v2, %v13129_v28 }
 0x781   :  { %v11872_v10 = vmul.f32 %v11753_v16, %v13130_v53  ;;  %v11876_v19 = vmul.f32 %v11755_v18, %v13131_v24  ;;  %v11880_v25 = vmul.f32 %v11757_v51, %v11688_v4  ;;  %v11884_v63 = vmul.f32 %v11751_v2, %v13132_v9  ;;  %v13141_v53 = vld [vmem:[#allocation72_spill] sm:$0xff]  ;;  %v13142_v24 = vld [vmem:[#allocation33_spill] sm:$0xff] }
 0x782   :  { %v11888_v41 = vmul.f32 %v11753_v16, %v13133_v26  ;;  %v11892_v49 = vmul.f32 %v11755_v18, %v13134_v7  ;;  %v11896_v37 = vmul.f32 %v11757_v51, %v11693_v38  ;;  %v11900_v4 = vmul.f32 %v11751_v2, %v13135_v22  ;;  %v13143_v26 = vld [vmem:[#allocation30_spill] sm:$0xff] }
 0x783   :  { %v11904_v0 = vmul.f32 %v11753_v16, %v13136_v33  ;;  %v11908_v6 = vmul.f32 %v11755_v18, %v13137_v52  ;;  %v11912_v15 = vmul.f32 %v11757_v51, %v11698_v11  ;;  %v11916_v38 = vmul.f32 %v11751_v2, %v13138_v39  ;;  %v13144_v22 = vld [vmem:[#allocation46_spill] sm:$0xff]  ;;  %v13146_v52 = vld [vmem:[#allocation77_spill] sm:$0xff] }
 0x784   :  { %v11920_v55 = vmul.f32 %v11753_v16, %v13139_v54  ;;  %v11924_v29 = vmul.f32 %v11755_v18, %v13140_v31  ;;  %v11928_v28 = vmul.f32 %v11757_v51, %v11703_v43  ;;  %v11932_v11 = vmul.f32 %v11751_v2, %v13141_v53  ;;  %v13148_v54 = vld [vmem:[#allocation57_spill] sm:$0xff]  ;;  %v13149_v53 = vld [vmem:[#allocation68_spill] sm:$0xff] }
 0x785   :  { %v11936_v9 = vmul.f32 %v11753_v16, %v13142_v24  ;;  %v11940_v7 = vmul.f32 %v11755_v18, %v13143_v26  ;;  %v11944_v33 = vmul.f32 %v11751_v2, %v13144_v22  ;;  %v11948_v43 = vmul.f32 %v11757_v51, %v11708_v3  ;;  %v13151_v26 = vld [vmem:[#allocation24_spill] sm:$0xff] }
 0x786   :  { %v11952_v39 = vmul.f32 %v11753_v16, %v13146_v52  ;;  %v11956_v31 = vmul.f32 %v11755_v18, %v13148_v54  ;;  %v11960_v24 = vmul.f32 %v11751_v2, %v13149_v53  ;;  %v11964_v22 = vmul.f32 %v11753_v16, %v13151_v26 }
 0x787   :  { %13145 = vst [vmem:[#allocation16_spill] sm:$0xff] %v11944_v33  ;;  %v13153_v33 = vld [vmem:[#allocation31_spill] sm:$0xff]  ;;  %v11972_v52 = vmul.f32 %v11757_v51, %v11718_v5  ;;  %v11980_v53 = vmul.f32 %v11757_v51, %v11713_v58 }
 0x788   :  { %13147 = vst [vmem:[#allocation38_spill] sm:$0xff] %v11952_v39  ;;  %v11968_v3 = vmul.f32 %v11755_v18, %v13153_v33  ;;  %v13156_v39 = vld [vmem:[#allocation73_spill] sm:$0xff] }
 0x789   :  { %13150 = vst [vmem:[#allocation22_spill] sm:$0xff] %v11960_v24  ;;  %v11976_v54 = vmul.f32 %v11751_v2, %v13156_v39  ;;  %v13158_v24 = vld [vmem:[#allocation34_spill] sm:$0xff]  ;;  %v11996_v39 = vmul.f32 %v11757_v51, %v11723_v40 }
 0x78a   :  { %13152 = vst [vmem:[#allocation44_spill] sm:$0xff] %v11964_v22  ;;  %v11984_v26 = vmul.f32 %v11753_v16, %v13158_v24  ;;  %v13160_v22 = vld [vmem:[#allocation32_spill] sm:$0xff] }
 0x78b   :  { %13154 = vst [vmem:[#allocation45_spill] sm:$0xff] %v11968_v3  ;;  %v11988_v33 = vmul.f32 %v11755_v18, %v13160_v22  ;;  %v13161_v3 = vld [vmem:[#allocation20_spill] sm:$0xff] }
 0x78c   :  { %13155 = vst [vmem:[#allocation25_spill] sm:$0xff] %v11972_v52  ;;  %v11992_v5 = vmul.f32 %v11751_v2, %v13161_v3  ;;  %v13166_v52 = vld [vmem:[#allocation35_spill] sm:$0xff]  ;;  %v12012_v3 = vmul.f32 %v11757_v51, %v11728_v56  ;;  %v12032_v56 = vperm.slane %v5261_v36, 3 }
 0x78d   :  { %13157 = vst [vmem:[#allocation47_spill] sm:$0xff] %v11976_v54  ;;  %v13164_v54 = vld [vmem:[#allocation78_spill] sm:$0xff]  ;;  %v12004_v24 = vmul.f32 %v11755_v18, %v13166_v52  ;;  %v12026_v52 = vmul.f32 %v11757_v51, %v11737_v45 }
 0x78e   :  { %13159 = vst [vmem:[#allocation48_spill] sm:$0xff] %v11984_v26  ;;  %v12000_v58 = vmul.f32 %v11753_v16, %v13164_v54  ;;  %v13167_v26 = vld [vmem:[#allocation69_spill] sm:$0xff] }
 0x78f   :  { %13162 = vst [vmem:[#allocation28_spill] sm:$0xff] %v11992_v5  ;;  %v12008_v22 = vmul.f32 %v11751_v2, %v13167_v26  ;;  %v13168_v5 = vld [vmem:[#allocation52_spill] sm:$0xff]  ;;  %v12028_v2 = vperm.slane %v5261_v36, 1  ;;  %v12030_v26 = vperm.slane %v5261_v36, 2 }
 0x790   :  { %13163 = vst [vmem:[#allocation50_spill] sm:$0xff] %v11996_v39  ;;  %v12016_v40 = vmul.f32 %v11753_v16, %v13168_v5  ;;  %v13169_v39 = vld [vmem:[#allocation36_spill] sm:$0xff] }
 0x791   :  { %13165 = vst [vmem:[#allocation51_spill] sm:$0xff] %v12000_v58  ;;  %v12020_v54 = vmul.f32 %v11755_v18, %v13169_v39  ;;  %v12022_v58 = vperm.slane %v5261_v36, 0  ;;  %v12051_v51 = vadd.f32 %v12028_v2, %v11772_v27  ;;  %v12055_v36 = vadd.f32 %v12030_v26, %v11776_v32  ;;  %v13178_v39 = vld [vmem:[#allocation38_spill] sm:$0xff] }
 0x792   :  { %v12071_v27 = vadd.f32 %v12032_v56, %v11799_v62  ;;  %v12075_v32 = vadd.f32 %v12028_v2, %v11809_v14  ;;  %v12091_v62 = vadd.f32 %v12030_v26, %v11828_v42  ;;  %v12095_v14 = vadd.f32 %v12032_v56, %v11832_v35 }
 0x793   :  { %v12036_v16 = vadd.f32 %v12022_v58, %v11768_v60  ;;  %v12040_v18 = vadd.f32 %v12022_v58, %v11787_v46  ;;  %v12044_v5 = vadd.f32 %v12022_v58, %v11805_v20  ;;  %v12047_v45 = vadd.f32 %v12022_v58, %v5274_v12  ;;  %13171 = vst [vmem:[#allocation58_spill] sm:$0xff] %v12051_v51 }
 0x794   :  { %13172 = vst [vmem:[#allocation37_spill] sm:$0xff] %v12055_v36  ;;  %v12059_v60 = vadd.f32 %v12032_v56, %v11780_v47  ;;  %v12063_v46 = vadd.f32 %v12028_v2, %v11791_v34  ;;  %v12067_v20 = vadd.f32 %v12030_v26, %v11795_v57  ;;  %v12079_v47 = vadd.f32 %v12030_v26, %v11814_v44 }
 0x795   :  { %13170 = vst [vmem:[#allocation55_spill] sm:$0xff] %v12036_v16  ;;  %v12083_v34 = vadd.f32 %v12032_v56, %v11818_v50  ;;  %v12087_v57 = vadd.f32 %v12028_v2, %v11824_v59  ;;  %v12099_v44 = vadd.f32 %v12022_v58, %v11836_v21  ;;  %v12103_v50 = vadd.f32 %v12028_v2, %v11840_v48 }
 0x796   :  { %13173 = vst [vmem:[#allocation59_spill] sm:$0xff] %v12059_v60  ;;  %v12107_v12 = vadd.f32 %v12030_v26, %v11844_v8  ;;  %v12111_v59 = vadd.f32 %v12032_v56, %v11848_v61  ;;  %v12115_v42 = vadd.f32 %v12022_v58, %v11852_v17  ;;  %v12119_v35 = vadd.f32 %v12028_v2, %v11856_v1 }
 0x797   :  { %v12123_v21 = vadd.f32 %v12030_v26, %v11860_v30  ;;  %v12127_v48 = vadd.f32 %v12032_v56, %v11864_v23  ;;  %v12131_v8 = vadd.f32 %v12022_v58, %v11868_v13  ;;  %v12135_v61 = vadd.f32 %v12028_v2, %v11872_v10 }
 0x798   :  { %v12139_v17 = vadd.f32 %v12030_v26, %v11876_v19  ;;  %v12143_v1 = vadd.f32 %v12032_v56, %v11880_v25  ;;  %v12147_v30 = vadd.f32 %v12022_v58, %v11884_v63  ;;  %v12151_v23 = vadd.f32 %v12028_v2, %v11888_v41 }
 0x799   :  { %v12155_v13 = vadd.f32 %v12030_v26, %v11892_v49  ;;  %v12159_v10 = vadd.f32 %v12032_v56, %v11896_v37  ;;  %v12163_v19 = vadd.f32 %v12022_v58, %v11900_v4  ;;  %v12167_v25 = vadd.f32 %v12028_v2, %v11904_v0 }
 0x79a   :  { %v12171_v63 = vadd.f32 %v12030_v26, %v11908_v6  ;;  %v12175_v41 = vadd.f32 %v12032_v56, %v11912_v15  ;;  %v12179_v49 = vadd.f32 %v12022_v58, %v11916_v38  ;;  %v12183_v37 = vadd.f32 %v12028_v2, %v11920_v55 }
 0x79b   :  { %v12187_v4 = vadd.f32 %v12030_v26, %v11924_v29  ;;  %v12191_v0 = vadd.f32 %v12032_v56, %v11928_v28  ;;  %v12195_v6 = vadd.f32 %v12022_v58, %v11932_v11  ;;  %v12199_v15 = vadd.f32 %v12028_v2, %v11936_v9  ;;  %v13176_v29 = vld [vmem:[#allocation16_spill] sm:$0xff] }
 0x79c   :  { %v12203_v38 = vadd.f32 %v12030_v26, %v11940_v7  ;;  %v12207_v55 = vadd.f32 %v12032_v56, %v11948_v43  ;;  %v12211_v28 = vadd.f32 %v12022_v58, %v13176_v29  ;;  %v12215_v11 = vadd.f32 %v12028_v2, %v13178_v39 }
 0x79d   :  { %v12219_v9 = vadd.f32 %v12030_v26, %v11956_v31  ;;  %v12223_v7 = vadd.f32 %v12032_v56, %v11980_v53 }
 0x79e   :  { %13174 = vst [vmem:[#allocation13_spill] sm:$0xff] %v12203_v38  ;;  %v13182_v38 = vld [vmem:[#allocation22_spill] sm:$0xff] }
 0x79f   :  { %13175 = vst [vmem:[#allocation60_spill] sm:$0xff] %v12207_v55  ;;  %v12227_v43 = vadd.f32 %v12022_v58, %v13182_v38  ;;  %v13183_v55 = vld [vmem:[#allocation44_spill] sm:$0xff] }
 0x7a0   :  { %13177 = vst [vmem:[#allocation39_spill] sm:$0xff] %v12211_v28  ;;  %v12231_v29 = vadd.f32 %v12028_v2, %v13183_v55  ;;  %v13185_v28 = vld [vmem:[#allocation45_spill] sm:$0xff]  ;;  %v12251_v55 = vadd.f32 %v12030_v26, %v11988_v33  ;;  %v12271_v33 = vadd.f32 %v12032_v56, %v12012_v3  ;;  %v5410_v3 = vmax.f32 %v12083_v34, 0.0 }
 0x7a1   :  { %13179 = vst [vmem:[#allocation19_spill] sm:$0xff] %v12215_v11  ;;  %v12235_v39 = vadd.f32 %v12030_v26, %v13185_v28  ;;  %v13187_v11 = vld [vmem:[#allocation25_spill] sm:$0xff]  ;;  %v5420_v34 = vmax.f32 %v12119_v35, 0.0  ;;  %v5430_v35 = vmax.f32 %v12159_v10, 0.0  ;;  %v5440_v10 = vmax.f32 %v12199_v15, 0.0 }
 0x7a2   :  { %13180 = vst [vmem:[#allocation41_spill] sm:$0xff] %v12219_v9  ;;  %v12239_v31 = vadd.f32 %v12032_v56, %v13187_v11  ;;  %v13189_v9 = vld [vmem:[#allocation47_spill] sm:$0xff] }
 0x7a3   :  { %13181 = vst [vmem:[#allocation42_spill] sm:$0xff] %v12223_v7  ;;  %v12243_v53 = vadd.f32 %v12022_v58, %v13189_v9  ;;  %v13190_v7 = vld [vmem:[#allocation48_spill] sm:$0xff] }
 0x7a4   :  { %13184 = vst [vmem:[#allocation43_spill] sm:$0xff] %v12231_v29  ;;  %v12247_v38 = vadd.f32 %v12028_v2, %v13190_v7  ;;  %v13191_v29 = vld [vmem:[#allocation50_spill] sm:$0xff]  ;;  %v12267_v7 = vadd.f32 %v12030_v26, %v12004_v24  ;;  %v12287_v24 = vadd.f32 %v12032_v56, %v12026_v52  ;;  %v5408_v52 = vmax.f32 %v12075_v32, 0.0 }
 0x7a5   :  { %13186 = vst [vmem:[#allocation61_spill] sm:$0xff] %v12235_v39  ;;  %v12255_v28 = vadd.f32 %v12032_v56, %v13191_v29  ;;  %v13192_v39 = vld [vmem:[#allocation28_spill] sm:$0xff]  ;;  %v12275_v29 = vadd.f32 %v12022_v58, %v12008_v22  ;;  %v5403_v22 = vmax.f32 %v12040_v18, 0.0  ;;  %v5409_v56 = vmax.f32 %v12079_v47, 0.0 }
 0x7a6   :  { %13188 = vst [vmem:[#allocation62_spill] sm:$0xff] %v12239_v31  ;;  %v12259_v11 = vadd.f32 %v12022_v58, %v13192_v39  ;;  %v13193_v31 = vld [vmem:[#allocation51_spill] sm:$0xff]  ;;  %v12279_v39 = vadd.f32 %v12028_v2, %v12016_v40  ;;  %v5404_v40 = vmax.f32 %v12063_v46, 0.0  ;;  %v5412_v58 = vmax.f32 %v12087_v57, 0.0  ;;  %v13201_v60 = vld [vmem:[#allocation60_spill] sm:$0xff] }
 0x7a7   :  { %v12263_v9 = vadd.f32 %v12028_v2, %v13193_v31  ;;  %13194 = vst [vmem:[#allocation63_spill] sm:$0xff] %v12267_v7  ;;  %v12283_v31 = vadd.f32 %v12030_v26, %v12020_v54  ;;  %v5405_v2 = vmax.f32 %v12067_v20, 0.0  ;;  %v5406_v54 = vmax.f32 %v12071_v27, 0.0  ;;  %v13200_v7 = vld [vmem:[#allocation13_spill] sm:$0xff]  ;;  %v13202_v36 = vld [vmem:[#allocation39_spill] sm:$0xff] }
 0x7a8   :  { %13195 = vst [vmem:[#allocation40_spill] sm:$0xff] %v12271_v33  ;;  %v5407_v26 = vmax.f32 %v12044_v5, 0.0  ;;  %v5411_v33 = vmax.f32 %v12047_v45, 0.0  ;;  %v5413_v18 = vmax.f32 %v12091_v62, 0.0  ;;  %v5414_v46 = vmax.f32 %v12095_v14, 0.0  ;;  %v13203_v51 = vld [vmem:[#allocation19_spill] sm:$0xff] }
 0x7a9   :  { %13196 = vst [vmem:[#allocation21_spill] sm:$0xff] %v12275_v29  ;;  %v5415_v20 = vmax.f32 %v12099_v44, 0.0  ;;  %v5416_v27 = vmax.f32 %v12103_v50, 0.0  ;;  %v5417_v5 = vmax.f32 %v12107_v12, 0.0  ;;  %v5418_v32 = vmax.f32 %v12111_v59, 0.0  ;;  %v13204_v16 = vld [vmem:[#allocation41_spill] sm:$0xff] }
 0x7aa   :  { %13197 = vst [vmem:[#allocation64_spill] sm:$0xff] %v12279_v39  ;;  %v5419_v47 = vmax.f32 %v12115_v42, 0.0  ;;  %v5421_v45 = vmax.f32 %v12123_v21, 0.0  ;;  %v5422_v57 = vmax.f32 %v12127_v48, 0.0  ;;  %v5423_v62 = vmax.f32 %v12131_v8, 0.0 }
 0x7ab   :  { %13198 = vst [vmem:[#allocation74_spill] sm:$0xff] %v12283_v31  ;;  %v5424_v14 = vmax.f32 %v12135_v61, 0.0  ;;  %v5425_v44 = vmax.f32 %v12139_v17, 0.0  ;;  %v5426_v50 = vmax.f32 %v12143_v1, 0.0  ;;  %v5427_v12 = vmax.f32 %v12147_v30, 0.0  ;;  %v13206_v31 = vld [vmem:[#allocation43_spill] sm:$0xff] }
 0x7ac   :  { %13199 = vst [vmem:[#allocation17_spill] sm:$0xff] %v12287_v24  ;;  %v5428_v59 = vmax.f32 %v12151_v23, 0.0  ;;  %v5429_v42 = vmax.f32 %v12155_v13, 0.0  ;;  %v5431_v21 = vmax.f32 %v12163_v19, 0.0  ;;  %v5432_v48 = vmax.f32 %v12167_v25, 0.0  ;;  %v13205_v24 = vld [vmem:[#allocation42_spill] sm:$0xff] }
 0x7ad   :  { %v5433_v8 = vmax.f32 %v12171_v63, 0.0  ;;  %v5434_v61 = vmax.f32 %v12175_v41, 0.0  ;;  %v5435_v17 = vmax.f32 %v12179_v49, 0.0  ;;  %v5436_v1 = vmax.f32 %v12183_v37, 0.0  ;;  %v13207_v39 = vld [vmem:[#allocation61_spill] sm:$0xff]  ;;  %v13208_v29 = vld [vmem:[#allocation62_spill] sm:$0xff] }
 0x7ae   :  { %v5437_v30 = vmax.f32 %v12187_v4, 0.0  ;;  %v5438_v23 = vmax.f32 %v12191_v0, 0.0  ;;  %v5439_v13 = vmax.f32 %v12195_v6, 0.0  ;;  %v5441_v19 = vmax.f32 %v13200_v7, 0.0 }
 0x7af   :  { %v5442_v25 = vmax.f32 %v13201_v60, 0.0  ;;  %v5443_v63 = vmax.f32 %v13202_v36, 0.0  ;;  %v5444_v41 = vmax.f32 %v13203_v51, 0.0  ;;  %v5445_v49 = vmax.f32 %v13204_v16, 0.0 }
 0x7b0   :  { %v5446_v37 = vmax.f32 %v13205_v24, 0.0  ;;  %v5447_v4 = vmax.f32 %v12227_v43, 0.0  ;;  %v5448_v0 = vmax.f32 %v13206_v31, 0.0  ;;  %v5449_v6 = vmax.f32 %v13207_v39, 0.0  ;;  %v13209_v43 = vld [vmem:[#allocation63_spill] sm:$0xff]  ;;  %v13210_v39 = vld [vmem:[#allocation40_spill] sm:$0xff] }
 0x7b1   :  { %v5450_v15 = vmax.f32 %v13208_v29, 0.0  ;;  %v5451_v7 = vmax.f32 %v12243_v53, 0.0  ;;  %v5452_v60 = vmax.f32 %v12247_v38, 0.0  ;;  %v5453_v36 = vmax.f32 %v12251_v55, 0.0  ;;  %v13211_v53 = vld [vmem:[#allocation21_spill] sm:$0xff]  ;;  %v13212_v55 = vld [vmem:[#allocation64_spill] sm:$0xff] }
 0x7b2   :  { %v5454_v51 = vmax.f32 %v12255_v28, 0.0  ;;  %v5455_v16 = vmax.f32 %v12259_v11, 0.0  ;;  %v5456_v24 = vmax.f32 %v12263_v9, 0.0  ;;  %v5457_v31 = vmax.f32 %v13209_v43, 0.0  ;;  %v13213_v11 = vld [vmem:[#allocation74_spill] sm:$0xff] }
 0x7b3   :  { %v5458_v29 = vmax.f32 %v13210_v39, 0.0  ;;  %v5459_v38 = vmax.f32 %v13211_v53, 0.0  ;;  %v5460_v28 = vmax.f32 %v13212_v55, 0.0  ;;  %v5461_v9 = vmax.f32 %v13213_v11, 0.0  ;;  %v13214_v43 = vld [vmem:[#allocation17_spill] sm:$0xff]  ;;  %v13215_v53 = vld [vmem:[#allocation55_spill] sm:$0xff] }
 0x7b4   :  { %v5462_v39 = vmax.f32 %v13214_v43, 0.0  ;;  %v13216_v55 = vmax.f32 %v13215_v53, 0.0  ;;  %v13218_v43 = vld [vmem:[#allocation58_spill] sm:$0xff] }
 0x7b5   :  { %v13219_v53 = vmax.f32 %v13218_v43, 0.0 }
 0x7b6   :  { %v12355_v11 = vpack.c.bf16 %v5403_v22, %v13216_v55  ;;  %v13221_v55 = vld [vmem:[#allocation37_spill] sm:$0xff] }
 0x7b7   :  { %v12359_v22 = vpack.c.bf16 %v5404_v40, %v13219_v53  ;;  %v13224_v40 = vld [vmem:[#allocation59_spill] sm:$0xff] }
 0x7b8   :  { %13217 = vst [vmem:[#allocation70_spill] sm:$0xff] %v12355_v11  ;;  %v13222_v11 = vmax.f32 %v13221_v55, 0.0  ;;  %v13225_v53 = vmax.f32 %v13224_v40, 0.0  ;;  %v12369_v55 = vpack.c.bf16 %v5411_v33, %v5407_v26  ;;  %v12377_v40 = vpack.c.bf16 %v5419_v47, %v5415_v20 }
 0x7b9   :  { %13220 = vst [vmem:[#allocation14_spill] sm:$0xff] %v12359_v22  ;;  %v12385_v26 = vpack.c.bf16 %v5427_v12, %v5423_v62  ;;  %v12387_v33 = vpack.c.bf16 %v5428_v59, %v5424_v14  ;;  %v12403_v20 = vpack.c.bf16 %v5444_v41, %v5440_v10  ;;  %v12411_v47 = vpack.c.bf16 %v5452_v60, %v5448_v0 }
 0x7ba   :  { %v12363_v43 = vpack.c.bf16 %v5405_v2, %v13222_v11  ;;  %v12367_v22 = vpack.c.bf16 %v5406_v54, %v13225_v53  ;;  %13227 = vst [vmem:[#allocation53_spill] sm:$0xff] %v12369_v55  ;;  %v12371_v2 = vpack.c.bf16 %v5412_v58, %v5408_v52  ;;  %v12373_v11 = vpack.c.bf16 %v5413_v18, %v5409_v56 }
 0x7bb   :  { %v12379_v53 = vpack.c.bf16 %v5420_v34, %v5416_v27  ;;  %v12381_v54 = vpack.c.bf16 %v5421_v45, %v5417_v5  ;;  %v12389_v55 = vpack.c.bf16 %v5429_v42, %v5425_v44  ;;  %v12391_v58 = vpack.c.bf16 %v5430_v35, %v5426_v50 }
 0x7bc   :  { %13223 = vst [vmem:[#allocation75_spill] sm:$0xff] %v12363_v43  ;;  %v12375_v43 = vpack.c.bf16 %v5414_v46, %v5410_v3  ;;  %v12393_v52 = vpack.c.bf16 %v5435_v17, %v5431_v21  ;;  %v12395_v3 = vpack.c.bf16 %v5436_v1, %v5432_v48  ;;  %v12397_v56 = vpack.c.bf16 %v5437_v30, %v5433_v8 }
 0x7bd   :  { %13226 = vst [vmem:[#allocation65_spill] sm:$0xff] %v12367_v22  ;;  %v12383_v22 = vpack.c.bf16 %v5422_v57, %v5418_v32  ;;  %v12399_v18 = vpack.c.bf16 %v5438_v23, %v5434_v61  ;;  %v12401_v46 = vpack.c.bf16 %v5443_v63, %v5439_v13  ;;  %v12405_v27 = vpack.c.bf16 %v5445_v49, %v5441_v19 }
 0x7be   :  { %v12407_v5 = vpack.c.bf16 %v5446_v37, %v5442_v25  ;;  %v12409_v32 = vpack.c.bf16 %v5451_v7, %v5447_v4  ;;  %v12413_v34 = vpack.c.bf16 %v5453_v36, %v5449_v6  ;;  %v12415_v45 = vpack.c.bf16 %v5454_v51, %v5450_v15 }
 0x7bf   :  { %v12417_v57 = vpack.c.bf16 %v5459_v38, %v5455_v16  ;;  %v12419_v62 = vpack.c.bf16 %v5460_v28, %v5456_v24  ;;  %v12421_v14 = vpack.c.bf16 %v5461_v9, %v5457_v31  ;;  %v12423_v44 = vpack.c.bf16 %v5462_v39, %v5458_v29 }
 0x7c0   :  { %7984 = dma.done.wait [#allocation4 + $0x1], 4096 }
 0x7c1   :  { %7985 = vsyncadd [#allocation4 + $0x1], 4294963200  ;;  %v7889_v50 = vld [vmem:[#allocation3 + $0x38] sm:$0xff]  ;;  %v7888_v35 = vld [vmem:[#allocation3 + $0x30] sm:$0xff] }
 0x7c2   :  { %v7897_v12 = vld [vmem:[#allocation3 + $0x78] sm:$0xff]  ;;  %5754 = vmatpush.bf16.msrb.mxu0 %v7889_v50  ;;  %v7896_v21 = vld [vmem:[#allocation3 + $0x70] sm:$0xff]  ;;  %v7887_v61 = vld [vmem:[#allocation3 + $0x28] sm:$0xff] }
 0x7c3   :  { %v7905_v59 = vld [vmem:[#allocation3 + $0xb8] sm:$0xff]  ;;  %5803 = vmatpush.bf16.msrb.mxu1 %v7897_v12  ;;  %v7904_v48 = vld [vmem:[#allocation3 + $0xb0] sm:$0xff]  ;;  %v7895_v17 = vld [vmem:[#allocation3 + $0x68] sm:$0xff] }
 0x7c4   :  { %v7913_v42 = vld [vmem:[#allocation3 + $0xf8] sm:$0xff]  ;;  %5852 = vmatpush.bf16.msrb.mxu2 %v7905_v59  ;;  %v7912_v8 = vld [vmem:[#allocation3 + $0xf0] sm:$0xff]  ;;  %v7903_v1 = vld [vmem:[#allocation3 + $0xa8] sm:$0xff] }
 0x7c5   :  { %5901 = vmatpush.bf16.msrb.mxu3 %v7913_v42  ;;  %v7911_v30 = vld [vmem:[#allocation3 + $0xe8] sm:$0xff]  ;;  %v7886_v23 = vld [vmem:[#allocation3 + $0x20] sm:$0xff]  ;;  %v7885_v25 = vld [vmem:[#allocation3 + $0x18] sm:$0xff] }
 0x7c6   :  { %5755 = vmatpush.bf16.msrb.mxu0 %v7888_v35  ;;  %v7894_v13 = vld [vmem:[#allocation3 + $0x60] sm:$0xff]  ;;  %v7893_v63 = vld [vmem:[#allocation3 + $0x58] sm:$0xff]  ;;  %v7884_v37 = vld [vmem:[#allocation3 + $0x10] sm:$0xff] }
 0x7c7   :  { %5804 = vmatpush.bf16.msrb.mxu1 %v7896_v21  ;;  %v7902_v10 = vld [vmem:[#allocation3 + $0xa0] sm:$0xff]  ;;  %v7901_v41 = vld [vmem:[#allocation3 + $0x98] sm:$0xff]  ;;  %v7892_v4 = vld [vmem:[#allocation3 + $0x50] sm:$0xff] }
 0x7c8   :  { %5853 = vmatpush.bf16.msrb.mxu2 %v7904_v48  ;;  %v7910_v19 = vld [vmem:[#allocation3 + $0xe0] sm:$0xff]  ;;  %v7909_v49 = vld [vmem:[#allocation3 + $0xd8] sm:$0xff]  ;;  %v7900_v0 = vld [vmem:[#allocation3 + $0x90] sm:$0xff] }
 0x7c9   :  { %5902 = vmatpush.bf16.msrb.mxu3 %v7912_v8  ;;  %v7908_v6 = vld [vmem:[#allocation3 + $0xd0] sm:$0xff]  ;;  %v7883_v15 = vld [vmem:[#allocation3 + $0x8] sm:$0xff]  ;;  %v7882_v51 = vld [vmem:[#allocation3] sm:$0xff] }
 0x7ca   :  { %5756 = vmatpush.bf16.msrb.mxu0 %v7887_v61  ;;  %v7891_v7 = vld [vmem:[#allocation3 + $0x48] sm:$0xff]  ;;  %v7890_v16 = vld [vmem:[#allocation3 + $0x40] sm:$0xff]  ;;  %v13230_v28 = vld [vmem:[#allocation75_spill] sm:$0xff] }
 0x7cb   :  { %5805 = vmatpush.bf16.msrb.mxu1 %v7895_v17  ;;  %v7899_v60 = vld [vmem:[#allocation3 + $0x88] sm:$0xff]  ;;  %v7898_v24 = vld [vmem:[#allocation3 + $0x80] sm:$0xff] }
 0x7cc   :  { %5854 = vmatpush.bf16.msrb.mxu2 %v7903_v1  ;;  %v7907_v36 = vld [vmem:[#allocation3 + $0xc8] sm:$0xff]  ;;  %v7906_v31 = vld [vmem:[#allocation3 + $0xc0] sm:$0xff] }
 0x7cd   :  { %5903 = vmatpush.bf16.msrb.mxu3 %v7911_v30  ;;  %v13228_v29 = vld [vmem:[#allocation70_spill] sm:$0xff]  ;;  %v13231_v9 = vld [vmem:[#allocation65_spill] sm:$0xff] }
 0x7ce   :  { %5757 = vmatpush.bf16.msrb.mxu0 %v7886_v23  ;;  %v13229_v38 = vld [vmem:[#allocation14_spill] sm:$0xff]  ;;  %v13232_v39 = vld [vmem:[#allocation53_spill] sm:$0xff] }
 0x7cf   :  { %5806 = vmatpush.bf16.msrb.mxu1 %v7894_v13 }
 0x7d0   :  { %5855 = vmatpush.bf16.msrb.mxu2 %v7902_v10 }
 0x7d1   :  { %5904 = vmatpush.bf16.msrb.mxu3 %v7910_v19 }
 0x7d2   :  { %5758 = vmatpush.bf16.msrb.mxu0 %v7885_v25 }
 0x7d3   :  { %5807 = vmatpush.bf16.msrb.mxu1 %v7893_v63 }
 0x7d4   :  { %5856 = vmatpush.bf16.msrb.mxu2 %v7901_v41 }
 0x7d5   :  { %5905 = vmatpush.bf16.msrb.mxu3 %v7909_v49 }
 0x7d6   :  { %5759 = vmatpush.bf16.msrb.mxu0 %v7884_v37 }
 0x7d7   :  { %5808 = vmatpush.bf16.msrb.mxu1 %v7892_v4 }
 0x7d8   :  { %5857 = vmatpush.bf16.msrb.mxu2 %v7900_v0 }
 0x7d9   :  { %5906 = vmatpush.bf16.msrb.mxu3 %v7908_v6 }
 0x7da   :  { %5760 = vmatpush.bf16.msrb.mxu0 %v7883_v15 }
 0x7db   :  { %5809 = vmatpush.bf16.msrb.mxu1 %v7891_v7 }
 0x7dc   :  { %5858 = vmatpush.bf16.msrb.mxu2 %v7899_v60 }
 0x7dd   :  { %5907 = vmatpush.bf16.msrb.mxu3 %v7907_v36 }
 0x7de   :  { %5761 = vmatpush.bf16.msrb.mxu0 %v7882_v51 }
 0x7df   :  { %5810 = vmatpush.bf16.msrb.mxu1 %v7890_v16 }
 0x7e0   :  { %5859 = vmatpush.bf16.msrb.mxu2 %v7898_v24 }
 0x7e1   :  { %5908 = vmatpush.bf16.msrb.mxu3 %v7906_v31  ;;  %5762 = vmatmul.bf16.vlgmr.msrb.gmra.mxu0 %v13228_v29 }
 0x7e2   :  { %5811 = vmatmul.bf16.vlgmr.msrb.gmra.mxu1 %v13229_v38 }
 0x7e3   :  { %5860 = vmatmul.bf16.vlgmr.msrb.gmra.mxu2 %v13230_v28 }
 0x7e4   :  { %5909 = vmatmul.bf16.vlgmr.msrb.gmra.mxu3 %v13231_v9 }
 0x7f1   :  { %5767 = vmatmul.bf16.gmra.mxu0 %v13232_v39 }
 0x7f2   :  { %5816 = vmatmul.bf16.gmra.mxu1 %v12371_v2 }
 0x7f3   :  { %5865 = vmatmul.bf16.gmra.mxu2 %v12373_v11 }
 0x7f4   :  { %5914 = vmatmul.bf16.gmra.mxu3 %v12375_v43 }
 0x801   :  { %5772 = vmatmul.bf16.gmra.mxu0 %v12377_v40 }
 0x802   :  { %5821 = vmatmul.bf16.gmra.mxu1 %v12379_v53 }
 0x803   :  { %5870 = vmatmul.bf16.gmra.mxu2 %v12381_v54 }
 0x804   :  { %5919 = vmatmul.bf16.gmra.mxu3 %v12383_v22 }
 0x811   :  { %5777 = vmatmul.bf16.gmra.mxu0 %v12385_v26 }
 0x812   :  { %5826 = vmatmul.bf16.gmra.mxu1 %v12387_v33 }
 0x813   :  { %5875 = vmatmul.bf16.gmra.mxu2 %v12389_v55 }
 0x814   :  { %5924 = vmatmul.bf16.gmra.mxu3 %v12391_v58 }
 0x821   :  { %5782 = vmatmul.bf16.gmra.mxu0 %v12393_v52 }
 0x822   :  { %5831 = vmatmul.bf16.gmra.mxu1 %v12395_v3 }
 0x823   :  { %5880 = vmatmul.bf16.gmra.mxu2 %v12397_v56 }
 0x824   :  { %5929 = vmatmul.bf16.gmra.mxu3 %v12399_v18 }
 0x831   :  { %5787 = vmatmul.bf16.gmra.mxu0 %v12401_v46 }
 0x832   :  { %5836 = vmatmul.bf16.gmra.mxu1 %v12403_v20 }
 0x833   :  { %5885 = vmatmul.bf16.gmra.mxu2 %v12405_v27 }
 0x834   :  { %5934 = vmatmul.bf16.gmra.mxu3 %v12407_v5 }
 0x841   :  { %5792 = vmatmul.bf16.gmra.mxu0 %v12409_v32 }
 0x842   :  { %5841 = vmatmul.bf16.gmra.mxu1 %v12411_v47 }
 0x843   :  { %5890 = vmatmul.bf16.gmra.mxu2 %v12413_v34 }
 0x844   :  { %5939 = vmatmul.bf16.gmra.mxu3 %v12415_v45 }
 0x851   :  { %5797 = vmatmul.bf16.gmra.mxu0 %v12417_v57 }
 0x852   :  { %5846 = vmatmul.bf16.gmra.mxu1 %v12419_v62 }
 0x853   :  { %5895 = vmatmul.bf16.gmra.mxu2 %v12421_v14 }
 0x854   :  { %5944 = vmatmul.bf16.gmra.mxu3 %v12423_v44 }
 0x85e   :  { %v5763_v22 = vpop.f32.mrf.mxu0 }
 0x85f   :  { %v5812_v43 = vpop.f32.mrf.mxu1 }
 0x860   :  { %v5813_v55 = vadd.f32 %v5812_v43, %v5763_v22 }
 0x866   :  { %v5861_v2 = vpop.f32.mrf.mxu2  ;;  %v5765_v53 = vpop.f32.mrf.mxu0 }
 0x867   :  { %v5910_v11 = vpop.f32.mrf.mxu3  ;;  %v5862_v40 = vadd.f32 %v5861_v2, %v5813_v55  ;;  %v5814_v54 = vpop.f32.mrf.mxu1 }
 0x868   :  { %v5815_v26 = vadd.f32 %v5814_v54, %v5765_v53 }
 0x869   :  { %v12457_v33 = vadd.f32 %v5910_v11, %v5862_v40 }
 0x86b   :  { %v5973_v40 = vmul.f32 %v12457_v33, %v12457_v33 }
 0x86e   :  { %v5863_v58 = vpop.f32.mrf.mxu2  ;;  %v5768_v56 = vpop.f32.mrf.mxu0 }
 0x86f   :  { %v5912_v52 = vpop.f32.mrf.mxu3  ;;  %v5864_v3 = vadd.f32 %v5863_v58, %v5815_v26  ;;  %v5817_v18 = vpop.f32.mrf.mxu1 }
 0x870   :  { %v5818_v46 = vadd.f32 %v5817_v18, %v5768_v56 }
 0x871   :  { %v12459_v20 = vadd.f32 %v5912_v52, %v5864_v3 }
 0x873   :  { %v5974_v2 = vmul.f32 %v12459_v20, %v12459_v20  ;;  %v5952_v54 = vadd.f32 %v12459_v20, %v12457_v33 }
 0x875   :  { %v5989_v18 = vadd.f32 %v5974_v2, %v5973_v40 }
 0x876   :  { %v5866_v27 = vpop.f32.mrf.mxu2  ;;  %v5770_v47 = vpop.f32.mrf.mxu0 }
 0x877   :  { %v5915_v5 = vpop.f32.mrf.mxu3  ;;  %v5867_v32 = vadd.f32 %v5866_v27, %v5818_v46  ;;  %v5819_v34 = vpop.f32.mrf.mxu1 }
 0x878   :  { %v5820_v45 = vadd.f32 %v5819_v34, %v5770_v47 }
 0x879   :  { %v12461_v57 = vadd.f32 %v5915_v5, %v5867_v32 }
 0x87b   :  { %v5975_v53 = vmul.f32 %v12461_v57, %v12461_v57  ;;  %v5953_v5 = vadd.f32 %v5952_v54, %v12461_v57 }
 0x87e   :  { %v5868_v62 = vpop.f32.mrf.mxu2  ;;  %v5773_v50 = vpop.f32.mrf.mxu0 }
 0x87f   :  { %v5917_v14 = vpop.f32.mrf.mxu3  ;;  %v5869_v44 = vadd.f32 %v5868_v62, %v5820_v45  ;;  %v5822_v12 = vpop.f32.mrf.mxu1  ;;  %v5990_v45 = vadd.f32 %v5989_v18, %v5975_v53 }
 0x880   :  { %v5823_v59 = vadd.f32 %v5822_v12, %v5773_v50 }
 0x881   :  { %v12463_v42 = vadd.f32 %v5917_v14, %v5869_v44 }
 0x883   :  { %v5976_v32 = vmul.f32 %v12463_v42, %v12463_v42  ;;  %v5954_v62 = vadd.f32 %v5953_v5, %v12463_v42 }
 0x886   :  { %v5871_v35 = vpop.f32.mrf.mxu2  ;;  %v5775_v8 = vpop.f32.mrf.mxu0 }
 0x887   :  { %v5920_v21 = vpop.f32.mrf.mxu3  ;;  %v5872_v48 = vadd.f32 %v5871_v35, %v5823_v59  ;;  %v5824_v61 = vpop.f32.mrf.mxu1  ;;  %v5991_v35 = vadd.f32 %v5990_v45, %v5976_v32 }
 0x888   :  { %v5825_v43 = vadd.f32 %v5824_v61, %v5775_v8 }
 0x889   :  { %v12465_v17 = vadd.f32 %v5920_v21, %v5872_v48 }
 0x88b   :  { %v5977_v14 = vmul.f32 %v12465_v17, %v12465_v17  ;;  %v5955_v21 = vadd.f32 %v5954_v62, %v12465_v17 }
 0x88e   :  { %v5873_v1 = vpop.f32.mrf.mxu2  ;;  %v5778_v23 = vpop.f32.mrf.mxu0 }
 0x88f   :  { %v5922_v30 = vpop.f32.mrf.mxu3  ;;  %v5827_v13 = vpop.f32.mrf.mxu1  ;;  %v5874_v11 = vadd.f32 %v5873_v1, %v5825_v43  ;;  %v5992_v1 = vadd.f32 %v5991_v35, %v5977_v14 }
 0x890   :  { %v5828_v55 = vadd.f32 %v5827_v13, %v5778_v23 }
 0x891   :  { %v12478_v47 = vadd.f32 %v5922_v30, %v5874_v11 }
 0x893   :  { %v5978_v48 = vmul.f32 %v12478_v47, %v12478_v47  ;;  %v5956_v30 = vadd.f32 %v5955_v21, %v12478_v47 }
 0x896   :  { %v5876_v10 = vpop.f32.mrf.mxu2  ;;  %v5780_v25 = vpop.f32.mrf.mxu0 }
 0x897   :  { %v5925_v19 = vpop.f32.mrf.mxu3  ;;  %v5829_v63 = vpop.f32.mrf.mxu1  ;;  %v5877_v26 = vadd.f32 %v5876_v10, %v5828_v55 }
 0x898   :  { %v5830_v58 = vadd.f32 %v5829_v63, %v5780_v25 }
 0x899   :  { %v12483_v44 = vadd.f32 %v5925_v19, %v5877_v26 }
 0x89b   :  { %v5979_v23 = vmul.f32 %v12483_v44, %v12483_v44 }
 0x89e   :  { %v5878_v41 = vpop.f32.mrf.mxu2  ;;  %v5783_v37 = vpop.f32.mrf.mxu0 }
 0x89f   :  { %v5927_v49 = vpop.f32.mrf.mxu3  ;;  %v5832_v4 = vpop.f32.mrf.mxu1  ;;  %v5879_v34 = vadd.f32 %v5878_v41, %v5830_v58 }
 0x8a0   :  { %v5833_v52 = vadd.f32 %v5832_v4, %v5783_v37  ;;  %v5993_v37 = vadd.f32 %v5992_v1, %v5978_v48  ;;  %v5957_v4 = vadd.f32 %v5956_v30, %v12483_v44 }
 0x8a1   :  { %v12488_v8 = vadd.f32 %v5927_v49, %v5879_v34 }
 0x8a3   :  { %v5980_v49 = vmul.f32 %v12488_v8, %v12488_v8 }
 0x8a6   :  { %v5881_v0 = vpop.f32.mrf.mxu2  ;;  %v5785_v15 = vpop.f32.mrf.mxu0 }
 0x8a7   :  { %v5930_v6 = vpop.f32.mrf.mxu3  ;;  %v5834_v7 = vpop.f32.mrf.mxu1  ;;  %v5882_v50 = vadd.f32 %v5881_v0, %v5833_v52 }
 0x8a8   :  { %v5835_v12 = vadd.f32 %v5834_v7, %v5785_v15 }
 0x8a9   :  { %v12493_v13 = vadd.f32 %v5930_v6, %v5882_v50  ;;  %v5958_v6 = vadd.f32 %v5957_v4, %v12488_v8 }
 0x8ab   :  { %v5959_v43 = vadd.f32 %v5958_v6, %v12493_v13 }
 0x8ae   :  { %v5883_v60 = vpop.f32.mrf.mxu2  ;;  %v5788_v51 = vpop.f32.mrf.mxu0 }
 0x8af   :  { %v5932_v36 = vpop.f32.mrf.mxu3  ;;  %v5837_v16 = vpop.f32.mrf.mxu1  ;;  %v5884_v61 = vadd.f32 %v5883_v60, %v5835_v12 }
 0x8b0   :  { %v5838_v59 = vadd.f32 %v5837_v16, %v5788_v51  ;;  %v5994_v51 = vadd.f32 %v5993_v37, %v5979_v23  ;;  %v5981_v16 = vmul.f32 %v12493_v13, %v12493_v13 }
 0x8b1   :  { %v12498_v7 = vadd.f32 %v5932_v36, %v5884_v61 }
 0x8b3   :  { %v5982_v55 = vmul.f32 %v12498_v7, %v12498_v7  ;;  %v5960_v53 = vadd.f32 %v5959_v43, %v12498_v7 }
 0x8b6   :  { %v5886_v24 = vpop.f32.mrf.mxu2  ;;  %v5790_v29 = vpop.f32.mrf.mxu0 }
 0x8b7   :  { %v5935_v31 = vpop.f32.mrf.mxu3  ;;  %v5839_v38 = vpop.f32.mrf.mxu1  ;;  %v5887_v25 = vadd.f32 %v5886_v24, %v5838_v59 }
 0x8b8   :  { %v5840_v63 = vadd.f32 %v5839_v38, %v5790_v29 }
 0x8b9   :  { %v12503_v24 = vadd.f32 %v5935_v31, %v5887_v25 }
 0x8bb   :  { %v5983_v31 = vmul.f32 %v12503_v24, %v12503_v24  ;;  %v5961_v52 = vadd.f32 %v5960_v53, %v12503_v24 }
 0x8be   :  { %v5888_v28 = vpop.f32.mrf.mxu2  ;;  %v5793_v39 = vpop.f32.mrf.mxu0 }
 0x8bf   :  { %v5937_v9 = vpop.f32.mrf.mxu3  ;;  %v5842_v22 = vpop.f32.mrf.mxu1  ;;  %v5889_v60 = vadd.f32 %v5888_v28, %v5840_v63 }
 0x8c0   :  { %v5843_v41 = vadd.f32 %v5842_v22, %v5793_v39  ;;  %v5995_v22 = vadd.f32 %v5994_v51, %v5980_v49 }
 0x8c1   :  { %v12508_v36 = vadd.f32 %v5937_v9, %v5889_v60 }
 0x8c2   :  { %v5996_v2 = vadd.f32 %v5995_v22, %v5981_v16 }
 0x8c3   :  { %v5962_v5 = vadd.f32 %v5961_v52, %v12508_v36 }
 0x8c4   :  { %v5997_v58 = vadd.f32 %v5996_v2, %v5982_v55 }
 0x8c6   :  { %v5891_v3 = vpop.f32.mrf.mxu2  ;;  %v5795_v46 = vpop.f32.mrf.mxu0 }
 0x8c7   :  { %v5940_v56 = vpop.f32.mrf.mxu3  ;;  %v5844_v27 = vpop.f32.mrf.mxu1  ;;  %v5892_v29 = vadd.f32 %v5891_v3, %v5843_v41  ;;  %v5984_v3 = vmul.f32 %v12508_v36, %v12508_v36 }
 0x8c8   :  { %v5845_v38 = vadd.f32 %v5844_v27, %v5795_v46  ;;  %v5998_v27 = vadd.f32 %v5997_v58, %v5983_v31 }
 0x8c9   :  { %v12513_v54 = vadd.f32 %v5940_v56, %v5892_v29 }
 0x8ca   :  { %v5999_v56 = vadd.f32 %v5998_v27, %v5984_v3 }
 0x8cb   :  { %v5985_v32 = vmul.f32 %v12513_v54, %v12513_v54  ;;  %v5963_v45 = vadd.f32 %v5962_v5, %v12513_v54 }
 0x8cd   :  { %v6000_v12 = vadd.f32 %v5999_v56, %v5985_v32 }
 0x8ce   :  { %v5893_v10 = vpop.f32.mrf.mxu2  ;;  %v5798_v0 = vpop.f32.mrf.mxu0 }
 0x8cf   :  { %v5942_v19 = vpop.f32.mrf.mxu3  ;;  %v5847_v15 = vpop.f32.mrf.mxu1  ;;  %v5894_v28 = vadd.f32 %v5893_v10, %v5845_v38 }
 0x8d0   :  { %v5848_v39 = vadd.f32 %v5847_v15, %v5798_v0 }
 0x8d1   :  { %v12518_v9 = vadd.f32 %v5942_v19, %v5894_v28 }
 0x8d3   :  { %v5986_v62 = vmul.f32 %v12518_v9, %v12518_v9  ;;  %v5964_v59 = vadd.f32 %v5963_v45, %v12518_v9 }
 0x8d5   :  { %v6001_v61 = vadd.f32 %v6000_v12, %v5986_v62 }
 0x8d6   :  { %v5896_v11 = vpop.f32.mrf.mxu2  ;;  %v5800_v18 = vpop.f32.mrf.mxu0 }
 0x8d7   :  { %v5945_v40 = vpop.f32.mrf.mxu3  ;;  %v5897_v26 = vadd.f32 %v5896_v11, %v5848_v39  ;;  %v5849_v46 = vpop.f32.mrf.mxu1 }
 0x8d8   :  { %v5850_v14 = vadd.f32 %v5849_v46, %v5800_v18  ;;  %v5951_v18 = vld [vmem:[%s12614_s9] sm:$0x1] }
 0x8d9   :  { %v12523_v34 = vadd.f32 %v5945_v40, %v5897_v26  ;;  %v5950_v26 = vld [vmem:[%s12613_s8] sm:$0x1] }
 0x8db   :  { %v5987_v35 = vmul.f32 %v12523_v34, %v12523_v34  ;;  %v5965_v1 = vadd.f32 %v5964_v59, %v12523_v34 }
 0x8dd   :  { %v6002_v23 = vadd.f32 %v6001_v61, %v5987_v35 }
 0x8de   :  { %v5898_v50 = vpop.f32.mrf.mxu2 }
 0x8df   :  { %v5899_v21 = vadd.f32 %v5898_v50, %v5850_v14  ;;  %v5947_v48 = vpop.f32.mrf.mxu3 }
 0x8e1   :  { %v12532_v30 = vadd.f32 %v5947_v48, %v5899_v21 }
 0x8e3   :  { %v5966_v10 = vadd.f32 %v5965_v1, %v12532_v30  ;;  %v5988_v19 = vmul.f32 %v12532_v30, %v12532_v30 }
 0x8e5   :  { %v5967_v25 = vrot.slane %v5966_v10, 4  ;;  %v6003_v63 = vadd.f32 %v6002_v23, %v5988_v19 }
 0x8e7   :  { %v5968_v41 = vadd.f32 %v5967_v25, %v5966_v10  ;;  %v6004_v37 = vrot.slane %v6003_v63, 4 }
 0x8e9   :  { %v5969_v4 = vrot.slane %v5968_v41, 2  ;;  %v6005_v49 = vadd.f32 %v6004_v37, %v6003_v63 }
 0x8eb   :  { %v5970_v0 = vadd.f32 %v5969_v4, %v5968_v41  ;;  %v6006_v15 = vrot.slane %v6005_v49, 2 }
 0x8ed   :  { %v5971_v60 = vrot.slane %v5970_v0, 1  ;;  %v6007_v51 = vadd.f32 %v6006_v15, %v6005_v49 }
 0x8ef   :  { %v5972_v6 = vadd.f32 %v5971_v60, %v5970_v0  ;;  %v6008_v16 = vrot.slane %v6007_v51, 1 }
 0x8f1   :  { %v6009_v29 = vadd.f32 %v6008_v16, %v6007_v51  ;;  %v6010_v38 = vmul.f32 0.0078125, %v5972_v6 }
 0x8f3   :  { %v6011_v39 = vmul.f32 0.0078125, %v6009_v29  ;;  %v6012_v22 = vmul.f32 %v6010_v38, %v6010_v38 }
 0x8f5   :  { %v6013_v43 = vsub.f32 %v6011_v39, %v6012_v22 }
 0x8f7   :  { %v6014_v55 = vmax.f32 %v6013_v43, 0.0 }
 0x8f9   :  { %v6015_v28 = vadd.f32 1e-05, %v6014_v55 }
 0x8fb   :  { %7932 = vrsqrt.f32 %v6015_v28  ;;  %vm6022_vm13 = vweird.f32 %v6015_v28 }
 0x901   :  { %v7933_v2 = vpop.eup %7932 }
 0x902   :  { %v6017_v11 = vmul.f32 %v7933_v2, %v6015_v28  ;;  %vm6023_vm6 = vweird.f32 %v7933_v2 }
 0x903   :  { %vm6024_vm14 = vmor %vm6022_vm13, %vm6023_vm6 }
 0x904   :  { %v6018_v40 = vmul.f32 %v7933_v2, %v6017_v11 }
 0x906   :  { %v6019_v53 = vmul.f32 0.5, %v6018_v40 }
 0x908   :  { %v6020_v31 = vsub.f32 1.5, %v6019_v53 }
 0x90a   :  { %v6021_v58 = vmul.f32 %v7933_v2, %v6020_v31 }
 0x90c   :  { %v6025_v52 = vsel %vm6024_vm14, %v7933_v2, %v6021_v58 }
 0x90d   :  { %v6026_v3 = vmul.f32 %v6025_v52, %v5950_v26 }
 0x90f   :  { %v6027_v46 = vmul.f32 %v6026_v3, %v6010_v38  ;;  %v6030_v5 = vperm.slane %v6026_v3, 0 }
 0x911   :  { %v6028_v27 = vsub.f32 %v5951_v18, %v6027_v46  ;;  %v6032_v32 = vmul.f32 %v6030_v5, %v12457_v33  ;;  %v6033_v56 = vmul.f32 %v6030_v5, %v12459_v20  ;;  %v6034_v45 = vmul.f32 %v6030_v5, %v12461_v57 }
 0x912   :  { %v6035_v14 = vmul.f32 %v6030_v5, %v12463_v42  ;;  %v6036_v50 = vmul.f32 %v6030_v5, %v12465_v17  ;;  %v6037_v21 = vmul.f32 %v6030_v5, %v12478_v47  ;;  %v6038_v61 = vmul.f32 %v6030_v5, %v12483_v44 }
 0x913   :  { %v6049_v62 = vperm.slane %v6028_v27, 0  ;;  %v6039_v33 = vmul.f32 %v6030_v5, %v12488_v8  ;;  %v6040_v57 = vmul.f32 %v6030_v5, %v12493_v13  ;;  %v6041_v17 = vmul.f32 %v6030_v5, %v12498_v7 }
 0x914   :  { %v6042_v44 = vmul.f32 %v6030_v5, %v12503_v24  ;;  %v6043_v13 = vmul.f32 %v6030_v5, %v12508_v36  ;;  %v6044_v7 = vmul.f32 %v6030_v5, %v12513_v54  ;;  %v6045_v24 = vmul.f32 %v6030_v5, %v12518_v9 }
 0x915   :  { %v6051_v12 = vadd.f32 %v6049_v62, %v6032_v32  ;;  %v6052_v59 = vadd.f32 %v6049_v62, %v6033_v56  ;;  %v6053_v35 = vadd.f32 %v6049_v62, %v6034_v45  ;;  %v6054_v48 = vadd.f32 %v6049_v62, %v6035_v14 }
 0x916   :  { %v6055_v1 = vadd.f32 %v6049_v62, %v6036_v50  ;;  %v6056_v20 = vadd.f32 %v6049_v62, %v6037_v21  ;;  %v6057_v42 = vadd.f32 %v6049_v62, %v6038_v61  ;;  %v6058_v47 = vadd.f32 %v6049_v62, %v6039_v33 }
 0x917   :  { %6067 = vst [vmem:[%s12615_s10] sm:$0xff] %v6051_v12  ;;  %v6059_v8 = vadd.f32 %v6049_v62, %v6040_v57  ;;  %v6060_v23 = vadd.f32 %v6049_v62, %v6041_v17  ;;  %v6061_v10 = vadd.f32 %v6049_v62, %v6042_v44  ;;  %v6062_v19 = vadd.f32 %v6049_v62, %v6043_v13 }
 0x918   :  { %6068 = vst [vmem:[%s12615_s10 + $0x8] sm:$0xff] %v6052_v59  ;;  %v6046_v36 = vmul.f32 %v6030_v5, %v12523_v34  ;;  %v6063_v25 = vadd.f32 %v6049_v62, %v6044_v7  ;;  %v6047_v54 = vmul.f32 %v6030_v5, %v12532_v30  ;;  %v6064_v63 = vadd.f32 %v6049_v62, %v6045_v24 }
 0x919   :  { %6069 = vst [vmem:[%s12615_s10 + $0x10] sm:$0xff] %v6053_v35 }
 0x91a   :  { %6070 = vst [vmem:[%s12615_s10 + $0x18] sm:$0xff] %v6054_v48  ;;  %v6065_v9 = vadd.f32 %v6049_v62, %v6046_v36  ;;  %v6066_v41 = vadd.f32 %v6049_v62, %v6047_v54 }
 0x91b   :  { %6071 = vst [vmem:[%s12615_s10 + $0x20] sm:$0xff] %v6055_v1 }
 0x91c   :  { %6072 = vst [vmem:[%s12615_s10 + $0x28] sm:$0xff] %v6056_v20 }
 0x91d   :  { %6073 = vst [vmem:[%s12615_s10 + $0x30] sm:$0xff] %v6057_v42 }
 0x91e   :  { %6074 = vst [vmem:[%s12615_s10 + $0x38] sm:$0xff] %v6058_v47 }
 0x91f   :  { %6075 = vst [vmem:[%s12615_s10 + $0x40] sm:$0xff] %v6059_v8 }
 0x920   :  { %6076 = vst [vmem:[%s12615_s10 + $0x48] sm:$0xff] %v6060_v23 }
 0x921   :  { %6077 = vst [vmem:[%s12615_s10 + $0x50] sm:$0xff] %v6061_v10 }
 0x922   :  { %6078 = vst [vmem:[%s12615_s10 + $0x58] sm:$0xff] %v6062_v19 }
 0x923   :  { %6079 = vst [vmem:[%s12615_s10 + $0x60] sm:$0xff] %v6063_v25 }
 0x924   :  { %6080 = vst [vmem:[%s12615_s10 + $0x68] sm:$0xff] %v6064_v63 }
 0x925   :  { %6081 = vst [vmem:[%s12615_s10 + $0x70] sm:$0xff] %v6065_v9 }
 0x926   :  { %6082 = vst [vmem:[%s12615_s10 + $0x78] sm:$0xff] %v6066_v41 }
 0x927   :  { %6087 = vsyncmov [#allocation4] }
 0x92a   :  { %s6088_s15 = vpop.sfrf %6087 }
 0x92b   :  { %p7556_p0 = scmp.ne.s32.totalorder %s6088_s15, 0 }
 0x92d   :  { %6092 = shalt.err (%p7556_p0)  }
 0x92e   :  { %6094 = vsyncmov [#allocation4 + $0x1] }
 0x931   :  { %s6095_s16 = vpop.sfrf %6094 }
 0x932   :  { %p7557_p1 = scmp.ne.s32.totalorder %s6095_s16, 0 }
 0x934   :  { %6099 = shalt.err (%p7557_p1)  }

</bundles_post_ra>
